<compile_context>
chip_gen: v7x
topology: tpu7x:2x2x1
jax: 0.10.0
libtpu: 0.0.40
codegen_flags: <defaults>
</compile_context>

<pallas_src>
import numpy as np
import jax
import jax.numpy as jnp
from jax.experimental import pallas as pl
from jax.experimental.pallas import tpu as pltpu

EPS = 1e-5
LANE = 128
_TAPS = tuple((dy, dx) for dy in range(3) for dx in range(3))


def _round_up(x, m):
    return (x + m - 1) // m * m


# ----------------------------------------------------------------------------------
# Pass 1: conv1 (3x3, input pre-padded) as one im2col matmul + per-image BN1 sums.
# ----------------------------------------------------------------------------------
def _conv3x3_stats_kernel(xp_ref,    # (1, H+2, W+2, Ci)  bf16, pre-padded input
                          w_ref,     # (9*Ci, Co)         bf16
                          y_ref,     # (1, H, W, Co)      bf16, pre-BN conv output
                          sums_ref,  # (1, 2, Co)         f32  [sum, sum_sq] over H*W
                          col_ref):  # scratch (H*W, 9*Ci) bf16 im2col buffer
    H, W, Co = y_ref.shape[1], y_ref.shape[2], y_ref.shape[3]
    Ci = xp_ref.shape[3]
    M = H * W

    # Build the im2col patch matrix once (lane-aligned 128-wide column blocks).
    for t, (dy, dx) in enumerate(_TAPS):
        col_ref[:, t * Ci:(t + 1) * Ci] = (
            xp_ref[0, dy:dy + H, dx:dx + W, :].reshape(M, Ci))

    # Single MXU matmul, bf16 inputs, f32 accumulation.  No conv bias (cancelled by BN).
    acc = jnp.dot(col_ref[...], w_ref[...], preferred_element_type=jnp.float32)

    # Per-image partial BN statistics (reduced over the grid in the wrapper).
    sums_ref[0, 0:1, :] = jnp.sum(acc, axis=0, keepdims=True)
    sums_ref[0, 1:2, :] = jnp.sum(acc * acc, axis=0, keepdims=True)

    y_ref[...] = acc.reshape(1, H, W, Co).astype(y_ref.dtype)


# ----------------------------------------------------------------------------------
# Pass 2: fused BN1(scale/shift) + ReLU + conv2 (im2col matmul) + per-image BN2 sums.
# ----------------------------------------------------------------------------------
def _bn_relu_conv3x3_stats_kernel(y1_ref,    # (1, H, W, C) bf16, pre-BN1 conv1 output
                                  s1_ref,    # (1, C) f32  BN1 scale
                                  t1_ref,    # (1, C) f32  BN1 shift
                                  w_ref,     # (9*C, C) bf16
                                  y2_ref,    # (1, H, W, C) bf16, pre-BN2 conv2 output
                                  sums_ref,  # (1, 2, C) f32
                                  pad_ref,   # scratch (H+2, W+2, C) bf16
                                  col_ref):  # scratch (H*W, 9*C) bf16
    H, W, C = y2_ref.shape[1], y2_ref.shape[2], y2_ref.shape[3]
    M = H * W

    # Zero only the 1-pixel halo ring (interior is fully overwritten below).
    zrow = jnp.zeros((1, W + 2, C), pad_ref.dtype)
    zcol = jnp.zeros((H + 2, 1, C), pad_ref.dtype)
    pad_ref[0:1, :, :] = zrow
    pad_ref[H + 1:H + 2, :, :] = zrow
    pad_ref[:, 0:1, :] = zcol
    pad_ref[:, W + 1:W + 2, :] = zcol

    # Fused BN1 (precomputed per-channel scale/shift) + ReLU, one pass, interior only.
    s = s1_ref[...].reshape(1, 1, C)
    t = t1_ref[...].reshape(1, 1, C)
    a = jnp.maximum(y1_ref[0].astype(jnp.float32) * s + t, 0.0)
    pad_ref[1:H + 1, 1:W + 1, :] = a.astype(pad_ref.dtype)

    # im2col for conv2, reading shifted windows of the scratch ref directly.
    for t_idx, (dy, dx) in enumerate(_TAPS):
        col_ref[:, t_idx * C:(t_idx + 1) * C] = (
            pad_ref[dy:dy + H, dx:dx + W, :].reshape(M, C))

    acc = jnp.dot(col_ref[...], w_ref[...], preferred_element_type=jnp.float32)

    sums_ref[0, 0:1, :] = jnp.sum(acc, axis=0, keepdims=True)
    sums_ref[0, 1:2, :] = jnp.sum(acc * acc, axis=0, keepdims=True)

    y2_ref[...] = acc.reshape(1, H, W, C).astype(y2_ref.dtype)


# ----------------------------------------------------------------------------------
# Pass 3: apply BN2 (fused scale/shift), transpose to channel-major, emit f32.
# Output block is (1, Cout, H*W): the lane axis (H*W) is a large multiple of 128 ->
# unmasked lane-dense stores, and only the *unpadded* channels hit HBM.
# ----------------------------------------------------------------------------------
def _bn_apply_transpose_kernel(y_ref,   # (1, H, W, Co) bf16
                               s_ref,   # (1, Co) f32
                               t_ref,   # (1, Co) f32
                               o_ref):  # (1, Cout, H*W) f32
    Cout, M = o_ref.shape[1], o_ref.shape[2]
    Co = y_ref.shape[3]
    y = y_ref[...].reshape(M, Co).astype(jnp.float32)
    o = y * s_ref[...].reshape(1, Co) + t_ref[...].reshape(1, Co)   # (M, Co)
    o_t = jnp.transpose(o)                                          # XLU transpose (Co, M)
    o_ref[0] = o_t[:Cout, :]


# ----------------------------------------------------------------------------------
# Wrapper (NCHW in / NCHW out, matching the PyTorch module)
# ----------------------------------------------------------------------------------
def _bn_scale_shift(sums, count, gamma_p, beta_p):
    """Fold batch stats (from per-image partial sums) + affine into (scale, shift)."""
    tot = jnp.sum(sums, axis=0)                  # (2, C)
    inv_count = jnp.float32(1.0 / count)
    mean = tot[0] * inv_count
    var = tot[1] * inv_count - mean * mean       # biased batch variance
    scale = gamma_p.reshape(-1) * jax.lax.rsqrt(var + EPS)
    shift = beta_p.reshape(-1) - mean * scale
    return (scale.reshape(1, -1).astype(jnp.float32),
            shift.reshape(1, -1).astype(jnp.float32))


def ru_double_conv(x_nchw, params):
    """x_nchw: (N, Cin, H, W). Returns (N, Cout, H, W), matching the PyTorch module."""
    w1, b1, g1, be1, w2, b2, g2, be2 = params
    del b1, b2  # conv bias before training-mode BatchNorm is exactly cancelled
    N, Cin, H, W = x_nchw.shape
    Cout = w1.shape[-1]
    Ci = _round_up(Cin, LANE)
    Co = _round_up(Cout, LANE)
    M = H * W

    # NCHW -> NHWC, spatial pad 1, channel pad to a full lane width, bf16 MXU inputs.
    x = jnp.transpose(x_nchw, (0, 2, 3, 1)).astype(jnp.float32)
    x = jnp.pad(x, ((0, 0), (1, 1), (1, 1), (0, Ci - Cin))).astype(jnp.bfloat16)

    w1p = jnp.pad(w1, ((0, 0), (0, 0), (0, Ci - Cin), (0, Co - Cout)))
    w1p = w1p.reshape(9 * Ci, Co).astype(jnp.bfloat16)
    w2p = jnp.pad(w2, ((0, 0), (0, 0), (0, Co - Cout), (0, Co - Cout)))
    w2p = w2p.reshape(9 * Co, Co).astype(jnp.bfloat16)
    g1p = jnp.pad(g1.reshape(1, Cout), ((0, 0), (0, Co - Cout)))
    be1p = jnp.pad(be1.reshape(1, Cout), ((0, 0), (0, Co - Cout)))
    g2p = jnp.pad(g2.reshape(1, Cout), ((0, 0), (0, Co - Cout)))
    be2p = jnp.pad(be2.reshape(1, Cout), ((0, 0), (0, Co - Cout)))

    cparams = pltpu.CompilerParams(
        dimension_semantics=("parallel",),
        vmem_limit_bytes=32 * 1024 * 1024)

    # ---- Pass 1: conv1 + per-image BN1 partial sums (grid over batch) ----
    # TODO(synk): for very large H*W the per-image block should be tiled over rows
    # (with a 1-row halo); at these shapes one image per grid step fits VMEM easily.
    y1, sums1 = pl.pallas_call(
        _conv3x3_stats_kernel,
        grid=(N,),
        in_specs=[
            pl.BlockSpec((1, H + 2, W + 2, Ci), lambda n: (n, 0, 0, 0)),
            pl.BlockSpec((9 * Ci, Co), lambda n: (0, 0)),
        ],
        out_specs=[
            pl.BlockSpec((1, H, W, Co), lambda n: (n, 0, 0, 0)),
            pl.BlockSpec((1, 2, Co), lambda n: (n, 0, 0)),
        ],
        out_shape=(jax.ShapeDtypeStruct((N, H, W, Co), jnp.bfloat16),
                   jax.ShapeDtypeStruct((N, 2, Co), jnp.float32)),
        scratch_shapes=[pltpu.VMEM((M, 9 * Ci), jnp.bfloat16)],
        compiler_params=cparams,
    )(x, w1p)

    s1, t1 = _bn_scale_shift(sums1, N * M, g1p, be1p)

    # ---- Pass 2: BN1-apply + ReLU + conv2 + per-image BN2 partial sums ----
    y2, sums2 = pl.pallas_call(
        _bn_relu_conv3x3_stats_kernel,
        grid=(N,),
        in_specs=[
            pl.BlockSpec((1, H, W, Co), lambda n: (n, 0, 0, 0)),
            pl.BlockSpec((1, Co), lambda n: (0, 0)),
            pl.BlockSpec((1, Co), lambda n: (0, 0)),
            pl.BlockSpec((9 * Co, Co), lambda n: (0, 0)),
        ],
        out_specs=[
            pl.BlockSpec((1, H, W, Co), lambda n: (n, 0, 0, 0)),
            pl.BlockSpec((1, 2, Co), lambda n: (n, 0, 0)),
        ],
        out_shape=(jax.ShapeDtypeStruct((N, H, W, Co), jnp.bfloat16),
                   jax.ShapeDtypeStruct((N, 2, Co), jnp.float32)),
        scratch_shapes=[
            pltpu.VMEM((H + 2, W + 2, Co), jnp.bfloat16),
            pltpu.VMEM((M, 9 * Co), jnp.bfloat16),
        ],
        compiler_params=cparams,
    )(y1, s1, t1, w2p)

    s2, t2 = _bn_scale_shift(sums2, N * M, g2p, be2p)

    # ---- Pass 3: BN2 apply + in-kernel transpose to channel-major (N, Cout, H*W) ----
    # Only the unpadded channels are written; the lane axis (H*W) stays 128-dense.
    out_cm = pl.pallas_call(
        _bn_apply_transpose_kernel,
        grid=(N,),
        in_specs=[
            pl.BlockSpec((1, H, W, Co), lambda n: (n, 0, 0, 0)),
            pl.BlockSpec((1, Co), lambda n: (0, 0)),
            pl.BlockSpec((1, Co), lambda n: (0, 0)),
        ],
        out_specs=pl.BlockSpec((1, Cout, M), lambda n: (n, 0, 0)),
        out_shape=jax.ShapeDtypeStruct((N, Cout, M), jnp.float32),
        compiler_params=cparams,
    )(y2, s2, t2)

    # Free row-major reshape (no data movement), already NCHW.
    return out_cm.reshape(N, Cout, H, W)


# ----------------------------------------------------------------------------------
# Pure-JAX f32 reference of the PyTorch forward (training-mode BN, biases included)
# ----------------------------------------------------------------------------------
def reference(x_nchw, params):
    w1, b1, g1, be1, w2, b2, g2, be2 = params
    x = jnp.transpose(x_nchw, (0, 2, 3, 1)).astype(jnp.float32)

    def conv(x, w, b):
        y = jax.lax.conv_general_dilated(
            x, w, window_strides=(1, 1), padding="SAME",
            dimension_numbers=("NHWC", "HWIO", "NHWC"))
        return y + b.reshape(1, 1, 1, -1)

    def bn(y, g, be):
        m = jnp.mean(y, axis=(0, 1, 2), keepdims=True)
        v = jnp.mean((y - m) ** 2, axis=(0, 1, 2), keepdims=True)
        return (y - m) * jax.lax.rsqrt(v + EPS) * g.reshape(1, 1, 1, -1) + be.reshape(1, 1, 1, -1)

    y = conv(x, w1, b1)
    y = bn(y, g1, be1)
    y = jnp.maximum(y, 0.0)
    y = conv(y, w2, b2)
    y = bn(y, g2, be2)
    return jnp.transpose(y, (0, 3, 1, 2))


def init_params(key, in_ch, out_ch):
    ks = jax.random.split(key, 8)
    w1 = 0.1 * jax.random.normal(ks[0], (3, 3, in_ch, out_ch), jnp.float32)   # HWIO
    b1 = 0.1 * jax.random.normal(ks[1], (1, out_ch), jnp.float32)
    g1 = 1.0 + 0.1 * jax.random.normal(ks[2], (1, out_ch), jnp.float32)
    be1 = 0.1 * jax.random.normal(ks[3], (1, out_ch), jnp.float32)
    w2 = 0.1 * jax.random.normal(ks[4], (3, 3, out_ch, out_ch), jnp.float32)
    b2 = 0.1 * jax.random.normal(ks[5], (1, out_ch), jnp.float32)
    g2 = 1.0 + 0.1 * jax.random.normal(ks[6], (1, out_ch), jnp.float32)
    be2 = 0.1 * jax.random.normal(ks[7], (1, out_ch), jnp.float32)
    return (w1, b1, g1, be1, w2, b2, g2, be2)


if __name__ == "__main__":
    key = jax.random.PRNGKey(0)
    k_x, k_p = jax.random.split(key)

    N, in_ch, out_ch, H, W = 2, 4, 8, 16, 16
    x = jax.random.normal(k_x, (N, in_ch, H, W), jnp.float32)
    params = init_params(k_p, in_ch, out_ch)

    out = jax.block_until_ready(jax.jit(ru_double_conv)(x, params))
    ref = jax.block_until_ready(reference(x, params))

    assert out.shape == (N, out_ch, H, W)
    # bf16 MXU inputs (f32 accumulation) -> compare against the f32 reference with a
    # tolerance sized for two chained bf16 convs + BatchNorm normalization.
    np.testing.assert_allclose(np.asarray(out), np.asarray(ref), atol=5e-2, rtol=5e-2)

    print("KERNEL_OK")
</pallas_src>

<mosaic_0001>
module attributes {stable_mosaic.version = 11 : i64} {
  func.func @_conv3x3_stats_kernel(%arg0: i32, %arg1: memref<1x18x18x128xbf16, #tpu.memory_space<vmem>>, %arg2: memref<1152x128xbf16, #tpu.memory_space<vmem>>, %arg3: memref<1x16x16x128xbf16, #tpu.memory_space<vmem>>, %arg4: memref<1x2x128xf32, #tpu.memory_space<vmem>>, %arg5: memref<256x1152xbf16, #tpu.memory_space<vmem>>) attributes {dimension_semantics = [#tpu.dimension_semantics<parallel>], iteration_bounds = array<i64: 2>, scalar_prefetch = 0 : i64, scratch_operands = 1 : i64, tpu.core_type = #tpu.core_type<tc>, window_params = [{transform_indices = @transform_0, window_bounds = array<i64: 1, 18, 18, 128>}, {pipeline_mode = #tpu.pipeline_mode<synchronous>, transform_indices = @transform_1, window_bounds = array<i64: 1152, 128>}, {transform_indices = @transform_2, window_bounds = array<i64: 1, 16, 16, 128>}, {transform_indices = @transform_3, window_bounds = array<i64: 1, 2, 128>}]} {
    %c0 = arith.constant 0 : index
    %c0_0 = arith.constant 0 : index
    %c0_1 = arith.constant 0 : index
    %c0_2 = arith.constant 0 : index
    %0 = vector.load %arg1[%c0, %c0_0, %c0_1, %c0_2] : memref<1x18x18x128xbf16, #tpu.memory_space<vmem>>, vector<1x16x16x128xbf16>
    %1 = vector.shape_cast %0 : vector<1x16x16x128xbf16> to vector<16x16x128xbf16>
    %2 = vector.shape_cast %1 : vector<16x16x128xbf16> to vector<256x128xbf16>
    %c0_3 = arith.constant 0 : index
    %c0_4 = arith.constant 0 : index
    %3 = vector.load %arg5[%c0_3, %c0_4] : memref<256x1152xbf16, #tpu.memory_space<vmem>>, vector<256x128xbf16>
    tpu.vector_store %arg5[%c0_3, %c0_4], %2 {strides = array<i32>} : memref<256x1152xbf16, #tpu.memory_space<vmem>>, vector<256x128xbf16>,
    %c0_5 = arith.constant 0 : index
    %c0_6 = arith.constant 0 : index
    %c1 = arith.constant 1 : index
    %c0_7 = arith.constant 0 : index
    %4 = vector.load %arg1[%c0_5, %c0_6, %c1, %c0_7] : memref<1x18x18x128xbf16, #tpu.memory_space<vmem>>, vector<1x16x16x128xbf16>
    %5 = vector.shape_cast %4 : vector<1x16x16x128xbf16> to vector<16x16x128xbf16>
    %6 = vector.shape_cast %5 : vector<16x16x128xbf16> to vector<256x128xbf16>
    %c0_8 = arith.constant 0 : index
    %c128 = arith.constant 128 : index
    %7 = vector.load %arg5[%c0_8, %c128] : memref<256x1152xbf16, #tpu.memory_space<vmem>>, vector<256x128xbf16>
    tpu.vector_store %arg5[%c0_8, %c128], %6 {strides = array<i32>} : memref<256x1152xbf16, #tpu.memory_space<vmem>>, vector<256x128xbf16>,
    %c0_9 = arith.constant 0 : index
    %c0_10 = arith.constant 0 : index
    %c2 = arith.constant 2 : index
    %c0_11 = arith.constant 0 : index
    %8 = vector.load %arg1[%c0_9, %c0_10, %c2, %c0_11] : memref<1x18x18x128xbf16, #tpu.memory_space<vmem>>, vector<1x16x16x128xbf16>
    %9 = vector.shape_cast %8 : vector<1x16x16x128xbf16> to vector<16x16x128xbf16>
    %10 = vector.shape_cast %9 : vector<16x16x128xbf16> to vector<256x128xbf16>
    %c0_12 = arith.constant 0 : index
    %c256 = arith.constant 256 : index
    %11 = vector.load %arg5[%c0_12, %c256] : memref<256x1152xbf16, #tpu.memory_space<vmem>>, vector<256x128xbf16>
    tpu.vector_store %arg5[%c0_12, %c256], %10 {strides = array<i32>} : memref<256x1152xbf16, #tpu.memory_space<vmem>>, vector<256x128xbf16>,
    %c0_13 = arith.constant 0 : index
    %c1_14 = arith.constant 1 : index
    %c0_15 = arith.constant 0 : index
    %c0_16 = arith.constant 0 : index
    %12 = vector.load %arg1[%c0_13, %c1_14, %c0_15, %c0_16] : memref<1x18x18x128xbf16, #tpu.memory_space<vmem>>, vector<1x16x16x128xbf16>
    %13 = vector.shape_cast %12 : vector<1x16x16x128xbf16> to vector<16x16x128xbf16>
    %14 = vector.shape_cast %13 : vector<16x16x128xbf16> to vector<256x128xbf16>
    %c0_17 = arith.constant 0 : index
    %c384 = arith.constant 384 : index
    %15 = vector.load %arg5[%c0_17, %c384] : memref<256x1152xbf16, #tpu.memory_space<vmem>>, vector<256x128xbf16>
    tpu.vector_store %arg5[%c0_17, %c384], %14 {strides = array<i32>} : memref<256x1152xbf16, #tpu.memory_space<vmem>>, vector<256x128xbf16>,
    %c0_18 = arith.constant 0 : index
    %c1_19 = arith.constant 1 : index
    %c1_20 = arith.constant 1 : index
    %c0_21 = arith.constant 0 : index
    %16 = vector.load %arg1[%c0_18, %c1_19, %c1_20, %c0_21] : memref<1x18x18x128xbf16, #tpu.memory_space<vmem>>, vector<1x16x16x128xbf16>
    %17 = vector.shape_cast %16 : vector<1x16x16x128xbf16> to vector<16x16x128xbf16>
    %18 = vector.shape_cast %17 : vector<16x16x128xbf16> to vector<256x128xbf16>
    %c0_22 = arith.constant 0 : index
    %c512 = arith.constant 512 : index
    %19 = vector.load %arg5[%c0_22, %c512] : memref<256x1152xbf16, #tpu.memory_space<vmem>>, vector<256x128xbf16>
    tpu.vector_store %arg5[%c0_22, %c512], %18 {strides = array<i32>} : memref<256x1152xbf16, #tpu.memory_space<vmem>>, vector<256x128xbf16>,
    %c0_23 = arith.constant 0 : index
    %c1_24 = arith.constant 1 : index
    %c2_25 = arith.constant 2 : index
    %c0_26 = arith.constant 0 : index
    %20 = vector.load %arg1[%c0_23, %c1_24, %c2_25, %c0_26] : memref<1x18x18x128xbf16, #tpu.memory_space<vmem>>, vector<1x16x16x128xbf16>
    %21 = vector.shape_cast %20 : vector<1x16x16x128xbf16> to vector<16x16x128xbf16>
    %22 = vector.shape_cast %21 : vector<16x16x128xbf16> to vector<256x128xbf16>
    %c0_27 = arith.constant 0 : index
    %c640 = arith.constant 640 : index
    %23 = vector.load %arg5[%c0_27, %c640] : memref<256x1152xbf16, #tpu.memory_space<vmem>>, vector<256x128xbf16>
    tpu.vector_store %arg5[%c0_27, %c640], %22 {strides = array<i32>} : memref<256x1152xbf16, #tpu.memory_space<vmem>>, vector<256x128xbf16>,
    %c0_28 = arith.constant 0 : index
    %c2_29 = arith.constant 2 : index
    %c0_30 = arith.constant 0 : index
    %c0_31 = arith.constant 0 : index
    %24 = vector.load %arg1[%c0_28, %c2_29, %c0_30, %c0_31] : memref<1x18x18x128xbf16, #tpu.memory_space<vmem>>, vector<1x16x16x128xbf16>
    %25 = vector.shape_cast %24 : vector<1x16x16x128xbf16> to vector<16x16x128xbf16>
    %26 = vector.shape_cast %25 : vector<16x16x128xbf16> to vector<256x128xbf16>
    %c0_32 = arith.constant 0 : index
    %c768 = arith.constant 768 : index
    %27 = vector.load %arg5[%c0_32, %c768] : memref<256x1152xbf16, #tpu.memory_space<vmem>>, vector<256x128xbf16>
    tpu.vector_store %arg5[%c0_32, %c768], %26 {strides = array<i32>} : memref<256x1152xbf16, #tpu.memory_space<vmem>>, vector<256x128xbf16>,
    %c0_33 = arith.constant 0 : index
    %c2_34 = arith.constant 2 : index
    %c1_35 = arith.constant 1 : index
    %c0_36 = arith.constant 0 : index
    %28 = vector.load %arg1[%c0_33, %c2_34, %c1_35, %c0_36] : memref<1x18x18x128xbf16, #tpu.memory_space<vmem>>, vector<1x16x16x128xbf16>
    %29 = vector.shape_cast %28 : vector<1x16x16x128xbf16> to vector<16x16x128xbf16>
    %30 = vector.shape_cast %29 : vector<16x16x128xbf16> to vector<256x128xbf16>
    %c0_37 = arith.constant 0 : index
    %c896 = arith.constant 896 : index
    %31 = vector.load %arg5[%c0_37, %c896] : memref<256x1152xbf16, #tpu.memory_space<vmem>>, vector<256x128xbf16>
    tpu.vector_store %arg5[%c0_37, %c896], %30 {strides = array<i32>} : memref<256x1152xbf16, #tpu.memory_space<vmem>>, vector<256x128xbf16>,
    %c0_38 = arith.constant 0 : index
    %c2_39 = arith.constant 2 : index
    %c2_40 = arith.constant 2 : index
    %c0_41 = arith.constant 0 : index
    %32 = vector.load %arg1[%c0_38, %c2_39, %c2_40, %c0_41] : memref<1x18x18x128xbf16, #tpu.memory_space<vmem>>, vector<1x16x16x128xbf16>
    %33 = vector.shape_cast %32 : vector<1x16x16x128xbf16> to vector<16x16x128xbf16>
    %34 = vector.shape_cast %33 : vector<16x16x128xbf16> to vector<256x128xbf16>
    %c0_42 = arith.constant 0 : index
    %c1024 = arith.constant 1024 : index
    %35 = vector.load %arg5[%c0_42, %c1024] : memref<256x1152xbf16, #tpu.memory_space<vmem>>, vector<256x128xbf16>
    tpu.vector_store %arg5[%c0_42, %c1024], %34 {strides = array<i32>} : memref<256x1152xbf16, #tpu.memory_space<vmem>>, vector<256x128xbf16>,
    %c0_43 = arith.constant 0 : index
    %c0_44 = arith.constant 0 : index
    %36 = vector.load %arg5[%c0_43, %c0_44] : memref<256x1152xbf16, #tpu.memory_space<vmem>>, vector<256x1152xbf16>
    %c0_45 = arith.constant 0 : index
    %c0_46 = arith.constant 0 : index
    %37 = vector.load %arg2[%c0_45, %c0_46] : memref<1152x128xbf16, #tpu.memory_space<vmem>>, vector<1152x128xbf16>
    %cst = arith.constant dense<0.000000e+00> : vector<256x128xf32>
    %38 = tpu.matmul %36, %37, %cst {dimension_numbers = #tpu.dot_dimension_numbers<[1], [0], [0], [1], [0, 0, 1, 1], [], []>} : vector<256x1152xbf16>, vector<1152x128xbf16>, vector<256x128xf32> -> vector<256x128xf32>
    %cst_47 = arith.constant dense<0.000000e+00> : vector<128xf32>
    %39 = vector.multi_reduction <add>, %38, %cst_47 [0] : vector<256x128xf32> to vector<128xf32>
    %40 = vector.shape_cast %39 : vector<128xf32> to vector<1x128xf32>
    %c0_48 = arith.constant 0 : index
    %c0_49 = arith.constant 0 : index
    %c0_50 = arith.constant 0 : index
    %41 = vector.load %arg4[%c0_48, %c0_49, %c0_50] : memref<1x2x128xf32, #tpu.memory_space<vmem>>, vector<1x1x128xf32>
    %42 = vector.shape_cast %41 : vector<1x1x128xf32> to vector<1x128xf32>
    %43 = vector.shape_cast %40 : vector<1x128xf32> to vector<1x1x128xf32>
    tpu.vector_store %arg4[%c0_48, %c0_49, %c0_50], %43 {strides = array<i32>} : memref<1x2x128xf32, #tpu.memory_space<vmem>>, vector<1x1x128xf32>,
    %44 = arith.mulf %38, %38 : vector<256x128xf32>
    %cst_51 = arith.constant dense<0.000000e+00> : vector<128xf32>
    %45 = vector.multi_reduction <add>, %44, %cst_51 [0] : vector<256x128xf32> to vector<128xf32>
    %46 = vector.shape_cast %45 : vector<128xf32> to vector<1x128xf32>
    %c0_52 = arith.constant 0 : index
    %c1_53 = arith.constant 1 : index
    %c0_54 = arith.constant 0 : index
    %47 = vector.load %arg4[%c0_52, %c1_53, %c0_54] : memref<1x2x128xf32, #tpu.memory_space<vmem>>, vector<1x1x128xf32>
    %48 = vector.shape_cast %47 : vector<1x1x128xf32> to vector<1x128xf32>
    %49 = vector.shape_cast %46 : vector<1x128xf32> to vector<1x1x128xf32>
    tpu.vector_store %arg4[%c0_52, %c1_53, %c0_54], %49 {strides = array<i32>} : memref<1x2x128xf32, #tpu.memory_space<vmem>>, vector<1x1x128xf32>,
    %50 = vector.shape_cast %38 : vector<256x128xf32> to vector<1x16x16x128xf32>
    %51 = arith.truncf %50 : vector<1x16x16x128xf32> to vector<1x16x16x128xbf16>
    %c0_55 = arith.constant 0 : index
    %c0_56 = arith.constant 0 : index
    %c0_57 = arith.constant 0 : index
    %c0_58 = arith.constant 0 : index
    %52 = vector.load %arg3[%c0_55, %c0_56, %c0_57, %c0_58] : memref<1x16x16x128xbf16, #tpu.memory_space<vmem>>, vector<1x16x16x128xbf16>
    tpu.vector_store %arg3[%c0_55, %c0_56, %c0_57, %c0_58], %51 {strides = array<i32>} : memref<1x16x16x128xbf16, #tpu.memory_space<vmem>>, vector<1x16x16x128xbf16>,
    return
  }
  func.func @transform_0(%arg0: i32) -> (i32, i32, i32, i32) {
    %c0_i32 = arith.constant 0 : i32
    %c0_i32_0 = arith.constant 0 : i32
    %c0_i32_1 = arith.constant 0 : i32
    %c0_i32_2 = arith.constant 0 : i32
    return %arg0, %c0_i32, %c0_i32_0, %c0_i32_1 : i32, i32, i32, i32
  }
  func.func @transform_1(%arg0: i32) -> (i32, i32) {
    %c0_i32 = arith.constant 0 : i32
    %c0_i32_0 = arith.constant 0 : i32
    %c0_i32_1 = arith.constant 0 : i32
    return %c0_i32, %c0_i32_0 : i32, i32
  }
  func.func @transform_2(%arg0: i32) -> (i32, i32, i32, i32) {
    %c0_i32 = arith.constant 0 : i32
    %c0_i32_0 = arith.constant 0 : i32
    %c0_i32_1 = arith.constant 0 : i32
    %c0_i32_2 = arith.constant 0 : i32
    return %arg0, %c0_i32, %c0_i32_0, %c0_i32_1 : i32, i32, i32, i32
  }
  func.func @transform_3(%arg0: i32) -> (i32, i32, i32) {
    %c0_i32 = arith.constant 0 : i32
    %c0_i32_0 = arith.constant 0 : i32
    %c0_i32_1 = arith.constant 0 : i32
    return %arg0, %c0_i32, %c0_i32_0 : i32, i32, i32
  }
}

module attributes {stable_mosaic.version = 11 : i64} {
  func.func @_bn_apply_transpose_kernel(%arg0: i32, %arg1: memref<1x16x16x128xbf16, #tpu.memory_space<vmem>>, %arg2: memref<1x128xf32, #tpu.memory_space<vmem>>, %arg3: memref<1x128xf32, #tpu.memory_space<vmem>>, %arg4: memref<1x8x256xf32, #tpu.memory_space<vmem>>) attributes {dimension_semantics = [#tpu.dimension_semantics<parallel>], iteration_bounds = array<i64: 2>, scalar_prefetch = 0 : i64, scratch_operands = 0 : i64, tpu.core_type = #tpu.core_type<tc>, window_params = [{transform_indices = @transform_0, window_bounds = array<i64: 1, 16, 16, 128>}, {pipeline_mode = #tpu.pipeline_mode<synchronous>, transform_indices = @transform_1, window_bounds = array<i64: 1, 128>}, {pipeline_mode = #tpu.pipeline_mode<synchronous>, transform_indices = @transform_2, window_bounds = array<i64: 1, 128>}, {transform_indices = @transform_3, window_bounds = array<i64: 1, 8, 256>}]} {
    %c0 = arith.constant 0 : index
    %c0_0 = arith.constant 0 : index
    %c0_1 = arith.constant 0 : index
    %c0_2 = arith.constant 0 : index
    %0 = vector.load %arg1[%c0, %c0_0, %c0_1, %c0_2] : memref<1x16x16x128xbf16, #tpu.memory_space<vmem>>, vector<1x16x16x128xbf16>
    %1 = vector.shape_cast %0 : vector<1x16x16x128xbf16> to vector<256x128xbf16>
    %2 = arith.extf %1 : vector<256x128xbf16> to vector<256x128xf32>
    %c0_3 = arith.constant 0 : index
    %c0_4 = arith.constant 0 : index
    %3 = vector.load %arg2[%c0_3, %c0_4] : memref<1x128xf32, #tpu.memory_space<vmem>>, vector<1x128xf32>
    %4 = vector.broadcast %3 : vector<1x128xf32> to vector<256x128xf32>
    %5 = arith.mulf %2, %4 : vector<256x128xf32>
    %c0_5 = arith.constant 0 : index
    %c0_6 = arith.constant 0 : index
    %6 = vector.load %arg3[%c0_5, %c0_6] : memref<1x128xf32, #tpu.memory_space<vmem>>, vector<1x128xf32>
    %7 = vector.broadcast %6 : vector<1x128xf32> to vector<256x128xf32>
    %8 = arith.addf %5, %7 : vector<256x128xf32>
    %9 = tpu.transpose %8, [1, 0] : vector<256x128xf32> -> vector<128x256xf32>
    %10 = vector.extract_strided_slice %9 {offsets = [0, 0], sizes = [8, 256], strides = [1, 1]} : vector<128x256xf32> to vector<8x256xf32>
    %c0_7 = arith.constant 0 : index
    %c0_8 = arith.constant 0 : index
    %c0_9 = arith.constant 0 : index
    %11 = vector.load %arg4[%c0_7, %c0_8, %c0_9] : memref<1x8x256xf32, #tpu.memory_space<vmem>>, vector<1x8x256xf32>
    %12 = vector.shape_cast %11 : vector<1x8x256xf32> to vector<8x256xf32>
    %13 = vector.shape_cast %10 : vector<8x256xf32> to vector<1x8x256xf32>
    tpu.vector_store %arg4[%c0_7, %c0_8, %c0_9], %13 {strides = array<i32>} : memref<1x8x256xf32, #tpu.memory_space<vmem>>, vector<1x8x256xf32>,
    return
  }
  func.func @transform_0(%arg0: i32) -> (i32, i32, i32, i32) {
    %c0_i32 = arith.constant 0 : i32
    %c0_i32_0 = arith.constant 0 : i32
    %c0_i32_1 = arith.constant 0 : i32
    %c0_i32_2 = arith.constant 0 : i32
    return %arg0, %c0_i32, %c0_i32_0, %c0_i32_1 : i32, i32, i32, i32
  }
  func.func @transform_1(%arg0: i32) -> (i32, i32) {
    %c0_i32 = arith.constant 0 : i32
    %c0_i32_0 = arith.constant 0 : i32
    %c0_i32_1 = arith.constant 0 : i32
    return %c0_i32, %c0_i32_0 : i32, i32
  }
  func.func @transform_2(%arg0: i32) -> (i32, i32) {
    %c0_i32 = arith.constant 0 : i32
    %c0_i32_0 = arith.constant 0 : i32
    %c0_i32_1 = arith.constant 0 : i32
    return %c0_i32, %c0_i32_0 : i32, i32
  }
  func.func @transform_3(%arg0: i32) -> (i32, i32, i32) {
    %c0_i32 = arith.constant 0 : i32
    %c0_i32_0 = arith.constant 0 : i32
    %c0_i32_1 = arith.constant 0 : i32
    return %arg0, %c0_i32, %c0_i32_0 : i32, i32, i32
  }
}

module attributes {stable_mosaic.version = 11 : i64} {
  func.func @_bn_relu_conv3x3_stats_kernel(%arg0: i32, %arg1: memref<1x16x16x128xbf16, #tpu.memory_space<vmem>>, %arg2: memref<1x128xf32, #tpu.memory_space<vmem>>, %arg3: memref<1x128xf32, #tpu.memory_space<vmem>>, %arg4: memref<1152x128xbf16, #tpu.memory_space<vmem>>, %arg5: memref<1x16x16x128xbf16, #tpu.memory_space<vmem>>, %arg6: memref<1x2x128xf32, #tpu.memory_space<vmem>>, %arg7: memref<18x18x128xbf16, #tpu.memory_space<vmem>>, %arg8: memref<256x1152xbf16, #tpu.memory_space<vmem>>) attributes {dimension_semantics = [#tpu.dimension_semantics<parallel>], iteration_bounds = array<i64: 2>, scalar_prefetch = 0 : i64, scratch_operands = 2 : i64, tpu.core_type = #tpu.core_type<tc>, window_params = [{transform_indices = @transform_0, window_bounds = array<i64: 1, 16, 16, 128>}, {pipeline_mode = #tpu.pipeline_mode<synchronous>, transform_indices = @transform_1, window_bounds = array<i64: 1, 128>}, {pipeline_mode = #tpu.pipeline_mode<synchronous>, transform_indices = @transform_2, window_bounds = array<i64: 1, 128>}, {pipeline_mode = #tpu.pipeline_mode<synchronous>, transform_indices = @transform_3, window_bounds = array<i64: 1152, 128>}, {transform_indices = @transform_4, window_bounds = array<i64: 1, 16, 16, 128>}, {transform_indices = @transform_5, window_bounds = array<i64: 1, 2, 128>}]} {
    %cst = arith.constant 0.000000e+00 : bf16
    %0 = vector.broadcast %cst : bf16 to vector<1x18x128xbf16>
    %cst_0 = arith.constant 0.000000e+00 : bf16
    %1 = vector.broadcast %cst_0 : bf16 to vector<18x1x128xbf16>
    %c0 = arith.constant 0 : index
    %c0_1 = arith.constant 0 : index
    %c0_2 = arith.constant 0 : index
    %2 = vector.load %arg7[%c0, %c0_1, %c0_2] : memref<18x18x128xbf16, #tpu.memory_space<vmem>>, vector<1x18x128xbf16>
    tpu.vector_store %arg7[%c0, %c0_1, %c0_2], %0 {strides = array<i32>} : memref<18x18x128xbf16, #tpu.memory_space<vmem>>, vector<1x18x128xbf16>,
    %c17 = arith.constant 17 : index
    %c0_3 = arith.constant 0 : index
    %c0_4 = arith.constant 0 : index
    %3 = vector.load %arg7[%c17, %c0_3, %c0_4] : memref<18x18x128xbf16, #tpu.memory_space<vmem>>, vector<1x18x128xbf16>
    tpu.vector_store %arg7[%c17, %c0_3, %c0_4], %0 {strides = array<i32>} : memref<18x18x128xbf16, #tpu.memory_space<vmem>>, vector<1x18x128xbf16>,
    %c0_5 = arith.constant 0 : index
    %c0_6 = arith.constant 0 : index
    %c0_7 = arith.constant 0 : index
    %4 = vector.load %arg7[%c0_5, %c0_6, %c0_7] : memref<18x18x128xbf16, #tpu.memory_space<vmem>>, vector<18x1x128xbf16>
    tpu.vector_store %arg7[%c0_5, %c0_6, %c0_7], %1 {strides = array<i32>} : memref<18x18x128xbf16, #tpu.memory_space<vmem>>, vector<18x1x128xbf16>,
    %c0_8 = arith.constant 0 : index
    %c17_9 = arith.constant 17 : index
    %c0_10 = arith.constant 0 : index
    %5 = vector.load %arg7[%c0_8, %c17_9, %c0_10] : memref<18x18x128xbf16, #tpu.memory_space<vmem>>, vector<18x1x128xbf16>
    tpu.vector_store %arg7[%c0_8, %c17_9, %c0_10], %1 {strides = array<i32>} : memref<18x18x128xbf16, #tpu.memory_space<vmem>>, vector<18x1x128xbf16>,
    %c0_11 = arith.constant 0 : index
    %c0_12 = arith.constant 0 : index
    %6 = vector.load %arg2[%c0_11, %c0_12] : memref<1x128xf32, #tpu.memory_space<vmem>>, vector<1x128xf32>
    %7 = vector.shape_cast %6 : vector<1x128xf32> to vector<1x1x128xf32>
    %c0_13 = arith.constant 0 : index
    %c0_14 = arith.constant 0 : index
    %8 = vector.load %arg3[%c0_13, %c0_14] : memref<1x128xf32, #tpu.memory_space<vmem>>, vector<1x128xf32>
    %9 = vector.shape_cast %8 : vector<1x128xf32> to vector<1x1x128xf32>
    %c0_15 = arith.constant 0 : index
    %c0_16 = arith.constant 0 : index
    %c0_17 = arith.constant 0 : index
    %c0_18 = arith.constant 0 : index
    %10 = vector.load %arg1[%c0_15, %c0_16, %c0_17, %c0_18] : memref<1x16x16x128xbf16, #tpu.memory_space<vmem>>, vector<1x16x16x128xbf16>
    %11 = vector.shape_cast %10 : vector<1x16x16x128xbf16> to vector<16x16x128xbf16>
    %12 = arith.extf %11 : vector<16x16x128xbf16> to vector<16x16x128xf32>
    %13 = vector.broadcast %7 : vector<1x1x128xf32> to vector<16x16x128xf32>
    %14 = arith.mulf %12, %13 : vector<16x16x128xf32>
    %15 = vector.broadcast %9 : vector<1x1x128xf32> to vector<16x16x128xf32>
    %16 = arith.addf %14, %15 : vector<16x16x128xf32>
    %cst_19 = arith.constant 0.000000e+00 : f32
    %17 = vector.broadcast %cst_19 : f32 to vector<16x16x128xf32>
    %18 = arith.maximumf %16, %17 : vector<16x16x128xf32>
    %19 = arith.truncf %18 : vector<16x16x128xf32> to vector<16x16x128xbf16>
    %c1 = arith.constant 1 : index
    %c1_20 = arith.constant 1 : index
    %c0_21 = arith.constant 0 : index
    %20 = vector.load %arg7[%c1, %c1_20, %c0_21] : memref<18x18x128xbf16, #tpu.memory_space<vmem>>, vector<16x16x128xbf16>
    tpu.vector_store %arg7[%c1, %c1_20, %c0_21], %19 {strides = array<i32>} : memref<18x18x128xbf16, #tpu.memory_space<vmem>>, vector<16x16x128xbf16>,
    %c0_22 = arith.constant 0 : index
    %c0_23 = arith.constant 0 : index
    %c0_24 = arith.constant 0 : index
    %21 = vector.load %arg7[%c0_22, %c0_23, %c0_24] : memref<18x18x128xbf16, #tpu.memory_space<vmem>>, vector<16x16x128xbf16>
    %22 = vector.shape_cast %21 : vector<16x16x128xbf16> to vector<256x128xbf16>
    %c0_25 = arith.constant 0 : index
    %c0_26 = arith.constant 0 : index
    %23 = vector.load %arg8[%c0_25, %c0_26] : memref<256x1152xbf16, #tpu.memory_space<vmem>>, vector<256x128xbf16>
    tpu.vector_store %arg8[%c0_25, %c0_26], %22 {strides = array<i32>} : memref<256x1152xbf16, #tpu.memory_space<vmem>>, vector<256x128xbf16>,
    %c0_27 = arith.constant 0 : index
    %c1_28 = arith.constant 1 : index
    %c0_29 = arith.constant 0 : index
    %24 = vector.load %arg7[%c0_27, %c1_28, %c0_29] : memref<18x18x128xbf16, #tpu.memory_space<vmem>>, vector<16x16x128xbf16>
    %25 = vector.shape_cast %24 : vector<16x16x128xbf16> to vector<256x128xbf16>
    %c0_30 = arith.constant 0 : index
    %c128 = arith.constant 128 : index
    %26 = vector.load %arg8[%c0_30, %c128] : memref<256x1152xbf16, #tpu.memory_space<vmem>>, vector<256x128xbf16>
    tpu.vector_store %arg8[%c0_30, %c128], %25 {strides = array<i32>} : memref<256x1152xbf16, #tpu.memory_space<vmem>>, vector<256x128xbf16>,
    %c0_31 = arith.constant 0 : index
    %c2 = arith.constant 2 : index
    %c0_32 = arith.constant 0 : index
    %27 = vector.load %arg7[%c0_31, %c2, %c0_32] : memref<18x18x128xbf16, #tpu.memory_space<vmem>>, vector<16x16x128xbf16>
    %28 = vector.shape_cast %27 : vector<16x16x128xbf16> to vector<256x128xbf16>
    %c0_33 = arith.constant 0 : index
    %c256 = arith.constant 256 : index
    %29 = vector.load %arg8[%c0_33, %c256] : memref<256x1152xbf16, #tpu.memory_space<vmem>>, vector<256x128xbf16>
    tpu.vector_store %arg8[%c0_33, %c256], %28 {strides = array<i32>} : memref<256x1152xbf16, #tpu.memory_space<vmem>>, vector<256x128xbf16>,
    %c1_34 = arith.constant 1 : index
    %c0_35 = arith.constant 0 : index
    %c0_36 = arith.constant 0 : index
    %30 = vector.load %arg7[%c1_34, %c0_35, %c0_36] : memref<18x18x128xbf16, #tpu.memory_space<vmem>>, vector<16x16x128xbf16>
    %31 = vector.shape_cast %30 : vector<16x16x128xbf16> to vector<256x128xbf16>
    %c0_37 = arith.constant 0 : index
    %c384 = arith.constant 384 : index
    %32 = vector.load %arg8[%c0_37, %c384] : memref<256x1152xbf16, #tpu.memory_space<vmem>>, vector<256x128xbf16>
    tpu.vector_store %arg8[%c0_37, %c384], %31 {strides = array<i32>} : memref<256x1152xbf16, #tpu.memory_space<vmem>>, vector<256x128xbf16>,
    %c1_38 = arith.constant 1 : index
    %c1_39 = arith.constant 1 : index
    %c0_40 = arith.constant 0 : index
    %33 = vector.load %arg7[%c1_38, %c1_39, %c0_40] : memref<18x18x128xbf16, #tpu.memory_space<vmem>>, vector<16x16x128xbf16>
    %34 = vector.shape_cast %33 : vector<16x16x128xbf16> to vector<256x128xbf16>
    %c0_41 = arith.constant 0 : index
    %c512 = arith.constant 512 : index
    %35 = vector.load %arg8[%c0_41, %c512] : memref<256x1152xbf16, #tpu.memory_space<vmem>>, vector<256x128xbf16>
    tpu.vector_store %arg8[%c0_41, %c512], %34 {strides = array<i32>} : memref<256x1152xbf16, #tpu.memory_space<vmem>>, vector<256x128xbf16>,
    %c1_42 = arith.constant 1 : index
    %c2_43 = arith.constant 2 : index
    %c0_44 = arith.constant 0 : index
    %36 = vector.load %arg7[%c1_42, %c2_43, %c0_44] : memref<18x18x128xbf16, #tpu.memory_space<vmem>>, vector<16x16x128xbf16>
    %37 = vector.shape_cast %36 : vector<16x16x128xbf16> to vector<256x128xbf16>
    %c0_45 = arith.constant 0 : index
    %c640 = arith.constant 640 : index
    %38 = vector.load %arg8[%c0_45, %c640] : memref<256x1152xbf16, #tpu.memory_space<vmem>>, vector<256x128xbf16>
    tpu.vector_store %arg8[%c0_45, %c640], %37 {strides = array<i32>} : memref<256x1152xbf16, #tpu.memory_space<vmem>>, vector<256x128xbf16>,
    %c2_46 = arith.constant 2 : index
    %c0_47 = arith.constant 0 : index
    %c0_48 = arith.constant 0 : index
    %39 = vector.load %arg7[%c2_46, %c0_47, %c0_48] : memref<18x18x128xbf16, #tpu.memory_space<vmem>>, vector<16x16x128xbf16>
    %40 = vector.shape_cast %39 : vector<16x16x128xbf16> to vector<256x128xbf16>
    %c0_49 = arith.constant 0 : index
    %c768 = arith.constant 768 : index
    %41 = vector.load %arg8[%c0_49, %c768] : memref<256x1152xbf16, #tpu.memory_space<vmem>>, vector<256x128xbf16>
    tpu.vector_store %arg8[%c0_49, %c768], %40 {strides = array<i32>} : memref<256x1152xbf16, #tpu.memory_space<vmem>>, vector<256x128xbf16>,
    %c2_50 = arith.constant 2 : index
    %c1_51 = arith.constant 1 : index
    %c0_52 = arith.constant 0 : index
    %42 = vector.load %arg7[%c2_50, %c1_51, %c0_52] : memref<18x18x128xbf16, #tpu.memory_space<vmem>>, vector<16x16x128xbf16>
    %43 = vector.shape_cast %42 : vector<16x16x128xbf16> to vector<256x128xbf16>
    %c0_53 = arith.constant 0 : index
    %c896 = arith.constant 896 : index
    %44 = vector.load %arg8[%c0_53, %c896] : memref<256x1152xbf16, #tpu.memory_space<vmem>>, vector<256x128xbf16>
    tpu.vector_store %arg8[%c0_53, %c896], %43 {strides = array<i32>} : memref<256x1152xbf16, #tpu.memory_space<vmem>>, vector<256x128xbf16>,
    %c2_54 = arith.constant 2 : index
    %c2_55 = arith.constant 2 : index
    %c0_56 = arith.constant 0 : index
    %45 = vector.load %arg7[%c2_54, %c2_55, %c0_56] : memref<18x18x128xbf16, #tpu.memory_space<vmem>>, vector<16x16x128xbf16>
    %46 = vector.shape_cast %45 : vector<16x16x128xbf16> to vector<256x128xbf16>
    %c0_57 = arith.constant 0 : index
    %c1024 = arith.constant 1024 : index
    %47 = vector.load %arg8[%c0_57, %c1024] : memref<256x1152xbf16, #tpu.memory_space<vmem>>, vector<256x128xbf16>
    tpu.vector_store %arg8[%c0_57, %c1024], %46 {strides = array<i32>} : memref<256x1152xbf16, #tpu.memory_space<vmem>>, vector<256x128xbf16>,
    %c0_58 = arith.constant 0 : index
    %c0_59 = arith.constant 0 : index
    %48 = vector.load %arg8[%c0_58, %c0_59] : memref<256x1152xbf16, #tpu.memory_space<vmem>>, vector<256x1152xbf16>
    %c0_60 = arith.constant 0 : index
    %c0_61 = arith.constant 0 : index
    %49 = vector.load %arg4[%c0_60, %c0_61] : memref<1152x128xbf16, #tpu.memory_space<vmem>>, vector<1152x128xbf16>
    %cst_62 = arith.constant dense<0.000000e+00> : vector<256x128xf32>
    %50 = tpu.matmul %48, %49, %cst_62 {dimension_numbers = #tpu.dot_dimension_numbers<[1], [0], [0], [1], [0, 0, 1, 1], [], []>} : vector<256x1152xbf16>, vector<1152x128xbf16>, vector<256x128xf32> -> vector<256x128xf32>
    %cst_63 = arith.constant dense<0.000000e+00> : vector<128xf32>
    %51 = vector.multi_reduction <add>, %50, %cst_63 [0] : vector<256x128xf32> to vector<128xf32>
    %52 = vector.shape_cast %51 : vector<128xf32> to vector<1x128xf32>
    %c0_64 = arith.constant 0 : index
    %c0_65 = arith.constant 0 : index
    %c0_66 = arith.constant 0 : index
    %53 = vector.load %arg6[%c0_64, %c0_65, %c0_66] : memref<1x2x128xf32, #tpu.memory_space<vmem>>, vector<1x1x128xf32>
    %54 = vector.shape_cast %53 : vector<1x1x128xf32> to vector<1x128xf32>
    %55 = vector.shape_cast %52 : vector<1x128xf32> to vector<1x1x128xf32>
    tpu.vector_store %arg6[%c0_64, %c0_65, %c0_66], %55 {strides = array<i32>} : memref<1x2x128xf32, #tpu.memory_space<vmem>>, vector<1x1x128xf32>,
    %56 = arith.mulf %50, %50 : vector<256x128xf32>
    %cst_67 = arith.constant dense<0.000000e+00> : vector<128xf32>
    %57 = vector.multi_reduction <add>, %56, %cst_67 [0] : vector<256x128xf32> to vector<128xf32>
    %58 = vector.shape_cast %57 : vector<128xf32> to vector<1x128xf32>
    %c0_68 = arith.constant 0 : index
    %c1_69 = arith.constant 1 : index
    %c0_70 = arith.constant 0 : index
    %59 = vector.load %arg6[%c0_68, %c1_69, %c0_70] : memref<1x2x128xf32, #tpu.memory_space<vmem>>, vector<1x1x128xf32>
    %60 = vector.shape_cast %59 : vector<1x1x128xf32> to vector<1x128xf32>
    %61 = vector.shape_cast %58 : vector<1x128xf32> to vector<1x1x128xf32>
    tpu.vector_store %arg6[%c0_68, %c1_69, %c0_70], %61 {strides = array<i32>} : memref<1x2x128xf32, #tpu.memory_space<vmem>>, vector<1x1x128xf32>,
    %62 = vector.shape_cast %50 : vector<256x128xf32> to vector<1x16x16x128xf32>
    %63 = arith.truncf %62 : vector<1x16x16x128xf32> to vector<1x16x16x128xbf16>
    %c0_71 = arith.constant 0 : index
    %c0_72 = arith.constant 0 : index
    %c0_73 = arith.constant 0 : index
    %c0_74 = arith.constant 0 : index
    %64 = vector.load %arg5[%c0_71, %c0_72, %c0_73, %c0_74] : memref<1x16x16x128xbf16, #tpu.memory_space<vmem>>, vector<1x16x16x128xbf16>
    tpu.vector_store %arg5[%c0_71, %c0_72, %c0_73, %c0_74], %63 {strides = array<i32>} : memref<1x16x16x128xbf16, #tpu.memory_space<vmem>>, vector<1x16x16x128xbf16>,
    return
  }
  func.func @transform_0(%arg0: i32) -> (i32, i32, i32, i32) {
    %c0_i32 = arith.constant 0 : i32
    %c0_i32_0 = arith.constant 0 : i32
    %c0_i32_1 = arith.constant 0 : i32
    %c0_i32_2 = arith.constant 0 : i32
    return %arg0, %c0_i32, %c0_i32_0, %c0_i32_1 : i32, i32, i32, i32
  }
  func.func @transform_1(%arg0: i32) -> (i32, i32) {
    %c0_i32 = arith.constant 0 : i32
    %c0_i32_0 = arith.constant 0 : i32
    %c0_i32_1 = arith.constant 0 : i32
    return %c0_i32, %c0_i32_0 : i32, i32
  }
  func.func @transform_2(%arg0: i32) -> (i32, i32) {
    %c0_i32 = arith.constant 0 : i32
    %c0_i32_0 = arith.constant 0 : i32
    %c0_i32_1 = arith.constant 0 : i32
    return %c0_i32, %c0_i32_0 : i32, i32
  }
  func.func @transform_3(%arg0: i32) -> (i32, i32) {
    %c0_i32 = arith.constant 0 : i32
    %c0_i32_0 = arith.constant 0 : i32
    %c0_i32_1 = arith.constant 0 : i32
    return %c0_i32, %c0_i32_0 : i32, i32
  }
  func.func @transform_4(%arg0: i32) -> (i32, i32, i32, i32) {
    %c0_i32 = arith.constant 0 : i32
    %c0_i32_0 = arith.constant 0 : i32
    %c0_i32_1 = arith.constant 0 : i32
    %c0_i32_2 = arith.constant 0 : i32
    return %arg0, %c0_i32, %c0_i32_0, %c0_i32_1 : i32, i32, i32, i32
  }
  func.func @transform_5(%arg0: i32) -> (i32, i32, i32) {
    %c0_i32 = arith.constant 0 : i32
    %c0_i32_0 = arith.constant 0 : i32
    %c0_i32_1 = arith.constant 0 : i32
    return %arg0, %c0_i32, %c0_i32_0 : i32, i32, i32
  }
}

</mosaic_0001>

<bundles_post_ra>
// kernel: ru_double_conv.5
= control target key start
LH: loop header
LB: loop body
LE: loop exit
PB: predicated region body
PF: predicated region fallthrough
CT: control target
= control target key end

     0   :  { %s564_s12 = smov 0   ;;  %s677_s0 = inlined_call_operand.vmem [shape: bf16[2,16,16,128], index: 0, kind: input, shape index: {}]   ;;  %s678_s1 = inlined_call_operand.vmem [shape: f32[1,128], index: 1, kind: input, shape index: {}]   ;;  %s679_s2 = inlined_call_operand.vmem [shape: f32[1,128], index: 2, kind: input, shape index: {}]   ;;  %s680_s3 = inlined_call_operand.vmem [shape: f32[2,8,256], index: 3, kind: output, shape index: {}]  }
   0x1 LB: > { %s434_s13 = sadd.s32 4294967295, %s542_s12   ;;  %p438_p0 = scmp.ge.s32.totalorder %s542_s12, 1  ;;  %s542_s12 = sphi %s564_s12, %s13_s12  }
   0x2   : > { %p137_p1 = scmp.lt.s32.totalorder %s542_s12, 3 }
   0x4   : > { %p138_p2 = pnand %p438_p0, %p137_p1 }
   0x5   : > { %p161_p3 = scmp.lt.s32.totalorder (!%p138_p2), %s434_s13, 1  ;;  %v583_v0 = vld [vmem:[%s678_s1] ss:$0 sm:$0xff] (!%p138_p2) }
   0x6   : > { %141 = sbr.rel (%p138_p2) target bundleno = 154 (0x9a), region = 32  ;;  %v592_v9 = vld [vmem:[%s679_s2] ss:$0 sm:$0xff] (!%p138_p2) }
   0xd   : > { %s682_s13 = smov (!%p161_p3, %s434_s13), 1 }
   0xe   : > { %s447_s14 = sshll.u32 %s682_s13, 7  ;;  %s448_s22 = sshll.u32 %s682_s13, 4 }
   0xf   : > { %s578_s17 = scalar_lea.vmem %s677_s0, %s447_s14  ;;  %s170_s25 = scalar_lea.vmem %s680_s3, %s448_s22 }
  0x10   : > { %v520_v1 = vld [vmem:[%s578_s17 + $0x40] sm:$0xff]   ;;  %v521_v3 = vld [vmem:[%s578_s17 + $0x48] sm:$0xff]   ;;  %v522_v24 = vld [vmem:[%s578_s17 + $0x50] sm:$0xff]  }
  0x11   : > { %v450_v2 = vld [vmem:[%s578_s17] sm:$0xff]   ;;  %v483_v4 = vunpack.c.l.bf16 %v520_v1  ;;  %v484_v6 = vunpack.c.h.bf16 %v520_v1  ;;  %v513_v8 = vld [vmem:[%s578_s17 + $0x8] sm:$0xff]   ;;  %v487_v10 = vunpack.c.l.bf16 %v521_v3  ;;  %v488_v19 = vunpack.c.h.bf16 %v521_v3  ;;  %v514_v25 = vld [vmem:[%s578_s17 + $0x10] sm:$0xff]  }
  0x12   : > { %v451_v5 = vunpack.c.l.bf16 %v450_v2  ;;  %v452_v7 = vunpack.c.h.bf16 %v450_v2  ;;  %v455_v11 = vunpack.c.l.bf16 %v513_v8  ;;  %v456_v20 = vunpack.c.h.bf16 %v513_v8  ;;  %v523_v38 = vld [vmem:[%s578_s17 + $0x58] sm:$0xff]   ;;  %v524_v52 = vld [vmem:[%s578_s17 + $0x60] sm:$0xff]   ;;  %v525_v3 = vld [vmem:[%s578_s17 + $0x68] sm:$0xff]  }
  0x13   : > { %v258_v12 = vmul.f32 %v483_v4, %v583_v0  ;;  %v259_v14 = vmul.f32 %v484_v6, %v583_v0  ;;  %v260_v18 = vmul.f32 %v487_v10, %v583_v0  ;;  %v261_v26 = vmul.f32 %v488_v19, %v583_v0  ;;  %v515_v39 = vld [vmem:[%s578_s17 + $0x18] sm:$0xff]   ;;  %v516_v53 = vld [vmem:[%s578_s17 + $0x20] sm:$0xff]   ;;  %v517_v4 = vld [vmem:[%s578_s17 + $0x28] sm:$0xff]  }
  0x14   : > { %v242_v13 = vmul.f32 %v451_v5, %v583_v0  ;;  %v243_v15 = vmul.f32 %v452_v7, %v583_v0  ;;  %v244_v23 = vmul.f32 %v455_v11, %v583_v0  ;;  %v245_v27 = vmul.f32 %v456_v20, %v583_v0  ;;  %v518_v19 = vld [vmem:[%s578_s17 + $0x30] sm:$0xff]  }
  0x15   : > { %v297_v16 = vadd.f32 %v592_v9, %v258_v12  ;;  %v298_v21 = vadd.f32 %v592_v9, %v259_v14  ;;  %v299_v28 = vadd.f32 %v592_v9, %v260_v18  ;;  %v491_v30 = vunpack.c.l.bf16 %v522_v24  ;;  %v526_v18 = vld [vmem:[%s578_s17 + $0x70] sm:$0xff]  }
  0x16   : > { %v281_v17 = vadd.f32 %v592_v9, %v242_v13  ;;  %v282_v22 = vadd.f32 %v592_v9, %v243_v15  ;;  %v283_v29 = vadd.f32 %v592_v9, %v244_v23  ;;  %v459_v31 = vunpack.c.l.bf16 %v514_v25 }
  0x17   : > { %345 = vxpose.xlu1.b32.start [1/16] (narrow) %v297_v16, 8  ;;  %v300_v32 = vadd.f32 %v592_v9, %v261_v26  ;;  %v492_v33 = vunpack.c.h.bf16 %v522_v24  ;;  %v284_v34 = vadd.f32 %v592_v9, %v245_v27  ;;  %v262_v35 = vmul.f32 %v491_v30, %v583_v0 }
  0x18   : > { %313 = vxpose.xlu0.b32.start [1/16] (narrow) %v281_v17, 8  ;;  %v246_v36 = vmul.f32 %v459_v31, %v583_v0  ;;  %v460_v37 = vunpack.c.h.bf16 %v514_v25  ;;  %v495_v41 = vunpack.c.l.bf16 %v523_v38  ;;  %v463_v45 = vunpack.c.l.bf16 %v515_v39 }
  0x19   : > { %v263_v40 = vmul.f32 %v492_v33, %v583_v0  ;;  %v301_v42 = vadd.f32 %v592_v9, %v262_v35  ;;  %v496_v47 = vunpack.c.h.bf16 %v523_v38  ;;  %v464_v51 = vunpack.c.h.bf16 %v515_v39  ;;  %v519_v33 = vld [vmem:[%s578_s17 + $0x38] sm:$0xff]  }
  0x1a   : > { %v285_v43 = vadd.f32 %v592_v9, %v246_v36  ;;  %v247_v44 = vmul.f32 %v460_v37, %v583_v0  ;;  %v264_v46 = vmul.f32 %v495_v41, %v583_v0  ;;  %v248_v50 = vmul.f32 %v463_v45, %v583_v0 }
  0x1b   : > { %346 = vxpose.xlu1.b32.cont [2/16] (narrow) %v298_v21, 8  ;;  %v302_v48 = vadd.f32 %v592_v9, %v263_v40  ;;  %v265_v54 = vmul.f32 %v496_v47, %v583_v0  ;;  %v499_v55 = vunpack.c.l.bf16 %v524_v52  ;;  %v249_v58 = vmul.f32 %v464_v51, %v583_v0 }
  0x1c   : > { %314 = vxpose.xlu0.b32.cont [2/16] (narrow) %v282_v22, 8  ;;  %v286_v49 = vadd.f32 %v592_v9, %v247_v44  ;;  %v303_v56 = vadd.f32 %v592_v9, %v264_v46  ;;  %v287_v57 = vadd.f32 %v592_v9, %v248_v50  ;;  %v467_v59 = vunpack.c.l.bf16 %v516_v53 }
  0x1d   : > { %v304_v60 = vadd.f32 %v592_v9, %v265_v54  ;;  %v266_v61 = vmul.f32 %v499_v55, %v583_v0  ;;  %v288_v62 = vadd.f32 %v592_v9, %v249_v58  ;;  %v500_v1 = vunpack.c.h.bf16 %v524_v52 }
  0x1e   : > { %v250_v63 = vmul.f32 %v467_v59, %v583_v0  ;;  %v468_v2 = vunpack.c.h.bf16 %v516_v53  ;;  %v503_v6 = vunpack.c.l.bf16 %v525_v3  ;;  %v471_v11 = vunpack.c.l.bf16 %v517_v4 }
  0x1f   : > { %347 = vxpose.xlu1.b32.cont [3/16] (narrow) %v299_v28, 8  ;;  %v305_v5 = vadd.f32 %v592_v9, %v266_v61  ;;  %v267_v8 = vmul.f32 %v500_v1, %v583_v0  ;;  %v504_v13 = vunpack.c.h.bf16 %v525_v3  ;;  %v472_v17 = vunpack.c.h.bf16 %v517_v4 }
  0x20   : > { %315 = vxpose.xlu0.b32.cont [3/16] (narrow) %v283_v29, 8  ;;  %v289_v7 = vadd.f32 %v592_v9, %v250_v63  ;;  %v251_v10 = vmul.f32 %v468_v2, %v583_v0  ;;  %v268_v12 = vmul.f32 %v503_v6, %v583_v0  ;;  %v252_v16 = vmul.f32 %v471_v11, %v583_v0 }
  0x21   : > { %v306_v14 = vadd.f32 %v592_v9, %v267_v8  ;;  %v269_v20 = vmul.f32 %v504_v13, %v583_v0  ;;  %v507_v21 = vunpack.c.l.bf16 %v526_v18  ;;  %v253_v24 = vmul.f32 %v472_v17, %v583_v0 }
  0x22   : > { %v290_v15 = vadd.f32 %v592_v9, %v251_v10  ;;  %v307_v22 = vadd.f32 %v592_v9, %v268_v12  ;;  %v291_v23 = vadd.f32 %v592_v9, %v252_v16  ;;  %v475_v25 = vunpack.c.l.bf16 %v518_v19 }
  0x23   : > { %348 = vxpose.xlu1.b32.cont [4/16] (narrow) %v300_v32, 8  ;;  %v308_v26 = vadd.f32 %v592_v9, %v269_v20  ;;  %v270_v27 = vmul.f32 %v507_v21, %v583_v0  ;;  %v292_v28 = vadd.f32 %v592_v9, %v253_v24  ;;  %v508_v30 = vunpack.c.h.bf16 %v526_v18  ;;  %v527_v32 = vld [vmem:[%s578_s17 + $0x78] sm:$0xff]  }
  0x24   : > { %316 = vxpose.xlu0.b32.cont [4/16] (narrow) %v284_v34, 8  ;;  %v254_v29 = vmul.f32 %v475_v25, %v583_v0  ;;  %v476_v31 = vunpack.c.h.bf16 %v518_v19  ;;  %v511_v35 = vunpack.c.l.bf16 %v527_v32  ;;  %v479_v39 = vunpack.c.l.bf16 %v519_v33 }
  0x25   : > { %v309_v34 = vadd.f32 %v592_v9, %v270_v27  ;;  %v271_v37 = vmul.f32 %v508_v30, %v583_v0  ;;  %v512_v41 = vunpack.c.h.bf16 %v527_v32  ;;  %v480_v45 = vunpack.c.h.bf16 %v519_v33 }
  0x26   : > { %v293_v36 = vadd.f32 %v592_v9, %v254_v29  ;;  %v255_v38 = vmul.f32 %v476_v31, %v583_v0  ;;  %v272_v40 = vmul.f32 %v511_v35, %v583_v0  ;;  %v256_v44 = vmul.f32 %v479_v39, %v583_v0 }
  0x27   : > { %349 = vxpose.xlu1.b32.cont [5/16] (narrow) %v301_v42, 8  ;;  %v310_v42 = vadd.f32 %v592_v9, %v271_v37  ;;  %v273_v46 = vmul.f32 %v512_v41, %v583_v0 }
  0x28   : > { %317 = vxpose.xlu0.b32.cont [5/16] (narrow) %v285_v43, 8  ;;  %v294_v43 = vadd.f32 %v592_v9, %v255_v38  ;;  %v311_v47 = vadd.f32 %v592_v9, %v272_v40 }
  0x29   : > { %v312_v50 = vadd.f32 %v592_v9, %v273_v46 }
  0x2b   : > { %350 = vxpose.xlu1.b32.cont [6/16] (narrow) %v302_v48, 8  ;;  %v295_v48 = vadd.f32 %v592_v9, %v256_v44 }
  0x2c   : > { %318 = vxpose.xlu0.b32.cont [6/16] (narrow) %v286_v49, 8  ;;  %v257_v49 = vmul.f32 %v480_v45, %v583_v0 }
  0x2e   : > { %v296_v51 = vadd.f32 %v592_v9, %v257_v49 }
  0x2f   : > { %351 = vxpose.xlu1.b32.cont [7/16] (narrow) %v303_v56, 8 }
  0x30   : > { %319 = vxpose.xlu0.b32.cont [7/16] (narrow) %v287_v57, 8 }
  0x33   : > { %352 = vxpose.xlu1.b32.cont [8/16] (narrow) %v304_v60, 8 }
  0x34   : > { %320 = vxpose.xlu0.b32.cont [8/16] (narrow) %v288_v62, 8 }
  0x37   : > { %353 = vxpose.xlu1.b32.cont [9/16] (narrow) %v305_v5, 8 }
  0x38   : > { %321 = vxpose.xlu0.b32.cont [9/16] (narrow) %v289_v7, 8 }
  0x3b   : > { %354 = vxpose.xlu1.b32.cont [10/16] (narrow) %v306_v14, 8 }
  0x3c   : > { %322 = vxpose.xlu0.b32.cont [10/16] (narrow) %v290_v15, 8 }
  0x3f   : > { %355 = vxpose.xlu1.b32.cont [11/16] (narrow) %v307_v22, 8 }
  0x40   : > { %323 = vxpose.xlu0.b32.cont [11/16] (narrow) %v291_v23, 8 }
  0x43   : > { %356 = vxpose.xlu1.b32.cont [12/16] (narrow) %v308_v26, 8 }
  0x44   : > { %324 = vxpose.xlu0.b32.cont [12/16] (narrow) %v292_v28, 8 }
  0x47   : > { %357 = vxpose.xlu1.b32.cont [13/16] (narrow) %v309_v34, 8 }
  0x48   : > { %325 = vxpose.xlu0.b32.cont [13/16] (narrow) %v293_v36, 8 }
  0x4b   : > { %358 = vxpose.xlu1.b32.cont [14/16] (narrow) %v310_v42, 8 }
  0x4c   : > { %326 = vxpose.xlu0.b32.cont [14/16] (narrow) %v294_v43, 8 }
  0x4f   : > { %359 = vxpose.xlu1.b32.cont [15/16] (narrow) %v311_v47, 8 }
  0x50   : > { %327 = vxpose.xlu0.b32.cont [15/16] (narrow) %v295_v48, 8 }
  0x53   : > { %360 = vxpose.xlu1.b32.end [16/16] (narrow) %v312_v50, 8 }
  0x54   : > { %328 = vxpose.xlu0.b32.end [16/16] (narrow) %v296_v51, 8 }
  0x97   : > { %v361_v52 = vpop.trf.xlu1 }
  0x98   : > { %v329_v53 = vpop.trf.xlu0  ;;  %378 = vst [vmem:[%s170_s25 + $0x8] sm:$0xff] %v361_v52 }
  0x99   : > { %377 = vst [vmem:[%s170_s25] sm:$0xff] %v329_v53 }
  0x9a PF: > { %s13_s12 = sadd.s32 1, %s542_s12  }
  0x9b   : > { %p10_p4 = scmp.ge.s32.totalorder %s13_s12, 4  }
  0x9d   :  { %12 = sbr.rel (!%p10_p4) target bundleno = 1 (0x1), region = 62 }

// kernel: ru_double_conv.3
= control target key start
LH: loop header
LB: loop body
LE: loop exit
PB: predicated region body
PF: predicated region fallthrough
CT: control target
= control target key end

     0   :  { %s6286_s12 = smov 0   ;;  %s7895_s0 = inlined_call_operand.vmem [shape: bf16[2,18,18,128], index: 0, kind: input, shape index: {}]   ;;  %s7896_s1 = inlined_call_operand.vmem [shape: bf16[1152,128], index: 1, kind: input, shape index: {}]   ;;  %s7897_s2 = inlined_call_operand.vmem [shape: bf16[2,16,16,128], index: 2, kind: output, shape index: {0}]   ;;  %s7898_s3 = inlined_call_operand.vmem [shape: f32[2,2,128], index: 3, kind: output, shape index: {1}]  }
   0x1 LB: > { %s4902_s13 = sadd.s32 4294967295, %s6264_s12   ;;  %p4906_p0 = scmp.ge.s32.totalorder %s6264_s12, 1  ;;  %s6264_s12 = sphi %s6286_s12, %s14_s12  }
   0x2   : > { %p140_p1 = scmp.lt.s32.totalorder %s6264_s12, 3 }
   0x4   : > { %p141_p2 = pnand %p4906_p0, %p140_p1 }
   0x6   : > { %144 = sbr.rel (%p141_p2) target bundleno = 585 (0x249), region = 28 }
   0xd   : > { %v6138_v0 = vld [vmem:[%s7896_s1 + $0x40] sm:$0xff]   ;;  %p168_p3 = scmp.lt.s32.totalorder %s4902_s13, 1  ;;  %v6140_v2 = vld [vmem:[%s7896_s1 + $0x48] sm:$0xff]   ;;  %v6142_v4 = vld [vmem:[%s7896_s1 + $0x50] sm:$0xff]   ;;  %vm375_vm0 = vsmask.f32 3328 }
   0xe   : > { %v6139_v1 = vld [vmem:[%s7896_s1] sm:$0xff]   ;;  %5593 = vmatprep.subr.bf16.mxu0 %v6138_v0  ;;  %6113 = vmatprep.subr.bf16.mxu1 %v6138_v0  ;;  %v6141_v3 = vld [vmem:[%s7896_s1 + $0x8] sm:$0xff]   ;;  %v6143_v5 = vld [vmem:[%s7896_s1 + $0x10] sm:$0xff]   ;;  %vm376_vm1 = vsmask.f32 7440  ;;  %vm938_vm3 = vcmask 1042432  }
   0xf   : > { %5594 = vmatpush3.bf16.msra.mxu0 %v6139_v1  ;;  %6121 = vmatpush3.bf16.msra.mxu1 %v6139_v1  ;;  %s7936_s13 = smov (!%p168_p3, %s4902_s13), 1  ;;  %v6144_v6 = vld [vmem:[%s7896_s1 + $0x58] sm:$0xff]   ;;  %v6146_v8 = vld [vmem:[%s7896_s1 + $0x60] sm:$0xff]   ;;  %v6148_v10 = vld [vmem:[%s7896_s1 + $0x68] sm:$0xff]   ;;  %vm939_vm4 = vcmask 1046532  }
  0x10   : > { %5595 = vmatprep.subr.bf16.mxu0 %v6140_v2  ;;  %6114 = vmatprep.subr.bf16.mxu1 %v6140_v2  ;;  %s6129_s28 = smul.u32 216, %s7936_s13  ;;  %v6145_v7 = vld [vmem:[%s7896_s1 + $0x18] sm:$0xff]   ;;  %v6147_v9 = vld [vmem:[%s7896_s1 + $0x20] sm:$0xff]   ;;  %v6149_v14 = vld [vmem:[%s7896_s1 + $0x28] sm:$0xff]   ;;  %s4910_s20 = sshll.u32 %s7936_s13, 1 }
  0x11   : > { %v6150_v17 = vld [vmem:[%s7896_s1 + $0x70] sm:$0xff]   ;;  %vm6352_vm2 = vmor %vm375_vm0, %vm376_vm1  ;;  %v6152_v43 = vld [vmem:[%s7896_s1 + $0x78] sm:$0xff]   ;;  %s181_s23 = scalar_lea.vmem %s7898_s3, %s4910_s20 }
  0x12   : > { %s6327_s8 = scalar_lea.vmem %s7895_s0, %s6129_s28  ;;  %v6151_v30 = vld [vmem:[%s7896_s1 + $0x30] sm:$0xff]   ;;  %v6153_v49 = vld [vmem:[%s7896_s1 + $0x38] sm:$0xff]   ;;  %v6156_v54 = vld [vmem:[%s7896_s1 + $0xc0] sm:$0xff]  }
  0x13   : > { %5596 = vmatpush3.bf16.msra.mxu0 %v6141_v3  ;;  %6122 = vmatpush3.bf16.msra.mxu1 %v6141_v3  ;;  %v327_v11 = vld [vmem:[%s6327_s8] sm:$0xf]  ;;  %v328_v12 = vld [vmem:[%s6327_s8 + $0x4] sm:$0xf]  ;;  %v329_v13 = vld [vmem:[%s6327_s8 + $0x8] sm:$0x1] }
  0x14   : > { %5597 = vmatprep.subr.bf16.mxu0 %v6142_v4  ;;  %6115 = vmatprep.subr.bf16.mxu1 %v6142_v4  ;;  %v379_v15 = vshrl.u32 %v327_v11, 16  ;;  %v382_v16 = vshll.u32 %v327_v11, 16  ;;  %v388_v18 = vshll.u32 %v328_v12, 16  ;;  %v392_v19 = vshrl.u32 %v328_v12, 16  ;;  %v363_v21 = vld [vmem:[%s6327_s8 + $0x90] sm:$0xf]  ;;  %vm6492_vm5 = vmor %vm938_vm3, %vm939_vm4 }
  0x15   : > { %v398_v20 = vshll.u32 %v329_v13, 16  ;;  %v364_v24 = vld [vmem:[%s6327_s8 + $0x94] sm:$0xf]  ;;  %v365_v25 = vld [vmem:[%s6327_s8 + $0x98] sm:$0x1]  ;;  %v667_v29 = vshrl.u32 %v363_v21, 16 }
  0x16   : > { %v381_v22 = vrot.slane %v379_v15, 4  ;;  %v384_v23 = vrot.slane %v382_v16, 5  ;;  %v390_v26 = vrot.slane %v388_v18, 5  ;;  %v394_v27 = vrot.slane %v392_v19, 4  ;;  %v6157_v55 = vld [vmem:[%s7896_s1 + $0x140] sm:$0xff]   ;;  %v6155_v57 = vld [vmem:[%s6327_s8 + $0x90] sm:$0xff]  }
  0x17   : > { %5598 = vmatpush3.bf16.msra.mxu0 %v6143_v5  ;;  %6123 = vmatpush3.bf16.msra.mxu1 %v6143_v5  ;;  %v400_v28 = vrot.slane %v398_v20, 5  ;;  %v670_v32 = vshll.u32 %v363_v21, 16  ;;  %v676_v33 = vshll.u32 %v364_v24, 16  ;;  %v680_v34 = vshrl.u32 %v364_v24, 16  ;;  %v6154_v56 = vld [vmem:[%s6327_s8] sm:$0xff]   ;;  %v6160_v4 = vld [vmem:[%s7896_s1 + $0xc8] sm:$0xff]  }
  0x18   : > { %5599 = vmatprep.subr.bf16.mxu0 %v6144_v6  ;;  %6116 = vmatprep.subr.bf16.mxu1 %v6144_v6  ;;  %v385_v31 = vor.u32 %v384_v23, %v381_v22  ;;  %v395_v36 = vor.u32 %v394_v27, %v390_v26  ;;  %v669_v37 = vrot.slane %v667_v29, 4  ;;  %v686_v38 = vshll.u32 %v365_v25, 16  ;;  %v6158_v60 = vld [vmem:[%s7896_s1 + $0x80] sm:$0xff]   ;;  %v330_v62 = vld [vmem:[%s6327_s8 + $0xc] sm:$0xf] }
  0x19   : > { %v672_v40 = vrot.slane %v670_v32, 5  ;;  %v678_v41 = vrot.slane %v676_v33, 5  ;;  %v682_v42 = vrot.slane %v680_v34, 4  ;;  %v6159_v61 = vld [vmem:[%s7896_s1 + $0x100] sm:$0xff]   ;;  %v331_v0 = vld [vmem:[%s6327_s8 + $0x10] sm:$0xf] }
  0x1a   : > { %v386_v39 = vrot.slane %v385_v31, 4  ;;  %v396_v44 = vrot.slane %v395_v36, 4  ;;  %v688_v45 = vrot.slane %v686_v38, 5  ;;  %v332_v1 = vld [vmem:[%s6327_s8 + $0x14] sm:$0x1]  ;;  %v403_v2 = vshrl.u32 %v330_v62, 16 }
  0x1b   : > { %5600 = vmatpush3.bf16.msra.mxu0 %v6145_v7  ;;  %6124 = vmatpush3.bf16.msra.mxu1 %v6145_v7  ;;  %v673_v47 = vor.u32 %v672_v40, %v669_v37  ;;  %v683_v48 = vor.u32 %v682_v42, %v678_v41  ;;  %v406_v3 = vshll.u32 %v330_v62, 16  ;;  %v412_v5 = vshll.u32 %v331_v0, 16  ;;  %v367_v11 = vld [vmem:[%s6327_s8 + $0xa0] sm:$0xf]  ;;  %v368_v12 = vld [vmem:[%s6327_s8 + $0xa4] sm:$0x1] }
  0x1c   : > { %5601 = vmatprep.subr.bf16.mxu0 %v6146_v8  ;;  %6117 = vmatprep.subr.bf16.mxu1 %v6146_v8  ;;  %v391_v46 = vsel %vm6352_vm2, %v386_v39, %v390_v26  ;;  %v401_v50 = vsel %vm6352_vm2, %v396_v44, %v400_v28  ;;  %v416_v6 = vshrl.u32 %v331_v0, 16  ;;  %v422_v7 = vshll.u32 %v332_v1, 16  ;;  %v366_v8 = vld [vmem:[%s6327_s8 + $0x9c] sm:$0xf]  ;;  %v6162_v31 = vld [vmem:[%s6327_s8 + $0xc] sm:$0xff]  }
  0x1d   : > { %v4927_v51 = vcombine.low %v391_v46, %v401_v50  ;;  %v674_v52 = vrot.slane %v673_v47, 4  ;;  %v684_v53 = vrot.slane %v683_v48, 4  ;;  %v414_v13 = vrot.slane %v412_v5, 5  ;;  %v6164_v32 = vld [vmem:[%s7896_s1 + $0xd0] sm:$0xff]   ;;  %v6163_v42 = vld [vmem:[%s6327_s8 + $0x9c] sm:$0xff]   ;;  %v6167_v44 = vld [vmem:[%s7896_s1 + $0x148] sm:$0xff]  }
  0x1e   : > { %v424_v15 = vrot.slane %v422_v7, 5  ;;  %v691_v16 = vshrl.u32 %v366_v8, 16  ;;  %v694_v19 = vshll.u32 %v366_v8, 16  ;;  %v700_v20 = vshll.u32 %v367_v11, 16  ;;  %v6165_v38 = vld [vmem:[%s7896_s1 + $0x90] sm:$0xff]   ;;  %v6169_v48 = vld [vmem:[%s7896_s1 + $0x108] sm:$0xff]  }
  0x1f   : > { %5602 = vmatpush3.bf16.msra.mxu0 %v6147_v9  ;;  %6125 = vmatpush3.bf16.msra.mxu1 %v6147_v9  ;;  %v679_v58 = vsel %vm6352_vm2, %v674_v52, %v678_v41  ;;  %v689_v59 = vsel %vm6352_vm2, %v684_v53, %v688_v45  ;;  %v405_v9 = vrot.slane %v403_v2, 4  ;;  %v704_v21 = vshrl.u32 %v367_v11, 16  ;;  %v6168_v45 = vld [vmem:[%s7896_s1 + $0x98] sm:$0xff]   ;;  %v335_v52 = vld [vmem:[%s6327_s8 + $0x20] sm:$0x1] }
  0x20   : > { %5603 = vmatprep.subr.bf16.mxu0 %v6148_v10  ;;  %6118 = vmatprep.subr.bf16.mxu1 %v6148_v10  ;;  %v4939_v63 = vcombine.low %v679_v58, %v689_v59  ;;  %v408_v10 = vrot.slane %v406_v3, 5  ;;  %v693_v23 = vrot.slane %v691_v16, 4  ;;  %v710_v24 = vshll.u32 %v368_v12, 16  ;;  %v369_v58 = vld [vmem:[%s6327_s8 + $0xa8] sm:$0xf]  ;;  %v6170_v16 = vld [vmem:[%s6327_s8 + $0x18] sm:$0xff]  }
  0x21   : > { %3775 = vmatprep.mubr.bf16.mxu0 %v4927_v51  ;;  %v696_v26 = vrot.slane %v694_v19, 5  ;;  %v702_v27 = vrot.slane %v700_v20, 5  ;;  %v706_v28 = vrot.slane %v704_v21, 4  ;;  %v334_v51 = vld [vmem:[%s6327_s8 + $0x1c] sm:$0xf]  ;;  %v715_v2 = vshrl.u32 %v369_v58, 16 }
  0x22   : > { %3871 = vmatprep.mubr.bf16.mxu1 %v4939_v63  ;;  %v409_v18 = vor.u32 %v408_v10, %v405_v9  ;;  %v371_v62 = vld [vmem:[%s6327_s8 + $0xb0] sm:$0x1] }
  0x23   : > { %5604 = vmatpush3.bf16.msra.mxu0 %v6149_v14  ;;  %6126 = vmatpush3.bf16.msra.mxu1 %v6149_v14  ;;  %v418_v14 = vrot.slane %v416_v6, 4  ;;  %v697_v34 = vor.u32 %v696_v26, %v693_v23  ;;  %v707_v36 = vor.u32 %v706_v28, %v702_v27  ;;  %v717_v8 = vrot.slane %v715_v2, 4  ;;  %v6174_v23 = vld [vmem:[%s7896_s1 + $0xe8] sm:$0xff]   ;;  %v6179_v2 = vld [vmem:[%s7896_s1 + $0x150] sm:$0xff]  }
  0x24   : > { %5605 = vmatprep.subr.bf16.mxu0 %v6150_v17  ;;  %6119 = vmatprep.subr.bf16.mxu1 %v6150_v17  ;;  %v6161_v17 = vld [vmem:[%s7896_s1 + $0x88] sm:$0xff]   ;;  %v410_v25 = vrot.slane %v409_v18, 4  ;;  %v734_v9 = vshll.u32 %v371_v62, 16  ;;  %v6173_v18 = vld [vmem:[%s7896_s1 + $0xa0] sm:$0xff]  }
  0x25   : > { %v419_v22 = vor.u32 %v418_v14, %v414_v13  ;;  %v698_v40 = vrot.slane %v697_v34, 4  ;;  %v708_v41 = vrot.slane %v707_v36, 4  ;;  %v6175_v28 = vld [vmem:[%s7896_s1 + $0xa8] sm:$0xff]  }
  0x26   : > { %v415_v33 = vsel %vm6352_vm2, %v410_v25, %v414_v13 }
  0x27   : > { %5606 = vmatpush3.bf16.msra.mxu0 %v6151_v30  ;;  %6127 = vmatpush3.bf16.msra.mxu1 %v6151_v30  ;;  %v420_v29 = vrot.slane %v419_v22, 4  ;;  %v712_v30 = vrot.slane %v710_v24, 5  ;;  %v703_v46 = vsel %vm6352_vm2, %v698_v40, %v702_v27  ;;  %v6171_v27 = vld [vmem:[%s6327_s8 + $0xa8] sm:$0xff]  }
  0x28   : > { %5607 = vmatprep.subr.bf16.mxu0 %v6152_v43  ;;  %6120 = vmatprep.subr.bf16.mxu1 %v6152_v43  ;;  %v6166_v43 = vld [vmem:[%s7896_s1 + $0xd8] sm:$0xff]  }
  0x29   : > { %v425_v37 = vsel %vm6352_vm2, %v420_v29, %v424_v15  ;;  %v713_v47 = vsel %vm6352_vm2, %v708_v41, %v712_v30  ;;  %v736_v15 = vrot.slane %v734_v9, 5  ;;  %v336_v29 = vld [vmem:[%s6327_s8 + $0x24] sm:$0xf]  ;;  %v337_v30 = vld [vmem:[%s6327_s8 + $0x28] sm:$0xf] }
  0x2a   : > { %v4928_v39 = vcombine.low %v415_v33, %v425_v37  ;;  %v4940_v50 = vcombine.low %v703_v46, %v713_v47  ;;  %v451_v34 = vshrl.u32 %v336_v29, 16  ;;  %v454_v36 = vshll.u32 %v336_v29, 16  ;;  %v372_v37 = vld [vmem:[%s6327_s8 + $0xb4] sm:$0xf] }
  0x2b   : > { %5608 = vmatpush3.bf16.msra.mxu0 %v6153_v49  ;;  %6128 = vmatpush3.bf16.msra.mxu1 %v6153_v49  ;;  %v333_v49 = vld [vmem:[%s6327_s8 + $0x18] sm:$0xf]  ;;  %v460_v40 = vshll.u32 %v337_v30, 16  ;;  %v464_v41 = vshrl.u32 %v337_v30, 16  ;;  %v739_v46 = vshrl.u32 %v372_v37, 16  ;;  %v742_v47 = vshll.u32 %v372_v37, 16 }
  0x2c   : > { %5705 = vmatprep.subr.bf16.mxu1 %v6156_v54  ;;  %5817 = vmatprep.subr.bf16.mxu0 %v6157_v55  ;;  %v427_v53 = vshrl.u32 %v333_v49, 16  ;;  %v430_v54 = vshll.u32 %v333_v49, 16  ;;  %v436_v55 = vshll.u32 %v334_v51, 16 }
  0x2d   : > { %v466_v49 = vrot.slane %v464_v41, 4  ;;  %v6186_v41 = vld [vmem:[%s7896_s1 + $0x1c0] sm:$0xff]  }
  0x2e   : > { %3776 = vmatmul.mubr.bf16.vlgmr.msra.gmra.mrb[0].mxu0 %v6154_v56  ;;  %3872 = vmatmul.mubr.bf16.vlgmr.msra.gmra.mrb[0].mxu1 %v6155_v57  ;;  %v440_v56 = vshrl.u32 %v334_v51, 16  ;;  %v446_v57 = vshll.u32 %v335_v52, 16  ;;  %v429_v59 = vrot.slane %v427_v53, 4  ;;  %v438_v63 = vrot.slane %v436_v55, 5 }
  0x2f   : > { %5706 = vmatpush3.bf16.msra.mxu1 %v6158_v60  ;;  %5818 = vmatpush3.bf16.msra.mxu0 %v6159_v61  ;;  %v432_v60 = vrot.slane %v430_v54, 5  ;;  %v370_v61 = vld [vmem:[%s6327_s8 + $0xac] sm:$0xf]  ;;  %v741_v53 = vrot.slane %v739_v46, 4  ;;  %v744_v54 = vrot.slane %v742_v47, 5  ;;  %v6187_v47 = vld [vmem:[%s7896_s1 + $0x180] sm:$0xff]  }
  0x30   : > { %5707 = vmatprep.subr.bf16.mxu1 %v6160_v4  ;;  %3783 = vmatprep.mubr.bf16.mxu0 %v4928_v39  ;;  %v442_v0 = vrot.slane %v440_v56, 4  ;;  %v448_v1 = vrot.slane %v446_v57, 5  ;;  %v718_v4 = vshll.u32 %v369_v58, 16  ;;  %v724_v5 = vshll.u32 %v370_v61, 16  ;;  %v6178_v56 = vld [vmem:[%s7896_s1 + $0xf0] sm:$0xff]  }
  0x31   : > { %5819 = vmatprep.subr.bf16.mxu0 %v6167_v44  ;;  %3879 = vmatprep.mubr.bf16.mxu1 %v4940_v50  ;;  %v433_v3 = vor.u32 %v432_v60, %v429_v59  ;;  %v728_v6 = vshrl.u32 %v370_v61, 16  ;;  %v453_v44 = vrot.slane %v451_v34, 4  ;;  %v745_v61 = vor.u32 %v744_v54, %v741_v53  ;;  %v843_v34 = vld [vmem:[%s6327_s8 + $0x4] sm:$0xf]  ;;  %v342_v53 = vld [vmem:[%s6327_s8 + $0x3c] sm:$0xf] }
  0x32   : > { %v443_v7 = vor.u32 %v442_v0, %v438_v63  ;;  %v720_v11 = vrot.slane %v718_v4, 5  ;;  %v726_v12 = vrot.slane %v724_v5, 5 }
  0x33   : > { %5708 = vmatpush3.bf16.msra.mxu1 %v6161_v17  ;;  %5820 = vmatpush3.bf16.msra.mxu0 %v6169_v48  ;;  %v434_v10 = vrot.slane %v433_v3, 4  ;;  %v730_v13 = vrot.slane %v728_v6, 4  ;;  %v6172_v17 = vld [vmem:[%s7896_s1 + $0xe0] sm:$0xff]   ;;  %v462_v48 = vrot.slane %v460_v40, 5  ;;  %v6180_v3 = vld [vmem:[%s7896_s1 + $0xb0] sm:$0xff]   ;;  %v746_v5 = vrot.slane %v745_v61, 4 }
  0x34   : > { %5709 = vmatprep.subr.bf16.mxu1 %v6164_v32  ;;  %v444_v14 = vrot.slane %v443_v7, 4  ;;  %v721_v20 = vor.u32 %v720_v11, %v717_v8  ;;  %v6181_v7 = vld [vmem:[%s7896_s1 + $0x110] sm:$0xff]   ;;  %5821 = vmatprep.subr.bf16.mxu0 %v6179_v2 }
  0x35   : > { %v439_v19 = vsel %vm6352_vm2, %v434_v10, %v438_v63  ;;  %v731_v21 = vor.u32 %v730_v13, %v726_v12  ;;  %v467_v57 = vor.u32 %v466_v49, %v462_v48  ;;  %v6182_v13 = vld [vmem:[%s7896_s1 + $0xf8] sm:$0xff]  }
  0x36   : > { %3784 = vmatmul.mubr.bf16.gmra.mrb[4].mxu0 %v6162_v31  ;;  %3880 = vmatmul.mubr.bf16.gmra.mrb[4].mxu1 %v6163_v42  ;;  %v449_v22 = vsel %vm6352_vm2, %v444_v14, %v448_v1  ;;  %v722_v25 = vrot.slane %v721_v20, 4  ;;  %v338_v31 = vld [vmem:[%s6327_s8 + $0x2c] sm:$0x1]  ;;  %v6176_v1 = vld [vmem:[%s6327_s8 + $0x24] sm:$0xff]   ;;  %v6183_v14 = vld [vmem:[%s7896_s1 + $0xb8] sm:$0xff]  }
  0x37   : > { %5710 = vmatpush3.bf16.msra.mxu1 %v6165_v38  ;;  %v4929_v24 = vcombine.low %v439_v19, %v449_v22  ;;  %v732_v26 = vrot.slane %v731_v21, 4  ;;  %v373_v38 = vld [vmem:[%s6327_s8 + $0xb8] sm:$0xf]  ;;  %v470_v42 = vshll.u32 %v338_v31, 16  ;;  %v468_v63 = vrot.slane %v467_v57, 4  ;;  %5822 = vmatpush3.bf16.msra.mxu0 %v6181_v7 }
  0x38   : > { %5711 = vmatprep.subr.bf16.mxu1 %v6166_v43  ;;  %v727_v32 = vsel %vm6352_vm2, %v722_v25, %v726_v12  ;;  %v374_v43 = vld [vmem:[%s6327_s8 + $0xbc] sm:$0x1]  ;;  %v748_v51 = vshll.u32 %v373_v38, 16  ;;  %v752_v55 = vshrl.u32 %v373_v38, 16  ;;  %v6177_v12 = vld [vmem:[%s6327_s8 + $0xb4] sm:$0xff]   ;;  %v6184_v25 = vld [vmem:[%s6327_s8 + $0xc] sm:$0xff]  }
  0x39   : > { %3791 = vmatprep.mubr.bf16.mxu0 %v4929_v24  ;;  %v737_v33 = vsel %vm6352_vm2, %v732_v26, %v736_v15  ;;  %v472_v50 = vrot.slane %v470_v42, 5  ;;  %v758_v59 = vshll.u32 %v374_v43, 16  ;;  %v339_v15 = vld [vmem:[%s6327_s8 + $0x30] sm:$0xf]  ;;  %v6188_v49 = vld [vmem:[%s7896_s1 + $0x158] sm:$0xff]  }
  0x3a   : > { %v4941_v39 = vcombine.low %v727_v32, %v737_v33  ;;  %v750_v58 = vrot.slane %v748_v51, 5  ;;  %v754_v62 = vrot.slane %v752_v55, 4  ;;  %v475_v19 = vshrl.u32 %v339_v15, 16  ;;  %v842_v33 = vld [vmem:[%s6327_s8] sm:$0xe]  ;;  %5823 = vmatprep.subr.bf16.mxu0 %v6188_v49 }
  0x3b   : > { %5712 = vmatpush3.bf16.msra.mxu1 %v6168_v45  ;;  %v456_v45 = vrot.slane %v454_v36, 5  ;;  %v760_v0 = vrot.slane %v758_v59, 5  ;;  %v473_v8 = vsel %vm6352_vm2, %v468_v63, %v472_v50  ;;  %v478_v20 = vshll.u32 %v339_v15, 16  ;;  %v844_v36 = vld [vmem:[%s6327_s8 + $0x8] sm:$0x1]  ;;  %v6190_v63 = vld [vmem:[%s6327_s8 + $0x18] sm:$0xff]  }
  0x3c   : > { %5713 = vmatprep.subr.bf16.mxu1 %v6172_v17  ;;  %3887 = vmatprep.mubr.bf16.mxu1 %v4941_v39  ;;  %v755_v6 = vor.u32 %v754_v62, %v750_v58  ;;  %v751_v10 = vsel %vm6352_vm2, %v746_v5, %v750_v58  ;;  %v340_v17 = vld [vmem:[%s6327_s8 + $0x34] sm:$0xf]  ;;  %v477_v26 = vrot.slane %v475_v19, 4  ;;  %v4943_v38 = vrot.slane %v842_v33, 9  ;;  %v344_v57 = vld [vmem:[%s6327_s8 + $0x44] sm:$0x1] }
  0x3d   : > { %v457_v52 = vor.u32 %v456_v45, %v453_v44  ;;  %v484_v22 = vshll.u32 %v340_v17, 16  ;;  %v943_v39 = vrot.slane %v843_v34, 5  ;;  %v946_v40 = vrot.slane %v844_v36, 5  ;;  %v6185_v44 = vld [vmem:[%s6327_s8 + $0x30] sm:$0xff]   ;;  %v346_v15 = vld [vmem:[%s6327_s8 + $0x4c] sm:$0xf] }
  0x3e   : > { %3792 = vmatmul.mubr.bf16.gmra.mrb[8].mxu0 %v6170_v16  ;;  %3888 = vmatmul.mubr.bf16.gmra.mrb[8].mxu1 %v6171_v27  ;;  %v756_v11 = vrot.slane %v755_v6, 4  ;;  %v480_v27 = vrot.slane %v478_v20, 5  ;;  %v499_v58 = vshrl.u32 %v342_v53, 16  ;;  %v502_v59 = vshll.u32 %v342_v53, 16  ;;  %v845_v6 = vld [vmem:[%s6327_s8 + $0xc] sm:$0xe] }
  0x3f   : > { %5714 = vmatpush3.bf16.msra.mxu1 %v6173_v18  ;;  %v458_v60 = vrot.slane %v457_v52, 4  ;;  %v341_v18 = vld [vmem:[%s6327_s8 + $0x38] sm:$0x1]  ;;  %v944_v45 = vsel %vm6492_vm5, %v4943_v38, %v943_v39  ;;  %v945_v46 = vrot.slane %v943_v39, 4  ;;  %v518_v62 = vshll.u32 %v344_v57, 16  ;;  %v6191_v19 = vld [vmem:[%s6327_s8 + $0x3c] sm:$0xff]  }
  0x40   : > { %5715 = vmatprep.subr.bf16.mxu1 %v6174_v23  ;;  %v761_v16 = vsel %vm6352_vm2, %v756_v11, %v760_v0  ;;  %v488_v23 = vshrl.u32 %v340_v17, 16  ;;  %v494_v24 = vshll.u32 %v341_v18, 16  ;;  %v481_v32 = vor.u32 %v480_v27, %v477_v26  ;;  %v6189_v52 = vld [vmem:[%s7896_s1 + $0x118] sm:$0xff]   ;;  %v846_v7 = vld [vmem:[%s6327_s8 + $0x10] sm:$0xf]  ;;  %v6196_v49 = vld [vmem:[%s7896_s1 + $0x120] sm:$0xff]  }
  0x41   : > { %v463_v4 = vsel %vm6352_vm2, %v458_v60, %v462_v48  ;;  %v4942_v21 = vcombine.low %v751_v10, %v761_v16  ;;  %v947_v51 = vsel %vm6492_vm5, %v945_v46, %v946_v40  ;;  %5824 = vmatpush3.bf16.msra.mxu0 %v6189_v52  ;;  %v501_v0 = vrot.slane %v499_v58, 4  ;;  %v347_v16 = vld [vmem:[%s6327_s8 + $0x50] sm:$0x1]  ;;  %v848_v39 = vld [vmem:[%s6327_s8 + $0x18] sm:$0xe]  ;;  %v6195_v46 = vld [vmem:[%s7896_s1 + $0x1c8] sm:$0xff]  }
  0x42   : > { %v4930_v9 = vcombine.low %v463_v4, %v473_v8  ;;  %v490_v29 = vrot.slane %v488_v23, 4  ;;  %v496_v30 = vrot.slane %v494_v24, 5  ;;  %v482_v42 = vrot.slane %v481_v32, 4  ;;  %v847_v8 = vld [vmem:[%s6327_s8 + $0x14] sm:$0x1]  ;;  %v6192_v23 = vld [vmem:[%s6327_s8 + $0x24] sm:$0xff]  }
  0x43   : > { %5716 = vmatpush3.bf16.msra.mxu1 %v6175_v28  ;;  %3895 = vmatprep.mubr.bf16.mxu1 %v4942_v21  ;;  %v486_v28 = vrot.slane %v484_v22, 5  ;;  %v4959_v55 = vcombine.low %v944_v45, %v947_v51  ;;  %v520_v4 = vrot.slane %v518_v62, 5  ;;  %v4944_v10 = vrot.slane %v845_v6, 9  ;;  %v849_v40 = vld [vmem:[%s6327_s8 + $0x1c] sm:$0xf] }
  0x44   : > { %5717 = vmatprep.subr.bf16.mxu1 %v6178_v56  ;;  %3799 = vmatprep.mubr.bf16.mxu0 %v4930_v9  ;;  %v343_v56 = vld [vmem:[%s6327_s8 + $0x40] sm:$0xf]  ;;  %v950_v11 = vrot.slane %v846_v7, 5  ;;  %v532_v26 = vshll.u32 %v346_v15, 16  ;;  %v536_v27 = vshrl.u32 %v346_v15, 16  ;;  %v542_v33 = vshll.u32 %v347_v16, 16 }
  0x45   : > { %v491_v37 = vor.u32 %v490_v29, %v486_v28  ;;  %v487_v48 = vsel %vm6352_vm2, %v482_v42, %v486_v28  ;;  %v508_v60 = vshll.u32 %v343_v56, 16  ;;  %v512_v61 = vshrl.u32 %v343_v56, 16  ;;  %v6194_v28 = vld [vmem:[%s7896_s1 + $0x160] sm:$0xff]   ;;  %v6193_v56 = vld [vmem:[%s6327_s8 + $0x48] sm:$0xff]   ;;  %v348_v58 = vld [vmem:[%s6327_s8 + $0x54] sm:$0xf] }
  0x46   : > { %3800 = vmatmul.mubr.bf16.gmra.mrb[12].mxu0 %v6176_v1  ;;  %3896 = vmatmul.mubr.bf16.gmra.mrb[12].mxu1 %v6177_v12  ;;  %v504_v1 = vrot.slane %v502_v59, 5  ;;  %v953_v12 = vrot.slane %v847_v8, 5  ;;  %v951_v20 = vsel %vm6492_vm5, %v4944_v10, %v950_v11  ;;  %v952_v21 = vrot.slane %v950_v11, 4  ;;  %v350_v62 = vld [vmem:[%s6327_s8 + $0x5c] sm:$0x1] }
  0x47   : > { %5718 = vmatpush3.bf16.msra.mxu1 %v6180_v3  ;;  %3936 = vmatprep.mubr.bf16.mxu1 %v6184_v25  ;;  %v492_v43 = vrot.slane %v491_v37, 4  ;;  %v510_v2 = vrot.slane %v508_v60, 5  ;;  %v514_v3 = vrot.slane %v512_v61, 4  ;;  %v534_v37 = vrot.slane %v532_v26, 5  ;;  %v349_v61 = vld [vmem:[%s6327_s8 + $0x58] sm:$0xf] }
  0x48   : > { %5719 = vmatprep.subr.bf16.mxu1 %v6182_v13  ;;  %v505_v5 = vor.u32 %v504_v1, %v501_v0  ;;  %v345_v13 = vld [vmem:[%s6327_s8 + $0x48] sm:$0xf]  ;;  %v538_v38 = vrot.slane %v536_v27, 4  ;;  %5825 = vmatprep.subr.bf16.mxu0 %v6194_v28  ;;  %v544_v42 = vrot.slane %v542_v33, 5  ;;  %v957_v45 = vrot.slane %v849_v40, 5 }
  0x49   : > { %v497_v50 = vsel %vm6352_vm2, %v492_v43, %v496_v30  ;;  %v515_v9 = vor.u32 %v514_v3, %v510_v2  ;;  %v523_v17 = vshrl.u32 %v345_v13, 16  ;;  %v526_v22 = vshll.u32 %v345_v13, 16  ;;  %v850_v43 = vld [vmem:[%s6327_s8 + $0x20] sm:$0x1]  ;;  %5826 = vmatpush3.bf16.msra.mxu0 %v6196_v49  ;;  %v852_v13 = vld [vmem:[%s6327_s8 + $0x28] sm:$0xf] }
  0x4a   : > { %v4931_v54 = vcombine.low %v487_v48, %v497_v50  ;;  %v954_v30 = vsel %vm6492_vm5, %v952_v21, %v953_v12  ;;  %v960_v48 = vrot.slane %v850_v43, 5  ;;  %v959_v52 = vrot.slane %v957_v45, 4  ;;  %v851_v12 = vld [vmem:[%s6327_s8 + $0x24] sm:$0xe]  ;;  %v6201_v21 = vld [vmem:[%s7896_s1 + $0x128] sm:$0xff]  }
  0x4b   : > { %5720 = vmatpush3.bf16.msra.mxu1 %v6183_v14  ;;  %v506_v14 = vrot.slane %v505_v5, 4  ;;  %v516_v18 = vrot.slane %v515_v9, 4  ;;  %v525_v25 = vrot.slane %v523_v17, 4  ;;  %v528_v32 = vrot.slane %v526_v22, 5  ;;  %v6198_v5 = vld [vmem:[%s6327_s8 + $0x30] sm:$0xff]  }
  0x4c   : > { %5929 = vmatprep.subr.bf16.mxu1 %v6186_v41  ;;  %3807 = vmatprep.mubr.bf16.mxu0 %v4931_v54  ;;  %v4960_v36 = vcombine.low %v951_v20, %v954_v30  ;;  %v6197_v54 = vld [vmem:[%s7896_s1 + $0x188] sm:$0xff]   ;;  %v961_v57 = vsel %vm6492_vm5, %v959_v52, %v960_v48  ;;  %v550_v0 = vshll.u32 %v348_v58, 16  ;;  %v560_v3 = vshrl.u32 %v349_v61, 16  ;;  %v351_v26 = vld [vmem:[%s6327_s8 + $0x60] sm:$0xf] }
  0x4d   : > { %v511_v24 = vsel %vm6352_vm2, %v506_v14, %v510_v2  ;;  %v521_v29 = vsel %vm6352_vm2, %v516_v18, %v520_v4  ;;  %v529_v41 = vor.u32 %v528_v32, %v525_v25  ;;  %v556_v2 = vshll.u32 %v349_v61, 16  ;;  %v853_v14 = vld [vmem:[%s6327_s8 + $0x2c] sm:$0x1]  ;;  %v352_v28 = vld [vmem:[%s6327_s8 + $0x64] sm:$0xf] }
  0x4e   : > { %3937 = vmatmul.mubr.bf16.vlgmr.msra.gmra.mrb[16].mxu1 %v4959_v55  ;;  %3808 = vmatmul.mubr.bf16.gmra.mrb[16].mxu0 %v6185_v44  ;;  %v4932_v34 = vcombine.low %v511_v24, %v521_v29  ;;  %v4945_v44 = vrot.slane %v848_v39, 9  ;;  %v566_v4 = vshll.u32 %v350_v62, 16  ;;  %v552_v7 = vrot.slane %v550_v0, 5  ;;  %v353_v29 = vld [vmem:[%s6327_s8 + $0x68] sm:$0x1] }
  0x4f   : > { %5930 = vmatpush3.bf16.msra.mxu1 %v6187_v47  ;;  %3944 = vmatprep.mubr.bf16.mxu1 %v6190_v63  ;;  %v539_v47 = vor.u32 %v538_v38, %v534_v37  ;;  %v530_v50 = vrot.slane %v529_v41, 4  ;;  %v547_v63 = vshrl.u32 %v348_v58, 16  ;;  %v558_v8 = vrot.slane %v556_v2, 5  ;;  %v854_v48 = vld [vmem:[%s6327_s8 + $0x30] sm:$0xe] }
  0x50   : > { %3815 = vmatprep.mubr.bf16.mxu0 %v4932_v34  ;;  %v958_v51 = vsel %vm6492_vm5, %v4945_v44, %v957_v45  ;;  %5931 = vmatprep.subr.bf16.mxu1 %v6195_v46  ;;  %v562_v9 = vrot.slane %v560_v3, 4  ;;  %v568_v10 = vrot.slane %v566_v4, 5  ;;  %v4946_v16 = vrot.slane %v851_v12, 9  ;;  %v6204_v46 = vld [vmem:[%s7896_s1 + $0x1d0] sm:$0xff]   ;;  %v354_v62 = vld [vmem:[%s6327_s8 + $0x6c] sm:$0xf] }
  0x51   : > { %v540_v53 = vrot.slane %v539_v47, 4  ;;  %v535_v55 = vsel %vm6352_vm2, %v530_v50, %v534_v37  ;;  %v4961_v60 = vcombine.low %v958_v51, %v961_v57  ;;  %v549_v6 = vrot.slane %v547_v63, 4  ;;  %v855_v49 = vld [vmem:[%s6327_s8 + $0x34] sm:$0xf]  ;;  %v856_v50 = vld [vmem:[%s6327_s8 + $0x38] sm:$0x1] }
  0x52   : > { %v563_v15 = vor.u32 %v562_v9, %v558_v8  ;;  %v964_v17 = vrot.slane %v852_v13, 5  ;;  %v967_v18 = vrot.slane %v853_v14, 5  ;;  %v571_v30 = vshrl.u32 %v351_v26, 16  ;;  %v355_v0 = vld [vmem:[%s6327_s8 + $0x70] sm:$0xf]  ;;  %v6206_v12 = vld [vmem:[%s6327_s8 + $0x48] sm:$0xff]  }
  0x53   : > { %v545_v59 = vsel %vm6352_vm2, %v540_v53, %v544_v42  ;;  %5932 = vmatpush3.bf16.msra.mxu1 %v6197_v54  ;;  %v553_v11 = vor.u32 %v552_v7, %v549_v6  ;;  %v574_v32 = vshll.u32 %v351_v26, 16  ;;  %v584_v37 = vshrl.u32 %v352_v28, 16  ;;  %v6202_v42 = vld [vmem:[%s6327_s8 + $0x3c] sm:$0xff]  }
  0x54   : > { %v4933_v1 = vcombine.low %v535_v55, %v545_v59  ;;  %v564_v22 = vrot.slane %v563_v15, 4  ;;  %v965_v24 = vsel %vm6492_vm5, %v4946_v16, %v964_v17  ;;  %v966_v25 = vrot.slane %v964_v17, 4  ;;  %v6205_v55 = vld [vmem:[%s7896_s1 + $0x190] sm:$0xff]   ;;  %5933 = vmatprep.subr.bf16.mxu1 %v6204_v46  ;;  %v6203_v59 = vld [vmem:[%s6327_s8 + $0x60] sm:$0xff]  }
  0x55   : > { %v554_v20 = vrot.slane %v553_v11, 4  ;;  %v573_v40 = vrot.slane %v571_v30, 4  ;;  %v576_v41 = vrot.slane %v574_v32, 5  ;;  %v586_v44 = vrot.slane %v584_v37, 4  ;;  %v6208_v16 = vld [vmem:[%s7896_s1 + $0x170] sm:$0xff]  }
  0x56   : > { %3945 = vmatmul.mubr.bf16.gmra.mrb[20].mxu1 %v4960_v36  ;;  %3816 = vmatmul.mubr.bf16.gmra.mrb[20].mxu0 %v6191_v19  ;;  %v6200_v19 = vld [vmem:[%s7896_s1 + $0x168] sm:$0xff]   ;;  %v569_v33 = vsel %vm6352_vm2, %v564_v22, %v568_v10  ;;  %v968_v34 = vsel %vm6492_vm5, %v966_v25, %v967_v18  ;;  %v580_v36 = vshll.u32 %v352_v28, 16  ;;  %v590_v45 = vshll.u32 %v353_v29, 16  ;;  %v857_v18 = vld [vmem:[%s6327_s8 + $0x3c] sm:$0xe]  ;;  %v6209_v25 = vld [vmem:[%s7896_s1 + $0x130] sm:$0xff]  }
  0x57   : > { %3952 = vmatprep.mubr.bf16.mxu1 %v6192_v23  ;;  %3823 = vmatprep.mubr.bf16.mxu0 %v4933_v1  ;;  %v6199_v23 = vld [vmem:[%s6327_s8 + $0x54] sm:$0xff]   ;;  %v559_v27 = vsel %vm6352_vm2, %v554_v20, %v558_v8  ;;  %v4962_v39 = vcombine.low %v965_v24, %v968_v34  ;;  %v577_v47 = vor.u32 %v576_v41, %v573_v40  ;;  %v4947_v53 = vrot.slane %v854_v48, 9  ;;  %v859_v20 = vld [vmem:[%s6327_s8 + $0x44] sm:$0x1]  ;;  %v6207_v29 = vld [vmem:[%s6327_s8 + $0x6c] sm:$0xff]  }
  0x58   : > { %5827 = vmatprep.subr.bf16.mxu0 %v6200_v19  ;;  %v4934_v38 = vcombine.low %v559_v27, %v569_v33  ;;  %v582_v43 = vrot.slane %v580_v36, 5  ;;  %v592_v52 = vrot.slane %v590_v45, 5  ;;  %v971_v54 = vrot.slane %v855_v49, 5  ;;  %5934 = vmatpush3.bf16.msra.mxu1 %v6205_v55  ;;  %v356_v1 = vld [vmem:[%s6327_s8 + $0x74] sm:$0x1] }
  0x59   : > { %5828 = vmatpush3.bf16.msra.mxu0 %v6201_v21  ;;  %v974_v57 = vrot.slane %v856_v50, 5  ;;  %v595_v2 = vshrl.u32 %v354_v62, 16  ;;  %v598_v3 = vshll.u32 %v354_v62, 16  ;;  %v604_v6 = vshll.u32 %v355_v0, 16  ;;  %v858_v19 = vld [vmem:[%s6327_s8 + $0x40] sm:$0xf] }
  0x5a   : > { %v587_v51 = vor.u32 %v586_v44, %v582_v43  ;;  %v973_v61 = vrot.slane %v971_v54, 4  ;;  %v608_v7 = vshrl.u32 %v355_v0, 16  ;;  %v614_v15 = vshll.u32 %v356_v1, 16  ;;  %5829 = vmatprep.subr.bf16.mxu0 %v6208_v16  ;;  %v357_v33 = vld [vmem:[%s6327_s8 + $0x78] sm:$0xf] }
  0x5b   : > { %v597_v10 = vrot.slane %v595_v2, 4  ;;  %v600_v11 = vrot.slane %v598_v3, 5  ;;  %v606_v13 = vrot.slane %v604_v6, 5  ;;  %v978_v24 = vrot.slane %v858_v19, 5  ;;  %v358_v36 = vld [vmem:[%s6327_s8 + $0x7c] sm:$0xf] }
  0x5c   : > { %v588_v58 = vrot.slane %v587_v51, 4  ;;  %v610_v14 = vrot.slane %v608_v7, 4  ;;  %v616_v22 = vrot.slane %v614_v15, 5  ;;  %v981_v27 = vrot.slane %v859_v20, 5  ;;  %v359_v37 = vld [vmem:[%s6327_s8 + $0x80] sm:$0x1] }
  0x5d   : > { %v601_v17 = vor.u32 %v600_v11, %v597_v10  ;;  %v980_v32 = vrot.slane %v978_v24, 4  ;;  %5830 = vmatpush3.bf16.msra.mxu0 %v6209_v25  ;;  %v6210_v48 = vld [vmem:[%s6327_s8 + $0x54] sm:$0xff]   ;;  %v638_v51 = vshll.u32 %v359_v37, 16  ;;  %v861_v55 = vld [vmem:[%s6327_s8 + $0x4c] sm:$0xf]  ;;  %v6216_v19 = vld [vmem:[%s6327_s8 + $0x60] sm:$0xff]  }
  0x5e   : > { %3953 = vmatmul.mubr.bf16.gmra.mrb[24].mxu1 %v4961_v60  ;;  %3824 = vmatmul.mubr.bf16.gmra.mrb[24].mxu0 %v6193_v56  ;;  %v578_v56 = vrot.slane %v577_v47, 4  ;;  %v972_v60 = vsel %vm6492_vm5, %v4947_v53, %v971_v54  ;;  %v593_v4 = vsel %vm6352_vm2, %v588_v58, %v592_v52  ;;  %v611_v21 = vor.u32 %v610_v14, %v606_v13  ;;  %v6212_v52 = vld [vmem:[%s7896_s1 + $0x1d8] sm:$0xff]   ;;  %v860_v54 = vld [vmem:[%s6327_s8 + $0x48] sm:$0xe]  ;;  %v6219_v37 = vld [vmem:[%s7896_s1 + $0x1e0] sm:$0xff]  }
  0x5f   : > { %3960 = vmatprep.mubr.bf16.mxu1 %v6198_v5  ;;  %3831 = vmatprep.mubr.bf16.mxu0 %v4934_v38  ;;  %v975_v5 = vsel %vm6492_vm5, %v973_v61, %v974_v57  ;;  %v602_v26 = vrot.slane %v601_v17, 4  ;;  %v619_v38 = vshrl.u32 %v357_v33, 16  ;;  %v982_v41 = vsel %vm6492_vm5, %v980_v32, %v981_v27  ;;  %v6213_v61 = vld [vmem:[%s7896_s1 + $0x198] sm:$0xff]  }
  0x60   : > { %v583_v63 = vsel %vm6352_vm2, %v578_v56, %v582_v43  ;;  %v4963_v9 = vcombine.low %v972_v60, %v975_v5  ;;  %v612_v28 = vrot.slane %v611_v21, 4  ;;  %v632_v43 = vshrl.u32 %v358_v36, 16  ;;  %v862_v56 = vld [vmem:[%s6327_s8 + $0x50] sm:$0x1]  ;;  %5935 = vmatprep.subr.bf16.mxu1 %v6212_v52  ;;  %v6211_v1 = vld [vmem:[%s6327_s8 + $0x78] sm:$0xff]  }
  0x61   : > { %v4935_v8 = vcombine.low %v583_v63, %v593_v4  ;;  %v607_v34 = vsel %vm6352_vm2, %v602_v26, %v606_v13  ;;  %v621_v46 = vrot.slane %v619_v38, 4  ;;  %v640_v58 = vrot.slane %v638_v51, 5  ;;  %5936 = vmatpush3.bf16.msra.mxu1 %v6213_v61  ;;  %v6214_v5 = vld [vmem:[%s7896_s1 + $0x178] sm:$0xff]   ;;  %v362_v13 = vld [vmem:[%s6327_s8 + $0x8c] sm:$0x1] }
  0x62   : > { %v617_v40 = vsel %vm6352_vm2, %v612_v28, %v616_v22  ;;  %v634_v50 = vrot.slane %v632_v43, 4  ;;  %v985_v60 = vrot.slane %v861_v55, 5  ;;  %v988_v63 = vrot.slane %v862_v56, 5  ;;  %5831 = vmatprep.subr.bf16.mxu0 %v6214_v5  ;;  %v863_v26 = vld [vmem:[%s6327_s8 + $0x54] sm:$0xe]  ;;  %5937 = vmatprep.subr.bf16.mxu1 %v6219_v37  ;;  %v6221_v56 = vld [vmem:[%s7896_s1 + $0x1a0] sm:$0xff]  }
  0x63   : > { %v4936_v44 = vcombine.low %v607_v34, %v617_v40  ;;  %v864_v27 = vld [vmem:[%s6327_s8 + $0x58] sm:$0xf]  ;;  %v865_v28 = vld [vmem:[%s6327_s8 + $0x5c] sm:$0x1]  ;;  %v5088_v43 = vld [vmem:[%s6327_s8 + $0x10] sm:$0xf] }
  0x64   : > { %v987_v3 = vrot.slane %v985_v60, 4  ;;  %v992_v32 = vrot.slane %v864_v27, 5  ;;  %v5023_v61 = vld [vmem:[%s6327_s8 + $0xc] sm:$0xf] }
  0x65   : > { %5938 = vmatpush3.bf16.msra.mxu1 %v6221_v56  ;;  %v6225_v56 = vld [vmem:[%s7896_s1 + $0x208] sm:$0xff]  }
  0x66   : > { %3961 = vmatmul.mubr.bf16.gmra.mrb[28].mxu1 %v4962_v39  ;;  %3832 = vmatmul.mubr.bf16.gmra.mrb[28].mxu0 %v6199_v23  ;;  %v4948_v23 = vrot.slane %v857_v18, 9  ;;  %v622_v39 = vshll.u32 %v357_v33, 16  ;;  %v989_v7 = vsel %vm6492_vm5, %v987_v3, %v988_v63  ;;  %v662_v18 = vshll.u32 %v362_v13, 16 }
  0x67   : > { %3968 = vmatprep.mubr.bf16.mxu1 %v6202_v42  ;;  %3839 = vmatprep.mubr.bf16.mxu0 %v4935_v8  ;;  %v628_v42 = vshll.u32 %v358_v36, 16  ;;  %v6215_v8 = vld [vmem:[%s7896_s1 + $0x138] sm:$0xff]   ;;  %v995_v33 = vrot.slane %v865_v28, 5  ;;  %v5087_v36 = vld [vmem:[%s6327_s8 + $0xc] sm:$0xe]  ;;  %v1330_v3 = vshll.u32 %v5023_v61, 16 }
  0x68   : > { %v979_v30 = vsel %vm6492_vm5, %v4948_v23, %v978_v24  ;;  %v624_v47 = vrot.slane %v622_v39, 5  ;;  %5832 = vmatpush3.bf16.msra.mxu0 %v6215_v8  ;;  %v664_v24 = vrot.slane %v662_v18, 5  ;;  %v6217_v39 = vld [vmem:[%s6327_s8 + $0x84] sm:$0xff]  }
  0x69   : > { %v4964_v45 = vcombine.low %v979_v30, %v982_v41  ;;  %v630_v49 = vrot.slane %v628_v42, 5  ;;  %v4950_v30 = vrot.slane %v863_v26, 9  ;;  %v994_v41 = vrot.slane %v992_v32, 4  ;;  %v6218_v42 = vld [vmem:[%s6327_s8 + $0x6c] sm:$0xff]  }
  0x6a   : > { %v625_v53 = vor.u32 %v624_v47, %v621_v46  ;;  %v5135_v46 = vrot.slane %v5087_v36, 9  ;;  %v1888_v47 = vrot.slane %v5088_v43, 5  ;;  %v869_v26 = vld [vmem:[%s6327_s8 + $0x6c] sm:$0xe]  ;;  %v871_v36 = vld [vmem:[%s6327_s8 + $0x74] sm:$0x1] }
  0x6b   : > { %v635_v57 = vor.u32 %v634_v50, %v630_v49  ;;  %v993_v40 = vsel %vm6492_vm5, %v4950_v30, %v992_v32  ;;  %v6681_v50 = vld [vmem:[%s7896_s1 + $0x200] sm:$0xff]   ;;  %v996_v52 = vsel %vm6492_vm5, %v994_v41, %v995_v33  ;;  %v870_v30 = vld [vmem:[%s6327_s8 + $0x70] sm:$0xf]  ;;  %v4952_v32 = vrot.slane %v869_v26, 9 }
  0x6c   : > { %v626_v62 = vrot.slane %v625_v53, 4  ;;  %v867_v53 = vld [vmem:[%s6327_s8 + $0x64] sm:$0xf]  ;;  %6065 = vmatprep.subr.bf16.mxu0 %v6681_v50  ;;  %v1006_v37 = vrot.slane %v870_v30, 5  ;;  %v1009_v41 = vrot.slane %v871_v36, 5 }
  0x6d   : > { %v636_v0 = vrot.slane %v635_v57, 4  ;;  %v999_v63 = vrot.slane %v867_v53, 5  ;;  %v5028_v43 = vld [vmem:[%s6327_s8 + $0x20] sm:$0x1] }
  0x6e   : > { %3969 = vmatmul.mubr.bf16.gmra.mrb[32].mxu1 %v4963_v9  ;;  %3840 = vmatmul.mubr.bf16.gmra.mrb[32].mxu0 %v6203_v59  ;;  %v4949_v59 = vrot.slane %v860_v54, 9  ;;  %v631_v4 = vsel %vm6352_vm2, %v626_v62, %v630_v49  ;;  %v360_v9 = vld [vmem:[%s6327_s8 + $0x84] sm:$0xf]  ;;  %v866_v49 = vld [vmem:[%s6327_s8 + $0x60] sm:$0xe] }
  0x6f   : > { %3976 = vmatprep.mubr.bf16.mxu1 %v6206_v12  ;;  %3847 = vmatprep.mubr.bf16.mxu0 %v4936_v44  ;;  %v641_v6 = vsel %vm6352_vm2, %v636_v0, %v640_v58  ;;  %v361_v12 = vld [vmem:[%s6327_s8 + $0x88] sm:$0xf]  ;;  %v643_v14 = vshrl.u32 %v360_v9, 16  ;;  %v646_v15 = vshll.u32 %v360_v9, 16  ;;  %v5089_v44 = vld [vmem:[%s6327_s8 + $0x14] sm:$0x1]  ;;  %v4966_v58 = vcombine.low %v993_v40, %v996_v52 }
  0x70   : > { %v986_v2 = vsel %vm6492_vm5, %v4949_v59, %v985_v60  ;;  %v4937_v10 = vcombine.low %v631_v4, %v641_v6  ;;  %v652_v16 = vshll.u32 %v361_v12, 16  ;;  %v656_v17 = vshrl.u32 %v361_v12, 16  ;;  %v868_v54 = vld [vmem:[%s6327_s8 + $0x68] sm:$0x1]  ;;  %v5024_v62 = vld [vmem:[%s6327_s8 + $0x10] sm:$0xf] }
  0x71   : > { %v4965_v11 = vcombine.low %v986_v2, %v989_v7  ;;  %v645_v20 = vrot.slane %v643_v14, 4  ;;  %v648_v21 = vrot.slane %v646_v15, 5  ;;  %v4951_v55 = vrot.slane %v866_v49, 9  ;;  %v6224_v49 = vld [vmem:[%s7896_s1 + $0x1e8] sm:$0xff]  }
  0x72   : > { %v654_v22 = vrot.slane %v652_v16, 5  ;;  %v658_v23 = vrot.slane %v656_v17, 4  ;;  %v1889_v59 = vsel %vm6492_vm5, %v5135_v46, %v1888_v47  ;;  %v1890_v60 = vrot.slane %v1888_v47, 4  ;;  %v6222_v17 = vld [vmem:[%s6327_s8 + $0x78] sm:$0xff]   ;;  %5939 = vmatprep.subr.bf16.mxu1 %v6224_v49 }
  0x73   : > { %v649_v25 = vor.u32 %v648_v21, %v645_v20  ;;  %v1002_v0 = vrot.slane %v868_v54, 5  ;;  %v1327_v2 = vshrl.u32 %v5023_v61, 16  ;;  %v1336_v5 = vshll.u32 %v5024_v62, 16  ;;  %v5090_v21 = vld [vmem:[%s6327_s8 + $0x18] sm:$0xe] }
  0x74   : > { %v1340_v6 = vshrl.u32 %v5024_v62, 16  ;;  %v1000_v9 = vsel %vm6492_vm5, %v4951_v55, %v999_v63  ;;  %v1332_v12 = vrot.slane %v1330_v3, 5  ;;  %v1007_v47 = vsel %vm6492_vm5, %v4952_v32, %v1006_v37  ;;  %v5093_v55 = vld [vmem:[%s6327_s8 + $0x24] sm:$0xe]  ;;  %v5094_v61 = vld [vmem:[%s6327_s8 + $0x28] sm:$0xf] }
  0x75   : > { %v650_v34 = vrot.slane %v649_v25, 4  ;;  %v1338_v13 = vrot.slane %v1336_v5, 5  ;;  %v5095_v62 = vld [vmem:[%s6327_s8 + $0x2c] sm:$0x1]  ;;  %v872_v3 = vld [vmem:[%s6327_s8 + $0x78] sm:$0xe] }
  0x76   : > { %3977 = vmatmul.mubr.bf16.gmra.mrb[36].mxu1 %v4964_v45  ;;  %3848 = vmatmul.mubr.bf16.gmra.mrb[36].mxu0 %v6207_v29  ;;  %v659_v29 = vor.u32 %v658_v23, %v654_v22  ;;  %v1342_v14 = vrot.slane %v1340_v6, 4  ;;  %v5092_v23 = vld [vmem:[%s6327_s8 + $0x20] sm:$0x1]  ;;  %v6229_v32 = vld [vmem:[%s7896_s1 + $0x1f0] sm:$0xff]  }
  0x77   : > { %3984 = vmatprep.mubr.bf16.mxu1 %v6210_v48  ;;  %3855 = vmatprep.mubr.bf16.mxu0 %v4937_v10  ;;  %v655_v45 = vsel %vm6352_vm2, %v650_v34, %v654_v22  ;;  %v1891_v48 = vrot.slane %v5089_v44, 5  ;;  %v1001_v10 = vrot.slane %v999_v63, 4  ;;  %v5091_v22 = vld [vmem:[%s6327_s8 + $0x1c] sm:$0xf] }
  0x78   : > { %v660_v38 = vrot.slane %v659_v29, 4  ;;  %v1343_v20 = vor.u32 %v1342_v14, %v1338_v13  ;;  %v1895_v25 = vrot.slane %v5091_v22, 5  ;;  %v1898_v29 = vrot.slane %v5092_v23, 5 }
  0x79   : > { %v1892_v4 = vsel %vm6492_vm5, %v1890_v60, %v1891_v48  ;;  %v1003_v16 = vsel %vm6492_vm5, %v1001_v10, %v1002_v0  ;;  %v1008_v48 = vrot.slane %v1006_v37, 4  ;;  %v6223_v60 = vld [vmem:[%s6327_s8 + $0x84] sm:$0xff]   ;;  %v874_v10 = vld [vmem:[%s6327_s8 + $0x80] sm:$0x1] }
  0x7a   : > { %v665_v51 = vsel %vm6352_vm2, %v660_v38, %v664_v24  ;;  %v5151_v8 = vcombine.low %v1889_v59, %v1892_v4  ;;  %v4967_v18 = vcombine.low %v1000_v9, %v1003_v16  ;;  %v5136_v24 = vrot.slane %v5090_v21, 9  ;;  %v5026_v38 = vld [vmem:[%s6327_s8 + $0x18] sm:$0xf]  ;;  %v6226_v4 = vld [vmem:[%s7896_s1 + $0x1a8] sm:$0xff]   ;;  %v873_v9 = vld [vmem:[%s6327_s8 + $0x7c] sm:$0xf] }
  0x7b   : > { %v4938_v57 = vcombine.low %v655_v45, %v665_v51  ;;  %v1344_v28 = vrot.slane %v1343_v20, 4  ;;  %v1897_v34 = vrot.slane %v1895_v25, 4  ;;  %v1351_v44 = vshrl.u32 %v5026_v38, 16  ;;  %5940 = vmatpush3.bf16.msra.mxu1 %v6226_v4  ;;  %v6230_v4 = vld [vmem:[%s7896_s1 + $0x210] sm:$0xff]  }
  0x7c   : > { %v1896_v33 = vsel %vm6492_vm5, %v5136_v24, %v1895_v25  ;;  %v1354_v53 = vshll.u32 %v5026_v38, 16  ;;  %v1370_v59 = vshll.u32 %v5028_v43, 16  ;;  %v6227_v38 = vld [vmem:[%s6327_s8 + $0x90] sm:$0xff]   ;;  %5941 = vmatprep.subr.bf16.mxu1 %v6229_v32  ;;  %v880_v32 = vld [vmem:[%s6327_s8 + $0x98] sm:$0x1] }
  0x7d   : > { %v1899_v46 = vsel %vm6492_vm5, %v1897_v34, %v1898_v29  ;;  %v1353_v52 = vrot.slane %v1351_v44, 4  ;;  %v5096_v44 = vld [vmem:[%s6327_s8 + $0x30] sm:$0xe] }
  0x7e   : > { %3985 = vmatmul.mubr.bf16.gmra.mrb[40].mxu1 %v4965_v11  ;;  %3856 = vmatmul.mubr.bf16.gmra.mrb[40].mxu0 %v6211_v1  ;;  %v5025_v1 = vld [vmem:[%s6327_s8 + $0x14] sm:$0x1]  ;;  %v1329_v11 = vrot.slane %v1327_v2, 4  ;;  %v5152_v51 = vcombine.low %v1896_v33, %v1899_v46  ;;  %v1356_v0 = vrot.slane %v1354_v53, 5  ;;  %v5137_v2 = vrot.slane %v5093_v55, 9 }
  0x7f   : > { %3992 = vmatprep.mubr.bf16.mxu1 %v6216_v19  ;;  %3863 = vmatprep.mubr.bf16.mxu0 %v4938_v57  ;;  %v1346_v7 = vshll.u32 %v5025_v1, 16  ;;  %v1010_v57 = vsel %vm6492_vm5, %v1008_v48, %v1009_v41  ;;  %v1372_v6 = vrot.slane %v1370_v59, 5  ;;  %v5098_v46 = vld [vmem:[%s6327_s8 + $0x38] sm:$0x1]  ;;  %v5138_v49 = vrot.slane %v5096_v44, 9 }
  0x80   : > { %v1333_v19 = vor.u32 %v1332_v12, %v1329_v11  ;;  %v4968_v63 = vcombine.low %v1007_v47, %v1010_v57  ;;  %v4953_v11 = vrot.slane %v872_v3, 9  ;;  %v1013_v12 = vrot.slane %v873_v9, 5  ;;  %v876_v55 = vld [vmem:[%s6327_s8 + $0x88] sm:$0xf]  ;;  %v6231_v9 = vld [vmem:[%s7896_s1 + $0x1b0] sm:$0xff]  }
  0x81   : > { %v1348_v15 = vrot.slane %v1346_v7, 5  ;;  %v1902_v7 = vrot.slane %v5094_v61, 5  ;;  %v5032_v61 = vld [vmem:[%s6327_s8 + $0x30] sm:$0xf]  ;;  %5942 = vmatpush3.bf16.msra.mxu1 %v6231_v9  ;;  %v5037_v44 = vld [vmem:[%s6327_s8 + $0x44] sm:$0x1] }
  0x82   : > { %v1334_v27 = vrot.slane %v1333_v19, 4  ;;  %v5031_v19 = vld [vmem:[%s6327_s8 + $0x2c] sm:$0x1]  ;;  %v1014_v21 = vsel %vm6492_vm5, %v4953_v11, %v1013_v12  ;;  %v1015_v22 = vrot.slane %v1013_v12, 4  ;;  %v1399_v3 = vshrl.u32 %v5032_v61, 16 }
  0x83   : > { %v1349_v40 = vsel %vm6352_vm2, %v1344_v28, %v1348_v15  ;;  %v1903_v15 = vsel %vm6492_vm5, %v5137_v2, %v1902_v7  ;;  %v1904_v16 = vrot.slane %v1902_v7, 4  ;;  %v5034_v2 = vld [vmem:[%s6327_s8 + $0x38] sm:$0x1]  ;;  %v1402_v7 = vshll.u32 %v5032_v61, 16 }
  0x84   : > { %v1401_v12 = vrot.slane %v1399_v3, 4 }
  0x86   : > { %3993 = vmatmul.mubr.bf16.gmra.mrb[44].mxu1 %v4966_v58  ;;  %3864 = vmatmul.mubr.bf16.gmra.mrb[44].mxu0 %v6217_v39  ;;  %v1339_v39 = vsel %vm6352_vm2, %v1334_v27, %v1338_v13  ;;  %v5029_v13 = vld [vmem:[%s6327_s8 + $0x24] sm:$0xf] }
  0x87   : > { %4000 = vmatprep.mubr.bf16.mxu1 %v6218_v42  ;;  %4097 = vmatprep.mubr.bf16.mxu0 %v5151_v8  ;;  %v5027_v42 = vld [vmem:[%s6327_s8 + $0x1c] sm:$0xf]  ;;  %v5071_v45 = vcombine.low %v1339_v39, %v1349_v40  ;;  %v1905_v8 = vrot.slane %v5095_v62, 5  ;;  %v1375_v23 = vshrl.u32 %v5029_v13, 16  ;;  %v1378_v26 = vshll.u32 %v5029_v13, 16 }
  0x88   : > { %v1360_v54 = vshll.u32 %v5027_v42, 16  ;;  %v1364_v58 = vshrl.u32 %v5027_v42, 16  ;;  %v1394_v42 = vshll.u32 %v5031_v19, 16  ;;  %v5033_v62 = vld [vmem:[%s6327_s8 + $0x34] sm:$0xf] }
  0x89   : > { %v1906_v25 = vsel %vm6492_vm5, %v1904_v16, %v1905_v8  ;;  %v1377_v30 = vrot.slane %v1375_v23, 4  ;;  %v1380_v36 = vrot.slane %v1378_v26, 5  ;;  %v1408_v8 = vshll.u32 %v5033_v62, 16  ;;  %v5099_v13 = vld [vmem:[%s6327_s8 + $0x3c] sm:$0xe] }
  0x8a   : > { %v1362_v1 = vrot.slane %v1360_v54, 5  ;;  %v1366_v5 = vrot.slane %v1364_v58, 4  ;;  %v5153_v34 = vcombine.low %v1903_v15, %v1906_v25  ;;  %v1396_v48 = vrot.slane %v1394_v42, 5  ;;  %v5100_v19 = vld [vmem:[%s6327_s8 + $0x40] sm:$0xf] }
  0x8b   : > { %v1381_v43 = vor.u32 %v1380_v36, %v1377_v30  ;;  %v1912_v54 = vrot.slane %v5098_v46, 5  ;;  %v1404_v15 = vrot.slane %v1402_v7, 5  ;;  %v1410_v16 = vrot.slane %v1408_v8, 5  ;;  %v5101_v23 = vld [vmem:[%s6327_s8 + $0x44] sm:$0x1] }
  0x8c   : > { %v1367_v14 = vor.u32 %v1366_v5, %v1362_v1  ;;  %v878_v25 = vld [vmem:[%s6327_s8 + $0x90] sm:$0xe]  ;;  %v879_v30 = vld [vmem:[%s6327_s8 + $0x94] sm:$0xf] }
  0x8d   : > { %v1382_v53 = vrot.slane %v1381_v43, 4  ;;  %v4955_v36 = vrot.slane %v878_v25, 9  ;;  %v5036_v43 = vld [vmem:[%s6327_s8 + $0x40] sm:$0xf]  ;;  %v5039_v25 = vld [vmem:[%s6327_s8 + $0x4c] sm:$0xf] }
  0x8e   : > { %4001 = vmatmul.mubr.bf16.gmra.mrb[48].mxu1 %v4967_v18  ;;  %4098 = vmatmul.mubr.bf16.vlgmr.msra.gmra.mrb[48].mxu0 %v5071_v45  ;;  %v5030_v18 = vld [vmem:[%s6327_s8 + $0x28] sm:$0xf]  ;;  %v1368_v24 = vrot.slane %v1367_v14, 4  ;;  %v5097_v45 = vld [vmem:[%s6327_s8 + $0x34] sm:$0xf] }
  0x8f   : > { %4008 = vmatprep.mubr.bf16.mxu1 %v6222_v17  ;;  %6066 = vmatpush3.bf16.msra.mxu0 %v6681_v50  ;;  %v1357_v50 = vor.u32 %v1356_v0, %v1353_v52  ;;  %v1016_v17 = vrot.slane %v874_v10, 5  ;;  %v1384_v27 = vshll.u32 %v5030_v18, 16  ;;  %v1388_v41 = vshrl.u32 %v5030_v18, 16  ;;  %v875_v52 = vld [vmem:[%s6327_s8 + $0x84] sm:$0xe]  ;;  %v6228_v18 = vld [vmem:[%s6327_s8 + $0x9c] sm:$0xff]  }
  0x90   : > { %4105 = vmatprep.mubr.bf16.mxu0 %v5152_v51  ;;  %6067 = vmatprep.subr.bf16.mxu0 %v6225_v56  ;;  %v1373_v33 = vsel %vm6352_vm2, %v1368_v24, %v1372_v6  ;;  %v1909_v51 = vrot.slane %v5097_v45, 5  ;;  %v1020_v0 = vrot.slane %v876_v55, 5  ;;  %v5139_v24 = vrot.slane %v5099_v13, 9 }
  0x91   : > { %v1358_v20 = vrot.slane %v1357_v50, 4  ;;  %v1017_v29 = vsel %vm6492_vm5, %v1015_v22, %v1016_v17  ;;  %v1386_v37 = vrot.slane %v1384_v27, 5  ;;  %v1390_v47 = vrot.slane %v1388_v41, 4 }
  0x92   : > { %v4969_v40 = vcombine.low %v1014_v21, %v1017_v29  ;;  %v1910_v58 = vsel %vm6492_vm5, %v5138_v49, %v1909_v51  ;;  %v1911_v59 = vrot.slane %v1909_v51, 4  ;;  %v1022_v11 = vrot.slane %v1020_v0, 4 }
  0x93   : > { %6068 = vmatpush3.bf16.msra.mxu0 %v6225_v56  ;;  %v1363_v28 = vsel %vm6352_vm2, %v1358_v20, %v1362_v1  ;;  %v877_v56 = vld [vmem:[%s6327_s8 + $0x8c] sm:$0x1]  ;;  %v1391_v57 = vor.u32 %v1390_v47, %v1386_v37  ;;  %v1412_v17 = vshrl.u32 %v5033_v62, 16  ;;  %v1418_v22 = vshll.u32 %v5034_v2, 16  ;;  %v5102_v2 = vld [vmem:[%s6327_s8 + $0x48] sm:$0xe] }
  0x94   : > { %v5072_v39 = vcombine.low %v1363_v28, %v1373_v33  ;;  %v1023_v1 = vrot.slane %v877_v56, 5  ;;  %v1913_v6 = vsel %vm6492_vm5, %v1911_v59, %v1912_v54  ;;  %6069 = vmatprep.subr.bf16.mxu0 %v6230_v4  ;;  %v1405_v27 = vor.u32 %v1404_v15, %v1401_v12  ;;  %v883_v15 = vld [vmem:[%s6327_s8 + $0xa4] sm:$0x1] }
  0x95   : > { %v1392_v5 = vrot.slane %v1391_v57, 4  ;;  %v5154_v50 = vcombine.low %v1910_v58, %v1913_v6  ;;  %v1414_v28 = vrot.slane %v1412_v17, 4  ;;  %v1916_v29 = vrot.slane %v5100_v19, 5  ;;  %v6232_v58 = vld [vmem:[%s6327_s8 + $0xa8] sm:$0xff]   ;;  %v5104_v6 = vld [vmem:[%s6327_s8 + $0x50] sm:$0x1] }
  0x96   : > { %4009 = vmatmul.mubr.bf16.gmra.mrb[52].mxu1 %v4968_v63  ;;  %4106 = vmatmul.mubr.bf16.gmra.mrb[52].mxu0 %v5072_v39  ;;  %v1387_v63 = vsel %vm6352_vm2, %v1382_v53, %v1386_v37  ;;  %v1024_v21 = vsel %vm6492_vm5, %v1022_v11, %v1023_v1  ;;  %v1420_v33 = vrot.slane %v1418_v22, 5  ;;  %v1027_v37 = vrot.slane %v879_v30, 5  ;;  %v6234_v11 = vld [vmem:[%s7896_s1 + $0x1f8] sm:$0xff]  }
  0x97   : > { %4016 = vmatprep.mubr.bf16.mxu1 %v6223_v60  ;;  %4113 = vmatprep.mubr.bf16.mxu0 %v5153_v34  ;;  %v4954_v60 = vrot.slane %v875_v52, 9  ;;  %v1397_v14 = vsel %vm6352_vm2, %v1392_v5, %v1396_v48  ;;  %v1919_v34 = vrot.slane %v5101_v23, 5  ;;  %v1406_v39 = vrot.slane %v1405_v27, 4  ;;  %v5103_v5 = vld [vmem:[%s6327_s8 + $0x4c] sm:$0xf]  ;;  %v6235_v22 = vld [vmem:[%s7896_s1 + $0x218] sm:$0xff]  }
  0x98   : > { %6070 = vmatpush3.bf16.msra.mxu0 %v6230_v4  ;;  %v5073_v20 = vcombine.low %v1387_v63, %v1397_v14  ;;  %v1917_v41 = vsel %vm6492_vm5, %v5139_v24, %v1916_v29  ;;  %v1918_v42 = vrot.slane %v1916_v29, 4  ;;  %v1028_v45 = vsel %vm6492_vm5, %v4955_v36, %v1027_v37  ;;  %v882_v14 = vld [vmem:[%s6327_s8 + $0xa0] sm:$0xf]  ;;  %5943 = vmatprep.subr.bf16.mxu1 %v6234_v11 }
  0x99   : > { %v1021_v10 = vsel %vm6492_vm5, %v4954_v60, %v1020_v0  ;;  %v1029_v46 = vrot.slane %v1027_v37, 4  ;;  %v1030_v47 = vrot.slane %v880_v32, 5  ;;  %v1411_v49 = vsel %vm6352_vm2, %v1406_v39, %v1410_v16  ;;  %6071 = vmatprep.subr.bf16.mxu0 %v6235_v22  ;;  %v5105_v39 = vld [vmem:[%s6327_s8 + $0x54] sm:$0xe] }
  0x9a   : > { %v4970_v26 = vcombine.low %v1021_v10, %v1024_v21  ;;  %v1920_v52 = vsel %vm6492_vm5, %v1918_v42, %v1919_v34  ;;  %v1432_v57 = vshll.u32 %v5036_v43, 16  ;;  %v1436_v62 = vshrl.u32 %v5036_v43, 16  ;;  %v881_v10 = vld [vmem:[%s6327_s8 + $0x9c] sm:$0xe]  ;;  %v5038_v21 = vld [vmem:[%s6327_s8 + $0x48] sm:$0xf] }
  0x9b   : > { %v5155_v54 = vcombine.low %v1917_v41, %v1920_v52  ;;  %v1031_v55 = vsel %vm6492_vm5, %v1029_v46, %v1030_v47  ;;  %v1442_v1 = vshll.u32 %v5037_v44, 16  ;;  %v5140_v7 = vrot.slane %v5102_v2, 9  ;;  %v884_v46 = vld [vmem:[%s6327_s8 + $0xa8] sm:$0xe]  ;;  %v885_v52 = vld [vmem:[%s6327_s8 + $0xac] sm:$0xf] }
  0x9c   : > { %v4971_v60 = vcombine.low %v1028_v45, %v1031_v55  ;;  %v1434_v0 = vrot.slane %v1432_v57, 5  ;;  %v1438_v4 = vrot.slane %v1436_v62, 4  ;;  %v1923_v9 = vrot.slane %v5103_v5, 5  ;;  %6072 = vmatpush3.bf16.msra.mxu0 %v6235_v22  ;;  %v5107_v45 = vld [vmem:[%s6327_s8 + $0x5c] sm:$0x1] }
  0x9d   : > { %v1444_v8 = vrot.slane %v1442_v1, 5  ;;  %v1034_v19 = vrot.slane %v882_v14, 5  ;;  %v1447_v27 = vshrl.u32 %v5038_v21, 16  ;;  %v1450_v32 = vshll.u32 %v5038_v21, 16  ;;  %v5043_v5 = vld [vmem:[%s6327_s8 + $0x5c] sm:$0x1] }
  0x9e   : > { %4017 = vmatmul.mubr.bf16.gmra.mrb[56].mxu1 %v4969_v40  ;;  %4114 = vmatmul.mubr.bf16.gmra.mrb[56].mxu0 %v5073_v20  ;;  %v1415_v40 = vor.u32 %v1414_v28, %v1410_v16  ;;  %v1439_v13 = vor.u32 %v1438_v4, %v1434_v0  ;;  %v4956_v16 = vrot.slane %v881_v10, 9  ;;  %v1924_v17 = vsel %vm6492_vm5, %v5140_v7, %v1923_v9  ;;  %v5042_v4 = vld [vmem:[%s6327_s8 + $0x58] sm:$0xf] }
  0x9f   : > { %4024 = vmatprep.mubr.bf16.mxu1 %v6227_v38  ;;  %v5035_v38 = vld [vmem:[%s6327_s8 + $0x3c] sm:$0xf]  ;;  %4121 = vmatprep.mubr.bf16.mxu0 %v5154_v50  ;;  %v1926_v50 = vrot.slane %v5104_v6, 5  ;;  %v1037_v20 = vrot.slane %v883_v15, 5  ;;  %v1036_v30 = vrot.slane %v1034_v19, 4  ;;  %v1449_v37 = vrot.slane %v1447_v27, 4 }
  0xa0   : > { %v1423_v48 = vshrl.u32 %v5035_v38, 16  ;;  %v1416_v51 = vrot.slane %v1415_v40, 4  ;;  %v1426_v53 = vshll.u32 %v5035_v38, 16  ;;  %v1440_v24 = vrot.slane %v1439_v13, 4  ;;  %v5106_v40 = vld [vmem:[%s6327_s8 + $0x58] sm:$0xf] }
  0xa1   : > { %v1035_v29 = vsel %vm6492_vm5, %v4956_v16, %v1034_v19  ;;  %v1456_v38 = vshll.u32 %v5039_v25, 16  ;;  %v1038_v42 = vsel %vm6492_vm5, %v1036_v30, %v1037_v20  ;;  %v1452_v43 = vrot.slane %v1450_v32, 5  ;;  %v6237_v13 = vld [vmem:[%s6327_s8 + $0xc0] sm:$0xff]  }
  0xa2   : > { %v1425_v56 = vrot.slane %v1423_v48, 4  ;;  %v1421_v59 = vsel %vm6352_vm2, %v1416_v51, %v1420_v33  ;;  %v1428_v61 = vrot.slane %v1426_v53, 5  ;;  %v6233_v33 = vld [vmem:[%s6327_s8 + $0xb4] sm:$0xff]   ;;  %v1445_v34 = vsel %vm6352_vm2, %v1440_v24, %v1444_v8 }
  0xa3   : > { %v5074_v63 = vcombine.low %v1411_v49, %v1421_v59  ;;  %v1460_v44 = vshrl.u32 %v5039_v25, 16  ;;  %v4972_v47 = vcombine.low %v1035_v29, %v1038_v42  ;;  %v1458_v48 = vrot.slane %v1456_v38, 5  ;;  %v6236_v53 = vld [vmem:[%s7896_s1 + $0x1b8] sm:$0xff]   ;;  %v5108_v25 = vld [vmem:[%s6327_s8 + $0x60] sm:$0xe] }
  0xa4   : > { %v1429_v3 = vor.u32 %v1428_v61, %v1425_v56  ;;  %v5141_v51 = vrot.slane %v5105_v39, 9  ;;  %v1930_v56 = vrot.slane %v5106_v40, 5  ;;  %v1933_v57 = vrot.slane %v5107_v45, 5  ;;  %5944 = vmatpush3.bf16.msra.mxu1 %v6236_v53  ;;  %v5110_v29 = vld [vmem:[%s6327_s8 + $0x68] sm:$0x1] }
  0xa5   : > { %v1462_v55 = vrot.slane %v1460_v44, 4  ;;  %v1041_v61 = vrot.slane %v885_v52, 5  ;;  %v1484_v21 = vshrl.u32 %v5042_v4, 16  ;;  %v1490_v24 = vshll.u32 %v5043_v5, 16  ;;  %v888_v39 = vld [vmem:[%s6327_s8 + $0xb8] sm:$0xf] }
  0xa6   : > { %4025 = vmatmul.mubr.bf16.gmra.mrb[60].mxu1 %v4970_v26  ;;  %4122 = vmatmul.mubr.bf16.gmra.mrb[60].mxu0 %v5074_v63  ;;  %v1430_v12 = vrot.slane %v1429_v3, 4  ;;  %v5040_v26 = vld [vmem:[%s6327_s8 + $0x50] sm:$0x1]  ;;  %v5041_v63 = vld [vmem:[%s6327_s8 + $0x54] sm:$0xf]  ;;  %v1931_v2 = vsel %vm6492_vm5, %v5141_v51, %v1930_v56  ;;  %v1932_v3 = vrot.slane %v1930_v56, 4 }
  0xa7   : > { %4032 = vmatprep.mubr.bf16.mxu1 %v6228_v18  ;;  %4129 = vmatprep.mubr.bf16.mxu0 %v5155_v54  ;;  %v1925_v18 = vrot.slane %v1923_v9, 4  ;;  %v1466_v49 = vshll.u32 %v5040_v26, 16  ;;  %v1453_v54 = vor.u32 %v1452_v43, %v1449_v37  ;;  %v1463_v1 = vor.u32 %v1462_v55, %v1458_v48  ;;  %v6239_v26 = vld [vmem:[%s7896_s1 + $0x220] sm:$0xff]   ;;  %v889_v40 = vld [vmem:[%s6327_s8 + $0xbc] sm:$0x1] }
  0xa8   : > { %v1435_v23 = vsel %vm6352_vm2, %v1430_v12, %v1434_v0  ;;  %v1043_v7 = vrot.slane %v1041_v61, 4  ;;  %v1471_v8 = vshrl.u32 %v5041_v63, 16  ;;  %v1474_v9 = vshll.u32 %v5041_v63, 16  ;;  %6073 = vmatprep.subr.bf16.mxu0 %v6239_v26  ;;  %v5046_v51 = vld [vmem:[%s6327_s8 + $0x68] sm:$0x1] }
  0xa9   : > { %v1927_v28 = vsel %vm6492_vm5, %v1925_v18, %v1926_v50  ;;  %v5075_v41 = vcombine.low %v1435_v23, %v1445_v34  ;;  %v1468_v59 = vrot.slane %v1466_v49, 5  ;;  %v1454_v0 = vrot.slane %v1453_v54, 4  ;;  %6074 = vmatpush3.bf16.msra.mxu0 %v6239_v26 }
  0xaa   : > { %v5156_v36 = vcombine.low %v1924_v17, %v1927_v28  ;;  %v1464_v10 = vrot.slane %v1463_v1, 4  ;;  %v1934_v11 = vsel %vm6492_vm5, %v1932_v3, %v1933_v57  ;;  %v1480_v12 = vshll.u32 %v5042_v4, 16  ;;  %v5109_v28 = vld [vmem:[%s6327_s8 + $0x64] sm:$0xf]  ;;  %v5215_v1 = vld [vmem:[%s6327_s8 + $0x18] sm:$0xf] }
  0xab   : > { %v1459_v50 = vsel %vm6352_vm2, %v1454_v0, %v1458_v48  ;;  %v5157_v14 = vcombine.low %v1931_v2, %v1934_v11  ;;  %v1473_v16 = vrot.slane %v1471_v8, 4  ;;  %v1476_v17 = vrot.slane %v1474_v9, 5  ;;  %v5113_v0 = vld [vmem:[%s6327_s8 + $0x74] sm:$0x1] }
  0xac   : > { %v1469_v18 = vsel %vm6352_vm2, %v1464_v10, %v1468_v59  ;;  %v1482_v20 = vrot.slane %v1480_v12, 5  ;;  %v1486_v27 = vrot.slane %v1484_v21, 4  ;;  %v5142_v30 = vrot.slane %v5108_v25, 9  ;;  %v5112_v59 = vld [vmem:[%s6327_s8 + $0x70] sm:$0xf] }
  0xad   : > { %v5076_v22 = vcombine.low %v1459_v50, %v1469_v18  ;;  %v1477_v23 = vor.u32 %v1476_v17, %v1473_v16  ;;  %v1940_v34 = vrot.slane %v5110_v29, 5  ;;  %v1492_v38 = vrot.slane %v1490_v24, 5  ;;  %v5217_v10 = vld [vmem:[%s6327_s8 + $0x20] sm:$0x1] }
  0xae   : > { %4033 = vmatmul.mubr.bf16.gmra.mrb[64].mxu1 %v4971_v60  ;;  %4130 = vmatmul.mubr.bf16.gmra.mrb[64].mxu0 %v5075_v41  ;;  %v4957_v60 = vrot.slane %v884_v46, 9  ;;  %v1487_v37 = vor.u32 %v1486_v27, %v1482_v20  ;;  %v1048_v45 = vrot.slane %v888_v39, 5  ;;  %v5044_v46 = vld [vmem:[%s6327_s8 + $0x60] sm:$0xf]  ;;  %v1051_v49 = vrot.slane %v889_v40, 5 }
  0xaf   : > { %4040 = vmatprep.mubr.bf16.mxu1 %v6232_v58  ;;  %v886_v58 = vld [vmem:[%s6327_s8 + $0xb0] sm:$0x1]  ;;  %4137 = vmatprep.mubr.bf16.mxu0 %v5156_v36  ;;  %v1478_v32 = vrot.slane %v1477_v23, 4  ;;  %v887_v36 = vld [vmem:[%s6327_s8 + $0xb4] sm:$0xe]  ;;  %v1495_v52 = vshrl.u32 %v5044_v46, 16 }
  0xb0   : > { %v1044_v62 = vrot.slane %v886_v58, 5  ;;  %v1042_v6 = vsel %vm6492_vm5, %v4957_v60, %v1041_v61  ;;  %v4958_v41 = vrot.slane %v887_v36, 9  ;;  %v1488_v48 = vrot.slane %v1487_v37, 4  ;;  %v5111_v58 = vld [vmem:[%s6327_s8 + $0x6c] sm:$0xe] }
  0xb1   : > { %v1483_v42 = vsel %vm6352_vm2, %v1478_v32, %v1482_v20  ;;  %v1498_v53 = vshll.u32 %v5044_v46, 16  ;;  %v1050_v56 = vrot.slane %v1048_v45, 4  ;;  %v1514_v9 = vshll.u32 %v5046_v51, 16  ;;  %v5048_v20 = vld [vmem:[%s6327_s8 + $0x70] sm:$0xf] }
  0xb2   : > { %v1045_v15 = vsel %vm6492_vm5, %v1043_v7, %v1044_v62  ;;  %v1049_v55 = vsel %vm6492_vm5, %v4958_v41, %v1048_v45  ;;  %v1493_v60 = vsel %vm6352_vm2, %v1488_v48, %v1492_v38  ;;  %v1497_v62 = vrot.slane %v1495_v52, 4  ;;  %v5049_v39 = vld [vmem:[%s6327_s8 + $0x74] sm:$0x1]  ;;  %v5114_v41 = vld [vmem:[%s6327_s8 + $0x78] sm:$0xe] }
  0xb3   : > { %v4973_v19 = vcombine.low %v1042_v6, %v1045_v15  ;;  %v1500_v63 = vrot.slane %v1498_v53, 5  ;;  %v5077_v2 = vcombine.low %v1483_v42, %v1493_v60  ;;  %v1052_v3 = vsel %vm6492_vm5, %v1050_v56, %v1051_v49  ;;  %v5216_v6 = vld [vmem:[%s6327_s8 + $0x1c] sm:$0xf]  ;;  %v5047_v15 = vld [vmem:[%s6327_s8 + $0x6c] sm:$0xf] }
  0xb4   : > { %v4974_v7 = vcombine.low %v1049_v55, %v1052_v3  ;;  %v5143_v50 = vrot.slane %v5111_v58, 9  ;;  %v1944_v12 = vrot.slane %v5112_v59, 5  ;;  %v1516_v17 = vrot.slane %v1514_v9, 5  ;;  %v5115_v46 = vld [vmem:[%s6327_s8 + $0x7c] sm:$0xf] }
  0xb5   : > { %v1501_v8 = vor.u32 %v1500_v63, %v1497_v62  ;;  %v2275_v18 = vshll.u32 %v5215_v1, 16  ;;  %v2291_v32 = vshll.u32 %v5217_v10, 16  ;;  %v1522_v40 = vshll.u32 %v5047_v15, 16  ;;  %v5116_v52 = vld [vmem:[%s6327_s8 + $0x80] sm:$0x1] }
  0xb6   : > { %4041 = vmatmul.mubr.bf16.gmra.mrb[68].mxu1 %v4972_v47  ;;  %4138 = vmatmul.mubr.bf16.gmra.mrb[68].mxu0 %v5076_v22  ;;  %v5045_v47 = vld [vmem:[%s6327_s8 + $0x64] sm:$0xf]  ;;  %v1945_v22 = vsel %vm6492_vm5, %v5143_v50, %v1944_v12  ;;  %v1946_v23 = vrot.slane %v1944_v12, 4  ;;  %v1528_v45 = vshll.u32 %v5048_v20, 16  ;;  %v1532_v55 = vshrl.u32 %v5048_v20, 16 }
  0xb7   : > { %4048 = vmatprep.mubr.bf16.mxu1 %v6233_v33  ;;  %v1937_v33 = vrot.slane %v5109_v28, 5  ;;  %4145 = vmatprep.mubr.bf16.mxu0 %v5157_v14  ;;  %v1504_v57 = vshll.u32 %v5045_v47, 16  ;;  %v1508_v5 = vshrl.u32 %v5045_v47, 16  ;;  %v2272_v14 = vshrl.u32 %v5215_v1, 16  ;;  %v5218_v53 = vld [vmem:[%s6327_s8 + $0x24] sm:$0xf] }
  0xb8   : > { %v1502_v16 = vrot.slane %v1501_v8, 4  ;;  %v2277_v26 = vrot.slane %v2275_v18, 5  ;;  %v2285_v28 = vshrl.u32 %v5216_v6, 16  ;;  %v1524_v51 = vrot.slane %v1522_v40, 5  ;;  %v5219_v63 = vld [vmem:[%s6327_s8 + $0x28] sm:$0xf] }
  0xb9   : > { %v1938_v43 = vsel %vm6492_vm5, %v5142_v30, %v1937_v33  ;;  %v1939_v44 = vrot.slane %v1937_v33, 4  ;;  %v1506_v4 = vrot.slane %v1504_v57, 5  ;;  %v1510_v11 = vrot.slane %v1508_v5, 4  ;;  %v5220_v8 = vld [vmem:[%s6327_s8 + $0x2c] sm:$0x1] }
  0xba   : > { %v2274_v24 = vrot.slane %v2272_v14, 4  ;;  %v1519_v33 = vshrl.u32 %v5047_v15, 16  ;;  %v2287_v38 = vrot.slane %v2285_v28, 4  ;;  %v1538_v56 = vshll.u32 %v5049_v39, 16  ;;  %v5050_v12 = vld [vmem:[%s6327_s8 + $0x78] sm:$0xf] }
  0xbb   : > { %v1941_v54 = vsel %vm6492_vm5, %v1939_v44, %v1940_v34  ;;  %v1511_v21 = vor.u32 %v1510_v11, %v1506_v4  ;;  %v1507_v25 = vsel %vm6352_vm2, %v1502_v16, %v1506_v4  ;;  %v6242_v34 = vld [vmem:[%s7896_s1 + $0x228] sm:$0xff]   ;;  %v5144_v57 = vrot.slane %v5114_v41, 9  ;;  %v5221_v40 = vld [vmem:[%s6327_s8 + $0x30] sm:$0xf] }
  0xbc   : > { %v5158_v61 = vcombine.low %v1938_v43, %v1941_v54  ;;  %v2278_v37 = vor.u32 %v2277_v26, %v2274_v24  ;;  %v2293_v43 = vrot.slane %v2291_v32, 5  ;;  %v1521_v44 = vrot.slane %v1519_v33, 4  ;;  %6075 = vmatprep.subr.bf16.mxu0 %v6242_v34  ;;  %v5118_v33 = vld [vmem:[%s6327_s8 + $0x88] sm:$0xf] }
  0xbd   : > { %v1512_v29 = vrot.slane %v1511_v21, 4  ;;  %6076 = vmatpush3.bf16.msra.mxu0 %v6242_v34  ;;  %v1530_v54 = vrot.slane %v1528_v45, 5  ;;  %v1951_v62 = vrot.slane %v5115_v46, 5  ;;  %v1540_v1 = vrot.slane %v1538_v56, 5  ;;  %v5119_v34 = vld [vmem:[%s6327_s8 + $0x8c] sm:$0x1] }
  0xbe   : > { %4049 = vmatmul.mubr.bf16.gmra.mrb[72].mxu1 %v4973_v19  ;;  %4146 = vmatmul.mubr.bf16.gmra.mrb[72].mxu0 %v5077_v2  ;;  %v2281_v19 = vshll.u32 %v5216_v6, 16  ;;  %v2279_v48 = vrot.slane %v2278_v37, 4  ;;  %v1525_v60 = vor.u32 %v1524_v51, %v1521_v44  ;;  %v1954_v2 = vrot.slane %v5116_v52, 5 }
  0xbf   : > { %4056 = vmatprep.mubr.bf16.mxu1 %v6237_v13  ;;  %v1947_v13 = vrot.slane %v5113_v0, 5  ;;  %4153 = vmatprep.mubr.bf16.mxu0 %v5158_v61  ;;  %v1517_v42 = vsel %vm6352_vm2, %v1512_v29, %v1516_v17  ;;  %v6238_v61 = vld [vmem:[%s6327_s8 + $0x18] sm:$0xff]   ;;  %v1534_v0 = vrot.slane %v1532_v55, 4  ;;  %v2296_v3 = vshrl.u32 %v5218_v53, 16  ;;  %v5222_v55 = vld [vmem:[%s6327_s8 + $0x34] sm:$0xf] }
  0xc0   : > { %v2283_v27 = vrot.slane %v2281_v19, 5  ;;  %v5078_v47 = vcombine.low %v1507_v25, %v1517_v42  ;;  %v1526_v5 = vrot.slane %v1525_v60, 4  ;;  %v1952_v6 = vsel %vm6492_vm5, %v5144_v57, %v1951_v62  ;;  %v5051_v17 = vld [vmem:[%s6327_s8 + $0x7c] sm:$0xf] }
  0xc1   : > { %v1948_v30 = vsel %vm6492_vm5, %v1946_v23, %v1947_v13  ;;  %v1535_v50 = vor.u32 %v1534_v0, %v1530_v54  ;;  %v2298_v10 = vrot.slane %v2296_v3, 4  ;;  %v2299_v11 = vshll.u32 %v5218_v53, 16 }
  0xc2   : > { %v5159_v36 = vcombine.low %v1945_v22, %v1948_v30  ;;  %v2288_v49 = vor.u32 %v2287_v38, %v2283_v27  ;;  %v2284_v58 = vsel %vm6352_vm2, %v2279_v48, %v2283_v27  ;;  %v1531_v13 = vsel %vm6352_vm2, %v1526_v5, %v1530_v54  ;;  %v5052_v22 = vld [vmem:[%s6327_s8 + $0x80] sm:$0x1]  ;;  %v5117_v27 = vld [vmem:[%s6327_s8 + $0x84] sm:$0xe] }
  0xc3   : > { %v2305_v15 = vshll.u32 %v5219_v63, 16  ;;  %v2309_v16 = vshrl.u32 %v5219_v63, 16  ;;  %v1536_v18 = vrot.slane %v1535_v50, 4  ;;  %v2301_v20 = vrot.slane %v2299_v11, 5  ;;  %v5223_v63 = vld [vmem:[%s6327_s8 + $0x38] sm:$0x1] }
  0xc4   : > { %v2289_v59 = vrot.slane %v2288_v49, 4  ;;  %v2315_v21 = vshll.u32 %v5220_v8, 16  ;;  %v1543_v25 = vshrl.u32 %v5050_v12, 16  ;;  %v1546_v26 = vshll.u32 %v5050_v12, 16  ;;  %v6245_v49 = vld [vmem:[%s7896_s1 + $0x230] sm:$0xff]  }
  0xc5   : > { %v2307_v23 = vrot.slane %v2305_v15, 5  ;;  %v2311_v24 = vrot.slane %v2309_v16, 4  ;;  %v1541_v28 = vsel %vm6352_vm2, %v1536_v18, %v1540_v1  ;;  %v2302_v29 = vor.u32 %v2301_v20, %v2298_v10  ;;  %6077 = vmatprep.subr.bf16.mxu0 %v6245_v49  ;;  %v5055_v11 = vld [vmem:[%s6327_s8 + $0x8c] sm:$0x1]  ;;  %v5120_v12 = vld [vmem:[%s6327_s8 + $0x90] sm:$0xe] }
  0xc6   : > { %4057 = vmatmul.mubr.bf16.gmra.mrb[76].mxu1 %v4974_v7  ;;  %4154 = vmatmul.mubr.bf16.gmra.mrb[76].mxu0 %v5078_v47  ;;  %v2294_v4 = vsel %vm6352_vm2, %v2289_v59, %v2293_v43  ;;  %v1953_v7 = vrot.slane %v1951_v62, 4  ;;  %v2317_v30 = vrot.slane %v2315_v21, 5  ;;  %v1552_v32 = vshll.u32 %v5051_v17, 16 }
  0xc7   : > { %4161 = vmatprep.mubr.bf16.mxu0 %v5159_v36  ;;  %v5263_v9 = vcombine.low %v2284_v58, %v2294_v4  ;;  %v5079_v36 = vcombine.low %v1531_v13, %v1541_v28  ;;  %v2312_v37 = vor.u32 %v2311_v24, %v2307_v23  ;;  %v1545_v38 = vrot.slane %v1543_v25, 4  ;;  %v6240_v58 = vld [vmem:[%s6327_s8 + $0x24] sm:$0xff]   ;;  %6078 = vmatpush3.bf16.msra.mxu0 %v6245_v49  ;;  %v5056_v49 = vld [vmem:[%s6327_s8 + $0x90] sm:$0xf] }
  0xc8   : > { %v1955_v14 = vsel %vm6492_vm5, %v1953_v7, %v1954_v2  ;;  %v1548_v39 = vrot.slane %v1546_v26, 5  ;;  %v2303_v41 = vrot.slane %v2302_v29, 4  ;;  %v1554_v42 = vrot.slane %v1552_v32, 5  ;;  %v5053_v2 = vld [vmem:[%s6327_s8 + $0x84] sm:$0xf] }
  0xc9   : > { %4258 = vmatprep.mubr.bf16.mxu1 %v5263_v9  ;;  %v5160_v19 = vcombine.low %v1952_v6, %v1955_v14  ;;  %v1556_v43 = vshrl.u32 %v5051_v17, 16  ;;  %v1562_v44 = vshll.u32 %v5052_v22, 16  ;;  %v2313_v45 = vrot.slane %v2312_v37, 4  ;;  %v5054_v7 = vld [vmem:[%s6327_s8 + $0x88] sm:$0xf] }
  0xca   : > { %v1549_v46 = vor.u32 %v1548_v39, %v1545_v38  ;;  %v5145_v47 = vrot.slane %v5117_v27, 9  ;;  %v1958_v48 = vrot.slane %v5118_v33, 5  ;;  %v2308_v51 = vsel %vm6352_vm2, %v2303_v41, %v2307_v23  ;;  %v5121_v17 = vld [vmem:[%s6327_s8 + $0x94] sm:$0xf]  ;;  %v5122_v26 = vld [vmem:[%s6327_s8 + $0x98] sm:$0x1] }
  0xcb   : > { %v1558_v52 = vrot.slane %v1556_v43, 4  ;;  %v1564_v53 = vrot.slane %v1562_v44, 5  ;;  %v1961_v54 = vrot.slane %v5119_v34, 5  ;;  %v2318_v56 = vsel %vm6352_vm2, %v2313_v45, %v2317_v30  ;;  %v5224_v37 = vld [vmem:[%s6327_s8 + $0x3c] sm:$0xf]  ;;  %v6241_v41 = vld [vmem:[%s6327_s8 + $0x30] sm:$0xff]  }
  0xcc   : > { %v1550_v57 = vrot.slane %v1549_v46, 4  ;;  %v1959_v59 = vsel %vm6492_vm5, %v5145_v47, %v1958_v48  ;;  %v1960_v60 = vrot.slane %v1958_v48, 4  ;;  %v2320_v0 = vshrl.u32 %v5221_v40, 16  ;;  %v5225_v43 = vld [vmem:[%s6327_s8 + $0x40] sm:$0xf] }
  0xcd   : > { %v1559_v62 = vor.u32 %v1558_v52, %v1554_v42  ;;  %v2323_v1 = vshll.u32 %v5221_v40, 16  ;;  %v2329_v5 = vshll.u32 %v5222_v55, 16  ;;  %v2333_v6 = vshrl.u32 %v5222_v55, 16  ;;  %v5226_v48 = vld [vmem:[%s6327_s8 + $0x44] sm:$0x1] }
  0xce   : > { %4259 = vmatmul.mubr.bf16.vlgmr.msra.gmra.mrb[80].mxu1 %v6238_v61  ;;  %4162 = vmatmul.mubr.bf16.gmra.mrb[80].mxu0 %v5079_v36  ;;  %v5264_v61 = vcombine.low %v2308_v51, %v2318_v56  ;;  %v1555_v3 = vsel %vm6352_vm2, %v1550_v57, %v1554_v42  ;;  %v1962_v4 = vsel %vm6492_vm5, %v1960_v60, %v1961_v54  ;;  %v2322_v50 = vrot.slane %v2320_v0, 4  ;;  %v5057_v55 = vld [vmem:[%s6327_s8 + $0x94] sm:$0xf]  ;;  %v6248_v60 = vld [vmem:[%s7896_s1 + $0x238] sm:$0xff]  }
  0xcf   : > { %4169 = vmatprep.mubr.bf16.mxu0 %v5160_v19  ;;  %v1560_v8 = vrot.slane %v1559_v62, 4  ;;  %v5161_v9 = vcombine.low %v1959_v59, %v1962_v4  ;;  %v2325_v10 = vrot.slane %v2323_v1, 5  ;;  %v2331_v13 = vrot.slane %v2329_v5, 5  ;;  %v5058_v5 = vld [vmem:[%s6327_s8 + $0x98] sm:$0x1]  ;;  %6079 = vmatprep.subr.bf16.mxu0 %v6248_v60 }
  0xd0   : > { %4266 = vmatprep.mubr.bf16.mxu1 %v5264_v61  ;;  %v2335_v14 = vrot.slane %v2333_v6, 4  ;;  %v2339_v15 = vshll.u32 %v5223_v63, 16  ;;  %v1567_v16 = vshrl.u32 %v5053_v2, 16  ;;  %v1570_v20 = vshll.u32 %v5053_v2, 16  ;;  %6080 = vmatpush3.bf16.msra.mxu0 %v6248_v60 }
  0xd1   : > { %v1565_v18 = vsel %vm6352_vm2, %v1560_v8, %v1564_v53  ;;  %v2326_v19 = vor.u32 %v2325_v10, %v2322_v50  ;;  %v1576_v21 = vshll.u32 %v5054_v7, 16  ;;  %v1580_v30 = vshrl.u32 %v5054_v7, 16  ;;  %v5123_v50 = vld [vmem:[%s6327_s8 + $0x9c] sm:$0xe] }
  0xd2   : > { %v5080_v22 = vcombine.low %v1555_v3, %v1565_v18  ;;  %v2336_v23 = vor.u32 %v2335_v14, %v2331_v13  ;;  %v2341_v24 = vrot.slane %v2339_v15, 5  ;;  %v1569_v25 = vrot.slane %v1567_v16, 4  ;;  %v5124_v14 = vld [vmem:[%s6327_s8 + $0xa0] sm:$0xf]  ;;  %v5125_v15 = vld [vmem:[%s6327_s8 + $0xa4] sm:$0x1] }
  0xd3   : > { %v2327_v27 = vrot.slane %v2326_v19, 4  ;;  %v1572_v28 = vrot.slane %v1570_v20, 5  ;;  %v1578_v29 = vrot.slane %v1576_v21, 5  ;;  %v1586_v33 = vshll.u32 %v5055_v11, 16  ;;  %v5227_v20 = vld [vmem:[%s6327_s8 + $0x48] sm:$0xf] }
  0xd4   : > { %v2337_v32 = vrot.slane %v2336_v23, 4  ;;  %v5146_v34 = vrot.slane %v5120_v12, 9  ;;  %v1965_v36 = vrot.slane %v5121_v17, 5  ;;  %v1582_v40 = vrot.slane %v1580_v30, 4  ;;  %v5228_v30 = vld [vmem:[%s6327_s8 + $0x4c] sm:$0xf] }
  0xd5   : > { %v2332_v38 = vsel %vm6352_vm2, %v2327_v27, %v2331_v13  ;;  %v1573_v39 = vor.u32 %v1572_v28, %v1569_v25  ;;  %v1968_v42 = vrot.slane %v5122_v26, 5  ;;  %v1588_v45 = vrot.slane %v1586_v33, 5  ;;  %v6243_v27 = vld [vmem:[%s6327_s8 + $0x3c] sm:$0xff]  }
  0xd6   : > { %4267 = vmatmul.mubr.bf16.gmra.mrb[84].mxu1 %v6240_v58  ;;  %4170 = vmatmul.mubr.bf16.gmra.mrb[84].mxu0 %v5080_v22  ;;  %v2342_v44 = vsel %vm6352_vm2, %v2337_v32, %v2341_v24  ;;  %v1966_v46 = vsel %vm6492_vm5, %v5146_v34, %v1965_v36  ;;  %v1967_v47 = vrot.slane %v1965_v36, 4  ;;  %v1583_v53 = vor.u32 %v1582_v40, %v1578_v29  ;;  %v5229_v36 = vld [vmem:[%s6327_s8 + $0x50] sm:$0x1] }
  0xd7   : > { %4177 = vmatprep.mubr.bf16.mxu0 %v5161_v9  ;;  %v5265_v51 = vcombine.low %v2332_v38, %v2342_v44  ;;  %v1574_v52 = vrot.slane %v1573_v39, 4  ;;  %v2344_v54 = vshrl.u32 %v5224_v37, 16  ;;  %v2347_v57 = vshll.u32 %v5224_v37, 16  ;;  %v5059_v38 = vld [vmem:[%s6327_s8 + $0x9c] sm:$0xf] }
  0xd8   : > { %v1969_v56 = vsel %vm6492_vm5, %v1967_v47, %v1968_v42  ;;  %v2353_v58 = vshll.u32 %v5225_v43, 16  ;;  %v2357_v59 = vshrl.u32 %v5225_v43, 16  ;;  %v1584_v62 = vrot.slane %v1583_v53, 4  ;;  %v5060_v53 = vld [vmem:[%s6327_s8 + $0xa0] sm:$0xf] }
  0xd9   : > { %4274 = vmatprep.mubr.bf16.mxu1 %v5265_v51  ;;  %v1579_v61 = vsel %vm6352_vm2, %v1574_v52, %v1578_v29  ;;  %v5162_v63 = vcombine.low %v1966_v46, %v1969_v56  ;;  %v2346_v0 = vrot.slane %v2344_v54, 4  ;;  %v2349_v1 = vrot.slane %v2347_v57, 5 }
  0xda   : > { %v2355_v2 = vrot.slane %v2353_v58, 5  ;;  %v2359_v3 = vrot.slane %v2357_v59, 4  ;;  %v2363_v4 = vshll.u32 %v5226_v48, 16  ;;  %v1589_v6 = vsel %vm6352_vm2, %v1584_v62, %v1588_v45  ;;  %v5061_v58 = vld [vmem:[%s6327_s8 + $0xa4] sm:$0x1] }
  0xdb   : > { %v1591_v7 = vshrl.u32 %v5056_v49, 16  ;;  %v1594_v8 = vshll.u32 %v5056_v49, 16  ;;  %v1600_v9 = vshll.u32 %v5057_v55, 16  ;;  %v5081_v10 = vcombine.low %v1579_v61, %v1589_v6 }
  0xdc   : > { %v2350_v11 = vor.u32 %v2349_v1, %v2346_v0  ;;  %v2360_v12 = vor.u32 %v2359_v3, %v2355_v2  ;;  %v2365_v13 = vrot.slane %v2363_v4, 5  ;;  %v1604_v19 = vshrl.u32 %v5057_v55, 16  ;;  %v5126_v1 = vld [vmem:[%s6327_s8 + $0xa8] sm:$0xe] }
  0xdd   : > { %v1593_v16 = vrot.slane %v1591_v7, 4  ;;  %v1596_v17 = vrot.slane %v1594_v8, 5  ;;  %v1602_v18 = vrot.slane %v1600_v9, 5  ;;  %v1610_v23 = vshll.u32 %v5058_v5, 16  ;;  %v5128_v7 = vld [vmem:[%s6327_s8 + $0xb0] sm:$0x1] }
  0xde   : > { %4275 = vmatmul.mubr.bf16.gmra.mrb[88].mxu1 %v6241_v41  ;;  %4178 = vmatmul.mubr.bf16.gmra.mrb[88].mxu0 %v5081_v10  ;;  %v2351_v21 = vrot.slane %v2350_v11, 4  ;;  %v2361_v22 = vrot.slane %v2360_v12, 4  ;;  %v5147_v24 = vrot.slane %v5123_v50, 9  ;;  %v1606_v26 = vrot.slane %v1604_v19, 4  ;;  %v5230_v11 = vld [vmem:[%s6327_s8 + $0x54] sm:$0xf] }
  0xdf   : > { %4185 = vmatprep.mubr.bf16.mxu0 %v5162_v63  ;;  %v1597_v25 = vor.u32 %v1596_v17, %v1593_v16  ;;  %v1972_v28 = vrot.slane %v5124_v14, 5  ;;  %v1975_v29 = vrot.slane %v5125_v15, 5  ;;  %v1612_v34 = vrot.slane %v1610_v23, 5  ;;  %v5231_v17 = vld [vmem:[%s6327_s8 + $0x58] sm:$0xf] }
  0xe0   : > { %v2356_v32 = vsel %vm6352_vm2, %v2351_v21, %v2355_v2  ;;  %v2366_v33 = vsel %vm6352_vm2, %v2361_v22, %v2365_v13  ;;  %v2368_v37 = vshrl.u32 %v5227_v20, 16  ;;  %v1607_v41 = vor.u32 %v1606_v26, %v1602_v18  ;;  %v5127_v2 = vld [vmem:[%s6327_s8 + $0xac] sm:$0xf] }
  0xe1   : > { %v5266_v39 = vcombine.low %v2356_v32, %v2366_v33  ;;  %v1598_v40 = vrot.slane %v1597_v25, 4  ;;  %v1973_v42 = vsel %vm6492_vm5, %v5147_v24, %v1972_v28  ;;  %v1974_v44 = vrot.slane %v1972_v28, 4  ;;  %v6244_v22 = vld [vmem:[%s6327_s8 + $0x48] sm:$0xff]  }
  0xe2   : > { %v2370_v45 = vrot.slane %v2368_v37, 4  ;;  %v2371_v46 = vshll.u32 %v5227_v20, 16  ;;  %v2377_v47 = vshll.u32 %v5228_v30, 16  ;;  %v1608_v49 = vrot.slane %v1607_v41, 4  ;;  %v5062_v41 = vld [vmem:[%s6327_s8 + $0xa8] sm:$0xf] }
  0xe3   : > { %4282 = vmatprep.mubr.bf16.mxu1 %v5266_v39  ;;  %v1603_v48 = vsel %vm6352_vm2, %v1598_v40, %v1602_v18  ;;  %v2381_v51 = vshrl.u32 %v5228_v30, 16  ;;  %v2387_v52 = vshll.u32 %v5229_v36, 16  ;;  %v1976_v55 = vsel %vm6492_vm5, %v1974_v44, %v1975_v29 }
  0xe4   : > { %v2373_v56 = vrot.slane %v2371_v46, 5  ;;  %v2379_v57 = vrot.slane %v2377_v47, 5  ;;  %v1615_v59 = vshrl.u32 %v5059_v38, 16  ;;  %v1613_v61 = vsel %vm6352_vm2, %v1608_v49, %v1612_v34 }
  0xe5   : > { %v5163_v62 = vcombine.low %v1973_v42, %v1976_v55  ;;  %v2383_v63 = vrot.slane %v2381_v51, 4  ;;  %v2389_v0 = vrot.slane %v2387_v52, 5  ;;  %v5082_v3 = vcombine.low %v1603_v48, %v1613_v61  ;;  %v5063_v48 = vld [vmem:[%s6327_s8 + $0xac] sm:$0xf] }
  0xe6   : > { %4283 = vmatmul.mubr.bf16.gmra.mrb[92].mxu1 %v6243_v27  ;;  %v2374_v4 = vor.u32 %v2373_v56, %v2370_v45  ;;  %v1617_v5 = vrot.slane %v1615_v59, 4  ;;  %v1618_v6 = vshll.u32 %v5059_v38, 16  ;;  %v1624_v9 = vshll.u32 %v5060_v53, 16  ;;  %v5232_v27 = vld [vmem:[%s6327_s8 + $0x5c] sm:$0x1] }
  0xe7   : > { %v2384_v8 = vor.u32 %v2383_v63, %v2379_v57  ;;  %v1628_v50 = vshrl.u32 %v5060_v53, 16  ;;  %v1634_v10 = vshll.u32 %v5061_v58, 16  ;;  %4186 = vmatmul.mubr.bf16.gmra.mrb[92].mxu0 %v5082_v3  ;;  %v5148_v15 = vrot.slane %v5126_v1, 9  ;;  %v5064_v56 = vld [vmem:[%s6327_s8 + $0xb0] sm:$0x1] }
  0xe8   : > { %v2375_v13 = vrot.slane %v2374_v4, 4  ;;  %v1620_v14 = vrot.slane %v1618_v6, 5  ;;  %v1979_v16 = vrot.slane %v5127_v2, 5  ;;  %4193 = vmatprep.mubr.bf16.mxu0 %v5163_v62  ;;  %v1626_v19 = vrot.slane %v1624_v9, 5  ;;  %v5129_v62 = vld [vmem:[%s6327_s8 + $0xb4] sm:$0xe] }
  0xe9   : > { %v2385_v18 = vrot.slane %v2384_v8, 4  ;;  %v1630_v20 = vrot.slane %v1628_v50, 4  ;;  %v1636_v21 = vrot.slane %v1634_v10, 5  ;;  %v1982_v32 = vrot.slane %v5128_v7, 5  ;;  %v5130_v4 = vld [vmem:[%s6327_s8 + $0xb8] sm:$0xf] }
  0xea   : > { %v2380_v23 = vsel %vm6352_vm2, %v2375_v13, %v2379_v57  ;;  %v1621_v24 = vor.u32 %v1620_v14, %v1617_v5  ;;  %v1980_v25 = vsel %vm6492_vm5, %v5148_v15, %v1979_v16  ;;  %v1981_v26 = vrot.slane %v1979_v16, 4  ;;  %v5131_v5 = vld [vmem:[%s6327_s8 + $0xbc] sm:$0x1]  ;;  %v5233_v50 = vld [vmem:[%s6327_s8 + $0x60] sm:$0xf] }
  0xeb   : > { %v2390_v29 = vsel %vm6352_vm2, %v2385_v18, %v2389_v0  ;;  %v1631_v30 = vor.u32 %v1630_v20, %v1626_v19  ;;  %v2392_v33 = vshrl.u32 %v5230_v11, 16  ;;  %v2395_v39 = vshll.u32 %v5230_v11, 16  ;;  %v5234_v16 = vld [vmem:[%s6327_s8 + $0x64] sm:$0xf] }
  0xec   : > { %v5267_v37 = vcombine.low %v2380_v23, %v2390_v29  ;;  %v1622_v38 = vrot.slane %v1621_v24, 4  ;;  %v2401_v40 = vshll.u32 %v5231_v17, 16  ;;  %v1983_v45 = vsel %vm6492_vm5, %v1981_v26, %v1982_v32 }
  0xed   : > { %v1632_v44 = vrot.slane %v1631_v30, 4  ;;  %v2394_v46 = vrot.slane %v2392_v33, 4  ;;  %v2405_v47 = vshrl.u32 %v5231_v17, 16  ;;  %v5164_v52 = vcombine.low %v1980_v25, %v1983_v45  ;;  %v6246_v30 = vld [vmem:[%s6327_s8 + $0x54] sm:$0xff]  }
  0xee   : > { %4290 = vmatprep.mubr.bf16.mxu1 %v5267_v37  ;;  %v1627_v51 = vsel %vm6352_vm2, %v1622_v38, %v1626_v19  ;;  %v2397_v53 = vrot.slane %v2395_v39, 5  ;;  %v2403_v55 = vrot.slane %v2401_v40, 5  ;;  %v2411_v59 = vshll.u32 %v5232_v27, 16 }
  0xef   : > { %v1637_v57 = vsel %vm6352_vm2, %v1632_v44, %v1636_v21  ;;  %4291 = vmatmul.mubr.bf16.gmra.mrb[96].mxu1 %v6244_v22  ;;  %v2407_v58 = vrot.slane %v2405_v47, 4  ;;  %v1639_v61 = vshrl.u32 %v5062_v41, 16  ;;  %v1642_v2 = vshll.u32 %v5062_v41, 16  ;;  %v5235_v41 = vld [vmem:[%s6327_s8 + $0x68] sm:$0x1] }
  0xf0   : > { %v5083_v0 = vcombine.low %v1627_v51, %v1637_v57  ;;  %v2398_v1 = vor.u32 %v2397_v53, %v2394_v46  ;;  %v1648_v3 = vshll.u32 %v5063_v48, 16  ;;  %v2413_v7 = vrot.slane %v2411_v59, 5  ;;  %v5065_v53 = vld [vmem:[%s6327_s8 + $0xb4] sm:$0xf] }
  0xf1   : > { %v2408_v6 = vor.u32 %v2407_v58, %v2403_v55  ;;  %v1641_v8 = vrot.slane %v1639_v61, 4  ;;  %v1652_v9 = vshrl.u32 %v5063_v48, 16  ;;  %v1644_v13 = vrot.slane %v1642_v2, 5  ;;  %v5066_v61 = vld [vmem:[%s6327_s8 + $0xb8] sm:$0xf] }
  0xf2   : > { %4194 = vmatmul.mubr.bf16.gmra.mrb[96].mxu0 %v5083_v0  ;;  %v2399_v11 = vrot.slane %v2398_v1, 4  ;;  %v1650_v14 = vrot.slane %v1648_v3, 5  ;;  %v1658_v15 = vshll.u32 %v5064_v56, 16  ;;  %v5149_v19 = vrot.slane %v5129_v62, 9  ;;  %v5067_v3 = vld [vmem:[%s6327_s8 + $0xbc] sm:$0x1] }
  0xf3   : > { %4201 = vmatprep.mubr.bf16.mxu0 %v5164_v52  ;;  %v2409_v17 = vrot.slane %v2408_v6, 4  ;;  %v1654_v18 = vrot.slane %v1652_v9, 4  ;;  %v1986_v20 = vrot.slane %v5130_v4, 5  ;;  %v1645_v22 = vor.u32 %v1644_v13, %v1641_v8 }
  0xf4   : > { %v2404_v21 = vsel %vm6352_vm2, %v2399_v11, %v2403_v55  ;;  %v1660_v23 = vrot.slane %v1658_v15, 5  ;;  %v1989_v24 = vrot.slane %v5131_v5, 5  ;;  %v2416_v44 = vshrl.u32 %v5233_v50, 16 }
  0xf5   : > { %v2414_v27 = vsel %vm6352_vm2, %v2409_v17, %v2413_v7  ;;  %v1655_v29 = vor.u32 %v1654_v18, %v1650_v14  ;;  %v1987_v32 = vsel %vm6492_vm5, %v5149_v19, %v1986_v20  ;;  %v1988_v33 = vrot.slane %v1986_v20, 4  ;;  %v5133_v20 = vld [vmem:[%s6327_s8 + $0xc4] sm:$0xf] }
  0xf6   : > { %v5268_v39 = vcombine.low %v2404_v21, %v2414_v27  ;;  %v1646_v40 = vrot.slane %v1645_v22, 4  ;;  %v2419_v45 = vshll.u32 %v5233_v50, 16  ;;  %v2425_v51 = vshll.u32 %v5234_v16, 16  ;;  %v5134_v27 = vld [vmem:[%s6327_s8 + $0xc8] sm:$0x1] }
  0xf7   : > { %v1656_v47 = vrot.slane %v1655_v29, 4  ;;  %v1990_v48 = vsel %vm6492_vm5, %v1988_v33, %v1989_v24  ;;  %v2429_v52 = vshrl.u32 %v5234_v16, 16  ;;  %v2418_v58 = vrot.slane %v2416_v44, 4 }
  0xf8   : > { %4298 = vmatprep.mubr.bf16.mxu1 %v5268_v39  ;;  %v1651_v56 = vsel %vm6352_vm2, %v1646_v40, %v1650_v14  ;;  %v5165_v57 = vcombine.low %v1987_v32, %v1990_v48  ;;  %v2421_v59 = vrot.slane %v2419_v45, 5  ;;  %v2427_v0 = vrot.slane %v2425_v51, 5  ;;  %v5132_v14 = vld [vmem:[%s6327_s8 + $0xc0] sm:$0xe]  ;;  %v5236_v40 = vld [vmem:[%s6327_s8 + $0x6c] sm:$0xf] }
  0xf9   : > { %v1661_v62 = vsel %vm6352_vm2, %v1656_v47, %v1660_v23  ;;  %4299 = vmatmul.mubr.bf16.gmra.mrb[100].mxu1 %v6246_v30  ;;  %v2431_v1 = vrot.slane %v2429_v52, 4  ;;  %v2435_v2 = vshll.u32 %v5235_v41, 16  ;;  %v1663_v7 = vshrl.u32 %v5065_v53, 16  ;;  %v6247_v45 = vld [vmem:[%s6327_s8 + $0x60] sm:$0xff]  }
  0xfa   : > { %v5084_v5 = vcombine.low %v1651_v56, %v1661_v62  ;;  %v2422_v6 = vor.u32 %v2421_v59, %v2418_v58  ;;  %v1666_v8 = vshll.u32 %v5065_v53, 16  ;;  %v1672_v11 = vshll.u32 %v5066_v61, 16  ;;  %v5238_v58 = vld [vmem:[%s6327_s8 + $0x74] sm:$0x1] }
  0xfb   : > { %v2432_v9 = vor.u32 %v2431_v1, %v2427_v0  ;;  %v2437_v50 = vrot.slane %v2435_v2, 5  ;;  %v1676_v13 = vshrl.u32 %v5066_v61, 16  ;;  %v1665_v17 = vrot.slane %v1663_v7, 4  ;;  %v5069_v2 = vld [vmem:[%s6327_s8 + $0xc4] sm:$0xf] }
  0xfc   : > { %4202 = vmatmul.mubr.bf16.gmra.mrb[100].mxu0 %v5084_v5  ;;  %v2423_v16 = vrot.slane %v2422_v6, 4  ;;  %v1668_v18 = vrot.slane %v1666_v8, 5  ;;  %v1682_v19 = vshll.u32 %v5067_v3, 16  ;;  %v1674_v22 = vrot.slane %v1672_v11, 5 }
  0xfd   : > { %4209 = vmatprep.mubr.bf16.mxu0 %v5165_v57  ;;  %v2433_v21 = vrot.slane %v2432_v9, 4  ;;  %v1678_v23 = vrot.slane %v1676_v13, 4  ;;  %v5150_v56 = vrot.slane %v5132_v14, 9  ;;  %v1993_v57 = vrot.slane %v5133_v20, 5  ;;  %v5070_v14 = vld [vmem:[%s6327_s8 + $0xc8] sm:$0x1] }
  0xfe   : > { %v2428_v30 = vsel %vm6352_vm2, %v2423_v16, %v2427_v0  ;;  %v1669_v32 = vor.u32 %v1668_v18, %v1665_v17  ;;  %v1684_v33 = vrot.slane %v1682_v19, 5  ;;  %v1996_v61 = vrot.slane %v5134_v27, 5 }
  0xff   : > { %v2440_v62 = vshrl.u32 %v5236_v40, 16  ;;  %v1995_v0 = vrot.slane %v1993_v57, 4  ;;  %v2459_v13 = vshll.u32 %v5238_v58, 16  ;;  %v1700_v27 = vshrl.u32 %v5069_v2, 16 }
 0x100   : > { %v1670_v53 = vrot.slane %v1669_v32, 4 }
 0x101   : > { %v6995_v43 = vpop.f32.mrb[0].mxu0  ;;  %v7000_v54 = vpop.f32.mrb[0].mxu1  ;;  %v2442_v5 = vrot.slane %v2440_v62, 4 }
 0x102   : > { %v7005_v60 = vpop.f32.mrb[1].mxu0  ;;  %v7013_v12 = vpop.f32.mrb[1].mxu1 }
 0x103   : > { %v7022_v28 = vpop.f32.mrb[2].mxu0  ;;  %v7026_v34 = vpop.f32.mrb[2].mxu1  ;;  %v7089_v24 = vadd.f32 %v7005_v60, %v6995_v43  ;;  %v7098_v39 = vadd.f32 %v7013_v12, %v7000_v54  ;;  %v2438_v43 = vsel %vm6352_vm2, %v2433_v21, %v2437_v50  ;;  %v1679_v60 = vor.u32 %v1678_v23, %v1674_v22  ;;  %v5237_v12 = vld [vmem:[%s6327_s8 + $0x70] sm:$0xf] }
 0x104   : > { %v7028_v36 = vpop.f32.mrb[3].mxu0  ;;  %v7031_v42 = vpop.f32.mrb[3].mxu1  ;;  %v5269_v52 = vcombine.low %v2428_v30, %v2438_v43  ;;  %v2449_v1 = vshll.u32 %v5237_v12, 16  ;;  %v2453_v7 = vshrl.u32 %v5237_v12, 16  ;;  %v1997_v50 = vsel %vm6492_vm5, %v1995_v0, %v1996_v61  ;;  %v5239_v30 = vld [vmem:[%s6327_s8 + $0x78] sm:$0xf] }
 0x105   : > { %7903 = vst [vmem:[#allocation3_spill] sm:$0xff] %v7098_v39  ;;  %v7110_v47 = vadd.f32 %v7028_v36, %v7022_v28  ;;  %v7114_v54 = vadd.f32 %v7031_v42, %v7026_v34  ;;  %v1680_v59 = vrot.slane %v1679_v60, 4  ;;  %v2443_v28 = vshll.u32 %v5236_v40, 16  ;;  %v5068_v36 = vld [vmem:[%s6327_s8 + $0xc0] sm:$0xf] }
 0x106   : > { %4306 = vmatprep.mubr.bf16.mxu1 %v5269_v52  ;;  %v1675_v34 = vsel %vm6352_vm2, %v1670_v53, %v1674_v22  ;;  %v1994_v42 = vsel %vm6492_vm5, %v5150_v56, %v1993_v57  ;;  %v2451_v11 = vrot.slane %v2449_v1, 5  ;;  %v2455_v18 = vrot.slane %v2453_v7, 4 }
 0x107   : > { %7904 = vst [vmem:[#allocation4_spill] sm:$0xff] %v7114_v54  ;;  %v1685_v3 = vsel %vm6352_vm2, %v1680_v59, %v1684_v33  ;;  %4307 = vmatmul.mubr.bf16.gmra.mrb[104].mxu1 %v6247_v45  ;;  %v2445_v6 = vrot.slane %v2443_v28, 5  ;;  %v5166_v16 = vcombine.low %v1994_v42, %v1997_v50  ;;  %v1687_v19 = vshrl.u32 %v5068_v36, 16  ;;  %v5240_v59 = vld [vmem:[%s6327_s8 + $0x7c] sm:$0xf] }
 0x108   : > { %v5085_v9 = vcombine.low %v1675_v34, %v1685_v3  ;;  %v2461_v21 = vrot.slane %v2459_v13, 5  ;;  %v1690_v22 = vshll.u32 %v5068_v36, 16  ;;  %v1696_v23 = vshll.u32 %v5069_v2, 16  ;;  %v5241_v2 = vld [vmem:[%s6327_s8 + $0x80] sm:$0x1] }
 0x109   : > { %v7036_v49 = vpop.f32.mrb[4].mxu0  ;;  %v7044_v63 = vpop.f32.mrb[4].mxu1  ;;  %v2446_v17 = vor.u32 %v2445_v6, %v2442_v5  ;;  %v2456_v43 = vor.u32 %v2455_v18, %v2451_v11  ;;  %v1689_v60 = vrot.slane %v1687_v19, 4  ;;  %v1706_v45 = vshll.u32 %v5070_v14, 16  ;;  %v5279_v3 = vld [vmem:[%s6327_s8 + $0x18] sm:$0xe] }
 0x10a   : > { %v7049_v10 = vpop.f32.mrb[5].mxu0  ;;  %v7054_v25 = vpop.f32.mrb[5].mxu1  ;;  %4210 = vmatmul.mubr.bf16.gmra.mrb[104].mxu0 %v5085_v9  ;;  %v1692_v53 = vrot.slane %v1690_v22, 5  ;;  %v1698_v56 = vrot.slane %v1696_v23, 5  ;;  %v1702_v57 = vrot.slane %v1700_v27, 4  ;;  %v2464_v6 = vshrl.u32 %v5239_v30, 16 }
 0x10b   : > { %v7056_v26 = vpop.f32.mrb[6].mxu0  ;;  %v7063_v37 = vpop.f32.mrb[6].mxu1  ;;  %4217 = vmatprep.mubr.bf16.mxu0 %v5166_v16  ;;  %v2447_v40 = vrot.slane %v2446_v17, 4  ;;  %v7148_v58 = vadd.f32 %v7049_v10, %v7036_v49  ;;  %v2457_v28 = vrot.slane %v2456_v43, 4  ;;  %v1708_v36 = vrot.slane %v1706_v45, 5 }
 0x10c   : > { %v7065_v38 = vpop.f32.mrb[7].mxu0  ;;  %v7068_v46 = vpop.f32.mrb[7].mxu1  ;;  %v7157_v34 = vadd.f32 %v7054_v25, %v7044_v63  ;;  %v1693_v49 = vor.u32 %v1692_v53, %v1689_v60  ;;  %v1703_v10 = vor.u32 %v1702_v57, %v1698_v56  ;;  %v5280_v5 = vld [vmem:[%s6327_s8 + $0x1c] sm:$0xf]  ;;  %v6249_v25 = vld [vmem:[%s6327_s8 + $0x6c] sm:$0xff]   ;;  %v2467_v7 = vshll.u32 %v5239_v30, 16 }
 0x10d   : > { %v2452_v62 = vsel %vm6352_vm2, %v2447_v40, %v2451_v11  ;;  %v7163_v0 = vadd.f32 %v7065_v38, %v7056_v26  ;;  %v7167_v1 = vadd.f32 %v7068_v46, %v7063_v37  ;;  %v2462_v63 = vsel %vm6352_vm2, %v2457_v28, %v2461_v21  ;;  %v5281_v50 = vld [vmem:[%s6327_s8 + $0x20] sm:$0x1]  ;;  %v5282_v11 = vld [vmem:[%s6327_s8 + $0x24] sm:$0xe]  ;;  %v5283_v13 = vld [vmem:[%s6327_s8 + $0x28] sm:$0xf] }
 0x10e   : > { %7905 = vst [vmem:[#allocation5_spill] sm:$0xff] %v7157_v34  ;;  %v2473_v9 = vshll.u32 %v5240_v59, 16  ;;  %v5270_v26 = vcombine.low %v2452_v62, %v2462_v63  ;;  %v1694_v38 = vrot.slane %v1693_v49, 4  ;;  %v1704_v14 = vrot.slane %v1703_v10, 4  ;;  %v5284_v27 = vld [vmem:[%s6327_s8 + $0x2c] sm:$0x1] }
 0x10f   : > { %7906 = vst [vmem:[#allocation6_spill] sm:$0xff] %v7167_v1  ;;  %v2477_v16 = vshrl.u32 %v5240_v59, 16  ;;  %v2466_v37 = vrot.slane %v2464_v6, 4  ;;  %v2469_v46 = vrot.slane %v2467_v7, 5  ;;  %v2483_v18 = vshll.u32 %v5241_v2, 16  ;;  %v6250_v6 = vld [vmem:[%s6327_s8 + $0x78] sm:$0xff]  }
 0x110   : > { %v2475_v17 = vrot.slane %v2473_v9, 5  ;;  %4314 = vmatprep.mubr.bf16.mxu1 %v5270_v26  ;;  %v1699_v19 = vsel %vm6352_vm2, %v1694_v38, %v1698_v56  ;;  %v1709_v21 = vsel %vm6352_vm2, %v1704_v14, %v1708_v36  ;;  %v5327_v23 = vrot.slane %v5279_v3, 9 }
 0x111   : > { %v7073_v55 = vpop.f32.mrb[8].mxu0  ;;  %v7084_v15 = vpop.f32.mrb[8].mxu1  ;;  %v2479_v22 = vrot.slane %v2477_v16, 4  ;;  %v5086_v30 = vcombine.low %v1699_v19, %v1709_v21  ;;  %4315 = vmatmul.mubr.bf16.gmra.mrb[108].mxu1 %v6249_v25  ;;  %v2470_v40 = vor.u32 %v2469_v46, %v2466_v37  ;;  %v2485_v43 = vrot.slane %v2483_v18, 5  ;;  %v5244_v37 = vld [vmem:[%s6327_s8 + $0x8c] sm:$0x1] }
 0x112   : > { %v7081_v4 = vpop.f32.mrb[9].mxu0  ;;  %v7092_v29 = vpop.f32.mrb[9].mxu1  ;;  %v2833_v60 = vrot.slane %v5280_v5, 5  ;;  %v2836_v59 = vrot.slane %v5281_v50, 5  ;;  %v5328_v62 = vrot.slane %v5282_v11, 9  ;;  %v2840_v56 = vrot.slane %v5283_v13, 5 }
 0x113   : > { %v7101_v41 = vpop.f32.mrb[10].mxu0  ;;  %v7103_v44 = vpop.f32.mrb[10].mxu1  ;;  %v2480_v57 = vor.u32 %v2479_v22, %v2475_v17  ;;  %4218 = vmatmul.mubr.bf16.gmra.mrb[108].mxu0 %v5086_v30  ;;  %v2471_v49 = vrot.slane %v2470_v40, 4  ;;  %v2843_v3 = vrot.slane %v5284_v27, 5  ;;  %v7202_v50 = vadd.f32 %v7081_v4, %v7073_v55  ;;  %v5242_v11 = vld [vmem:[%s6327_s8 + $0x84] sm:$0xf] }
 0x114   : > { %v7117_v48 = vpop.f32.mrb[11].mxu0  ;;  %v7119_v51 = vpop.f32.mrb[11].mxu1  ;;  %v2834_v10 = vsel %vm6492_vm5, %v5327_v23, %v2833_v60  ;;  %v2835_v2 = vrot.slane %v2833_v60, 4  ;;  %v2841_v7 = vsel %vm6492_vm5, %v5328_v62, %v2840_v56  ;;  %v2842_v9 = vrot.slane %v2840_v56, 4  ;;  %v5243_v4 = vld [vmem:[%s6327_s8 + $0x88] sm:$0xf] }
 0x115   : > { %v2481_v25 = vrot.slane %v2480_v57, 4  ;;  %v2476_v38 = vsel %vm6352_vm2, %v2471_v49, %v2475_v17  ;;  %v7215_v16 = vadd.f32 %v7092_v29, %v7084_v15  ;;  %v7219_v55 = vadd.f32 %v7117_v48, %v7101_v41  ;;  %v5285_v46 = vld [vmem:[%s6327_s8 + $0x30] sm:$0xe]  ;;  %v5286_v15 = vld [vmem:[%s6327_s8 + $0x34] sm:$0xf] }
 0x116   : > { %v2837_v14 = vsel %vm6492_vm5, %v2835_v2, %v2836_v59  ;;  %v2844_v19 = vsel %vm6492_vm5, %v2842_v9, %v2843_v3  ;;  %v7230_v21 = vadd.f32 %v7119_v51, %v7103_v44  ;;  %v5287_v29 = vld [vmem:[%s6327_s8 + $0x38] sm:$0x1]  ;;  %v2488_v48 = vshrl.u32 %v5242_v11, 16  ;;  %v5288_v27 = vld [vmem:[%s6327_s8 + $0x3c] sm:$0xe] }
 0x117   : > { %7907 = vst [vmem:[#allocation7_spill] sm:$0xff] %v7215_v16  ;;  %v2486_v18 = vsel %vm6352_vm2, %v2481_v25, %v2485_v43  ;;  %v5343_v17 = vcombine.low %v2834_v10, %v2837_v14  ;;  %v5344_v41 = vcombine.low %v2841_v7, %v2844_v19  ;;  %v2491_v23 = vshll.u32 %v5242_v11, 16  ;;  %v5289_v57 = vld [vmem:[%s6327_s8 + $0x40] sm:$0xf]  ;;  %v5290_v56 = vld [vmem:[%s6327_s8 + $0x44] sm:$0x1] }
 0x118   : > { %7908 = vst [vmem:[#allocation8_spill] sm:$0xff] %v7230_v21  ;;  %v5271_v22 = vcombine.low %v2476_v38, %v2486_v18  ;;  %v2497_v30 = vshll.u32 %v5243_v4, 16  ;;  %v2501_v40 = vshrl.u32 %v5243_v4, 16  ;;  %v2507_v43 = vshll.u32 %v5244_v37, 16  ;;  %v5245_v14 = vld [vmem:[%s6327_s8 + $0x90] sm:$0xf] }
 0x119   : > { %v7130_v8 = vpop.f32.mrb[12].mxu0  ;;  %v7138_v32 = vpop.f32.mrb[12].mxu1  ;;  %6081 = vmatprep.mubr.bf16.mxu0 %v5343_v17  ;;  %v5329_v60 = vrot.slane %v5285_v46, 9  ;;  %v2490_v59 = vrot.slane %v2488_v48, 4  ;;  %v2493_v62 = vrot.slane %v2491_v23, 5  ;;  %v2847_v44 = vrot.slane %v5286_v15, 5 }
 0x11a   : > { %v7135_v20 = vpop.f32.mrb[13].mxu0  ;;  %v7142_v12 = vpop.f32.mrb[13].mxu1  ;;  %4322 = vmatprep.mubr.bf16.mxu1 %v5271_v22  ;;  %v2850_v51 = vrot.slane %v5287_v29, 5  ;;  %v2499_v49 = vrot.slane %v2497_v30, 5  ;;  %v2503_v10 = vrot.slane %v2501_v40, 4  ;;  %v2509_v2 = vrot.slane %v2507_v43, 5 }
 0x11b   : > { %v7140_v33 = vpop.f32.mrb[14].mxu0  ;;  %v7151_v61 = vpop.f32.mrb[14].mxu1  ;;  %4323 = vmatmul.mubr.bf16.gmra.mrb[112].mxu1 %v6250_v6  ;;  %v5330_v3 = vrot.slane %v5288_v27, 9  ;;  %6082 = vmatmul.mubr.bf16.vlgmr.msra.gmra.mrb[112].mxu0 %v5344_v41  ;;  %v2494_v7 = vor.u32 %v2493_v62, %v2490_v59  ;;  %v2848_v9 = vsel %vm6492_vm5, %v5329_v60, %v2847_v44  ;;  %v2849_v11 = vrot.slane %v2847_v44, 4  ;;  %v5246_v19 = vld [vmem:[%s6327_s8 + $0x94] sm:$0xf] }
 0x11c   : > { %v7144_v52 = vpop.f32.mrb[15].mxu0  ;;  %v7159_v42 = vpop.f32.mrb[15].mxu1  ;;  %v2854_v38 = vrot.slane %v5289_v57, 5  ;;  %v2504_v6 = vor.u32 %v2503_v10, %v2499_v49  ;;  %v2857_v46 = vrot.slane %v5290_v56, 5  ;;  %v7248_v18 = vadd.f32 %v7135_v20, %v7130_v8  ;;  %v5247_v20 = vld [vmem:[%s6327_s8 + $0x98] sm:$0x1] }
 0x11d   : > { %v7252_v17 = vadd.f32 %v7142_v12, %v7138_v32  ;;  %v2495_v22 = vrot.slane %v2494_v7, 4  ;;  %v2851_v41 = vsel %vm6492_vm5, %v2849_v11, %v2850_v51  ;;  %v6251_v30 = vld [vmem:[%s6327_s8 + $0x84] sm:$0xff]   ;;  %v7271_v40 = vadd.f32 %v7144_v52, %v7140_v33  ;;  %v5292_v57 = vld [vmem:[%s6327_s8 + $0x4c] sm:$0xf]  ;;  %v5293_v10 = vld [vmem:[%s6327_s8 + $0x50] sm:$0x1] }
 0x11e   : > { %v2855_v48 = vsel %vm6492_vm5, %v5330_v3, %v2854_v38  ;;  %v2856_v8 = vrot.slane %v2854_v38, 4  ;;  %v2505_v12 = vrot.slane %v2504_v6, 4  ;;  %v5345_v27 = vcombine.low %v2848_v9, %v2851_v41  ;;  %v5291_v60 = vld [vmem:[%s6327_s8 + $0x48] sm:$0xe]  ;;  %v5294_v3 = vld [vmem:[%s6327_s8 + $0x54] sm:$0xe] }
 0x11f   : > { %7909 = vst [vmem:[#allocation9_spill] sm:$0xff] %v7252_v17  ;;  %v7275_v43 = vadd.f32 %v7159_v42, %v7151_v61  ;;  %v2500_v62 = vsel %vm6352_vm2, %v2495_v22, %v2499_v49  ;;  %v2512_v51 = vshrl.u32 %v5245_v14, 16  ;;  %v2515_v56 = vshll.u32 %v5245_v14, 16  ;;  %v5295_v49 = vld [vmem:[%s6327_s8 + $0x58] sm:$0xf] }
 0x120   : > { %v2858_v44 = vsel %vm6492_vm5, %v2856_v8, %v2857_v46  ;;  %v2510_v33 = vsel %vm6352_vm2, %v2505_v12, %v2509_v2  ;;  %6085 = vmatprep.mubr.bf16.mxu0 %v5345_v27  ;;  %v2521_v61 = vshll.u32 %v5246_v19, 16  ;;  %v2525_v42 = vshrl.u32 %v5246_v19, 16  ;;  %v5296_v41 = vld [vmem:[%s6327_s8 + $0x5c] sm:$0x1]  ;;  %v5313_v16 = vld [vmem:[%s6327_s8 + $0xa0] sm:$0xf] }
 0x121   : > { %v7183_v45 = vpop.f32.mrb[16].mxu0  ;;  %v7185_v53 = vpop.f32.mrb[16].mxu1  ;;  %7910 = vst [vmem:[#allocation10_spill] sm:$0xff] %v7275_v43  ;;  %v5346_v52 = vcombine.low %v2855_v48, %v2858_v44  ;;  %v5272_v7 = vcombine.low %v2500_v62, %v2510_v33  ;;  %v2514_v9 = vrot.slane %v2512_v51, 4  ;;  %v2517_v11 = vrot.slane %v2515_v56, 5 }
 0x122   : > { %v7187_v28 = vpop.f32.mrb[17].mxu0  ;;  %v7189_v36 = vpop.f32.mrb[17].mxu1  ;;  %v2531_v38 = vshll.u32 %v5247_v20, 16  ;;  %v2523_v6 = vrot.slane %v2521_v61, 5  ;;  %v2527_v22 = vrot.slane %v2525_v42, 4  ;;  %v5331_v46 = vrot.slane %v5291_v60, 9 }
 0x123   : > { %v7193_v5 = vpop.f32.mrb[18].mxu0  ;;  %v7195_v63 = vpop.f32.mrb[18].mxu1  ;;  %v2861_v14 = vrot.slane %v5292_v57, 5  ;;  %4330 = vmatprep.mubr.bf16.mxu1 %v5272_v7  ;;  %6086 = vmatmul.mubr.bf16.gmra.mrb[116].mxu0 %v5346_v52  ;;  %v2518_v8 = vor.u32 %v2517_v11, %v2514_v9  ;;  %v2864_v12 = vrot.slane %v5293_v10, 5  ;;  %v5332_v48 = vrot.slane %v5294_v3, 9 }
 0x124   : > { %v7205_v13 = vpop.f32.mrb[19].mxu0  ;;  %v7207_v26 = vpop.f32.mrb[19].mxu1  ;;  %v2533_v2 = vrot.slane %v2531_v38, 5  ;;  %4331 = vmatmul.mubr.bf16.gmra.mrb[116].mxu1 %v6251_v30  ;;  %v2528_v20 = vor.u32 %v2527_v22, %v2523_v6  ;;  %v2868_v57 = vrot.slane %v5295_v49, 5  ;;  %v5248_v44 = vld [vmem:[%s6327_s8 + $0x9c] sm:$0xf]  ;;  %v7304_v52 = vadd.f32 %v7187_v28, %v7183_v45 }
 0x125   : > { %v2862_v62 = vsel %vm6492_vm5, %v5331_v46, %v2861_v14  ;;  %v2863_v60 = vrot.slane %v2861_v14, 4  ;;  %v2519_v10 = vrot.slane %v2518_v8, 4  ;;  %v2871_v33 = vrot.slane %v5296_v41, 5  ;;  %v5249_v61 = vld [vmem:[%s6327_s8 + $0xa0] sm:$0xf] }
 0x126   : > { %v5723_v30 = vadd.f32 %v7189_v36, %v7185_v53  ;;  %v2529_v7 = vrot.slane %v2528_v20, 4  ;;  %v2869_v45 = vsel %vm6492_vm5, %v5332_v48, %v2868_v57  ;;  %v2870_v28 = vrot.slane %v2868_v57, 4  ;;  %v5250_v11 = vld [vmem:[%s6327_s8 + $0xa4] sm:$0x1]  ;;  %v5297_v14 = vld [vmem:[%s6327_s8 + $0x60] sm:$0xe] }
 0x127   : > { %v2865_v9 = vsel %vm6492_vm5, %v2863_v60, %v2864_v12  ;;  %v2524_v36 = vsel %vm6352_vm2, %v2519_v10, %v2523_v6  ;;  %v7329_v46 = vadd.f32 %v7205_v13, %v7193_v5  ;;  %v5298_v41 = vld [vmem:[%s6327_s8 + $0x64] sm:$0xf]  ;;  %v5299_v8 = vld [vmem:[%s6327_s8 + $0x68] sm:$0x1]  ;;  %v6252_v48 = vld [vmem:[%s6327_s8 + $0x90] sm:$0xff]   ;;  %v2536_v20 = vshrl.u32 %v5248_v44, 16 }
 0x128   : > { %v5347_v49 = vcombine.low %v2862_v62, %v2865_v9  ;;  %v7325_v22 = vadd.f32 %v5723_v30, %v7089_v24  ;;  %v2534_v12 = vsel %vm6352_vm2, %v2529_v7, %v2533_v2  ;;  %v2872_v6 = vsel %vm6492_vm5, %v2870_v28, %v2871_v33  ;;  %v5300_v57 = vld [vmem:[%s6327_s8 + $0x6c] sm:$0xe]  ;;  %v5301_v10 = vld [vmem:[%s6327_s8 + $0x70] sm:$0xf]  ;;  %v5302_v43 = vld [vmem:[%s6327_s8 + $0x74] sm:$0x1] }
 0x129   : > { %v7237_v25 = vpop.f32.mrb[20].mxu1  ;;  %v7242_v4 = vpop.f32.mrb[20].mxu0  ;;  %v5726_v24 = vadd.f32 %v7207_v26, %v7195_v63  ;;  %v5273_v62 = vcombine.low %v2524_v36, %v2534_v12  ;;  %v5348_v60 = vcombine.low %v2869_v45, %v2872_v6  ;;  %v2539_v5 = vshll.u32 %v5248_v44, 16 }
 0x12a   : > { %v7244_v37 = vpop.f32.mrb[21].mxu1  ;;  %v7255_v15 = vpop.f32.mrb[21].mxu0  ;;  %6089 = vmatprep.mubr.bf16.mxu0 %v5347_v49  ;;  %v2545_v13 = vshll.u32 %v5249_v61, 16  ;;  %v2538_v2 = vrot.slane %v2536_v20, 4  ;;  %v2549_v7 = vshrl.u32 %v5249_v61, 16  ;;  %v2555_v9 = vshll.u32 %v5250_v11, 16 }
 0x12b   : > { %v7257_v29 = vpop.f32.mrb[22].mxu1  ;;  %v7264_v23 = vpop.f32.mrb[22].mxu0  ;;  %v7344_v30 = vadd.f32 %v5726_v24, %v7110_v47  ;;  %4338 = vmatprep.mubr.bf16.mxu1 %v5273_v62  ;;  %6090 = vmatmul.mubr.bf16.gmra.mrb[120].mxu0 %v5348_v60  ;;  %v2541_v63 = vrot.slane %v2539_v5, 5  ;;  %v5333_v33 = vrot.slane %v5297_v14, 9  ;;  %v2875_v28 = vrot.slane %v5298_v41, 5 }
 0x12c   : > { %v7266_v32 = vpop.f32.mrb[23].mxu1  ;;  %v7279_v59 = vpop.f32.mrb[23].mxu0  ;;  %v2547_v26 = vrot.slane %v2545_v13, 5  ;;  %4339 = vmatmul.mubr.bf16.gmra.mrb[120].mxu1 %v6252_v48  ;;  %v2551_v36 = vrot.slane %v2549_v7, 4  ;;  %v2557_v47 = vrot.slane %v2555_v9, 5  ;;  %v2878_v61 = vrot.slane %v5299_v8, 5 }
 0x12d   : > { %7911 = vst [vmem:[#allocation11_spill] sm:$0xff] %v7344_v30  ;;  %v5334_v11 = vrot.slane %v5300_v57, 9  ;;  %v2542_v6 = vor.u32 %v2541_v63, %v2538_v2  ;;  %v2876_v14 = vsel %vm6492_vm5, %v5333_v33, %v2875_v28  ;;  %v2877_v41 = vrot.slane %v2875_v28, 4  ;;  %v5251_v13 = vld [vmem:[%s6327_s8 + $0xa8] sm:$0xf] }
 0x12e   : > { %v2882_v24 = vrot.slane %v5301_v10, 5  ;;  %v2552_v62 = vor.u32 %v2551_v36, %v2547_v26  ;;  %v2885_v60 = vrot.slane %v5302_v43, 5  ;;  %v7365_v8 = vadd.f32 %v7255_v15, %v7242_v4  ;;  %v5252_v57 = vld [vmem:[%s6327_s8 + $0xac] sm:$0xf]  ;;  %v5253_v63 = vld [vmem:[%s6327_s8 + $0xb0] sm:$0x1] }
 0x12f   : > { %v5729_v5 = vadd.f32 %v7244_v37, %v7237_v25  ;;  %v2543_v10 = vrot.slane %v2542_v6, 4  ;;  %v2879_v7 = vsel %vm6492_vm5, %v2877_v41, %v2878_v61  ;;  %v5303_v4 = vld [vmem:[%s6327_s8 + $0x78] sm:$0xe]  ;;  %v7384_v37 = vadd.f32 %v7279_v59, %v7264_v23  ;;  %v5304_v28 = vld [vmem:[%s6327_s8 + $0x7c] sm:$0xf] }
 0x130   : > { %v2883_v43 = vsel %vm6492_vm5, %v5334_v11, %v2882_v24  ;;  %v2884_v9 = vrot.slane %v2882_v24, 4  ;;  %v2553_v15 = vrot.slane %v2552_v62, 4  ;;  %v5349_v33 = vcombine.low %v2876_v14, %v2879_v7  ;;  %v6253_v61 = vld [vmem:[%s6327_s8 + $0x9c] sm:$0xff]   ;;  %v5306_v62 = vld [vmem:[%s6327_s8 + $0x84] sm:$0xe] }
 0x131   : > { %v7291_v19 = vpop.f32.mrb[24].mxu0  ;;  %v7293_v27 = vpop.f32.mrb[24].mxu1  ;;  %v7380_v25 = vadd.f32 %v5729_v5, %v7148_v58  ;;  %v2548_v36 = vsel %vm6352_vm2, %v2543_v10, %v2547_v26  ;;  %v5732_v6 = vadd.f32 %v7266_v32, %v7257_v29  ;;  %v2560_v14 = vshrl.u32 %v5251_v13, 16  ;;  %v5305_v41 = vld [vmem:[%s6327_s8 + $0x80] sm:$0x1] }
 0x132   : > { %v7298_v51 = vpop.f32.mrb[25].mxu0  ;;  %v7300_v56 = vpop.f32.mrb[25].mxu1  ;;  %v2886_v11 = vsel %vm6492_vm5, %v2884_v9, %v2885_v60  ;;  %v2558_v58 = vsel %vm6352_vm2, %v2553_v15, %v2557_v47  ;;  %6093 = vmatprep.mubr.bf16.mxu0 %v5349_v33  ;;  %v2563_v59 = vshll.u32 %v5251_v13, 16  ;;  %v2569_v24 = vshll.u32 %v5252_v57, 16  ;;  %v5307_v5 = vld [vmem:[%s6327_s8 + $0x88] sm:$0xf] }
 0x133   : > { %v7309_v42 = vpop.f32.mrb[26].mxu0  ;;  %v7311_v3 = vpop.f32.mrb[26].mxu1  ;;  %7912 = vst [vmem:[#allocation12_spill] sm:$0xff] %v7380_v25  ;;  %v5350_v23 = vcombine.low %v2883_v43, %v2886_v11  ;;  %v5274_v26 = vcombine.low %v2548_v36, %v2558_v58  ;;  %v7400_v10 = vadd.f32 %v5732_v6, %v7163_v0  ;;  %v2562_v7 = vrot.slane %v2560_v14, 4  ;;  %v5308_v9 = vld [vmem:[%s6327_s8 + $0x8c] sm:$0x1] }
 0x134   : > { %v7318_v38 = vpop.f32.mrb[27].mxu0  ;;  %v7320_v53 = vpop.f32.mrb[27].mxu1  ;;  %v2573_v60 = vshrl.u32 %v5252_v57, 16  ;;  %v2565_v32 = vrot.slane %v2563_v59, 5  ;;  %v2571_v47 = vrot.slane %v2569_v24, 5  ;;  %v2579_v15 = vshll.u32 %v5253_v63, 16 }
 0x135   : > { %7913 = vst [vmem:[#allocation13_spill] sm:$0xff] %v7400_v10  ;;  %6094 = vmatmul.mubr.bf16.gmra.mrb[124].mxu0 %v5350_v23  ;;  %v5335_v43 = vrot.slane %v5303_v4, 9  ;;  %4346 = vmatprep.mubr.bf16.mxu1 %v5274_v26  ;;  %v2889_v0 = vrot.slane %v5304_v28, 5  ;;  %v2892_v11 = vrot.slane %v5305_v41, 5  ;;  %v5336_v57 = vrot.slane %v5306_v62, 9 }
 0x136   : > { %v2575_v36 = vrot.slane %v2573_v60, 4  ;;  %4347 = vmatmul.mubr.bf16.gmra.mrb[124].mxu1 %v6253_v61  ;;  %v2566_v58 = vor.u32 %v2565_v32, %v2562_v7  ;;  %v2581_v63 = vrot.slane %v2579_v15, 5  ;;  %v2896_v4 = vrot.slane %v5307_v5, 5  ;;  %v5254_v61 = vld [vmem:[%s6327_s8 + $0xb4] sm:$0xf] }
 0x137   : > { %v2899_v23 = vrot.slane %v5308_v9, 5  ;;  %v2890_v41 = vsel %vm6492_vm5, %v5335_v43, %v2889_v0  ;;  %v2891_v62 = vrot.slane %v2889_v0, 4  ;;  %v7423_v26 = vadd.f32 %v7298_v51, %v7291_v19  ;;  %v5255_v7 = vld [vmem:[%s6327_s8 + $0xb8] sm:$0xf]  ;;  %v5256_v15 = vld [vmem:[%s6327_s8 + $0xbc] sm:$0x1] }
 0x138   : > { %v2576_v28 = vor.u32 %v2575_v36, %v2571_v47  ;;  %v2567_v60 = vrot.slane %v2566_v58, 4  ;;  %v2897_v5 = vsel %vm6492_vm5, %v5336_v57, %v2896_v4  ;;  %v2898_v9 = vrot.slane %v2896_v4, 4  ;;  %v5309_v43 = vld [vmem:[%s6327_s8 + $0x90] sm:$0xe]  ;;  %v5310_v57 = vld [vmem:[%s6327_s8 + $0x94] sm:$0xf] }
 0x139   : > { %v7347_v17 = vpop.f32.mrb[28].mxu1  ;;  %v7349_v45 = vpop.f32.mrb[28].mxu0  ;;  %v5735_v32 = vadd.f32 %v7300_v56, %v7293_v27  ;;  %v2893_v19 = vsel %vm6492_vm5, %v2891_v62, %v2892_v11  ;;  %v7437_v51 = vadd.f32 %v7318_v38, %v7309_v42  ;;  %v5738_v0 = vadd.f32 %v7320_v53, %v7311_v3  ;;  %v5311_v11 = vld [vmem:[%s6327_s8 + $0x98] sm:$0x1]  ;;  %v6254_v38 = vld [vmem:[%s6327_s8 + $0xa8] sm:$0xff]  }
 0x13a   : > { %v7351_v44 = vpop.f32.mrb[29].mxu1  ;;  %v7353_v49 = vpop.f32.mrb[29].mxu0  ;;  %v2577_v36 = vrot.slane %v2576_v28, 4  ;;  %v2572_v58 = vsel %vm6352_vm2, %v2567_v60, %v2571_v47  ;;  %v5351_v27 = vcombine.low %v2890_v41, %v2893_v19  ;;  %v2900_v56 = vsel %vm6492_vm5, %v2898_v9, %v2899_v23  ;;  %v5312_v28 = vld [vmem:[%s6327_s8 + $0x9c] sm:$0xe] }
 0x13b   : > { %v7355_v12 = vpop.f32.mrb[30].mxu1  ;;  %v7359_v20 = vpop.f32.mrb[30].mxu0  ;;  %v7447_v4 = vadd.f32 %v5735_v32, %v7202_v50  ;;  %v5352_v62 = vcombine.low %v2897_v5, %v2900_v56  ;;  %v7455_v3 = vadd.f32 %v5738_v0, %v7219_v55  ;;  %v2584_v53 = vshrl.u32 %v5254_v61, 16  ;;  %v7459_v47 = vld [vmem:[%s6327_s8 + $0xa4] sm:$0x1] }
 0x13c   : > { %v7361_v48 = vpop.f32.mrb[31].mxu1  ;;  %v7371_v2 = vpop.f32.mrb[31].mxu0  ;;  %v2582_v42 = vsel %vm6352_vm2, %v2577_v36, %v2581_v63  ;;  %6097 = vmatprep.mubr.bf16.mxu0 %v5351_v27  ;;  %v2587_v60 = vshll.u32 %v5254_v61, 16  ;;  %v2593_v9 = vshll.u32 %v5255_v7, 16  ;;  %v2597_v32 = vshrl.u32 %v5255_v7, 16 }
 0x13d   : > { %7914 = vst [vmem:[#allocation14_spill] sm:$0xff] %v7447_v4  ;;  %7915 = vst [vmem:[#allocation15_spill] sm:$0xff] %v7455_v3  ;;  %v5275_v50 = vcombine.low %v2572_v58, %v2582_v42  ;;  %6098 = vmatmul.mubr.bf16.gmra.mrb[128].mxu0 %v5352_v62  ;;  %v2586_v55 = vrot.slane %v2584_v53, 4  ;;  %v2603_v5 = vshll.u32 %v5256_v15, 16  ;;  %v5337_v36 = vrot.slane %v5309_v43, 9 }
 0x13e   : > { %v2903_v0 = vrot.slane %v5310_v57, 5  ;;  %v2589_v58 = vrot.slane %v2587_v60, 5  ;;  %v2595_v27 = vrot.slane %v2593_v9, 5  ;;  %v2599_v61 = vrot.slane %v2597_v32, 4  ;;  %v5257_v9 = vld [vmem:[%s6327_s8 + $0xc0] sm:$0xf] }
 0x13f   : > { %4354 = vmatprep.mubr.bf16.mxu1 %v5275_v50  ;;  %v2906_v42 = vrot.slane %v5311_v11, 5  ;;  %v2605_v62 = vrot.slane %v2603_v5, 5  ;;  %v5338_v57 = vrot.slane %v5312_v28, 9  ;;  %v2910_v60 = vrot.slane %v5313_v16, 5  ;;  %v5320_v4 = vld [vmem:[%s6327_s8 + $0xbc] sm:$0x1] }
 0x140   : > { %4355 = vmatmul.mubr.bf16.gmra.mrb[128].mxu1 %v6254_v38  ;;  %v2904_v15 = vsel %vm6492_vm5, %v5337_v36, %v2903_v0  ;;  %v2905_v43 = vrot.slane %v2903_v0, 4  ;;  %v2590_v53 = vor.u32 %v2589_v58, %v2586_v55  ;;  %v2600_v50 = vor.u32 %v2599_v61, %v2595_v27  ;;  %v5258_v55 = vld [vmem:[%s6327_s8 + $0xc4] sm:$0xf]  ;;  %v6255_v0 = vld [vmem:[%s6327_s8 + $0xb4] sm:$0xff]   ;;  %v5259_v61 = vld [vmem:[%s6327_s8 + $0xc8] sm:$0x1] }
 0x141   : > { %v7403_v21 = vpop.f32.mrb[32].mxu0  ;;  %v7405_v29 = vpop.f32.mrb[32].mxu1  ;;  %v2913_v11 = vrot.slane %v7459_v47, 5  ;;  %v7485_v38 = vadd.f32 %v7353_v49, %v7349_v45  ;;  %v5741_v5 = vadd.f32 %v7351_v44, %v7347_v17  ;;  %v7491_v28 = vadd.f32 %v7371_v2, %v7359_v20  ;;  %v5315_v45 = vld [vmem:[%s6327_s8 + $0xa8] sm:$0xe] }
 0x142   : > { %v7407_v13 = vpop.f32.mrb[33].mxu0  ;;  %v7409_v33 = vpop.f32.mrb[33].mxu1  ;;  %v2907_v32 = vsel %vm6492_vm5, %v2905_v43, %v2906_v42  ;;  %v2591_v16 = vrot.slane %v2590_v53, 4  ;;  %v2601_v36 = vrot.slane %v2600_v50, 4  ;;  %v2911_v58 = vsel %vm6492_vm5, %v5338_v57, %v2910_v60  ;;  %v5316_v49 = vld [vmem:[%s6327_s8 + $0xac] sm:$0xf] }
 0x143   : > { %v7411_v6 = vpop.f32.mrb[34].mxu0  ;;  %v7413_v14 = vpop.f32.mrb[34].mxu1  ;;  %v5353_v47 = vcombine.low %v2904_v15, %v2907_v32  ;;  %v2912_v17 = vrot.slane %v2910_v60, 4  ;;  %v7503_v44 = vadd.f32 %v5741_v5, %v7248_v18  ;;  %v5744_v20 = vadd.f32 %v7361_v48, %v7355_v12  ;;  %v5317_v15 = vld [vmem:[%s6327_s8 + $0xb0] sm:$0x1] }
 0x144   : > { %v7415_v59 = vpop.f32.mrb[35].mxu0  ;;  %v7417_v24 = vpop.f32.mrb[35].mxu1  ;;  %v2608_v2 = vshrl.u32 %v5257_v9, 16  ;;  %v2596_v57 = vsel %vm6352_vm2, %v2591_v16, %v2595_v27  ;;  %v2606_v50 = vsel %vm6352_vm2, %v2601_v36, %v2605_v62  ;;  %v2611_v60 = vshll.u32 %v5257_v9, 16  ;;  %v5318_v32 = vld [vmem:[%s6327_s8 + $0xb4] sm:$0xe] }
 0x145   : > { %7916 = vst [vmem:[#allocation16_spill] sm:$0xff] %v7503_v44  ;;  %6101 = vmatprep.mubr.bf16.mxu0 %v5353_v47  ;;  %v2617_v18 = vshll.u32 %v5258_v55, 16  ;;  %v5276_v48 = vcombine.low %v2596_v57, %v2606_v50  ;;  %v2914_v54 = vsel %vm6492_vm5, %v2912_v17, %v2913_v11  ;;  %v7524_v39 = vadd.f32 %v5744_v20, %v7271_v40  ;;  %v5319_v16 = vld [vmem:[%s6327_s8 + $0xb8] sm:$0xf] }
 0x146   : > { %v2610_v27 = vrot.slane %v2608_v2, 4  ;;  %v5354_v9 = vcombine.low %v2911_v58, %v2914_v54  ;;  %v2613_v36 = vrot.slane %v2611_v60, 5  ;;  %v2621_v3 = vshrl.u32 %v5258_v55, 16 }
 0x147   : > { %7917 = vst [vmem:[#allocation17_spill] sm:$0xff] %v7524_v39  ;;  %v2619_v47 = vrot.slane %v2617_v18, 5  ;;  %4362 = vmatprep.mubr.bf16.mxu1 %v5276_v48  ;;  %v2627_v57 = vshll.u32 %v5259_v61, 16  ;;  %v5339_v50 = vrot.slane %v5315_v45, 9  ;;  %v2917_v11 = vrot.slane %v5316_v49, 5 }
 0x148   : > { %v2920_v40 = vrot.slane %v5317_v15, 5  ;;  %4363 = vmatmul.mubr.bf16.gmra.mrb[132].mxu1 %v6255_v0  ;;  %6102 = vmatmul.mubr.bf16.gmra.mrb[132].mxu0 %v5354_v9  ;;  %v2614_v17 = vor.u32 %v2613_v36, %v2610_v27  ;;  %v2623_v20 = vrot.slane %v2621_v3, 4  ;;  %v5340_v2 = vrot.slane %v5318_v32, 9  ;;  %v5260_v49 = vld [vmem:[%s6327_s8 + $0xcc] sm:$0xf] }
 0x149   : > { %v7461_v41 = vpop.f32.mrb[36].mxu0  ;;  %v7463_v23 = vpop.f32.mrb[36].mxu1  ;;  %v2924_v54 = vrot.slane %v5319_v16, 5  ;;  %v2629_v58 = vrot.slane %v2627_v57, 5  ;;  %v2918_v55 = vsel %vm6492_vm5, %v5339_v50, %v2917_v11  ;;  %v2919_v60 = vrot.slane %v2917_v11, 4 }
 0x14a   : > { %v7465_v19 = vpop.f32.mrb[37].mxu0  ;;  %v7467_v63 = vpop.f32.mrb[37].mxu1  ;;  %v2927_v18 = vrot.slane %v5320_v4, 5  ;;  %v2615_v61 = vrot.slane %v2614_v17, 4  ;;  %v2624_v45 = vor.u32 %v2623_v20, %v2619_v47  ;;  %v7543_v32 = vadd.f32 %v7407_v13, %v7403_v21  ;;  %v5261_v27 = vld [vmem:[%s6327_s8 + $0xd0] sm:$0xf] }
 0x14b   : > { %v7469_v56 = vpop.f32.mrb[38].mxu0  ;;  %v7471_v1 = vpop.f32.mrb[38].mxu1  ;;  %v2925_v0 = vsel %vm6492_vm5, %v5340_v2, %v2924_v54  ;;  %v2926_v3 = vrot.slane %v2924_v54, 4  ;;  %v2921_v15 = vsel %vm6492_vm5, %v2919_v60, %v2920_v40  ;;  %v5747_v4 = vadd.f32 %v7409_v33, %v7405_v29  ;;  %v5262_v16 = vld [vmem:[%s6327_s8 + $0xd4] sm:$0x1] }
 0x14c   : > { %v7473_v7 = vpop.f32.mrb[39].mxu0  ;;  %v7475_v34 = vpop.f32.mrb[39].mxu1  ;;  %v7549_v48 = vadd.f32 %v7415_v59, %v7411_v6  ;;  %v5321_v9 = vld [vmem:[%s6327_s8 + $0xc0] sm:$0xe]  ;;  %v2620_v36 = vsel %vm6352_vm2, %v2615_v61, %v2619_v47  ;;  %v2625_v57 = vrot.slane %v2624_v45, 4  ;;  %v5355_v50 = vcombine.low %v2918_v55, %v2921_v15 }
 0x14d   : > { %v2928_v21 = vsel %vm6492_vm5, %v2926_v3, %v2927_v18  ;;  %v5322_v13 = vld [vmem:[%s6327_s8 + $0xc4] sm:$0xf]  ;;  %v5323_v11 = vld [vmem:[%s6327_s8 + $0xc8] sm:$0x1]  ;;  %v5324_v29 = vld [vmem:[%s6327_s8 + $0xcc] sm:$0xe]  ;;  %v7564_v59 = vadd.f32 %v5747_v4, %v7304_v52  ;;  %v5750_v40 = vadd.f32 %v7417_v24, %v7413_v14 }
 0x14e   : > { %v5356_v6 = vcombine.low %v2925_v0, %v2928_v21  ;;  %v2632_v17 = vshrl.u32 %v5260_v49, 16  ;;  %v5325_v47 = vld [vmem:[%s6327_s8 + $0xd0] sm:$0xf]  ;;  %v2630_v54 = vsel %vm6352_vm2, %v2625_v57, %v2629_v58  ;;  %6105 = vmatprep.mubr.bf16.mxu0 %v5355_v50  ;;  %v6256_v55 = vld [vmem:[%s6327_s8 + $0xc0] sm:$0xff]   ;;  %v2635_v60 = vshll.u32 %v5260_v49, 16 }
 0x14f   : > { %7918 = vst [vmem:[#allocation18_spill] sm:$0xff] %v7564_v59  ;;  %v2641_v18 = vshll.u32 %v5261_v27, 16  ;;  %v2645_v61 = vshrl.u32 %v5261_v27, 16  ;;  %v5277_v0 = vcombine.low %v2620_v36, %v2630_v54  ;;  %v7577_v14 = vadd.f32 %v5750_v40, %v7329_v46  ;;  %v5326_v15 = vld [vmem:[%s6327_s8 + $0xd4] sm:$0x1] }
 0x150   : > { %v2634_v24 = vrot.slane %v2632_v17, 4  ;;  %v2651_v3 = vshll.u32 %v5262_v16, 16  ;;  %6106 = vmatmul.mubr.bf16.gmra.mrb[136].mxu0 %v5356_v6  ;;  %v2637_v59 = vrot.slane %v2635_v60, 5  ;;  %v5341_v57 = vrot.slane %v5321_v9, 9 }
 0x151   : > { %v7500_v42 = vpop.f32.mrb[40].mxu1  ;;  %v7508_v43 = vpop.f32.mrb[40].mxu0  ;;  %v2643_v39 = vrot.slane %v2641_v18, 5  ;;  %v2647_v58 = vrot.slane %v2645_v61, 4  ;;  %4370 = vmatprep.mubr.bf16.mxu1 %v5277_v0  ;;  %v2931_v27 = vrot.slane %v5322_v13, 5  ;;  %v2934_v25 = vrot.slane %v5323_v11, 5 }
 0x152   : > { %v7510_v53 = vpop.f32.mrb[41].mxu1  ;;  %v7517_v5 = vpop.f32.mrb[41].mxu0  ;;  %v2653_v49 = vrot.slane %v2651_v3, 5  ;;  %v5342_v30 = vrot.slane %v5324_v29, 9  ;;  %4371 = vmatmul.mubr.bf16.gmra.mrb[136].mxu1 %v6256_v55  ;;  %v2638_v36 = vor.u32 %v2637_v59, %v2634_v24  ;;  %v2938_v40 = vrot.slane %v5325_v47, 5  ;;  %v6257_v61 = vld [vmem:[%s6327_s8 + $0xcc] sm:$0xff]  }
 0x153   : > { %v7519_v12 = vpop.f32.mrb[42].mxu1  ;;  %v7527_v44 = vpop.f32.mrb[42].mxu0  ;;  %v2648_v46 = vor.u32 %v2647_v58, %v2643_v39  ;;  %v2941_v17 = vrot.slane %v5326_v15, 5  ;;  %v2932_v16 = vsel %vm6492_vm5, %v5341_v57, %v2931_v27  ;;  %v2933_v54 = vrot.slane %v2931_v27, 4  ;;  %s5465_s8 = sshll.u32 %s7936_s13, 7 }
 0x154   : > { %v7529_v62 = vpop.f32.mrb[43].mxu1  ;;  %v7532_v10 = vpop.f32.mrb[43].mxu0  ;;  %v5665_v6 = vadd.f32 %v7465_v19, %v7461_v41  ;;  %v5753_v9 = vadd.f32 %v7467_v63, %v7463_v23  ;;  %v2639_v60 = vrot.slane %v2638_v36, 4  ;;  %v2939_v11 = vsel %vm6492_vm5, %v5342_v30, %v2938_v40  ;;  %s7826_s19 = scalar_lea.vmem %s7897_s2, %s5465_s8 }
 0x155   : > { %v2649_v13 = vrot.slane %v2648_v46, 4  ;;  %v2940_v29 = vrot.slane %v2938_v40, 4  ;;  %v2935_v47 = vsel %vm6492_vm5, %v2933_v54, %v2934_v25  ;;  %v5668_v18 = vadd.f32 %v7473_v7, %v7469_v56  ;;  %v7920_v54 = vld [vmem:[#allocation12_spill] sm:$0xff] }
 0x156   : > { %v7591_v55 = vadd.f32 %v5753_v9, %v7365_v8  ;;  %v5756_v41 = vadd.f32 %v7475_v34, %v7471_v1  ;;  %v2644_v19 = vsel %vm6352_vm2, %v2639_v60, %v2643_v39  ;;  %v5357_v63 = vcombine.low %v2932_v16, %v2935_v47 }
 0x157   : > { %v2654_v30 = vsel %vm6352_vm2, %v2649_v13, %v2653_v49  ;;  %v2942_v25 = vsel %vm6492_vm5, %v2940_v29, %v2941_v17  ;;  %v5671_v34 = vadd.f32 %v7517_v5, %v7508_v43  ;;  %v5759_v35 = vadd.f32 %v7510_v53, %v7500_v42 }
 0x158   : > { %v5278_v0 = vcombine.low %v2644_v19, %v2654_v30  ;;  %v5358_v24 = vcombine.low %v2939_v11, %v2942_v25  ;;  %v7605_v56 = vadd.f32 %v5756_v41, %v7384_v37  ;;  %6109 = vmatprep.mubr.bf16.mxu0 %v5357_v63  ;;  %v5674_v39 = vadd.f32 %v7532_v10, %v7527_v44 }
 0x159   : > { %v7561_v33 = vpop.f32.mrb[44].mxu1  ;;  %v7569_v20 = vpop.f32.mrb[44].mxu0  ;;  %v5762_v31 = vadd.f32 %v7529_v62, %v7519_v12  ;;  %v7619_v42 = vadd.f32 %v5759_v35, %v7423_v26 }
 0x15a   : > { %v7571_v2 = vpop.f32.mrb[45].mxu1  ;;  %v5676_v52 = vpop.f32.mrb[45].mxu0  ;;  %4378 = vmatprep.mubr.bf16.mxu1 %v5278_v0  ;;  %6110 = vmatmul.mubr.bf16.gmra.mrb[140].mxu0 %v5358_v24 }
 0x15b   : > { %v5766_v45 = vpop.f32.mrb[46].mxu1  ;;  %v5678_v4 = vpop.f32.mrb[46].mxu0  ;;  %v5677_v3 = vadd.f32 %v5676_v52, %v7569_v20  ;;  %v5765_v37 = vadd.f32 %v7571_v2, %v7561_v33  ;;  %4379 = vmatmul.mubr.bf16.gmra.mrb[140].mxu1 %v6257_v61  ;;  %v7622_v10 = vadd.f32 %v5762_v31, %v7437_v51 }
 0x15c   : > { %v5767_v21 = vpop.f32.mrb[47].mxu1  ;;  %v5679_v50 = vpop.f32.mrb[47].mxu0 }
 0x15d   : > { %v5680_v43 = vadd.f32 %v5679_v50, %v5678_v4  ;;  %v5768_v5 = vadd.f32 %v5767_v21, %v5766_v45  ;;  %v7625_v62 = vadd.f32 %v5765_v37, %v7485_v38  ;;  %v7919_v4 = vld [vmem:[#allocation11_spill] sm:$0xff] }
 0x15e   : > { %v7923_v37 = vld [vmem:[#allocation15_spill] sm:$0xff] }
 0x15f   : > { %v7628_v20 = vadd.f32 %v5768_v5, %v7491_v28 }
 0x161   : > { %v5769_v59 = vpop.f32.mrb[48].mxu1  ;;  %v5833_v1 = vpop.f32.mrb[48].mxu0 }
 0x162   : > { %v5770_v23 = vpop.f32.mrb[49].mxu1  ;;  %v5834_v15 = vpop.f32.mrb[49].mxu0 }
 0x163   : > { %v5772_v8 = vpop.f32.mrb[50].mxu1  ;;  %v5836_v58 = vpop.f32.mrb[50].mxu0  ;;  %v5771_v44 = vadd.f32 %v5770_v23, %v5769_v59  ;;  %v5835_v53 = vadd.f32 %v5834_v15, %v5833_v1  ;;  %v7921_v59 = vld [vmem:[#allocation13_spill] sm:$0xff]  ;;  %v7922_v1 = vld [vmem:[#allocation14_spill] sm:$0xff] }
 0x164   : > { %v5773_v7 = vpop.f32.mrb[51].mxu1  ;;  %v5837_v12 = vpop.f32.mrb[51].mxu0 }
 0x165   : > { %v5774_v33 = vadd.f32 %v5773_v7, %v5772_v8  ;;  %v5838_v2 = vadd.f32 %v5837_v12, %v5836_v58  ;;  %v7631_v52 = vadd.f32 %v5771_v44, %v7543_v32  ;;  %v7634_v26 = vadd.f32 %v5835_v53, %v7325_v22 }
 0x167   : > { %v7637_v51 = vadd.f32 %v5774_v33, %v7549_v48  ;;  %v7640_v21 = vadd.f32 %v5838_v2, %v7919_v4 }
 0x169   : > { %v5775_v45 = vpop.f32.mrb[52].mxu1  ;;  %v5839_v36 = vpop.f32.mrb[52].mxu0 }
 0x16a   : > { %v5776_v38 = vpop.f32.mrb[53].mxu1  ;;  %v5840_v46 = vpop.f32.mrb[53].mxu0 }
 0x16b   : > { %v5777_v57 = vadd.f32 %v5776_v38, %v5775_v45  ;;  %v5778_v50 = vpop.f32.mrb[54].mxu1  ;;  %v5841_v22 = vadd.f32 %v5840_v46, %v5839_v36  ;;  %v5842_v40 = vpop.f32.mrb[54].mxu0 }
 0x16c   : > { %v5779_v28 = vpop.f32.mrb[55].mxu1  ;;  %v5843_v16 = vpop.f32.mrb[55].mxu0 }
 0x16d   : > { %v7642_v49 = vadd.f32 %v5777_v57, %v5665_v6  ;;  %v5780_v27 = vadd.f32 %v5779_v28, %v5778_v50  ;;  %v7647_v9 = vadd.f32 %v5841_v22, %v7920_v54  ;;  %v5844_v60 = vadd.f32 %v5843_v16, %v5842_v40  ;;  %v7924_v57 = vld [vmem:[#allocation16_spill] sm:$0xff] }
 0x16e   : > { %v7927_v40 = vld [vmem:[#allocation4_spill] sm:$0xff] }
 0x16f   : > { %v7644_v32 = vadd.f32 %v5780_v27, %v5668_v18  ;;  %v7650_v6 = vadd.f32 %v5844_v60, %v7921_v59  ;;  %v7925_v27 = vld [vmem:[#allocation3_spill] sm:$0xff] }
 0x171   : > { %v5781_v17 = vpop.f32.mrb[56].mxu1  ;;  %v5845_v23 = vpop.f32.mrb[56].mxu0 }
 0x172   : > { %v5782_v48 = vpop.f32.mrb[57].mxu1  ;;  %v5846_v19 = vpop.f32.mrb[57].mxu0 }
 0x173   : > { %v5783_v13 = vadd.f32 %v5782_v48, %v5781_v17  ;;  %v5784_v11 = vpop.f32.mrb[58].mxu1  ;;  %v5847_v63 = vadd.f32 %v5846_v19, %v5845_v23  ;;  %v5848_v61 = vpop.f32.mrb[58].mxu0  ;;  %v7928_v23 = vld [vmem:[#allocation18_spill] sm:$0xff] }
 0x174   : > { %v5785_v29 = vpop.f32.mrb[59].mxu1  ;;  %v5849_v8 = vpop.f32.mrb[59].mxu0 }
 0x175   : > { %v7652_v47 = vadd.f32 %v5783_v13, %v5671_v34  ;;  %v5786_v18 = vadd.f32 %v5785_v29, %v5784_v11  ;;  %v7657_v7 = vadd.f32 %v5847_v63, %v7922_v1  ;;  %v5850_v35 = vadd.f32 %v5849_v8, %v5848_v61  ;;  %v7929_v61 = vld [vmem:[#allocation5_spill] sm:$0xff] }
 0x177   : > { %v7654_v41 = vadd.f32 %v5786_v18, %v5674_v39  ;;  %v7662_v39 = vadd.f32 %v5850_v35, %v7923_v37 }
 0x179   : > { %v5787_v30 = vpop.f32.mrb[60].mxu1  ;;  %v5851_v58 = vpop.f32.mrb[60].mxu0 }
 0x17a   : > { %v5788_v25 = vpop.f32.mrb[61].mxu1  ;;  %v5852_v44 = vpop.f32.mrb[61].mxu0 }
 0x17b   : > { %v5789_v0 = vadd.f32 %v5788_v25, %v5787_v30  ;;  %v5790_v24 = vpop.f32.mrb[62].mxu1  ;;  %v5853_v12 = vadd.f32 %v5852_v44, %v5851_v58  ;;  %v5854_v33 = vpop.f32.mrb[62].mxu0 }
 0x17c   : > { %v5791_v31 = vpop.f32.mrb[63].mxu1  ;;  %v5855_v45 = vpop.f32.mrb[63].mxu0 }
 0x17d   : > { %v7659_v15 = vadd.f32 %v5789_v0, %v5677_v3  ;;  %v5792_v34 = vadd.f32 %v5791_v31, %v5790_v24  ;;  %v7667_v50 = vadd.f32 %v5853_v12, %v7924_v57  ;;  %v5856_v3 = vadd.f32 %v5855_v45, %v5854_v33  ;;  %v7930_v24 = vld [vmem:[#allocation6_spill] sm:$0xff] }
 0x17f   : > { %v7664_v5 = vadd.f32 %v5792_v34, %v5680_v43  ;;  %v7926_v43 = vld [vmem:[#allocation17_spill] sm:$0xff] }
 0x180   : > { %v7673_v22 = vadd.f32 %v5856_v3, %v7926_v43 }
 0x181   : > { %v5793_v53 = vpop.f32.mrb[64].mxu1  ;;  %v5857_v16 = vpop.f32.mrb[64].mxu0 }
 0x182   : > { %v5794_v2 = vpop.f32.mrb[65].mxu1  ;;  %v5858_v48 = vpop.f32.mrb[65].mxu0 }
 0x183   : > { %v5795_v4 = vadd.f32 %v5794_v2, %v5793_v53  ;;  %v5796_v38 = vpop.f32.mrb[66].mxu1  ;;  %v5859_v60 = vadd.f32 %v5858_v48, %v5857_v16  ;;  %v5860_v13 = vpop.f32.mrb[66].mxu0 }
 0x184   : > { %v5797_v28 = vpop.f32.mrb[67].mxu1  ;;  %v5861_v29 = vpop.f32.mrb[67].mxu0 }
 0x185   : > { %v7670_v36 = vadd.f32 %v5795_v4, %v7925_v27  ;;  %v5798_v46 = vadd.f32 %v5797_v28, %v5796_v38  ;;  %v7679_v19 = vadd.f32 %v5859_v60, %v7928_v23  ;;  %v5862_v30 = vadd.f32 %v5861_v29, %v5860_v13  ;;  %v7931_v38 = vld [vmem:[#allocation7_spill] sm:$0xff]  ;;  %v7932_v28 = vld [vmem:[#allocation8_spill] sm:$0xff] }
 0x187   : > { %v7676_v17 = vadd.f32 %v5798_v46, %v7927_v40  ;;  %v7685_v0 = vadd.f32 %v5862_v30, %v7577_v14 }
 0x189   : > { %v5799_v54 = vpop.f32.mrb[68].mxu1  ;;  %v5863_v35 = vpop.f32.mrb[68].mxu0 }
 0x18a   : > { %v5800_v11 = vpop.f32.mrb[69].mxu1  ;;  %v5864_v34 = vpop.f32.mrb[69].mxu0 }
 0x18b   : > { %v5801_v59 = vadd.f32 %v5800_v11, %v5799_v54  ;;  %v5802_v18 = vpop.f32.mrb[70].mxu1  ;;  %v5865_v58 = vadd.f32 %v5864_v34, %v5863_v35  ;;  %v5866_v44 = vpop.f32.mrb[70].mxu0 }
 0x18c   : > { %v5803_v63 = vpop.f32.mrb[71].mxu1  ;;  %v5867_v33 = vpop.f32.mrb[71].mxu0 }
 0x18d   : > { %v7682_v25 = vadd.f32 %v5801_v59, %v7929_v61  ;;  %v5804_v8 = vadd.f32 %v5803_v63, %v5802_v18  ;;  %v7691_v45 = vadd.f32 %v5865_v58, %v7591_v55  ;;  %v5868_v4 = vadd.f32 %v5867_v33, %v5866_v44  ;;  %v7933_v18 = vld [vmem:[#allocation9_spill] sm:$0xff]  ;;  %v7934_v63 = vld [vmem:[#allocation10_spill] sm:$0xff] }
 0x18f   : > { %v7688_v1 = vadd.f32 %v5804_v8, %v7930_v24  ;;  %v7697_v3 = vadd.f32 %v5868_v4, %v7605_v56 }
 0x191   : > { %v5805_v31 = vpop.f32.mrb[72].mxu1  ;;  %v5869_v46 = vpop.f32.mrb[72].mxu0 }
 0x192   : > { %v5806_v37 = vpop.f32.mrb[73].mxu1  ;;  %v5870_v43 = vpop.f32.mrb[73].mxu0 }
 0x193   : > { %v5807_v53 = vadd.f32 %v5806_v37, %v5805_v31  ;;  %v5808_v12 = vpop.f32.mrb[74].mxu1  ;;  %v5871_v16 = vadd.f32 %v5870_v43, %v5869_v46  ;;  %v5872_v48 = vpop.f32.mrb[74].mxu0 }
 0x194   : > { %v5809_v2 = vpop.f32.mrb[75].mxu1  ;;  %v5873_v60 = vpop.f32.mrb[75].mxu0 }
 0x195   : > { %v7694_v14 = vadd.f32 %v5807_v53, %v7931_v38  ;;  %v5810_v57 = vadd.f32 %v5809_v2, %v5808_v12  ;;  %v7703_v11 = vadd.f32 %v5871_v16, %v7619_v42  ;;  %v5874_v29 = vadd.f32 %v5873_v60, %v5872_v48 }
 0x197   : > { %v7700_v27 = vadd.f32 %v5810_v57, %v7932_v28  ;;  %v7709_v30 = vadd.f32 %v5874_v29, %v7622_v10 }
 0x199   : > { %v5811_v40 = vpop.f32.mrb[76].mxu1  ;;  %v5875_v8 = vpop.f32.mrb[76].mxu0 }
 0x19a   : > { %v5812_v54 = vpop.f32.mrb[77].mxu1  ;;  %v5876_v24 = vpop.f32.mrb[77].mxu0 }
 0x19b   : > { %v5813_v55 = vadd.f32 %v5812_v54, %v5811_v40  ;;  %v5814_v13 = vpop.f32.mrb[78].mxu1  ;;  %v5877_v35 = vadd.f32 %v5876_v24, %v5875_v8  ;;  %v5878_v31 = vpop.f32.mrb[78].mxu0 }
 0x19c   : > { %v5815_v59 = vpop.f32.mrb[79].mxu1  ;;  %v5879_v34 = vpop.f32.mrb[79].mxu0 }
 0x19d   : > { %v7706_v56 = vadd.f32 %v5813_v55, %v7933_v18  ;;  %v5816_v23 = vadd.f32 %v5815_v59, %v5814_v13  ;;  %v7715_v42 = vadd.f32 %v5877_v35, %v7625_v62  ;;  %v5880_v37 = vadd.f32 %v5879_v34, %v5878_v31 }
 0x19f   : > { %v7712_v61 = vadd.f32 %v5816_v23, %v7934_v63  ;;  %v7718_v58 = vadd.f32 %v5880_v37, %v7628_v20 }
 0x1a1   : > { %v5945_v44 = vpop.f32.mrb[80].mxu1  ;;  %v5881_v2 = vpop.f32.mrb[80].mxu0 }
 0x1a2   : > { %v5946_v53 = vpop.f32.mrb[81].mxu1  ;;  %v5882_v57 = vpop.f32.mrb[81].mxu0 }
 0x1a3   : > { %v5947_v12 = vadd.f32 %v5946_v53, %v5945_v44  ;;  %v5948_v10 = vpop.f32.mrb[82].mxu1  ;;  %v5883_v28 = vadd.f32 %v5882_v57, %v5881_v2  ;;  %v5884_v46 = vpop.f32.mrb[82].mxu0 }
 0x1a4   : > { %v5949_v33 = vpop.f32.mrb[83].mxu1  ;;  %v5885_v43 = vpop.f32.mrb[83].mxu0 }
 0x1a5   : > { %v5950_v4 = vadd.f32 %v5949_v33, %v5948_v10  ;;  %v7721_v38 = vadd.f32 %v5947_v12, %v7634_v26  ;;  %v7727_v20 = vadd.f32 %v5883_v28, %v7631_v52  ;;  %v5886_v40 = vadd.f32 %v5885_v43, %v5884_v46 }
 0x1a7   : > { %v7724_v62 = vadd.f32 %v5950_v4, %v7640_v21  ;;  %v7730_v16 = vadd.f32 %v5886_v40, %v7637_v51 }
 0x1a9   : > { %v5951_v48 = vpop.f32.mrb[84].mxu1  ;;  %v5887_v13 = vpop.f32.mrb[84].mxu0 }
 0x1aa   : > { %v5952_v54 = vpop.f32.mrb[85].mxu1  ;;  %v5888_v21 = vpop.f32.mrb[85].mxu0 }
 0x1ab   : > { %v5953_v60 = vadd.f32 %v5952_v54, %v5951_v48  ;;  %v5954_v55 = vpop.f32.mrb[86].mxu1  ;;  %v5889_v18 = vadd.f32 %v5888_v21, %v5887_v13  ;;  %v5890_v23 = vpop.f32.mrb[86].mxu0 }
 0x1ac   : > { %v5955_v26 = vpop.f32.mrb[87].mxu1  ;;  %v5891_v63 = vpop.f32.mrb[87].mxu0 }
 0x1ad   : > { %v5956_v29 = vadd.f32 %v5955_v26, %v5954_v55  ;;  %v7733_v59 = vadd.f32 %v5953_v60, %v7647_v9  ;;  %v7739_v51 = vadd.f32 %v5889_v18, %v7642_v49  ;;  %v5892_v8 = vadd.f32 %v5891_v63, %v5890_v23 }
 0x1af   : > { %v7736_v52 = vadd.f32 %v5956_v29, %v7650_v6  ;;  %v7742_v24 = vadd.f32 %v5892_v8, %v7644_v32 }
 0x1b1   : > { %v5957_v35 = vpop.f32.mrb[88].mxu1  ;;  %v5893_v44 = vpop.f32.mrb[88].mxu0 }
 0x1b2   : > { %v5958_v31 = vpop.f32.mrb[89].mxu1  ;;  %v5894_v6 = vpop.f32.mrb[89].mxu0 }
 0x1b3   : > { %v5959_v34 = vadd.f32 %v5958_v31, %v5957_v35  ;;  %v5960_v37 = vpop.f32.mrb[90].mxu1  ;;  %v5895_v10 = vadd.f32 %v5894_v6, %v5893_v44  ;;  %v5896_v33 = vpop.f32.mrb[90].mxu0 }
 0x1b4   : > { %v5961_v9 = vpop.f32.mrb[91].mxu1  ;;  %v5897_v2 = vpop.f32.mrb[91].mxu0 }
 0x1b5   : > { %v5962_v53 = vadd.f32 %v5961_v9, %v5960_v37  ;;  %v7745_v12 = vadd.f32 %v5959_v34, %v7657_v7  ;;  %v7751_v32 = vadd.f32 %v5895_v10, %v7652_v47  ;;  %v5898_v4 = vadd.f32 %v5897_v2, %v5896_v33 }
 0x1b7   : > { %v7748_v49 = vadd.f32 %v5962_v53, %v7662_v39  ;;  %v7754_v57 = vadd.f32 %v5898_v4, %v7654_v41 }
 0x1b9   : > { %v5963_v28 = vpop.f32.mrb[92].mxu1 }
 0x1ba   : > { %v5964_v46 = vpop.f32.mrb[93].mxu1  ;;  %v5899_v48 = vpop.f32.mrb[92].mxu0 }
 0x1bb   : > { %v5965_v43 = vadd.f32 %v5964_v46, %v5963_v28  ;;  %v5966_v40 = vpop.f32.mrb[94].mxu1  ;;  %v5900_v39 = vpop.f32.mrb[93].mxu0 }
 0x1bc   : > { %v5967_v7 = vpop.f32.mrb[95].mxu1  ;;  %v5901_v55 = vadd.f32 %v5900_v39, %v5899_v48  ;;  %v5902_v26 = vpop.f32.mrb[94].mxu0 }
 0x1bd   : > { %v5968_v54 = vadd.f32 %v5967_v7, %v5966_v40  ;;  %v7757_v60 = vadd.f32 %v5965_v43, %v7667_v50  ;;  %v5903_v13 = vpop.f32.mrb[95].mxu0 }
 0x1be   : > { %v7763_v41 = vadd.f32 %v5901_v55, %v7659_v15  ;;  %v5904_v29 = vadd.f32 %v5903_v13, %v5902_v26 }
 0x1bf   : > { %v7760_v47 = vadd.f32 %v5968_v54, %v7673_v22 }
 0x1c0   : > { %v7766_v21 = vadd.f32 %v5904_v29, %v7664_v5 }
 0x1c2   : > { %v5969_v18 = vpop.f32.mrb[96].mxu1 }
 0x1c3   : > { %v5970_v23 = vpop.f32.mrb[97].mxu1 }
 0x1c4   : > { %v5971_v63 = vadd.f32 %v5970_v23, %v5969_v18  ;;  %v5972_v8 = vpop.f32.mrb[98].mxu1 }
 0x1c5   : > { %v5905_v50 = vpop.f32.mrb[96].mxu0  ;;  %v5973_v35 = vpop.f32.mrb[99].mxu1 }
 0x1c6   : > { %v5906_v31 = vpop.f32.mrb[97].mxu0  ;;  %v5974_v34 = vadd.f32 %v5973_v35, %v5972_v8  ;;  %v7769_v37 = vadd.f32 %v5971_v63, %v7679_v19 }
 0x1c7   : > { %v5907_v22 = vadd.f32 %v5906_v31, %v5905_v50  ;;  %v5908_v9 = vpop.f32.mrb[98].mxu0 }
 0x1c8   : > { %v5909_v44 = vpop.f32.mrb[99].mxu0  ;;  %v7772_v15 = vadd.f32 %v5974_v34, %v7685_v0 }
 0x1c9   : > { %v7775_v5 = vadd.f32 %v5907_v22, %v7670_v36  ;;  %v5910_v53 = vadd.f32 %v5909_v44, %v5908_v9 }
 0x1cb   : > { %v7778_v6 = vadd.f32 %v5910_v53, %v7676_v17 }
 0x1cc   : > { %v5975_v10 = vpop.f32.mrb[100].mxu1 }
 0x1cd   : > { %v5976_v33 = vpop.f32.mrb[101].mxu1 }
 0x1ce   : > { %v5977_v2 = vadd.f32 %v5976_v33, %v5975_v10  ;;  %v5978_v4 = vpop.f32.mrb[102].mxu1 }
 0x1cf   : > { %v5911_v28 = vpop.f32.mrb[100].mxu0  ;;  %v5979_v19 = vpop.f32.mrb[103].mxu1 }
 0x1d0   : > { %v5912_v46 = vpop.f32.mrb[101].mxu0  ;;  %v5980_v43 = vadd.f32 %v5979_v19, %v5978_v4  ;;  %v7781_v40 = vadd.f32 %v5977_v2, %v7691_v45 }
 0x1d1   : > { %v5913_v0 = vadd.f32 %v5912_v46, %v5911_v28  ;;  %v5914_v7 = vpop.f32.mrb[102].mxu0 }
 0x1d2   : > { %v5915_v48 = vpop.f32.mrb[103].mxu0  ;;  %v7784_v36 = vadd.f32 %v5980_v43, %v7697_v3 }
 0x1d3   : > { %v7787_v17 = vadd.f32 %v5913_v0, %v7682_v25  ;;  %v5916_v54 = vadd.f32 %v5915_v48, %v5914_v7 }
 0x1d5   : > { %v7790_v39 = vadd.f32 %v5916_v54, %v7688_v1 }
 0x1da   : > { %v5981_v55 = vpop.f32.mrb[104].mxu1 }
 0x1db   : > { %v5982_v26 = vpop.f32.mrb[105].mxu1 }
 0x1dc   : > { %v5983_v13 = vadd.f32 %v5982_v26, %v5981_v55  ;;  %v5984_v29 = vpop.f32.mrb[106].mxu1 }
 0x1dd   : > { %v5917_v18 = vpop.f32.mrb[104].mxu0  ;;  %v5985_v45 = vpop.f32.mrb[107].mxu1 }
 0x1de   : > { %v5918_v23 = vpop.f32.mrb[105].mxu0  ;;  %v5986_v63 = vadd.f32 %v5985_v45, %v5984_v29  ;;  %v7793_v8 = vadd.f32 %v5983_v13, %v7703_v11 }
 0x1df   : > { %v5919_v3 = vadd.f32 %v5918_v23, %v5917_v18  ;;  %v5920_v50 = vpop.f32.mrb[106].mxu0 }
 0x1e0   : > { %v5921_v35 = vpop.f32.mrb[107].mxu0  ;;  %v7796_v25 = vadd.f32 %v5986_v63, %v7709_v30 }
 0x1e1   : > { %v7799_v1 = vadd.f32 %v5919_v3, %v7694_v14  ;;  %v5922_v31 = vadd.f32 %v5921_v35, %v5920_v50 }
 0x1e3   : > { %v7802_v34 = vadd.f32 %v5922_v31, %v7700_v27 }
 0x1e4   : > { %v5987_v22 = vpop.f32.mrb[108].mxu1 }
 0x1e5   : > { %v5988_v9 = vpop.f32.mrb[109].mxu1 }
 0x1e6   : > { %v5923_v44 = vpop.f32.mrb[108].mxu0  ;;  %v5989_v53 = vadd.f32 %v5988_v9, %v5987_v22  ;;  %v5990_v10 = vpop.f32.mrb[110].mxu1 }
 0x1e7   : > { %v5924_v11 = vpop.f32.mrb[109].mxu0  ;;  %v5991_v33 = vpop.f32.mrb[111].mxu1 }
 0x1e8   : > { %v5925_v2 = vadd.f32 %v5924_v11, %v5923_v44  ;;  %v5926_v4 = vpop.f32.mrb[110].mxu0  ;;  %v5992_v28 = vadd.f32 %v5991_v33, %v5990_v10  ;;  %v7805_v30 = vadd.f32 %v5989_v53, %v7715_v42 }
 0x1e9   : > { %v5927_v14 = vpop.f32.mrb[111].mxu0 }
 0x1ea   : > { %v7808_v19 = vadd.f32 %v5925_v2, %v7706_v56  ;;  %v5928_v27 = vadd.f32 %v5927_v14, %v5926_v4  ;;  %v7811_v46 = vadd.f32 %v5992_v28, %v7718_v58 }
 0x1ec   : > { %v7814_v43 = vadd.f32 %v5928_v27, %v7712_v61 }
 0x1ee   : > { %v5993_v0 = vpop.f32.mrb[112].mxu1  ;;  %v6083_v7 = vpop.f32.mrb[112].mxu0 }
 0x1ef   : > { %v5994_v48 = vpop.f32.mrb[113].mxu1  ;;  %v4430_v54 = vadd.f32 %v6083_v7, %v7733_v59  ;;  %v4421_v26 = vpop.f32.mrb[113].mxu0 }
 0x1f0   : > { %v5995_v55 = vadd.f32 %v5994_v48, %v5993_v0  ;;  %v5996_v42 = vpop.f32.mrb[114].mxu1  ;;  %v4422_v13 = vadd.f32 %v4421_v26, %v7721_v38  ;;  %v6084_v56 = vpop.f32.mrb[114].mxu0 }
 0x1f1   : > { %v5997_v29 = vpop.f32.mrb[115].mxu1  ;;  %v4433_v18 = vadd.f32 %v6084_v56, %v7736_v52  ;;  %v4424_v45 = vpop.f32.mrb[115].mxu0 }
 0x1f2   : > { %v5998_v58 = vadd.f32 %v5997_v29, %v5996_v42  ;;  %v7821_v61 = vadd.f32 %v5995_v55, %v7727_v20  ;;  %v4425_v59 = vadd.f32 %v4424_v45, %v7724_v62  ;;  %v4586_v63 = vmul.f32 %v4422_v13, %v4422_v13 }
 0x1f3   : > { %v5506_v23 = vpack.c.bf16 %v4433_v18, %v4430_v54  ;;  %v4588_v20 = vmul.f32 %v4430_v54, %v4430_v54  ;;  %v4589_v10 = vmul.f32 %v4433_v18, %v4433_v18 }
 0x1f4   : > { %v7830_v38 = vadd.f32 %v5998_v58, %v7730_v16  ;;  %v4548_v52 = vadd.f32 %v4425_v59, %v4422_v13  ;;  %v4587_v3 = vmul.f32 %v4425_v59, %v4425_v59  ;;  %v5501_v50 = vpack.c.bf16 %v4425_v59, %v4422_v13 }
 0x1f5   : > { %5578 = vst [vmem:[%s7826_s19 + $0x8] sm:$0xff] %v5506_v23  }
 0x1f6   : > { %v4549_v35 = vadd.f32 %v4548_v52, %v4430_v54  ;;  %v4618_v31 = vadd.f32 %v4587_v3, %v4586_v63  ;;  %5502 = vst [vmem:[%s7826_s19] sm:$0xff] %v5501_v50   ;;  %v6087_v22 = vpop.f32.mrb[116].mxu0 }
 0x1f7   : > { %v5999_v9 = vpop.f32.mrb[116].mxu1  ;;  %v4446_v44 = vadd.f32 %v6087_v22, %v7757_v60  ;;  %v4437_v53 = vpop.f32.mrb[117].mxu0 }
 0x1f8   : > { %v4619_v62 = vadd.f32 %v4618_v31, %v4588_v20  ;;  %v6000_v11 = vpop.f32.mrb[117].mxu1  ;;  %v4438_v16 = vadd.f32 %v4437_v53, %v7745_v12  ;;  %v4550_v33 = vadd.f32 %v4549_v35, %v4433_v18  ;;  %v6088_v2 = vpop.f32.mrb[118].mxu0 }
 0x1f9   : > { %v6001_v4 = vadd.f32 %v6000_v11, %v5999_v9  ;;  %v6002_v28 = vpop.f32.mrb[118].mxu1  ;;  %v4449_v14 = vadd.f32 %v6088_v2, %v7760_v47  ;;  %v4440_v27 = vpop.f32.mrb[119].mxu0  ;;  %v4592_v18 = vmul.f32 %v4446_v44, %v4446_v44 }
 0x1fa   : > { %v4551_v0 = vadd.f32 %v4550_v33, %v4438_v16  ;;  %v4590_v7 = vmul.f32 %v4438_v16, %v4438_v16  ;;  %v4620_v48 = vadd.f32 %v4619_v62, %v4589_v10  ;;  %v6003_v54 = vpop.f32.mrb[119].mxu1  ;;  %v4441_v60 = vadd.f32 %v4440_v27, %v7748_v49 }
 0x1fb   : > { %v5516_v55 = vpack.c.bf16 %v4449_v14, %v4446_v44  ;;  %v6004_v26 = vadd.f32 %v6003_v54, %v6002_v28  ;;  %v7839_v42 = vadd.f32 %v6001_v4, %v7739_v51  ;;  %v4593_v52 = vmul.f32 %v4449_v14, %v4449_v14 }
 0x1fc   : > { %v4621_v12 = vadd.f32 %v4620_v48, %v4590_v7  ;;  %v4552_v13 = vadd.f32 %v4551_v0, %v4441_v60  ;;  %v4591_v56 = vmul.f32 %v4441_v60, %v4441_v60  ;;  %v5511_v29 = vpack.c.bf16 %v4441_v60, %v4438_v16 }
 0x1fd   : > { %5580 = vst [vmem:[%s7826_s19 + $0x18] sm:$0xff] %v5516_v55   ;;  %v7843_v47 = vadd.f32 %v6004_v26, %v7742_v24 }
 0x1fe   : > { %v4553_v58 = vadd.f32 %v4552_v13, %v4446_v44  ;;  %v4622_v45 = vadd.f32 %v4621_v12, %v4591_v56  ;;  %5579 = vst [vmem:[%s7826_s19 + $0x10] sm:$0xff] %v5511_v29   ;;  %v6091_v59 = vpop.f32.mrb[120].mxu0 }
 0x1ff   : > { %v6005_v23 = vpop.f32.mrb[120].mxu1  ;;  %v4462_v49 = vadd.f32 %v6091_v59, %v7781_v40  ;;  %v4453_v63 = vpop.f32.mrb[121].mxu0 }
 0x200   : > { %v4623_v51 = vadd.f32 %v4622_v45, %v4592_v18  ;;  %v6006_v3 = vpop.f32.mrb[121].mxu1  ;;  %v4454_v50 = vadd.f32 %v4453_v63, %v7769_v37  ;;  %v4554_v20 = vadd.f32 %v4553_v58, %v4449_v14  ;;  %v6092_v35 = vpop.f32.mrb[122].mxu0 }
 0x201   : > { %v6007_v31 = vadd.f32 %v6006_v3, %v6005_v23  ;;  %v6008_v24 = vpop.f32.mrb[122].mxu1  ;;  %v4465_v22 = vadd.f32 %v6092_v35, %v7784_v36  ;;  %v4456_v9 = vpop.f32.mrb[123].mxu0  ;;  %v4596_v14 = vmul.f32 %v4462_v49, %v4462_v49 }
 0x202   : > { %v4555_v44 = vadd.f32 %v4554_v20, %v4454_v50  ;;  %v4594_v53 = vmul.f32 %v4454_v50, %v4454_v50  ;;  %v4624_v10 = vadd.f32 %v4623_v51, %v4593_v52  ;;  %v6009_v62 = vpop.f32.mrb[123].mxu1  ;;  %v4457_v40 = vadd.f32 %v4456_v9, %v7772_v15 }
 0x203   : > { %v5526_v11 = vpack.c.bf16 %v4465_v22, %v4462_v49  ;;  %v6010_v16 = vadd.f32 %v6009_v62, %v6008_v24  ;;  %v7851_v33 = vadd.f32 %v6007_v31, %v7751_v32  ;;  %v4597_v48 = vmul.f32 %v4465_v22, %v4465_v22 }
 0x204   : > { %v4625_v37 = vadd.f32 %v4624_v10, %v4594_v53  ;;  %v4556_v2 = vadd.f32 %v4555_v44, %v4457_v40  ;;  %v4595_v4 = vmul.f32 %v4457_v40, %v4457_v40  ;;  %v5521_v28 = vpack.c.bf16 %v4457_v40, %v4454_v50 }
 0x205   : > { %5582 = vst [vmem:[%s7826_s19 + $0x28] sm:$0xff] %v5526_v11   ;;  %v7855_v36 = vadd.f32 %v6010_v16, %v7754_v57 }
 0x206   : > { %v4557_v27 = vadd.f32 %v4556_v2, %v4462_v49  ;;  %v4626_v0 = vadd.f32 %v4625_v37, %v4595_v4  ;;  %5581 = vst [vmem:[%s7826_s19 + $0x20] sm:$0xff] %v5521_v28  }
 0x208   : > { %v6095_v7 = vpop.f32.mrb[124].mxu0  ;;  %v4627_v15 = vadd.f32 %v4626_v0, %v4596_v14  ;;  %v4558_v32 = vadd.f32 %v4557_v27, %v4465_v22 }
 0x209   : > { %v4478_v54 = vadd.f32 %v6095_v7, %v7805_v30  ;;  %v4469_v60 = vpop.f32.mrb[125].mxu0  ;;  %v6011_v55 = vpop.f32.mrb[124].mxu1 }
 0x20a   : > { %v4470_v26 = vadd.f32 %v4469_v60, %v7793_v8  ;;  %v6096_v12 = vpop.f32.mrb[126].mxu0  ;;  %v6012_v13 = vpop.f32.mrb[125].mxu1  ;;  %v4628_v56 = vadd.f32 %v4627_v15, %v4597_v48 }
 0x20b   : > { %v4481_v57 = vadd.f32 %v6096_v12, %v7811_v46  ;;  %v4472_v29 = vpop.f32.mrb[127].mxu0  ;;  %v6013_v18 = vadd.f32 %v6012_v13, %v6011_v55  ;;  %v6014_v59 = vpop.f32.mrb[126].mxu1  ;;  %v4600_v20 = vmul.f32 %v4478_v54, %v4478_v54 }
 0x20c   : > { %v4559_v58 = vadd.f32 %v4558_v32, %v4470_v26  ;;  %v4598_v45 = vmul.f32 %v4470_v26, %v4470_v26  ;;  %v4473_v23 = vadd.f32 %v4472_v29, %v7796_v25  ;;  %v6015_v49 = vpop.f32.mrb[127].mxu1 }
 0x20d   : > { %v5536_v30 = vpack.c.bf16 %v4481_v57, %v4478_v54  ;;  %v6016_v52 = vadd.f32 %v6015_v49, %v6014_v59  ;;  %v4349_v50 = vadd.f32 %v6013_v18, %v7763_v41  ;;  %v4601_v22 = vmul.f32 %v4481_v57, %v4481_v57 }
 0x20e   : > { %v4629_v63 = vadd.f32 %v4628_v56, %v4598_v45  ;;  %v4560_v51 = vadd.f32 %v4559_v58, %v4473_v23  ;;  %v4599_v8 = vmul.f32 %v4473_v23, %v4473_v23  ;;  %v5531_v3 = vpack.c.bf16 %v4473_v23, %v4470_v26 }
 0x20f   : > { %5584 = vst [vmem:[%s7826_s19 + $0x38] sm:$0xff] %v5536_v30   ;;  %v4352_v31 = vadd.f32 %v6016_v52, %v7766_v21 }
 0x210   : > { %v4561_v46 = vadd.f32 %v4560_v51, %v4478_v54  ;;  %v4630_v35 = vadd.f32 %v4629_v63, %v4599_v8  ;;  %5583 = vst [vmem:[%s7826_s19 + $0x30] sm:$0xff] %v5531_v3   ;;  %v6099_v24 = vpop.f32.mrb[128].mxu0 }
 0x211   : > { %v4494_v25 = vadd.f32 %v6099_v24, %v7839_v42  ;;  %v4485_v44 = vpop.f32.mrb[129].mxu0 }
 0x212   : > { %v4631_v9 = vadd.f32 %v4630_v35, %v4600_v20  ;;  %v4562_v53 = vadd.f32 %v4561_v46, %v4481_v57  ;;  %v4486_v62 = vadd.f32 %v4485_v44, %v7821_v61  ;;  %v6100_v40 = vpop.f32.mrb[130].mxu0 }
 0x213   : > { %v6017_v10 = vpop.f32.mrb[128].mxu1  ;;  %v4497_v16 = vadd.f32 %v6100_v40, %v7843_v47  ;;  %v4488_v37 = vpop.f32.mrb[131].mxu0  ;;  %v4604_v60 = vmul.f32 %v4494_v25, %v4494_v25 }
 0x214   : > { %v6018_v11 = vpop.f32.mrb[129].mxu1  ;;  %v4632_v41 = vadd.f32 %v4631_v9, %v4601_v22  ;;  %v4563_v21 = vadd.f32 %v4562_v53, %v4486_v62  ;;  %v4602_v4 = vmul.f32 %v4486_v62, %v4486_v62  ;;  %v4489_v14 = vadd.f32 %v4488_v37, %v7830_v38 }
 0x215   : > { %v6019_v2 = vadd.f32 %v6018_v11, %v6017_v10  ;;  %v6020_v28 = vpop.f32.mrb[130].mxu1  ;;  %v5546_v42 = vpack.c.bf16 %v4497_v16, %v4494_v25  ;;  %v4605_v26 = vmul.f32 %v4497_v16, %v4497_v16 }
 0x216   : > { %v6021_v27 = vpop.f32.mrb[131].mxu1  ;;  %v4633_v0 = vadd.f32 %v4632_v41, %v4602_v4  ;;  %v4564_v48 = vadd.f32 %v4563_v21, %v4489_v14  ;;  %v4603_v61 = vmul.f32 %v4489_v14, %v4489_v14  ;;  %v5541_v15 = vpack.c.bf16 %v4489_v14, %v4486_v62 }
 0x217   : > { %v6022_v7 = vadd.f32 %v6021_v27, %v6020_v28  ;;  %5586 = vst [vmem:[%s7826_s19 + $0x48] sm:$0xff] %v5546_v42   ;;  %v4357_v54 = vadd.f32 %v6019_v2, %v7775_v5 }
 0x218   : > { %v4565_v47 = vadd.f32 %v4564_v48, %v4494_v25  ;;  %v4634_v32 = vadd.f32 %v4633_v0, %v4603_v61  ;;  %5585 = vst [vmem:[%s7826_s19 + $0x40] sm:$0xff] %v5541_v15  }
 0x219   : > { %v4360_v55 = vadd.f32 %v6022_v7, %v7778_v6 }
 0x21a   : > { %v4635_v12 = vadd.f32 %v4634_v32, %v4604_v60  ;;  %v4566_v13 = vadd.f32 %v4565_v47, %v4497_v16 }
 0x21b   : > { %v6023_v38 = vpop.f32.mrb[132].mxu1  ;;  %v6103_v56 = vpop.f32.mrb[132].mxu0 }
 0x21c   : > { %v4510_v57 = vadd.f32 %v6103_v56, %v4349_v50  ;;  %v6024_v29 = vpop.f32.mrb[133].mxu1  ;;  %v4501_v18 = vpop.f32.mrb[133].mxu0  ;;  %v4636_v58 = vadd.f32 %v4635_v12, %v4605_v26 }
 0x21d   : > { %v6025_v45 = vadd.f32 %v6024_v29, %v6023_v38  ;;  %v4502_v59 = vadd.f32 %v4501_v18, %v7851_v33  ;;  %v6026_v5 = vpop.f32.mrb[134].mxu1  ;;  %v6104_v23 = vpop.f32.mrb[134].mxu0 }
 0x21e   : > { %v4513_v30 = vadd.f32 %v6104_v23, %v4352_v31  ;;  %v6027_v49 = vpop.f32.mrb[135].mxu1  ;;  %v4504_v63 = vpop.f32.mrb[135].mxu0  ;;  %v4608_v22 = vmul.f32 %v4510_v57, %v4510_v57 }
 0x21f   : > { %v4567_v6 = vadd.f32 %v4566_v13, %v4502_v59  ;;  %v4606_v52 = vmul.f32 %v4502_v59, %v4502_v59  ;;  %v6028_v51 = vadd.f32 %v6027_v49, %v6026_v5  ;;  %v4505_v8 = vadd.f32 %v4504_v63, %v7855_v36 }
 0x220   : > { %v5556_v3 = vpack.c.bf16 %v4513_v30, %v4510_v57  ;;  %v4365_v50 = vadd.f32 %v6025_v45, %v7787_v17  ;;  %v4609_v10 = vmul.f32 %v4513_v30, %v4513_v30 }
 0x221   : > { %v4637_v20 = vadd.f32 %v4636_v58, %v4606_v52  ;;  %v4568_v46 = vadd.f32 %v4567_v6, %v4505_v8  ;;  %v4607_v35 = vmul.f32 %v4505_v8, %v4505_v8  ;;  %v5551_v24 = vpack.c.bf16 %v4505_v8, %v4502_v59 }
 0x222   : > { %5588 = vst [vmem:[%s7826_s19 + $0x58] sm:$0xff] %v5556_v3   ;;  %v4368_v33 = vadd.f32 %v6028_v51, %v7790_v39 }
 0x223   : > { %v4569_v31 = vadd.f32 %v4568_v46, %v4510_v57  ;;  %v4638_v9 = vadd.f32 %v4637_v20, %v4607_v35  ;;  %5587 = vst [vmem:[%s7826_s19 + $0x50] sm:$0xff] %v5551_v24   ;;  %v6107_v25 = vpop.f32.mrb[136].mxu0 }
 0x224   : > { %v4526_v44 = vadd.f32 %v6107_v25, %v4365_v50  ;;  %v4517_v53 = vpop.f32.mrb[137].mxu0 }
 0x225   : > { %v4639_v62 = vadd.f32 %v4638_v9, %v4608_v22  ;;  %v6029_v36 = vpop.f32.mrb[136].mxu1  ;;  %v4518_v40 = vadd.f32 %v4517_v53, %v4357_v54  ;;  %v4570_v11 = vadd.f32 %v4569_v31, %v4513_v30  ;;  %v6108_v17 = vpop.f32.mrb[138].mxu0 }
 0x226   : > { %v6030_v41 = vpop.f32.mrb[137].mxu1  ;;  %v4529_v16 = vadd.f32 %v6108_v17, %v4368_v33  ;;  %v4520_v37 = vpop.f32.mrb[139].mxu0  ;;  %v4612_v47 = vmul.f32 %v4526_v44, %v4526_v44 }
 0x227   : > { %v6031_v2 = vadd.f32 %v6030_v41, %v6029_v36  ;;  %v4571_v21 = vadd.f32 %v4570_v11, %v4518_v40  ;;  %v4610_v39 = vmul.f32 %v4518_v40, %v4518_v40  ;;  %v4640_v4 = vadd.f32 %v4639_v62, %v4609_v10  ;;  %v6032_v28 = vpop.f32.mrb[138].mxu1 }
 0x228   : > { %v5566_v14 = vpack.c.bf16 %v4529_v16, %v4526_v44  ;;  %v6033_v42 = vpop.f32.mrb[139].mxu1  ;;  %v4521_v27 = vadd.f32 %v4520_v37, %v4360_v55  ;;  %v4613_v56 = vmul.f32 %v4529_v16, %v4529_v16 }
 0x229   : > { %v4641_v0 = vadd.f32 %v4640_v4, %v4610_v39  ;;  %v6034_v7 = vadd.f32 %v6033_v42, %v6032_v28  ;;  %v4373_v48 = vadd.f32 %v6031_v2, %v7799_v1 }
 0x22a   : > { %5590 = vst [vmem:[%s7826_s19 + $0x68] sm:$0xff] %v5566_v14   ;;  %v4572_v61 = vadd.f32 %v4571_v21, %v4521_v27  ;;  %v4611_v15 = vmul.f32 %v4521_v27, %v4521_v27  ;;  %v5561_v54 = vpack.c.bf16 %v4521_v27, %v4518_v40 }
 0x22b   : > { %v4376_v60 = vadd.f32 %v6034_v7, %v7802_v34 }
 0x22c   : > { %v4573_v32 = vadd.f32 %v4572_v61, %v4526_v44  ;;  %v4642_v26 = vadd.f32 %v4641_v0, %v4611_v15  ;;  %5589 = vst [vmem:[%s7826_s19 + $0x60] sm:$0xff] %v5561_v54  }
 0x22d   : > { %v6111_v12 = vpop.f32.mrb[140].mxu0 }
 0x22e   : > { %v6035_v13 = vpop.f32.mrb[140].mxu1  ;;  %v4533_v38 = vpop.f32.mrb[141].mxu0  ;;  %v4643_v57 = vadd.f32 %v4642_v26, %v4612_v47  ;;  %v4574_v18 = vadd.f32 %v4573_v32, %v4529_v16 }
 0x22f   : > { %v6036_v55 = vpop.f32.mrb[141].mxu1  ;;  %v4534_v29 = vadd.f32 %v4533_v38, %v4373_v48  ;;  %v6112_v58 = vpop.f32.mrb[142].mxu0 }
 0x230   : > { %v6037_v1 = vadd.f32 %v6036_v55, %v6035_v13  ;;  %v6038_v45 = vpop.f32.mrb[142].mxu1  ;;  %v4536_v59 = vpop.f32.mrb[143].mxu0  ;;  %v4644_v34 = vadd.f32 %v4643_v57, %v4613_v56 }
 0x231   : > { %v4575_v5 = vadd.f32 %v4574_v18, %v4534_v29  ;;  %v4614_v23 = vmul.f32 %v4534_v29, %v4534_v29  ;;  %v6039_v30 = vpop.f32.mrb[143].mxu1  ;;  %v4537_v49 = vadd.f32 %v4536_v59, %v4376_v60 }
 0x232   : > { %v4381_v63 = vadd.f32 %v6037_v1, %v7808_v19  ;;  %v6040_v6 = vadd.f32 %v6039_v30, %v6038_v45 }
 0x233   : > { %v4645_v52 = vadd.f32 %v4644_v34, %v4614_v23  ;;  %v4576_v51 = vadd.f32 %v4575_v5, %v4537_v49  ;;  %v4615_v8 = vmul.f32 %v4537_v49, %v4537_v49  ;;  %v5571_v3 = vpack.c.bf16 %v4537_v49, %v4534_v29 }
 0x234   : > { %v4542_v50 = vadd.f32 %v6111_v12, %v4381_v63  ;;  %v4384_v20 = vadd.f32 %v6040_v6, %v7814_v43 }
 0x235   : > { %v4646_v46 = vadd.f32 %v4645_v52, %v4615_v8  ;;  %5591 = vst [vmem:[%s7826_s19 + $0x70] sm:$0xff] %v5571_v3  }
 0x236   : > { %v4616_v35 = vmul.f32 %v4542_v50, %v4542_v50  ;;  %v4545_v24 = vadd.f32 %v6112_v58, %v4384_v20  ;;  %v4577_v33 = vadd.f32 %v4576_v51, %v4542_v50 }
 0x238   : > { %v4617_v22 = vmul.f32 %v4545_v24, %v4545_v24  ;;  %v5576_v31 = vpack.c.bf16 %v4545_v24, %v4542_v50  ;;  %v4578_v9 = vadd.f32 %v4577_v33, %v4545_v24  ;;  %v4647_v25 = vadd.f32 %v4646_v46, %v4616_v35 }
 0x23a   : > { %5592 = vst [vmem:[%s7826_s19 + $0x78] sm:$0xff] %v5576_v31   ;;  %v4579_v19 = vrot.slane %v4578_v9, 4  ;;  %v4648_v44 = vadd.f32 %v4647_v25, %v4617_v22 }
 0x23c   : > { %v4580_v53 = vadd.f32 %v4579_v19, %v4578_v9  ;;  %v4649_v10 = vrot.slane %v4648_v44, 4 }
 0x23e   : > { %v4581_v62 = vrot.slane %v4580_v53, 2  ;;  %v4650_v36 = vadd.f32 %v4649_v10, %v4648_v44 }
 0x240   : > { %v4582_v40 = vadd.f32 %v4581_v62, %v4580_v53  ;;  %v4651_v43 = vrot.slane %v4650_v36, 2 }
 0x242   : > { %v4583_v11 = vrot.slane %v4582_v40, 1  ;;  %v4652_v17 = vadd.f32 %v4651_v43, %v4650_v36 }
 0x244   : > { %v4584_v41 = vadd.f32 %v4583_v11, %v4582_v40  ;;  %v4653_v16 = vrot.slane %v4652_v17, 1 }
 0x246   : > { %4585 = vst [vmem:[%s181_s23] sm:$0x1] %v4584_v41  ;;  %v4654_v37 = vadd.f32 %v4653_v16, %v4652_v17 }
 0x248   : > { %4655 = vst [vmem:[%s181_s23 + $0x1] sm:$0x1] %v4654_v37 }
 0x249 PF: > { %s14_s12 = sadd.s32 1, %s6264_s12  }
 0x24a   : > { %p11_p4 = scmp.ge.s32.totalorder %s14_s12, 4  }
 0x24c   :  { %13 = sbr.rel (!%p11_p4) target bundleno = 1 (0x1), region = 72 }

// kernel: ru_double_conv.4
= control target key start
LH: loop header
LB: loop body
LE: loop exit
PB: predicated region body
PF: predicated region fallthrough
CT: control target
= control target key end

     0   :  { %s7074_s18 = smov 0   ;;  %s8908_s0 = inlined_call_operand.vmem [shape: bf16[2,16,16,128], index: 0, kind: input, shape index: {}]   ;;  %s8909_s1 = inlined_call_operand.vmem [shape: f32[1,128], index: 1, kind: input, shape index: {}]   ;;  %s8910_s2 = inlined_call_operand.vmem [shape: f32[1,128], index: 2, kind: input, shape index: {}]   ;;  %s8911_s3 = inlined_call_operand.vmem [shape: bf16[1152,128], index: 3, kind: input, shape index: {}]   ;;  %s8912_s4 = inlined_call_operand.vmem [shape: bf16[2,16,16,128], index: 4, kind: output, shape index: {0}]   ;;  %s8913_s5 = inlined_call_operand.vmem [shape: f32[2,2,128], index: 5, kind: output, shape index: {1}]  }
   0x1 LB: > { %s5782_s19 = sadd.s32 4294967295, %s7041_s18   ;;  %p5786_p0 = scmp.ge.s32.totalorder %s7041_s18, 1  ;;  %s7041_s18 = sphi %s7074_s18, %s16_s18  }
   0x2   : > { %p190_p1 = scmp.lt.s32.totalorder %s7041_s18, 3 }
   0x4   : > { %p191_p2 = pnand %p5786_p0, %p190_p1 }
   0x6   : > { %194 = sbr.rel (%p191_p2) target bundleno = 681 (0x2a9), region = 36 }
   0xd   : > { %v6909_v0 = vld [vmem:[%s8911_s3 + $0x40] sm:$0xff]   ;;  %v7043_v2 = vmov 0   ;;  %v6911_v3 = vld [vmem:[%s8911_s3 + $0x48] sm:$0xff]   ;;  %v6913_v5 = vld [vmem:[%s8911_s3 + $0x50] sm:$0xff]   ;;  %p222_p3 = scmp.lt.s32.totalorder %s5782_s19, 1  ;;  %vm244_vm0 = vcmask 1040384  }
   0xe   : > { %v6910_v1 = vld [vmem:[%s8911_s3] sm:$0xff]   ;;  %237 = vst [vmem:[#allocation2] sm:$0xf] %v7043_v2  ;;  %238 = vst [vmem:[#allocation2 + $0x4] sm:$0xf] %v7043_v2  ;;  %6364 = vmatprep.subr.bf16.mxu0 %v6909_v0  ;;  %6884 = vmatprep.subr.bf16.mxu1 %v6909_v0  ;;  %v6912_v4 = vld [vmem:[%s8911_s3 + $0x8] sm:$0xff]  }
   0xf   : > { %239 = vst [vmem:[#allocation2 + $0x8] sm:$0x1] %v7043_v2  ;;  %241 = vst [vmem:[#allocation2 + $0xcc] sm:$0xf] %v7043_v2  ;;  %6365 = vmatpush3.bf16.msra.mxu0 %v6910_v1  ;;  %6892 = vmatpush3.bf16.msra.mxu1 %v6910_v1  ;;  %v6914_v6 = vld [vmem:[%s8911_s3 + $0x10] sm:$0xff]   ;;  %v6915_v7 = vld [vmem:[%s8911_s3 + $0x58] sm:$0xff]  }
  0x10   : > { %242 = vst [vmem:[#allocation2 + $0xd0] sm:$0xf] %v7043_v2  ;;  %243 = vst [vmem:[#allocation2 + $0xd4] sm:$0x1] %v7043_v2  ;;  %6366 = vmatprep.subr.bf16.mxu0 %v6911_v3  ;;  %6885 = vmatprep.subr.bf16.mxu1 %v6911_v3  ;;  %s8962_s19 = smov (!%p222_p3, %s5782_s19), 1  ;;  %v6916_v8 = vld [vmem:[%s8911_s3 + $0x18] sm:$0xff]  }
  0x11   : > { %v6917_v9 = vld [vmem:[%s8911_s3 + $0x60] sm:$0xff]   ;;  %s6124_s13 = sshll.u32 %s8962_s19, 7  ;;  %v6919_v11 = vld [vmem:[%s8911_s3 + $0x68] sm:$0xff]   ;;  %vm245_vm1 = vsmask.f32 256  ;;  %v8916_v13 = vmov 0 }
  0x12   : > { %v6918_v10 = vld [vmem:[%s8911_s3 + $0x20] sm:$0xff]   ;;  %s7127_s22 = scalar_lea.vmem %s8908_s0, %s6124_s13  ;;  %vm301_vm2 = vsmask.f32 7938  ;;  %vm7131_vm3 = vmand %vm244_vm0, %vm245_vm1  ;;  %v6920_v16 = vld [vmem:[%s8911_s3 + $0x28] sm:$0xff]   ;;  %v8919_v18 = vmov 0  ;;  %vm950_vm6 = vcmask 1043456   ;;  %s8842_s11 = scalar_lea.vmem %s8912_s4, %s6124_s13 }
  0x13   : > { %6367 = vmatpush3.bf16.msra.mxu0 %v6912_v4  ;;  %6893 = vmatpush3.bf16.msra.mxu1 %v6912_v4  ;;  %v8917_v13 = vsel %vm7131_vm3, 4294967295, %v8916_v13  ;;  %vm7142_vm4 = vmand %vm244_vm0, %vm301_vm2  ;;  %v6191_v21 = vld [vmem:[%s7127_s22] sm:$0xff]   ;;  %v6921_v22 = vld [vmem:[%s8911_s3 + $0x70] sm:$0xff]   ;;  %vm1256_vm5 = vsmask.f32 3328  ;;  %vm1819_vm12 = vcmask 1042432  }
  0x14   : > { %6368 = vmatprep.subr.bf16.mxu0 %v6913_v5  ;;  %6886 = vmatprep.subr.bf16.mxu1 %v6913_v5  ;;  %8918 = vst [vmem:[#allocation4_spill] sm:$0xff] %v8917_v13  ;;  %v8920_v18 = vsel %vm7142_vm4, 4294967295, %v8919_v18  ;;  %v250_v24 = vld [vmem:[#allocation2 + $0xc] sm:$0x1]  ;;  %v6192_v25 = vunpack.c.l.bf16 %v6191_v21  ;;  %v6193_v26 = vunpack.c.h.bf16 %v6191_v21  ;;  %v306_v30 = vld [vmem:[#allocation2 + $0x14] sm:$0x1]  ;;  %vm7207_vm10 = vmand %vm950_vm6, %vm301_vm2 }
  0x15   : > { %v247_v12 = vld [vmem:[#allocation2] sm:$0x1]  ;;  %v1209_v15 = vld [vmem:[#allocation2 + $0x4] sm:$0xf]  ;;  %8921 = vst [vmem:[#allocation5_spill] sm:$0xff] %v8920_v18  ;;  %v251_v29 = vsel %vm7131_vm3, 0, %v250_v24 }
  0x16   : > { %v303_v14 = vld [vmem:[#allocation2 + $0x8] sm:$0x1]  ;;  %v248_v17 = vsel %vm7131_vm3, 0, %v247_v12  ;;  %v1269_v19 = vshll.u32 %v1209_v15, 16  ;;  %v1273_v20 = vshrl.u32 %v1209_v15, 16  ;;  %v6344_v31 = vld [vmem:[%s7127_s22 + $0x58] sm:$0xff]  }
  0x17   : > { %6369 = vmatpush3.bf16.msra.mxu0 %v6914_v6  ;;  %6894 = vmatpush3.bf16.msra.mxu1 %v6914_v6  ;;  %249 = vst [vmem:[#allocation2] sm:$0x1] %v248_v17  ;;  %v304_v23 = vsel %vm7142_vm4, 0, %v303_v14  ;;  %v6922_v32 = vld [vmem:[%s8911_s3 + $0x30] sm:$0xff]   ;;  %252 = vst [vmem:[#allocation2 + $0xc] sm:$0x1] %v251_v29  ;;  %v6236_v36 = vunpack.c.l.bf16 %v6344_v31  ;;  %v6237_v37 = vunpack.c.h.bf16 %v6344_v31 }
  0x18   : > { %6370 = vmatprep.subr.bf16.mxu0 %v6915_v7  ;;  %6887 = vmatprep.subr.bf16.mxu1 %v6915_v7  ;;  %305 = vst [vmem:[#allocation2 + $0x8] sm:$0x1] %v304_v23  ;;  %v7152_v27 = vrot.slane %v1269_v19, 5  ;;  %v1275_v28 = vrot.slane %v1273_v20, 4  ;;  %v307_v33 = vsel %vm7142_vm4, 0, %v306_v30  ;;  %v6923_v38 = vld [vmem:[%s8911_s3 + $0x78] sm:$0xff]  }
  0x19   : > { %v7165_v34 = vld [vmem:[%s8909_s1] ss:$0 sm:$0xff]  ;;  %308 = vst [vmem:[#allocation2 + $0x14] sm:$0x1] %v307_v33  ;;  %v283_v41 = vld [vmem:[#allocation2 + $0x90] sm:$0x1] }
  0x1a   : > { %v7170_v35 = vld [vmem:[%s8910_s2] ss:$0 sm:$0xff]  ;;  %v429_v39 = vmul.f32 %v6192_v25, %v7165_v34  ;;  %v430_v40 = vmul.f32 %v6193_v26, %v7165_v34  ;;  %v339_v42 = vld [vmem:[#allocation2 + $0x98] sm:$0x1]  ;;  %v284_v43 = vsel %vm7131_vm3, 0, %v283_v41  ;;  %v451_v45 = vmul.f32 %v6236_v36, %v7165_v34  ;;  %s5791_s13 = sshll.u32 %s8962_s19, 1 }
  0x1b   : > { %6371 = vmatpush3.bf16.msra.mxu0 %v6916_v8  ;;  %6895 = vmatpush3.bf16.msra.mxu1 %v6916_v8  ;;  %v340_v44 = vsel %vm7142_vm4, 0, %v339_v42  ;;  %v452_v46 = vmul.f32 %v6237_v37, %v7165_v34  ;;  %vm1257_vm7 = vsmask.f32 7440  ;;  %v1276_v47 = vor.u32 %v1275_v28, %v7152_v27  ;;  %285 = vst [vmem:[#allocation2 + $0x90] sm:$0x1] %v284_v43  ;;  %v6924_v50 = vld [vmem:[%s8911_s3 + $0x38] sm:$0xff]   ;;  %s235_s15 = scalar_lea.vmem %s8913_s5, %s5791_s13 }
  0x1c   : > { %6372 = vmatprep.subr.bf16.mxu0 %v6917_v9  ;;  %6888 = vmatprep.subr.bf16.mxu1 %v6917_v9  ;;  %v467_v48 = vadd.f32 %v7170_v35, %v429_v39  ;;  %v468_v49 = vadd.f32 %v7170_v35, %v430_v40  ;;  %341 = vst [vmem:[#allocation2 + $0x98] sm:$0x1] %v340_v44  ;;  %vm627_vm8 = vsmask.f32 4368  ;;  %v6926_v55 = vld [vmem:[%s8911_s3 + $0xc0] sm:$0xff]   ;;  %vm7199_vm9 = vmor %vm1256_vm5, %vm1257_vm7  ;;  %v6334_v44 = vld [vmem:[%s7127_s22 + $0x8] sm:$0xff]  }
  0x1d   : > { %v489_v51 = vadd.f32 %v7170_v35, %v451_v45  ;;  %v490_v52 = vadd.f32 %v7170_v35, %v452_v46  ;;  %v1277_v61 = vrot.slane %v1276_v47, 4  ;;  %v6927_v1 = vld [vmem:[%s8911_s3 + $0x140] sm:$0xff]   ;;  %vm7213_vm11 = vmor %vm245_vm1, %vm627_vm8  ;;  %v253_v42 = vld [vmem:[#allocation2 + $0x18] sm:$0x1]  ;;  %vm1820_vm13 = vcmask 1046532  }
  0x1e   : > { %v1208_v53 = vld [vmem:[#allocation2] sm:$0xf]  ;;  %v499_v54 = vmax.f32 %v467_v48, 0.0  ;;  %v500_v59 = vmax.f32 %v468_v49, 0.0  ;;  %v952_v15 = vld [vmem:[#allocation2 + $0xc] sm:$0xf]  ;;  %vm7454_vm14 = vmor %vm1819_vm12, %vm1820_vm13 }
  0x1f   : > { %6373 = vmatpush3.bf16.msra.mxu0 %v6918_v10  ;;  %6896 = vmatpush3.bf16.msra.mxu1 %v6918_v10  ;;  %v1210_v56 = vld [vmem:[#allocation2 + $0x8] sm:$0x1]  ;;  %v1260_v57 = vshrl.u32 %v1208_v53, 16  ;;  %v1263_v58 = vshll.u32 %v1208_v53, 16  ;;  %v521_v60 = vmax.f32 %v489_v51, 0.0  ;;  %v522_v0 = vmax.f32 %v490_v52, 0.0 }
  0x20   : > { %6374 = vmatprep.subr.bf16.mxu0 %v6919_v11  ;;  %6889 = vmatprep.subr.bf16.mxu1 %v6919_v11  ;;  %v1279_v62 = vshll.u32 %v1210_v56, 16  ;;  %v6126_v63 = vpack.c.bf16 %v499_v54, %v499_v54  ;;  %v6127_v5 = vpack.c.bf16 %v500_v59, %v500_v59  ;;  %v956_v20 = vld [vmem:[#allocation2 + $0x14] sm:$0x1]  ;;  %v6925_v25 = vld [vmem:[#allocation2] sm:$0xff]   ;;  %v6196_v59 = vunpack.c.l.bf16 %v6334_v44 }
  0x21   : > { %v1262_v3 = vrot.slane %v1260_v57, 4  ;;  %v1265_v4 = vrot.slane %v1263_v58, 5  ;;  %v6148_v6 = vpack.c.bf16 %v521_v60, %v521_v60  ;;  %v6149_v10 = vpack.c.bf16 %v522_v0, %v522_v0  ;;  %v309_v43 = vld [vmem:[#allocation2 + $0x20] sm:$0x1]  ;;  %v342_v51 = vld [vmem:[#allocation2 + $0xa4] sm:$0x1] }
  0x22   : > { %v1281_v7 = vrot.slane %v1279_v62, 5  ;;  %v630_v8 = vshrl.u32 %v6126_v63, 16  ;;  %v633_v9 = vshll.u32 %v6126_v63, 16  ;;  %v638_v12 = vshrl.u32 %v6127_v5, 16  ;;  %v1029_v23 = vld [vmem:[#allocation2 + $0x90] sm:$0xf] }
  0x23   : > { %6375 = vmatpush3.bf16.msra.mxu0 %v6920_v16  ;;  %6897 = vmatpush3.bf16.msra.mxu1 %v6920_v16  ;;  %v1266_v11 = vor.u32 %v1265_v4, %v1262_v3  ;;  %v641_v14 = vshll.u32 %v6127_v5, 16  ;;  %v817_v16 = vshrl.u32 %v6148_v6, 16  ;;  %v820_v21 = vshll.u32 %v6148_v6, 16  ;;  %v1033_v37 = vld [vmem:[#allocation2 + $0x98] sm:$0x1]  ;;  %v6931_v49 = vld [vmem:[%s8911_s3 + $0x100] sm:$0xff]  }
  0x24   : > { %6376 = vmatprep.subr.bf16.mxu0 %v6921_v22  ;;  %6890 = vmatprep.subr.bf16.mxu1 %v6921_v22  ;;  %v1282_v17 = vsel %vm7199_vm9, %v1277_v61, %v1281_v7  ;;  %v632_v19 = vrot.slane %v630_v8, 7  ;;  %v825_v22 = vshrl.u32 %v6149_v10, 16  ;;  %v640_v26 = vrot.slane %v638_v12, 7  ;;  %v6939_v5 = vld [vmem:[%s8911_s3 + $0x148] sm:$0xff]  }
  0x25   : > { %v1267_v24 = vrot.slane %v1266_v11, 4  ;;  %v819_v29 = vrot.slane %v817_v16, 7  ;;  %v828_v30 = vshll.u32 %v6149_v10, 16  ;;  %v254_v57 = vsel %vm7131_vm3, 0, %v253_v42  ;;  %v256_v10 = vld [vmem:[#allocation2 + $0x24] sm:$0x1] }
  0x26   : > { %v636_v33 = vrot.slane %v632_v19, 4  ;;  %v827_v36 = vrot.slane %v825_v22, 7  ;;  %v643_v39 = vor.u32 %v641_v14, %v640_v26  ;;  %v645_v40 = vrot.slane %v640_v26, 4  ;;  %255 = vst [vmem:[#allocation2 + $0x18] sm:$0x1] %v254_v57 }
  0x27   : > { %6377 = vmatpush3.bf16.msra.mxu0 %v6922_v32  ;;  %6898 = vmatpush3.bf16.msra.mxu1 %v6922_v32  ;;  %v635_v32 = vor.u32 %v633_v9, %v632_v19  ;;  %v822_v41 = vor.u32 %v820_v21, %v819_v29  ;;  %v823_v47 = vrot.slane %v819_v29, 4  ;;  %v310_v58 = vsel %vm7142_vm4, 0, %v309_v43  ;;  %v6941_v9 = vld [vmem:[%s8911_s3 + $0x108] sm:$0xff]  }
  0x28   : > { %6378 = vmatprep.subr.bf16.mxu0 %v6923_v38  ;;  %6891 = vmatprep.subr.bf16.mxu1 %v6923_v38  ;;  %v1272_v38 = vsel %vm7199_vm9, %v1267_v24, %v7152_v27  ;;  %v830_v48 = vor.u32 %v828_v30, %v827_v36  ;;  %v644_v27 = vsel %vm7213_vm11, %v636_v33, %v643_v39  ;;  %v832_v53 = vrot.slane %v827_v36, 4 }
  0x29   : > { %v5842_v45 = vcombine.low %v1272_v38, %v1282_v17  ;;  %v953_v46 = vsel %vm7207_vm10, %v635_v32, %v952_v15  ;;  %v957_v52 = vsel %vm7131_vm3, %v645_v40, %v956_v20  ;;  %v1030_v54 = vsel %vm7207_vm10, %v822_v41, %v1029_v23  ;;  %955 = vst [vmem:[#allocation2 + $0x10] sm:$0xf] %v644_v27 }
  0x2a   : > { %954 = vst [vmem:[#allocation2 + $0xc] sm:$0xf] %v953_v46  ;;  %958 = vst [vmem:[#allocation2 + $0x14] sm:$0x1] %v957_v52  ;;  %v831_v56 = vsel %vm7213_vm11, %v823_v47, %v830_v48  ;;  %v1034_v60 = vsel %vm7131_vm3, %v832_v53, %v1033_v37  ;;  %v6197_v61 = vunpack.c.h.bf16 %v6334_v44  ;;  %v343_v63 = vsel %vm7142_vm4, 0, %v342_v51 }
  0x2b   : > { %6379 = vmatpush3.bf16.msra.mxu0 %v6924_v50  ;;  %6899 = vmatpush3.bf16.msra.mxu1 %v6924_v50  ;;  %v286_v50 = vld [vmem:[#allocation2 + $0x9c] sm:$0x1]  ;;  %1031 = vst [vmem:[#allocation2 + $0x90] sm:$0xf] %v1030_v54  ;;  %1032 = vst [vmem:[#allocation2 + $0x94] sm:$0xf] %v831_v56  ;;  %v431_v0 = vmul.f32 %v6196_v59, %v7165_v34 }
  0x2c   : > { %6476 = vmatprep.subr.bf16.mxu1 %v6926_v55  ;;  %6588 = vmatprep.subr.bf16.mxu0 %v6927_v1  ;;  %v6345_v55 = vld [vmem:[%s7127_s22 + $0x60] sm:$0xff]   ;;  %311 = vst [vmem:[#allocation2 + $0x20] sm:$0x1] %v310_v58  ;;  %v287_v62 = vsel %vm7131_vm3, 0, %v286_v50  ;;  %1035 = vst [vmem:[#allocation2 + $0x98] sm:$0x1] %v1034_v60  ;;  %v432_v4 = vmul.f32 %v6197_v61, %v7165_v34 }
  0x2d   : > { %4655 = vmatprep.mubr.bf16.mxu0 %v5842_v45  ;;  %288 = vst [vmem:[#allocation2 + $0x9c] sm:$0x1] %v287_v62  ;;  %344 = vst [vmem:[#allocation2 + $0xa4] sm:$0x1] %v343_v63  ;;  %v6240_v1 = vunpack.c.l.bf16 %v6345_v55  ;;  %v6241_v3 = vunpack.c.h.bf16 %v6345_v55  ;;  %v469_v6 = vadd.f32 %v7170_v35, %v431_v0  ;;  %v257_v14 = vsel %vm7131_vm3, 0, %v256_v10 }
  0x2e   : > { %4656 = vmatmul.mubr.bf16.vlgmr.msra.gmra.mrb[0].mxu0 %v6925_v25  ;;  %v470_v20 = vadd.f32 %v7170_v35, %v432_v4  ;;  %258 = vst [vmem:[#allocation2 + $0x24] sm:$0x1] %v257_v14  ;;  %v312_v60 = vld [vmem:[#allocation2 + $0x2c] sm:$0x1] }
  0x2f   : > { %6589 = vmatpush3.bf16.msra.mxu0 %v6931_v49  ;;  %v453_v7 = vmul.f32 %v6240_v1, %v7165_v34  ;;  %v454_v8 = vmul.f32 %v6241_v3, %v7165_v34  ;;  %v501_v12 = vmax.f32 %v469_v6, 0.0  ;;  %v959_v3 = vld [vmem:[#allocation2 + $0x18] sm:$0xf] }
  0x30   : > { %6590 = vmatprep.subr.bf16.mxu0 %v6939_v5  ;;  %v1212_v15 = vld [vmem:[#allocation2 + $0x10] sm:$0xf]  ;;  %v502_v48 = vmax.f32 %v470_v20, 0.0 }
  0x31   : > { %v1211_v11 = vld [vmem:[#allocation2 + $0xc] sm:$0xf]  ;;  %v1213_v16 = vld [vmem:[#allocation2 + $0x14] sm:$0x1]  ;;  %v1293_v21 = vshll.u32 %v1212_v15, 16  ;;  %v1297_v22 = vshrl.u32 %v1212_v15, 16  ;;  %v491_v25 = vadd.f32 %v7170_v35, %v453_v7  ;;  %v6128_v33 = vpack.c.bf16 %v501_v12, %v501_v12 }
  0x32   : > { %v1284_v17 = vshrl.u32 %v1211_v11, 16  ;;  %v1287_v19 = vshll.u32 %v1211_v11, 16  ;;  %v1303_v23 = vshll.u32 %v1213_v16, 16  ;;  %v1244_v24 = vld [vmem:[#allocation2 + $0x90] sm:$0xf]  ;;  %v492_v36 = vadd.f32 %v7170_v35, %v454_v8 }
  0x33   : > { %6591 = vmatpush3.bf16.msra.mxu0 %v6941_v9  ;;  %v1245_v30 = vld [vmem:[#allocation2 + $0x94] sm:$0xf]  ;;  %v1246_v32 = vld [vmem:[#allocation2 + $0x98] sm:$0x1]  ;;  %v1295_v37 = vrot.slane %v1293_v21, 5  ;;  %v1299_v38 = vrot.slane %v1297_v22, 4  ;;  %v6129_v54 = vpack.c.bf16 %v502_v48, %v502_v48 }
  0x34   : > { %v1286_v26 = vrot.slane %v1284_v17, 4  ;;  %v1289_v29 = vrot.slane %v1287_v19, 5  ;;  %v1305_v39 = vrot.slane %v1303_v23, 5  ;;  %v1548_v40 = vshrl.u32 %v1244_v24, 16  ;;  %v6928_v62 = vld [vmem:[#allocation2 + $0xc] sm:$0xff]   ;;  %v6930_v9 = vld [vmem:[%s8911_s3 + $0x80] sm:$0xff]  }
  0x35   : > { %v1551_v42 = vshll.u32 %v1244_v24, 16  ;;  %v1557_v43 = vshll.u32 %v1245_v30, 16  ;;  %v1561_v44 = vshrl.u32 %v1245_v30, 16  ;;  %v1300_v45 = vor.u32 %v1299_v38, %v1295_v37  ;;  %v963_v7 = vld [vmem:[#allocation2 + $0x20] sm:$0x1]  ;;  %v6335_v15 = vld [vmem:[%s7127_s22 + $0x10] sm:$0xff]  }
  0x36   : > { %v1290_v41 = vor.u32 %v1289_v29, %v1286_v26  ;;  %v1550_v46 = vrot.slane %v1548_v40, 4  ;;  %v1567_v47 = vshll.u32 %v1246_v32, 16  ;;  %v647_v55 = vshrl.u32 %v6128_v33, 16  ;;  %v289_v16 = vld [vmem:[#allocation2 + $0xa8] sm:$0x1]  ;;  %v6929_v20 = vld [vmem:[#allocation2 + $0x90] sm:$0xff]  }
  0x37   : > { %v1553_v50 = vrot.slane %v1551_v42, 5  ;;  %v1559_v51 = vrot.slane %v1557_v43, 5  ;;  %v1563_v27 = vrot.slane %v1561_v44, 4  ;;  %v1301_v52 = vrot.slane %v1300_v45, 4  ;;  %v6932_v21 = vld [vmem:[%s8911_s3 + $0xc8] sm:$0xff]  }
  0x38   : > { %v1291_v49 = vrot.slane %v1290_v41, 4  ;;  %v1569_v53 = vrot.slane %v1567_v47, 5  ;;  %v650_v59 = vshll.u32 %v6128_v33, 16  ;;  %v649_v63 = vrot.slane %v647_v55, 7  ;;  %v345_v24 = vld [vmem:[#allocation2 + $0xb0] sm:$0x1] }
  0x39   : > { %v1554_v57 = vor.u32 %v1553_v50, %v1550_v46  ;;  %v1564_v58 = vor.u32 %v1563_v27, %v1559_v51  ;;  %v1306_v61 = vsel %vm7199_vm9, %v1301_v52, %v1305_v39  ;;  %v655_v0 = vshrl.u32 %v6129_v54, 16  ;;  %v6346_v32 = vld [vmem:[%s7127_s22 + $0x68] sm:$0xff]   ;;  %v259_v48 = vld [vmem:[#allocation2 + $0x30] sm:$0x1]  ;;  %v1036_v50 = vld [vmem:[#allocation2 + $0x9c] sm:$0xf] }
  0x3a   : > { %v1296_v56 = vsel %vm7199_vm9, %v1291_v49, %v1295_v37  ;;  %v658_v1 = vshll.u32 %v6129_v54, 16  ;;  %v523_v8 = vmax.f32 %v491_v25, 0.0  ;;  %v652_v10 = vor.u32 %v650_v59, %v649_v63  ;;  %v6933_v39 = vld [vmem:[%s8911_s3 + $0x88] sm:$0xff]   ;;  %v6949_v49 = vld [vmem:[%s8911_s3 + $0x150] sm:$0xff]  }
  0x3b   : > { %v5843_v4 = vcombine.low %v1296_v56, %v1306_v61  ;;  %v1555_v5 = vrot.slane %v1554_v57, 4  ;;  %v1565_v6 = vrot.slane %v1564_v58, 4  ;;  %v653_v11 = vrot.slane %v649_v63, 4  ;;  %v6934_v27 = vld [vmem:[%s8911_s3 + $0xd0] sm:$0xff]   ;;  %6592 = vmatprep.subr.bf16.mxu0 %v6949_v49 }
  0x3c   : > { %v657_v12 = vrot.slane %v655_v0, 7  ;;  %v524_v14 = vmax.f32 %v492_v36, 0.0  ;;  %v6150_v22 = vpack.c.bf16 %v523_v8, %v523_v8  ;;  %v313_v23 = vsel %vm7142_vm4, 0, %v312_v60  ;;  %v315_v60 = vld [vmem:[#allocation2 + $0x38] sm:$0x1]  ;;  %v6937_v61 = vld [vmem:[%s8911_s3 + $0x90] sm:$0xff]  }
  0x3d   : > { %4663 = vmatprep.mubr.bf16.mxu0 %v5843_v4  ;;  %v1560_v17 = vsel %vm7199_vm9, %v1555_v5, %v1559_v51  ;;  %v1570_v19 = vsel %vm7199_vm9, %v1565_v6, %v1569_v53  ;;  %v960_v30 = vsel %vm7207_vm10, %v652_v10, %v959_v3  ;;  %314 = vst [vmem:[#allocation2 + $0x2c] sm:$0x1] %v313_v23  ;;  %v6200_v38 = vunpack.c.l.bf16 %v6335_v15  ;;  %v1040_v51 = vld [vmem:[#allocation2 + $0xa4] sm:$0x1]  ;;  %v6953_v3 = vld [vmem:[%s8911_s3 + $0x110] sm:$0xff]  }
  0x3e   : > { %v5854_v25 = vcombine.low %v1560_v17, %v1570_v19  ;;  %4664 = vmatmul.mubr.bf16.gmra.mrb[4].mxu0 %v6928_v62  ;;  %v660_v26 = vor.u32 %v658_v1, %v657_v12  ;;  %v662_v29 = vrot.slane %v657_v12, 4  ;;  %961 = vst [vmem:[#allocation2 + $0x18] sm:$0xf] %v960_v30  ;;  %v6151_v33 = vpack.c.bf16 %v524_v14, %v524_v14 }
  0x3f   : > { %v834_v36 = vshrl.u32 %v6150_v22, 16  ;;  %v837_v37 = vshll.u32 %v6150_v22, 16  ;;  %v6201_v42 = vunpack.c.h.bf16 %v6335_v15  ;;  %v290_v43 = vsel %vm7131_vm3, 0, %v289_v16  ;;  %6593 = vmatpush3.bf16.msra.mxu0 %v6953_v3 }
  0x40   : > { %4751 = vmatprep.mubr.bf16.mxu1 %v5854_v25  ;;  %v661_v40 = vsel %vm7213_vm11, %v653_v11, %v660_v26  ;;  %v964_v41 = vsel %vm7131_vm3, %v662_v29, %v963_v7  ;;  %v842_v45 = vshrl.u32 %v6151_v33, 16  ;;  %v845_v46 = vshll.u32 %v6151_v33, 16  ;;  %291 = vst [vmem:[#allocation2 + $0xa8] sm:$0x1] %v290_v43  ;;  %v6938_v7 = vld [vmem:[%s8911_s3 + $0xd8] sm:$0xff]  }
  0x41   : > { %4752 = vmatmul.mubr.bf16.vlgmr.msra.gmra.mrb[0].mxu1 %v6929_v20  ;;  %962 = vst [vmem:[#allocation2 + $0x1c] sm:$0xf] %v661_v40  ;;  %965 = vst [vmem:[#allocation2 + $0x20] sm:$0x1] %v964_v41  ;;  %v836_v44 = vrot.slane %v834_v36, 7  ;;  %v433_v47 = vmul.f32 %v6200_v38, %v7165_v34  ;;  %v434_v52 = vmul.f32 %v6201_v42, %v7165_v34  ;;  %v346_v53 = vsel %vm7142_vm4, 0, %v345_v24 }
  0x42   : > { %6477 = vmatpush3.bf16.msra.mxu1 %v6930_v9  ;;  %v6244_v54 = vunpack.c.l.bf16 %v6346_v32  ;;  %v6245_v55 = vunpack.c.h.bf16 %v6346_v32  ;;  %v844_v58 = vrot.slane %v842_v45, 7  ;;  %347 = vst [vmem:[#allocation2 + $0xb0] sm:$0x1] %v346_v53  ;;  %v260_v1 = vsel %vm7131_vm3, 0, %v259_v48  ;;  %v7318_v9 = vld [vmem:[%s7127_s22 + $0x18] sm:$0xff]   ;;  %v6942_v45 = vld [vmem:[%s8911_s3 + $0xe0] sm:$0xff]  }
  0x43   : > { %6478 = vmatprep.subr.bf16.mxu1 %v6932_v21  ;;  %v839_v56 = vor.u32 %v837_v37, %v836_v44  ;;  %v840_v57 = vrot.slane %v836_v44, 4  ;;  %v471_v59 = vadd.f32 %v7170_v35, %v433_v47  ;;  %v472_v62 = vadd.f32 %v7170_v35, %v434_v52  ;;  %261 = vst [vmem:[#allocation2 + $0x30] sm:$0x1] %v260_v1  ;;  %v6940_v37 = vld [vmem:[%s8911_s3 + $0x98] sm:$0xff]  }
  0x44   : > { %v455_v63 = vmul.f32 %v6244_v54, %v7165_v34  ;;  %v456_v0 = vmul.f32 %v6245_v55, %v7165_v34  ;;  %v847_v4 = vor.u32 %v845_v46, %v844_v58  ;;  %v849_v5 = vrot.slane %v844_v58, 4 }
  0x45   : > { %v1037_v6 = vsel %vm7207_vm10, %v839_v56, %v1036_v50  ;;  %v503_v8 = vmax.f32 %v471_v59, 0.0  ;;  %v1214_v10 = vld [vmem:[#allocation2 + $0x18] sm:$0xf]  ;;  %v504_v11 = vmax.f32 %v472_v62, 0.0  ;;  %v316_v15 = vsel %vm7142_vm4, 0, %v315_v60  ;;  %v6945_v50 = vld [vmem:[%s8911_s3 + $0xa0] sm:$0xff]  }
  0x46   : > { %6479 = vmatpush3.bf16.msra.mxu1 %v6933_v39  ;;  %1038 = vst [vmem:[#allocation2 + $0x9c] sm:$0xf] %v1037_v6  ;;  %v493_v12 = vadd.f32 %v7170_v35, %v455_v63  ;;  %v7322_v14 = vadd.f32 %v7170_v35, %v456_v0  ;;  %v1308_v16 = vshrl.u32 %v1214_v10, 16  ;;  %v1311_v17 = vshll.u32 %v1214_v10, 16  ;;  %317 = vst [vmem:[#allocation2 + $0x38] sm:$0x1] %v316_v15 }
  0x47   : > { %v848_v19 = vsel %vm7213_vm11, %v840_v57, %v847_v4  ;;  %v1041_v20 = vsel %vm7131_vm3, %v849_v5, %v1040_v51  ;;  %6480 = vmatprep.subr.bf16.mxu1 %v6934_v27  ;;  %v6130_v23 = vpack.c.bf16 %v503_v8, %v503_v8  ;;  %v6131_v24 = vpack.c.bf16 %v504_v11, %v504_v11  ;;  %v966_v59 = vld [vmem:[#allocation2 + $0x24] sm:$0xf]  ;;  %v970_v60 = vld [vmem:[#allocation2 + $0x2c] sm:$0x1] }
  0x48   : > { %v1215_v21 = vld [vmem:[#allocation2 + $0x1c] sm:$0xf]  ;;  %v1216_v22 = vld [vmem:[#allocation2 + $0x20] sm:$0x1]  ;;  %1039 = vst [vmem:[#allocation2 + $0xa0] sm:$0xf] %v848_v19  ;;  %v6204_v25 = vunpack.c.l.bf16 %v7318_v9  ;;  %v6205_v26 = vunpack.c.h.bf16 %v7318_v9 }
  0x49   : > { %1042 = vst [vmem:[#allocation2 + $0xa4] sm:$0x1] %v1041_v20  ;;  %v1310_v29 = vrot.slane %v1308_v16, 4  ;;  %v1313_v30 = vrot.slane %v1311_v17, 5  ;;  %v1317_v32 = vshll.u32 %v1215_v21, 16  ;;  %v1321_v33 = vshrl.u32 %v1215_v21, 16 }
  0x4a   : > { %v1327_v36 = vshll.u32 %v1216_v22, 16  ;;  %6481 = vmatpush3.bf16.msra.mxu1 %v6937_v61  ;;  %v664_v38 = vshrl.u32 %v6130_v23, 16  ;;  %v667_v39 = vshll.u32 %v6130_v23, 16  ;;  %v672_v40 = vshrl.u32 %v6131_v24, 16  ;;  %v6946_v61 = vld [vmem:[%s8911_s3 + $0xe8] sm:$0xff]   ;;  %v6935_v3 = vld [vmem:[#allocation2 + $0x18] sm:$0xff]  }
  0x4b   : > { %v1314_v41 = vor.u32 %v1313_v30, %v1310_v29  ;;  %v1319_v42 = vrot.slane %v1317_v32, 5  ;;  %v1323_v43 = vrot.slane %v1321_v33, 4  ;;  %6482 = vmatprep.subr.bf16.mxu1 %v6938_v7  ;;  %v675_v44 = vshll.u32 %v6131_v24, 16  ;;  %v6947_v11 = vld [vmem:[%s8911_s3 + $0xa8] sm:$0xff]   ;;  %v292_v17 = vld [vmem:[#allocation2 + $0xb4] sm:$0x1] }
  0x4c   : > { %v1329_v46 = vrot.slane %v1327_v36, 5  ;;  %v666_v47 = vrot.slane %v664_v38, 7  ;;  %v674_v48 = vrot.slane %v672_v40, 7  ;;  %v525_v49 = vmax.f32 %v493_v12, 0.0  ;;  %v7360_v30 = vld [vmem:[%s7127_s22 + $0x70] sm:$0xff]  }
  0x4d   : > { %v1315_v51 = vrot.slane %v1314_v41, 4  ;;  %v1324_v27 = vor.u32 %v1323_v43, %v1319_v42  ;;  %v1247_v52 = vld [vmem:[#allocation2 + $0x9c] sm:$0xf]  ;;  %v526_v53 = vmax.f32 %v7322_v14, 0.0  ;;  %v435_v54 = vmul.f32 %v6204_v25, %v7165_v34  ;;  %v6948_v32 = vld [vmem:[%s8911_s3 + $0xf0] sm:$0xff]  }
  0x4e   : > { %v1572_v55 = vshrl.u32 %v1247_v52, 16  ;;  %v1575_v56 = vshll.u32 %v1247_v52, 16  ;;  %6483 = vmatpush3.bf16.msra.mxu1 %v6940_v37  ;;  %v669_v57 = vor.u32 %v667_v39, %v666_v47  ;;  %v670_v58 = vrot.slane %v666_v47, 4  ;;  %v348_v39 = vld [vmem:[#allocation2 + $0xbc] sm:$0x1]  ;;  %v6952_v40 = vld [vmem:[%s8911_s3 + $0xb0] sm:$0xff]  }
  0x4f   : > { %v1320_v62 = vsel %vm7199_vm9, %v1315_v51, %v1319_v42  ;;  %v1325_v63 = vrot.slane %v1324_v27, 4  ;;  %v1248_v0 = vld [vmem:[#allocation2 + $0xa0] sm:$0xf]  ;;  %v677_v4 = vor.u32 %v675_v44, %v674_v48  ;;  %v6152_v5 = vpack.c.bf16 %v525_v49, %v525_v49  ;;  %6484 = vmatprep.subr.bf16.mxu1 %v6942_v45  ;;  %v1043_v43 = vld [vmem:[#allocation2 + $0xa8] sm:$0xf]  ;;  %v6954_v51 = vld [vmem:[%s8911_s3 + $0xf8] sm:$0xff]  }
  0x50   : > { %v1249_v1 = vld [vmem:[#allocation2 + $0xa4] sm:$0x1]  ;;  %v1574_v6 = vrot.slane %v1572_v55, 4  ;;  %v1577_v7 = vrot.slane %v1575_v56, 5  ;;  %v1581_v8 = vshll.u32 %v1248_v0, 16  ;;  %v1585_v10 = vshrl.u32 %v1248_v0, 16 }
  0x51   : > { %v1330_v12 = vsel %vm7199_vm9, %v1325_v63, %v1329_v46  ;;  %v1591_v14 = vshll.u32 %v1249_v1, 16  ;;  %v678_v15 = vsel %vm7213_vm11, %v670_v58, %v677_v4  ;;  %v679_v16 = vrot.slane %v674_v48, 4  ;;  %v1047_v49 = vld [vmem:[#allocation2 + $0xb0] sm:$0x1]  ;;  %v6936_v55 = vld [vmem:[#allocation2 + $0x9c] sm:$0xff]  }
  0x52   : > { %v5844_v19 = vcombine.low %v1320_v62, %v1330_v12  ;;  %v1578_v20 = vor.u32 %v1577_v7, %v1574_v6  ;;  %v1583_v21 = vrot.slane %v1581_v8, 5  ;;  %v1587_v22 = vrot.slane %v1585_v10, 4  ;;  %969 = vst [vmem:[#allocation2 + $0x28] sm:$0xf] %v678_v15  ;;  %6485 = vmatpush3.bf16.msra.mxu1 %v6945_v50  ;;  %v6955_v6 = vld [vmem:[%s8911_s3 + $0xb8] sm:$0xff]   ;;  %v6957_v7 = vld [vmem:[%s8911_s3 + $0x1c0] sm:$0xff]  }
  0x53   : > { %v1593_v23 = vrot.slane %v1591_v14, 5  ;;  %v967_v24 = vsel %vm7207_vm10, %v669_v57, %v966_v59  ;;  %v971_v25 = vsel %vm7131_vm3, %v679_v16, %v970_v60  ;;  %v6153_v29 = vpack.c.bf16 %v526_v53, %v526_v53  ;;  %6486 = vmatprep.subr.bf16.mxu1 %v6946_v61  ;;  %v6960_v53 = vld [vmem:[%s8911_s3 + $0x158] sm:$0xff]  }
  0x54   : > { %4671 = vmatprep.mubr.bf16.mxu0 %v5844_v19  ;;  %v1579_v33 = vrot.slane %v1578_v20, 4  ;;  %v1588_v36 = vor.u32 %v1587_v22, %v1583_v21  ;;  %968 = vst [vmem:[#allocation2 + $0x24] sm:$0xf] %v967_v24  ;;  %972 = vst [vmem:[#allocation2 + $0x2c] sm:$0x1] %v971_v25  ;;  %v851_v37 = vshrl.u32 %v6152_v5, 16  ;;  %v436_v44 = vmul.f32 %v6205_v26, %v7165_v34 }
  0x55   : > { %v854_v38 = vshll.u32 %v6152_v5, 16  ;;  %4672 = vmatmul.mubr.bf16.gmra.mrb[8].mxu0 %v6935_v3  ;;  %v859_v41 = vshrl.u32 %v6153_v29, 16  ;;  %v862_v42 = vshll.u32 %v6153_v29, 16  ;;  %v473_v45 = vadd.f32 %v7170_v35, %v435_v54  ;;  %v6961_v59 = vld [vmem:[%s8911_s3 + $0x118] sm:$0xff]   ;;  %6594 = vmatprep.subr.bf16.mxu0 %v6960_v53  ;;  %v6337_v53 = vld [vmem:[%s7127_s22 + $0x20] sm:$0xff]  }
  0x56   : > { %v1584_v46 = vsel %vm7199_vm9, %v1579_v33, %v1583_v21  ;;  %v1589_v47 = vrot.slane %v1588_v36, 4  ;;  %v853_v48 = vrot.slane %v851_v37, 7  ;;  %6487 = vmatpush3.bf16.msra.mxu1 %v6947_v11  ;;  %v293_v50 = vsel %vm7131_vm3, 0, %v292_v17  ;;  %6595 = vmatpush3.bf16.msra.mxu0 %v6961_v59  ;;  %v262_v21 = vld [vmem:[#allocation2 + $0x3c] sm:$0x1] }
  0x57   : > { %v861_v27 = vrot.slane %v859_v41, 7  ;;  %v474_v9 = vadd.f32 %v7170_v35, %v436_v44  ;;  %v505_v26 = vmax.f32 %v473_v45, 0.0  ;;  %294 = vst [vmem:[#allocation2 + $0xb4] sm:$0x1] %v293_v50  ;;  %v349_v52 = vsel %vm7142_vm4, 0, %v348_v39  ;;  %6488 = vmatprep.subr.bf16.mxu1 %v6948_v32 }
  0x58   : > { %v1594_v54 = vsel %vm7199_vm9, %v1589_v47, %v1593_v23  ;;  %v856_v56 = vor.u32 %v854_v38, %v853_v48  ;;  %v857_v57 = vrot.slane %v853_v48, 4  ;;  %350 = vst [vmem:[#allocation2 + $0xbc] sm:$0x1] %v349_v52  ;;  %v6248_v58 = vunpack.c.l.bf16 %v7360_v30  ;;  %v973_v39 = vld [vmem:[#allocation2 + $0x30] sm:$0xf] }
  0x59   : > { %v5855_v60 = vcombine.low %v1584_v46, %v1594_v54  ;;  %v1218_v61 = vld [vmem:[#allocation2 + $0x28] sm:$0xf]  ;;  %v864_v62 = vor.u32 %v862_v42, %v861_v27  ;;  %v866_v63 = vrot.slane %v861_v27, 4  ;;  %v506_v0 = vmax.f32 %v474_v9, 0.0  ;;  %v318_v52 = vld [vmem:[#allocation2 + $0x44] sm:$0x1] }
  0x5a   : > { %v1341_v1 = vshll.u32 %v1218_v61, 16  ;;  %v1345_v3 = vshrl.u32 %v1218_v61, 16  ;;  %v1044_v4 = vsel %vm7207_vm10, %v856_v56, %v1043_v43  ;;  %v6132_v5 = vpack.c.bf16 %v505_v26, %v505_v26  ;;  %6489 = vmatpush3.bf16.msra.mxu1 %v6952_v40  ;;  %v977_v43 = vld [vmem:[#allocation2 + $0x38] sm:$0x1] }
  0x5b   : > { %4759 = vmatprep.mubr.bf16.mxu1 %v5855_v60  ;;  %v1217_v8 = vld [vmem:[#allocation2 + $0x24] sm:$0xf]  ;;  %v1219_v10 = vld [vmem:[#allocation2 + $0x2c] sm:$0x1]  ;;  %v865_v11 = vsel %vm7213_vm11, %v857_v57, %v864_v62  ;;  %1045 = vst [vmem:[#allocation2 + $0xa8] sm:$0xf] %v1044_v4  ;;  %v1048_v12 = vsel %vm7131_vm3, %v866_v63, %v1047_v49  ;;  %v6133_v14 = vpack.c.bf16 %v506_v0, %v506_v0  ;;  %v6249_v15 = vunpack.c.h.bf16 %v7360_v30 }
  0x5c   : > { %6490 = vmatprep.subr.bf16.mxu1 %v6954_v51  ;;  %4760 = vmatmul.mubr.bf16.gmra.mrb[4].mxu1 %v6936_v55  ;;  %v1332_v16 = vshrl.u32 %v1217_v8, 16  ;;  %v1335_v17 = vshll.u32 %v1217_v8, 16  ;;  %v1343_v19 = vrot.slane %v1341_v1, 5  ;;  %v1347_v20 = vrot.slane %v1345_v3, 4  ;;  %1046 = vst [vmem:[#allocation2 + $0xac] sm:$0xf] %v865_v11 }
  0x5d   : > { %1049 = vst [vmem:[#allocation2 + $0xb0] sm:$0x1] %v1048_v12  ;;  %v1351_v22 = vshll.u32 %v1219_v10, 16  ;;  %v681_v23 = vshrl.u32 %v6132_v5, 16  ;;  %v684_v24 = vshll.u32 %v6132_v5, 16  ;;  %v689_v25 = vshrl.u32 %v6133_v14, 16 }
  0x5e   : > { %v1334_v29 = vrot.slane %v1332_v16, 4  ;;  %v1337_v32 = vrot.slane %v1335_v17, 5  ;;  %v1348_v33 = vor.u32 %v1347_v20, %v1343_v19  ;;  %v692_v36 = vshll.u32 %v6133_v14, 16  ;;  %6491 = vmatpush3.bf16.msra.mxu1 %v6955_v6  ;;  %v6943_v63 = vld [vmem:[#allocation2 + $0x24] sm:$0xff]   ;;  %v7421_v4 = vld [vmem:[#allocation2] sm:$0xe] }
  0x5f   : > { %v1353_v37 = vrot.slane %v1351_v22, 5  ;;  %v683_v30 = vrot.slane %v681_v23, 7  ;;  %v691_v38 = vrot.slane %v689_v25, 7  ;;  %v457_v40 = vmul.f32 %v6248_v58, %v7165_v34  ;;  %6700 = vmatprep.subr.bf16.mxu1 %v6957_v7  ;;  %v7423_v10 = vld [vmem:[#allocation2 + $0x4] sm:$0xf] }
  0x60   : > { %v1338_v41 = vor.u32 %v1337_v32, %v1334_v29  ;;  %v1349_v42 = vrot.slane %v1348_v33, 4  ;;  %v458_v44 = vmul.f32 %v6249_v15, %v7165_v34  ;;  %v263_v45 = vsel %vm7131_vm3, 0, %v262_v21  ;;  %v6965_v21 = vld [vmem:[%s8911_s3 + $0x160] sm:$0xff]  }
  0x61   : > { %v686_v46 = vor.u32 %v684_v24, %v683_v30  ;;  %v687_v47 = vrot.slane %v683_v30, 4  ;;  %v694_v48 = vor.u32 %v692_v36, %v691_v38  ;;  %v696_v49 = vrot.slane %v691_v38, 4  ;;  %264 = vst [vmem:[#allocation2 + $0x3c] sm:$0x1] %v263_v45  ;;  %v7434_v24 = vld [vmem:[%s8909_s1] ss:$0 sm:$0xff]  ;;  %6596 = vmatprep.subr.bf16.mxu0 %v6965_v21 }
  0x62   : > { %v1339_v50 = vrot.slane %v1338_v41, 4  ;;  %v1354_v51 = vsel %vm7199_vm9, %v1349_v42, %v1353_v37  ;;  %v1250_v27 = vld [vmem:[#allocation2 + $0xa8] sm:$0xf]  ;;  %v495_v9 = vadd.f32 %v7170_v35, %v457_v40  ;;  %v496_v26 = vadd.f32 %v7170_v35, %v458_v44  ;;  %v7444_v42 = vld [vmem:[%s8910_s2] ss:$0 sm:$0xff] }
  0x63   : > { %v1251_v34 = vld [vmem:[#allocation2 + $0xac] sm:$0xf]  ;;  %v1596_v55 = vshrl.u32 %v1250_v27, 16  ;;  %v1599_v56 = vshll.u32 %v1250_v27, 16  ;;  %v695_v57 = vsel %vm7213_vm11, %v687_v47, %v694_v48  ;;  %v974_v58 = vsel %vm7207_vm10, %v686_v46, %v973_v39 }
  0x64   : > { %v1252_v54 = vld [vmem:[#allocation2 + $0xb0] sm:$0x1]  ;;  %v1344_v59 = vsel %vm7199_vm9, %v1339_v50, %v1343_v19  ;;  %v1605_v60 = vshll.u32 %v1251_v34, 16  ;;  %v1609_v61 = vshrl.u32 %v1251_v34, 16  ;;  %975 = vst [vmem:[#allocation2 + $0x30] sm:$0xf] %v974_v58  ;;  %v978_v3 = vsel %vm7131_vm3, %v696_v49, %v977_v43 }
  0x65   : > { %v1615_v62 = vshll.u32 %v1252_v54, 16  ;;  %976 = vst [vmem:[#allocation2 + $0x34] sm:$0xf] %v695_v57  ;;  %v5845_v35 = vcombine.low %v1344_v59, %v1354_v51  ;;  %v1598_v0 = vrot.slane %v1596_v55, 4  ;;  %v1601_v1 = vrot.slane %v1599_v56, 5  ;;  %v6944_v45 = vld [vmem:[#allocation2 + $0xa8] sm:$0xff]  }
  0x66   : > { %v1607_v5 = vrot.slane %v1605_v60, 5  ;;  %v1611_v6 = vrot.slane %v1609_v61, 4  ;;  %979 = vst [vmem:[#allocation2 + $0x38] sm:$0x1] %v978_v3  ;;  %v527_v8 = vmax.f32 %v495_v9, 0.0  ;;  %v528_v12 = vmax.f32 %v496_v26, 0.0 }
  0x67   : > { %v1617_v7 = vrot.slane %v1615_v62, 5  ;;  %4679 = vmatprep.mubr.bf16.mxu0 %v5845_v35  ;;  %v1602_v11 = vor.u32 %v1601_v1, %v1598_v0  ;;  %v319_v14 = vsel %vm7142_vm4, 0, %v318_v52  ;;  %v6208_v15 = vunpack.c.l.bf16 %v6337_v53  ;;  %v1050_v49 = vld [vmem:[#allocation2 + $0xb4] sm:$0xf]  ;;  %v1054_v52 = vld [vmem:[#allocation2 + $0xbc] sm:$0x1] }
  0x68   : > { %v1612_v16 = vor.u32 %v1611_v6, %v1607_v5  ;;  %4680 = vmatmul.mubr.bf16.gmra.mrb[12].mxu0 %v6943_v63  ;;  %v6154_v17 = vpack.c.bf16 %v527_v8, %v527_v8  ;;  %320 = vst [vmem:[#allocation2 + $0x44] sm:$0x1] %v319_v14  ;;  %v6209_v19 = vunpack.c.h.bf16 %v6337_v53  ;;  %v5858_v20 = vrot.slane %v7421_v4, 9  ;;  %v6968_v53 = vld [vmem:[%s8911_s3 + $0x120] sm:$0xff]   ;;  %v1725_v57 = vld [vmem:[#allocation2 + $0x8] sm:$0x1] }
  0x69   : > { %v1603_v22 = vrot.slane %v1602_v11, 4  ;;  %v6155_v23 = vpack.c.bf16 %v528_v12, %v528_v12  ;;  %v437_v25 = vmul.f32 %v7434_v24, %v6208_v15  ;;  %v1824_v29 = vrot.slane %v7423_v10, 5  ;;  %v265_v63 = vld [vmem:[#allocation2 + $0x48] sm:$0x1]  ;;  %v321_v35 = vld [vmem:[#allocation2 + $0x50] sm:$0x1]  ;;  %6597 = vmatpush3.bf16.msra.mxu0 %v6968_v53 }
  0x6a   : > { %v1613_v32 = vrot.slane %v1612_v16, 4  ;;  %v868_v33 = vshrl.u32 %v6154_v17, 16  ;;  %v871_v36 = vshll.u32 %v6154_v17, 16  ;;  %v438_v37 = vmul.f32 %v7434_v24, %v6209_v19  ;;  %v7469_v15 = vld [vmem:[#allocation2 + $0xc] sm:$0xe] }
  0x6b   : > { %v1608_v30 = vsel %vm7199_vm9, %v1603_v22, %v1607_v5  ;;  %v1220_v38 = vld [vmem:[#allocation2 + $0x30] sm:$0xf]  ;;  %v876_v40 = vshrl.u32 %v6155_v23, 16  ;;  %v879_v41 = vshll.u32 %v6155_v23, 16  ;;  %v475_v43 = vadd.f32 %v7444_v42, %v437_v25  ;;  %v6338_v22 = vld [vmem:[%s7127_s22 + $0x28] sm:$0xff]  }
  0x6c   : > { %v1221_v39 = vld [vmem:[#allocation2 + $0x34] sm:$0xf]  ;;  %v1618_v44 = vsel %vm7199_vm9, %v1613_v32, %v1617_v7  ;;  %v1356_v46 = vshrl.u32 %v1220_v38, 16  ;;  %v1359_v47 = vshll.u32 %v1220_v38, 16  ;;  %v870_v9 = vrot.slane %v868_v33, 7 }
  0x6d   : > { %v1365_v48 = vshll.u32 %v1221_v39, 16  ;;  %v5856_v50 = vcombine.low %v1608_v30, %v1618_v44  ;;  %v1222_v51 = vld [vmem:[#allocation2 + $0x38] sm:$0x1]  ;;  %v1369_v27 = vshrl.u32 %v1221_v39, 16  ;;  %v878_v26 = vrot.slane %v876_v40, 7  ;;  %v6950_v33 = vld [vmem:[#allocation2 + $0x30] sm:$0xff]  }
  0x6e   : > { %v1358_v34 = vrot.slane %v1356_v46, 4  ;;  %v1361_v54 = vrot.slane %v1359_v47, 5  ;;  %v1375_v56 = vshll.u32 %v1222_v51, 16  ;;  %v873_v59 = vor.u32 %v871_v36, %v870_v9  ;;  %v7472_v23 = vld [vmem:[#allocation2 + $0x10] sm:$0xf] }
  0x6f   : > { %v1367_v55 = vrot.slane %v1365_v48, 5  ;;  %4767 = vmatprep.mubr.bf16.mxu1 %v5856_v50  ;;  %v1371_v58 = vrot.slane %v1369_v27, 4  ;;  %v874_v60 = vrot.slane %v870_v9, 4  ;;  %v881_v61 = vor.u32 %v879_v41, %v878_v26  ;;  %v7474_v25 = vld [vmem:[#allocation2 + $0x14] sm:$0x1] }
  0x70   : > { %4768 = vmatmul.mubr.bf16.gmra.mrb[8].mxu1 %v6944_v45  ;;  %v1362_v0 = vor.u32 %v1361_v54, %v1358_v34  ;;  %v1377_v1 = vrot.slane %v1375_v56, 5  ;;  %v883_v3 = vrot.slane %v878_v26, 4  ;;  %v476_v4 = vadd.f32 %v7444_v42, %v438_v37  ;;  %v268_v30 = vld [vmem:[#allocation2 + $0x54] sm:$0x1]  ;;  %v980_v27 = vld [vmem:[#allocation2 + $0x3c] sm:$0xf] }
  0x71   : > { %v1372_v5 = vor.u32 %v1371_v58, %v1367_v55  ;;  %v882_v6 = vsel %vm7213_vm11, %v874_v60, %v881_v61  ;;  %v1051_v7 = vsel %vm7207_vm10, %v873_v59, %v1050_v49  ;;  %v507_v8 = vmax.f32 %v475_v43, 0.0  ;;  %v7483_v38 = vld [vmem:[%s7127_s22 + $0x30] sm:$0xff]   ;;  %v984_v9 = vld [vmem:[#allocation2 + $0x44] sm:$0x1] }
  0x72   : > { %v1363_v10 = vrot.slane %v1362_v0, 4  ;;  %1052 = vst [vmem:[#allocation2 + $0xb4] sm:$0xf] %v1051_v7  ;;  %1053 = vst [vmem:[#allocation2 + $0xb8] sm:$0xf] %v882_v6  ;;  %v1055_v11 = vsel %vm7131_vm3, %v883_v3, %v1054_v52  ;;  %v508_v12 = vmax.f32 %v476_v4, 0.0  ;;  %v7467_v14 = vsel %vm7454_vm14, %v5858_v20, %v1824_v29 }
  0x73   : > { %v1373_v16 = vrot.slane %v1372_v5, 4  ;;  %1056 = vst [vmem:[#allocation2 + $0xbc] sm:$0x1] %v1055_v11  ;;  %v6134_v17 = vpack.c.bf16 %v507_v8, %v507_v8  ;;  %v1826_v19 = vrot.slane %v1824_v29, 4  ;;  %v1827_v21 = vrot.slane %v1725_v57, 5 }
  0x74   : > { %v1368_v32 = vsel %vm7199_vm9, %v1363_v10, %v1367_v55  ;;  %v6135_v36 = vpack.c.bf16 %v508_v12, %v508_v12  ;;  %v266_v20 = vsel %vm7131_vm3, 0, %v265_v63  ;;  %v322_v37 = vsel %vm7142_vm4, 0, %v321_v35  ;;  %v324_v10 = vld [vmem:[#allocation2 + $0x5c] sm:$0x1] }
  0x75   : > { %v1378_v29 = vsel %vm7199_vm9, %v1373_v16, %v1377_v1  ;;  %v698_v39 = vshrl.u32 %v6134_v17, 16  ;;  %v701_v40 = vshll.u32 %v6134_v17, 16  ;;  %v7489_v41 = vsel %vm7454_vm14, %v1826_v19, %v1827_v21  ;;  %267 = vst [vmem:[#allocation2 + $0x48] sm:$0x1] %v266_v20  ;;  %323 = vst [vmem:[#allocation2 + $0x50] sm:$0x1] %v322_v37 }
  0x76   : > { %v5846_v43 = vcombine.low %v1368_v32, %v1378_v29  ;;  %v706_v44 = vshrl.u32 %v6135_v36, 16  ;;  %v709_v45 = vshll.u32 %v6135_v36, 16  ;;  %v5874_v46 = vcombine.low %v7467_v14, %v7489_v41  ;;  %v6979_v14 = vld [vmem:[%s8911_s3 + $0x170] sm:$0xff]  }
  0x77   : > { %v700_v47 = vrot.slane %v698_v39, 7  ;;  %v6212_v48 = vunpack.c.l.bf16 %v6338_v22  ;;  %v6213_v49 = vunpack.c.h.bf16 %v6338_v22  ;;  %v5859_v50 = vrot.slane %v7469_v15, 9  ;;  %v6956_v39 = vld [vmem:[#allocation2 + $0xc] sm:$0xff]  }
  0x78   : > { %4687 = vmatprep.mubr.bf16.mxu0 %v5846_v43  ;;  %v708_v51 = vrot.slane %v706_v44, 7  ;;  %v1831_v26 = vrot.slane %v7472_v23, 5  ;;  %v1834_v52 = vrot.slane %v7474_v25, 5  ;;  %v269_v53 = vsel %vm7131_vm3, 0, %v268_v30  ;;  %v7509_v23 = vld [vmem:[#allocation2 + $0x18] sm:$0xe] }
  0x79   : > { %v1253_v34 = vld [vmem:[#allocation2 + $0xb4] sm:$0xf]  ;;  %v1254_v54 = vld [vmem:[#allocation2 + $0xb8] sm:$0xf]  ;;  %4688 = vmatmul.mubr.bf16.gmra.mrb[16].mxu0 %v6950_v33  ;;  %v703_v55 = vor.u32 %v701_v40, %v700_v47  ;;  %v439_v56 = vmul.f32 %v7434_v24, %v6212_v48  ;;  %v440_v57 = vmul.f32 %v7434_v24, %v6213_v49  ;;  %270 = vst [vmem:[#allocation2 + $0x54] sm:$0x1] %v269_v53  ;;  %v6216_v58 = vunpack.c.l.bf16 %v7483_v38 }
  0x7a   : > { %v1255_v59 = vld [vmem:[#allocation2 + $0xbc] sm:$0x1]  ;;  %v1620_v60 = vshrl.u32 %v1253_v34, 16  ;;  %v1623_v61 = vshll.u32 %v1253_v34, 16  ;;  %v1629_v63 = vshll.u32 %v1254_v54, 16  ;;  %v1633_v35 = vshrl.u32 %v1254_v54, 16 }
  0x7b   : > { %v1639_v0 = vshll.u32 %v1255_v59, 16  ;;  %v704_v1 = vrot.slane %v700_v47, 4  ;;  %v711_v3 = vor.u32 %v709_v45, %v708_v51  ;;  %v713_v4 = vrot.slane %v708_v51, 4  ;;  %v6951_v49 = vld [vmem:[#allocation2 + $0xb4] sm:$0xff]   ;;  %v7543_v54 = vld [vmem:[%s7127_s22 + $0x40] sm:$0xff]  }
  0x7c   : > { %v1622_v5 = vrot.slane %v1620_v60, 4  ;;  %v1625_v6 = vrot.slane %v1623_v61, 5  ;;  %v1631_v7 = vrot.slane %v1629_v63, 5  ;;  %v1635_v8 = vrot.slane %v1633_v35, 4 }
  0x7d   : > { %v1641_v11 = vrot.slane %v1639_v0, 5  ;;  %v712_v12 = vsel %vm7213_vm11, %v704_v1, %v711_v3  ;;  %v981_v15 = vsel %vm7207_vm10, %v703_v55, %v980_v27  ;;  %v985_v16 = vsel %vm7131_vm3, %v713_v4, %v984_v9  ;;  %v7533_v27 = vld [vmem:[%s7127_s22 + $0x38] sm:$0xff]   ;;  %v6973_v9 = vld [vmem:[%s8911_s3 + $0x128] sm:$0xff]  }
  0x7e   : > { %v1626_v17 = vor.u32 %v1625_v6, %v1622_v5  ;;  %v1636_v19 = vor.u32 %v1635_v8, %v1631_v7  ;;  %982 = vst [vmem:[#allocation2 + $0x3c] sm:$0xf] %v981_v15  ;;  %983 = vst [vmem:[#allocation2 + $0x40] sm:$0xf] %v712_v12  ;;  %v477_v21 = vadd.f32 %v7444_v42, %v439_v56  ;;  %v1833_v32 = vrot.slane %v1831_v26, 4 }
  0x7f   : > { %986 = vst [vmem:[#allocation2 + $0x44] sm:$0x1] %v985_v16  ;;  %v478_v22 = vadd.f32 %v7444_v42, %v440_v57  ;;  %v7513_v25 = vsel %vm7454_vm14, %v5859_v50, %v1831_v26  ;;  %v325_v33 = vsel %vm7142_vm4, 0, %v324_v10  ;;  %v6217_v36 = vunpack.c.h.bf16 %v7483_v38  ;;  %v6972_v38 = vld [vmem:[%s8911_s3 + $0x168] sm:$0xff]   ;;  %v1730_v8 = vld [vmem:[#allocation2 + $0x1c] sm:$0xf] }
  0x80   : > { %v1627_v20 = vrot.slane %v1626_v17, 4  ;;  %v1637_v37 = vrot.slane %v1636_v19, 4  ;;  %v509_v30 = vmax.f32 %v477_v21, 0.0  ;;  %326 = vst [vmem:[#allocation2 + $0x5c] sm:$0x1] %v325_v33  ;;  %v7520_v40 = vsel %vm7454_vm14, %v1833_v32, %v1834_v52  ;;  %6598 = vmatprep.subr.bf16.mxu0 %v6972_v38  ;;  %v6959_v33 = vld [vmem:[%s8911_s3 + $0x180] sm:$0xff]  }
  0x81   : > { %v510_v29 = vmax.f32 %v478_v22, 0.0  ;;  %v441_v43 = vmul.f32 %v7434_v24, %v6216_v58  ;;  %v442_v44 = vmul.f32 %v7434_v24, %v6217_v36  ;;  %v5860_v45 = vrot.slane %v7509_v23, 9  ;;  %6599 = vmatpush3.bf16.msra.mxu0 %v6973_v9  ;;  %v991_v22 = vld [vmem:[#allocation2 + $0x50] sm:$0x1]  ;;  %v6966_v38 = vld [vmem:[%s8911_s3 + $0x1c8] sm:$0xff]  }
  0x82   : > { %v1632_v47 = vsel %vm7199_vm9, %v1627_v20, %v1631_v7  ;;  %v1642_v48 = vsel %vm7199_vm9, %v1637_v37, %v1641_v11  ;;  %v6136_v50 = vpack.c.bf16 %v509_v30, %v509_v30  ;;  %v5875_v52 = vcombine.low %v7513_v25, %v7520_v40  ;;  %v987_v7 = vld [vmem:[#allocation2 + $0x48] sm:$0xf]  ;;  %v271_v9 = vld [vmem:[#allocation2 + $0x60] sm:$0x1]  ;;  %6600 = vmatprep.subr.bf16.mxu0 %v6979_v14 }
  0x83   : > { %v6137_v51 = vpack.c.bf16 %v510_v29, %v510_v29  ;;  %v5857_v26 = vcombine.low %v1632_v47, %v1642_v48  ;;  %v479_v53 = vadd.f32 %v7444_v42, %v441_v43  ;;  %v480_v34 = vadd.f32 %v7444_v42, %v442_v44  ;;  %v6962_v43 = vld [vmem:[#allocation2 + $0x18] sm:$0xff]   ;;  %v1731_v47 = vld [vmem:[#allocation2 + $0x20] sm:$0x1] }
  0x84   : > { %v715_v55 = vshrl.u32 %v6136_v50, 16  ;;  %v718_v56 = vshll.u32 %v6136_v50, 16  ;;  %v6220_v63 = vunpack.c.l.bf16 %v7533_v27  ;;  %v6221_v35 = vunpack.c.h.bf16 %v7533_v27 }
  0x85   : > { %v723_v57 = vshrl.u32 %v6137_v51, 16  ;;  %v726_v58 = vshll.u32 %v6137_v51, 16  ;;  %4775 = vmatprep.mubr.bf16.mxu1 %v5857_v26  ;;  %v1223_v59 = vld [vmem:[#allocation2 + $0x3c] sm:$0xf]  ;;  %v1224_v60 = vld [vmem:[#allocation2 + $0x40] sm:$0xf]  ;;  %v6224_v0 = vunpack.c.l.bf16 %v7543_v54  ;;  %v6225_v1 = vunpack.c.h.bf16 %v7543_v54 }
  0x86   : > { %v1225_v61 = vld [vmem:[#allocation2 + $0x44] sm:$0x1]  ;;  %4776 = vmatmul.mubr.bf16.gmra.mrb[12].mxu1 %v6951_v49  ;;  %v1380_v3 = vshrl.u32 %v1223_v59, 16  ;;  %v1383_v4 = vshll.u32 %v1223_v59, 16  ;;  %v1389_v5 = vshll.u32 %v1224_v60, 16  ;;  %v1393_v6 = vshrl.u32 %v1224_v60, 16 }
  0x87   : > { %v1399_v10 = vshll.u32 %v1225_v61, 16  ;;  %4816 = vmatprep.mubr.bf16.mxu1 %v6956_v39  ;;  %v717_v11 = vrot.slane %v715_v55, 7  ;;  %v725_v12 = vrot.slane %v723_v57, 7  ;;  %v7550_v15 = vmul.f32 %v7434_v24, %v6220_v63  ;;  %v327_v26 = vld [vmem:[#allocation2 + $0x68] sm:$0x1]  ;;  %v6958_v59 = vld [vmem:[#allocation2 + $0x3c] sm:$0xff]  }
  0x88   : > { %v1382_v16 = vrot.slane %v1380_v3, 4  ;;  %v1385_v17 = vrot.slane %v1383_v4, 5  ;;  %v1391_v19 = vrot.slane %v1389_v5, 5  ;;  %v1395_v21 = vrot.slane %v1393_v6, 4  ;;  %v7572_v3 = vld [vmem:[#allocation2 + $0x28] sm:$0xf] }
  0x89   : > { %v1401_v32 = vrot.slane %v1399_v10, 5  ;;  %v720_v36 = vor.u32 %v718_v56, %v717_v11  ;;  %v721_v20 = vrot.slane %v717_v11, 4  ;;  %v728_v37 = vor.u32 %v726_v58, %v725_v12  ;;  %v7564_v58 = vld [vmem:[#allocation2 + $0x24] sm:$0xe]  ;;  %v6969_v11 = vld [vmem:[%s8911_s3 + $0x188] sm:$0xff]  }
  0x8a   : > { %v1386_v30 = vor.u32 %v1385_v17, %v1382_v16  ;;  %v1396_v29 = vor.u32 %v1395_v21, %v1391_v19  ;;  %v730_v39 = vrot.slane %v725_v12, 4  ;;  %v511_v44 = vmax.f32 %v479_v53, 0.0  ;;  %v7588_v12 = vld [vmem:[#allocation2 + $0x2c] sm:$0x1]  ;;  %v6975_v21 = vld [vmem:[%s8911_s3 + $0x1d0] sm:$0xff]  }
  0x8b   : > { %v729_v48 = vsel %vm7213_vm11, %v721_v20, %v728_v37  ;;  %v988_v49 = vsel %vm7207_vm10, %v720_v36, %v987_v7  ;;  %v512_v50 = vmax.f32 %v480_v34, 0.0  ;;  %v1838_v51 = vrot.slane %v1730_v8, 5 }
  0x8c   : > { %v1387_v55 = vrot.slane %v1386_v30, 4  ;;  %v1397_v56 = vrot.slane %v1396_v29, 4  ;;  %989 = vst [vmem:[#allocation2 + $0x48] sm:$0xf] %v988_v49  ;;  %990 = vst [vmem:[#allocation2 + $0x4c] sm:$0xf] %v729_v48  ;;  %v992_v53 = vsel %vm7131_vm3, %v730_v39, %v991_v22  ;;  %v6138_v57 = vpack.c.bf16 %v511_v44, %v511_v44 }
  0x8d   : > { %993 = vst [vmem:[#allocation2 + $0x50] sm:$0x1] %v992_v53  ;;  %v6139_v60 = vpack.c.bf16 %v512_v50, %v512_v50  ;;  %v7570_v34 = vsel %vm7454_vm14, %v5860_v45, %v1838_v51  ;;  %v1840_v61 = vrot.slane %v1838_v51, 4  ;;  %v1841_v63 = vrot.slane %v1731_v47, 5  ;;  %v6981_v22 = vld [vmem:[%s8911_s3 + $0x130] sm:$0xff]  }
  0x8e   : > { %v1392_v4 = vsel %vm7199_vm9, %v1387_v55, %v1391_v19  ;;  %v1402_v5 = vsel %vm7199_vm9, %v1397_v56, %v1401_v32  ;;  %4817 = vmatmul.mubr.bf16.vlgmr.msra.gmra.mrb[16].mxu1 %v5874_v46  ;;  %v732_v6 = vshrl.u32 %v6138_v57, 16  ;;  %v735_v23 = vshll.u32 %v6138_v57, 16  ;;  %v994_v46 = vld [vmem:[#allocation2 + $0x54] sm:$0xf]  ;;  %v274_v53 = vld [vmem:[#allocation2 + $0x6c] sm:$0x1]  ;;  %6601 = vmatpush3.bf16.msra.mxu0 %v6981_v22 }
  0x8f   : > { %v5847_v7 = vcombine.low %v1392_v4, %v1402_v5  ;;  %6701 = vmatpush3.bf16.msra.mxu1 %v6959_v33  ;;  %4824 = vmatprep.mubr.bf16.mxu1 %v6962_v43  ;;  %v740_v45 = vshrl.u32 %v6139_v60, 16  ;;  %v743_v8 = vshll.u32 %v6139_v60, 16  ;;  %v7583_v10 = vsel %vm7454_vm14, %v1840_v61, %v1841_v63  ;;  %v6964_v33 = vld [vmem:[#allocation2 + $0x24] sm:$0xff]   ;;  %v6977_v30 = vld [vmem:[%s8911_s3 + $0x190] sm:$0xff]   ;;  %v998_v43 = vld [vmem:[#allocation2 + $0x5c] sm:$0x1] }
  0x90   : > { %v734_v41 = vrot.slane %v732_v6, 7  ;;  %6702 = vmatprep.subr.bf16.mxu1 %v6966_v38  ;;  %v5876_v16 = vcombine.low %v7570_v34, %v7583_v10  ;;  %v272_v17 = vsel %vm7131_vm3, 0, %v271_v9  ;;  %v328_v19 = vsel %vm7142_vm4, 0, %v327_v26  ;;  %v330_v60 = vld [vmem:[#allocation2 + $0x74] sm:$0x1] }
  0x91   : > { %4695 = vmatprep.mubr.bf16.mxu0 %v5847_v7  ;;  %v742_v32 = vrot.slane %v740_v45, 7  ;;  %273 = vst [vmem:[#allocation2 + $0x60] sm:$0x1] %v272_v17  ;;  %329 = vst [vmem:[#allocation2 + $0x68] sm:$0x1] %v328_v19  ;;  %v444_v36 = vmul.f32 %v7434_v24, %v6221_v35  ;;  %v481_v20 = vadd.f32 %v7444_v42, %v7550_v15  ;;  %v5861_v37 = vrot.slane %v7564_v58, 9 }
  0x92   : > { %4696 = vmatmul.mubr.bf16.gmra.mrb[20].mxu0 %v6958_v59  ;;  %v737_v29 = vor.u32 %v735_v23, %v734_v41  ;;  %v738_v39 = vrot.slane %v734_v41, 4  ;;  %v1845_v44 = vrot.slane %v7572_v3, 5  ;;  %v1848_v27 = vrot.slane %v7588_v12, 5  ;;  %v6983_v35 = vld [vmem:[%s8911_s3 + $0x1d8] sm:$0xff]   ;;  %v7650_v41 = vld [vmem:[%s7127_s22 + $0x48] sm:$0xff]  }
  0x93   : > { %v1226_v15 = vld [vmem:[#allocation2 + $0x48] sm:$0xf]  ;;  %v1227_v38 = vld [vmem:[#allocation2 + $0x4c] sm:$0xf]  ;;  %v745_v47 = vor.u32 %v743_v8, %v742_v32  ;;  %6703 = vmatpush3.bf16.msra.mxu1 %v6969_v11  ;;  %v482_v48 = vadd.f32 %v7444_v42, %v444_v36  ;;  %v445_v49 = vmul.f32 %v7434_v24, %v6224_v0  ;;  %v446_v50 = vmul.f32 %v7434_v24, %v6225_v1  ;;  %v6985_v23 = vld [vmem:[%s8911_s3 + $0x198] sm:$0xff]  }
  0x94   : > { %v1228_v51 = vld [vmem:[#allocation2 + $0x50] sm:$0x1]  ;;  %v1404_v9 = vshrl.u32 %v1226_v15, 16  ;;  %v1407_v26 = vshll.u32 %v1226_v15, 16  ;;  %v1413_v55 = vshll.u32 %v1227_v38, 16  ;;  %v1417_v56 = vshrl.u32 %v1227_v38, 16  ;;  %6704 = vmatprep.subr.bf16.mxu1 %v6975_v21 }
  0x95   : > { %v1423_v57 = vshll.u32 %v1228_v51, 16  ;;  %v746_v58 = vsel %vm7213_vm11, %v738_v39, %v745_v47  ;;  %v747_v59 = vrot.slane %v742_v32, 4  ;;  %v995_v0 = vsel %vm7207_vm10, %v737_v29, %v994_v46  ;;  %v7653_v46 = vld [vmem:[%s7127_s22 + $0x50] sm:$0xff]   ;;  %v6963_v39 = vld [vmem:[#allocation2 + $0x48] sm:$0xff]  }
  0x96   : > { %v1406_v54 = vrot.slane %v1404_v9, 4  ;;  %v1409_v61 = vrot.slane %v1407_v26, 5  ;;  %v1415_v1 = vrot.slane %v1413_v55, 5  ;;  %v1419_v63 = vrot.slane %v1417_v56, 4  ;;  %4825 = vmatmul.mubr.bf16.gmra.mrb[20].mxu1 %v5875_v52  ;;  %996 = vst [vmem:[#allocation2 + $0x54] sm:$0xf] %v995_v0 }
  0x97   : > { %997 = vst [vmem:[#allocation2 + $0x58] sm:$0xf] %v746_v58  ;;  %v1425_v3 = vrot.slane %v1423_v57, 5  ;;  %v999_v4 = vsel %vm7131_vm3, %v747_v59, %v998_v43  ;;  %4832 = vmatprep.mubr.bf16.mxu1 %v6964_v33  ;;  %v513_v5 = vmax.f32 %v481_v20, 0.0  ;;  %v514_v6 = vmax.f32 %v482_v48, 0.0  ;;  %6705 = vmatpush3.bf16.msra.mxu1 %v6977_v30  ;;  %v6986_v52 = vld [vmem:[%s8911_s3 + $0x178] sm:$0xff]  }
  0x98   : > { %v1410_v7 = vor.u32 %v1409_v61, %v1406_v54  ;;  %v1420_v45 = vor.u32 %v1419_v63, %v1415_v1  ;;  %1000 = vst [vmem:[#allocation2 + $0x5c] sm:$0x1] %v999_v4  ;;  %v7640_v25 = vsel %vm7454_vm14, %v5861_v37, %v1845_v44  ;;  %v1847_v40 = vrot.slane %v1845_v44, 4  ;;  %6706 = vmatprep.subr.bf16.mxu1 %v6983_v35  ;;  %v6970_v37 = vld [vmem:[#allocation2 + $0x30] sm:$0xff]   ;;  %v1001_v55 = vld [vmem:[#allocation2 + $0x60] sm:$0xf] }
  0x99   : > { %v6140_v8 = vpack.c.bf16 %v513_v5, %v513_v5  ;;  %v6141_v11 = vpack.c.bf16 %v514_v6, %v514_v6  ;;  %v275_v12 = vsel %vm7131_vm3, 0, %v274_v53  ;;  %v331_v14 = vsel %vm7142_vm4, 0, %v330_v60  ;;  %6602 = vmatprep.subr.bf16.mxu0 %v6986_v52  ;;  %v1735_v61 = vld [vmem:[#allocation2 + $0x30] sm:$0xe] }
  0x9a   : > { %v1411_v17 = vrot.slane %v1410_v7, 4  ;;  %v1421_v19 = vrot.slane %v1420_v45, 4  ;;  %v7657_v21 = vsel %vm7454_vm14, %v1847_v40, %v1848_v27  ;;  %276 = vst [vmem:[#allocation2 + $0x6c] sm:$0x1] %v275_v12  ;;  %332 = vst [vmem:[#allocation2 + $0x74] sm:$0x1] %v331_v14  ;;  %v483_v22 = vadd.f32 %v7444_v42, %v445_v49 }
  0x9b   : > { %v749_v32 = vshrl.u32 %v6140_v8, 16  ;;  %v752_v33 = vshll.u32 %v6140_v8, 16  ;;  %v757_v36 = vshrl.u32 %v6141_v11, 16  ;;  %v760_v20 = vshll.u32 %v6141_v11, 16  ;;  %6707 = vmatpush3.bf16.msra.mxu1 %v6985_v23  ;;  %v6974_v7 = vld [vmem:[#allocation2 + $0x3c] sm:$0xff]  }
  0x9c   : > { %v1416_v30 = vsel %vm7199_vm9, %v1411_v17, %v1415_v1  ;;  %v1426_v29 = vsel %vm7199_vm9, %v1421_v19, %v1425_v3  ;;  %v5877_v43 = vcombine.low %v7640_v25, %v7657_v21  ;;  %v484_v44 = vadd.f32 %v7444_v42, %v446_v50  ;;  %v1736_v3 = vld [vmem:[#allocation2 + $0x34] sm:$0xf]  ;;  %v6987_v45 = vld [vmem:[%s8911_s3 + $0x138] sm:$0xff]   ;;  %v333_v17 = vld [vmem:[#allocation2 + $0x80] sm:$0x1] }
  0x9d   : > { %v5848_v27 = vcombine.low %v1416_v30, %v1426_v29  ;;  %v1229_v35 = vld [vmem:[#allocation2 + $0x54] sm:$0xf]  ;;  %v6228_v38 = vunpack.c.l.bf16 %v7650_v41  ;;  %v6229_v47 = vunpack.c.h.bf16 %v7650_v41  ;;  %v6232_v48 = vunpack.c.l.bf16 %v7653_v46  ;;  %v1737_v12 = vld [vmem:[#allocation2 + $0x38] sm:$0x1]  ;;  %v6990_v19 = vld [vmem:[%s8911_s3 + $0x1e0] sm:$0xff]   ;;  %6603 = vmatpush3.bf16.msra.mxu0 %v6987_v45 }
  0x9e   : > { %v1230_v15 = vld [vmem:[#allocation2 + $0x58] sm:$0xf]  ;;  %v1428_v49 = vshrl.u32 %v1229_v35, 16  ;;  %v1431_v51 = vshll.u32 %v1229_v35, 16  ;;  %4833 = vmatmul.mubr.bf16.gmra.mrb[24].mxu1 %v5876_v16  ;;  %v751_v56 = vrot.slane %v749_v32, 7  ;;  %v759_v53 = vrot.slane %v757_v36, 7  ;;  %6708 = vmatprep.subr.bf16.mxu1 %v6990_v19 }
  0x9f   : > { %v1437_v9 = vshll.u32 %v1230_v15, 16  ;;  %v1441_v26 = vshrl.u32 %v1230_v15, 16  ;;  %4703 = vmatprep.mubr.bf16.mxu0 %v5848_v27  ;;  %v1231_v50 = vld [vmem:[#allocation2 + $0x5c] sm:$0x1]  ;;  %4840 = vmatprep.mubr.bf16.mxu1 %v6970_v37  ;;  %v515_v57 = vmax.f32 %v483_v22, 0.0  ;;  %v7674_v58 = vmul.f32 %v7434_v24, %v6228_v38  ;;  %v6967_v27 = vld [vmem:[#allocation2 + $0x54] sm:$0xff]  }
  0xa0   : > { %4704 = vmatmul.mubr.bf16.gmra.mrb[24].mxu0 %v6963_v39  ;;  %v1430_v59 = vrot.slane %v1428_v49, 4  ;;  %v1433_v0 = vrot.slane %v1431_v51, 5  ;;  %v1447_v1 = vshll.u32 %v1231_v50, 16  ;;  %v754_v63 = vor.u32 %v752_v33, %v751_v56  ;;  %v1005_v16 = vld [vmem:[#allocation2 + $0x68] sm:$0x1] }
  0xa1   : > { %v1439_v60 = vrot.slane %v1437_v9, 5  ;;  %v1443_v54 = vrot.slane %v1441_v26, 4  ;;  %v755_v34 = vrot.slane %v751_v56, 4  ;;  %v762_v10 = vor.u32 %v760_v20, %v759_v53  ;;  %v277_v14 = vld [vmem:[#allocation2 + $0x78] sm:$0x1] }
  0xa2   : > { %v1434_v4 = vor.u32 %v1433_v0, %v1430_v59  ;;  %v764_v6 = vrot.slane %v759_v53, 4  ;;  %v516_v23 = vmax.f32 %v484_v44, 0.0  ;;  %v1449_v40 = vrot.slane %v1447_v1, 5  ;;  %v7697_v26 = vld [vmem:[#allocation2 + $0x3c] sm:$0xe]  ;;  %v7711_v0 = vld [vmem:[%s8911_s3 + $0x200] sm:$0xff]  }
  0xa3   : > { %v1444_v5 = vor.u32 %v1443_v54, %v1439_v60  ;;  %v763_v52 = vsel %vm7213_vm11, %v755_v34, %v762_v10  ;;  %v1002_v8 = vsel %vm7207_vm10, %v754_v63, %v1001_v55  ;;  %v6142_v11 = vpack.c.bf16 %v515_v57, %v515_v57  ;;  %v1008_v50 = vld [vmem:[#allocation2 + $0x6c] sm:$0xf]  ;;  %v1739_v34 = vld [vmem:[#allocation2 + $0x40] sm:$0xf]  ;;  %6836 = vmatprep.subr.bf16.mxu0 %v7711_v0 }
  0xa4   : > { %v1435_v22 = vrot.slane %v1434_v4, 4  ;;  %1003 = vst [vmem:[#allocation2 + $0x60] sm:$0xf] %v1002_v8  ;;  %1004 = vst [vmem:[#allocation2 + $0x64] sm:$0xf] %v763_v52  ;;  %v1006_v33 = vsel %vm7131_vm3, %v764_v6, %v1005_v16  ;;  %v6143_v36 = vpack.c.bf16 %v516_v23, %v516_v23  ;;  %v5862_v30 = vrot.slane %v1735_v61, 9 }
  0xa5   : > { %v1445_v32 = vrot.slane %v1444_v5, 4  ;;  %1007 = vst [vmem:[#allocation2 + $0x68] sm:$0x1] %v1006_v33  ;;  %v766_v20 = vshrl.u32 %v6142_v11, 16  ;;  %v769_v37 = vshll.u32 %v6142_v11, 16  ;;  %v1852_v29 = vrot.slane %v1736_v3, 5 }
  0xa6   : > { %v1440_v39 = vsel %vm7199_vm9, %v1435_v22, %v1439_v60  ;;  %4841 = vmatmul.mubr.bf16.gmra.mrb[28].mxu1 %v5877_v43  ;;  %v774_v35 = vshrl.u32 %v6143_v36, 16  ;;  %v777_v15 = vshll.u32 %v6143_v36, 16  ;;  %v1855_v56 = vrot.slane %v1737_v12, 5  ;;  %v1012_v61 = vld [vmem:[#allocation2 + $0x74] sm:$0x1]  ;;  %v6978_v63 = vld [vmem:[#allocation2 + $0x48] sm:$0xff]  }
  0xa7   : > { %v1450_v44 = vsel %vm7199_vm9, %v1445_v32, %v1449_v40  ;;  %v768_v49 = vrot.slane %v766_v20, 7  ;;  %4848 = vmatprep.mubr.bf16.mxu1 %v6974_v7  ;;  %v1853_v51 = vsel %vm7454_vm14, %v5862_v30, %v1852_v29  ;;  %v1854_v9 = vrot.slane %v1852_v29, 4  ;;  %v1740_v3 = vld [vmem:[#allocation2 + $0x44] sm:$0x1]  ;;  %v336_v12 = vld [vmem:[#allocation2 + $0x8c] sm:$0x1] }
  0xa8   : > { %v5849_v38 = vcombine.low %v1440_v39, %v1450_v44  ;;  %v776_v55 = vrot.slane %v774_v35, 7  ;;  %v278_v53 = vsel %vm7131_vm3, 0, %v277_v14  ;;  %v334_v25 = vsel %vm7142_vm4, 0, %v333_v17  ;;  %v280_v4 = vld [vmem:[#allocation2 + $0x84] sm:$0x1] }
  0xa9   : > { %v771_v21 = vor.u32 %v769_v37, %v768_v49  ;;  %v772_v43 = vrot.slane %v768_v49, 4  ;;  %279 = vst [vmem:[#allocation2 + $0x78] sm:$0x1] %v278_v53  ;;  %335 = vst [vmem:[#allocation2 + $0x80] sm:$0x1] %v334_v25  ;;  %v448_v57 = vmul.f32 %v7434_v24, %v6229_v47  ;;  %v485_v59 = vadd.f32 %v7444_v42, %v7674_v58  ;;  %v6992_v37 = vld [vmem:[%s8911_s3 + $0x1a0] sm:$0xff]  }
  0xaa   : > { %4711 = vmatprep.mubr.bf16.mxu0 %v5849_v38  ;;  %v779_v60 = vor.u32 %v777_v15, %v776_v55  ;;  %v781_v54 = vrot.slane %v776_v55, 4  ;;  %v1856_v1 = vsel %vm7454_vm14, %v1854_v9, %v1855_v56  ;;  %v5863_v41 = vrot.slane %v7697_v26, 9  ;;  %6709 = vmatpush3.bf16.msra.mxu1 %v6992_v37 }
  0xab   : > { %4712 = vmatmul.mubr.bf16.gmra.mrb[28].mxu0 %v6967_v27  ;;  %v1232_v24 = vld [vmem:[#allocation2 + $0x60] sm:$0xf]  ;;  %v1233_v47 = vld [vmem:[#allocation2 + $0x64] sm:$0xf]  ;;  %v1009_v58 = vsel %vm7207_vm10, %v771_v21, %v1008_v50  ;;  %v5878_v10 = vcombine.low %v1853_v51, %v1856_v1  ;;  %v486_v16 = vadd.f32 %v7444_v42, %v448_v57  ;;  %v6233_v5 = vunpack.c.h.bf16 %v7653_v46 }
  0xac   : > { %v1234_v6 = vld [vmem:[#allocation2 + $0x68] sm:$0x1]  ;;  %v1452_v23 = vshrl.u32 %v1232_v24, 16  ;;  %v1455_v7 = vshll.u32 %v1232_v24, 16  ;;  %v1461_v45 = vshll.u32 %v1233_v47, 16  ;;  %v1465_v40 = vshrl.u32 %v1233_v47, 16 }
  0xad   : > { %1010 = vst [vmem:[#allocation2 + $0x6c] sm:$0xf] %v1009_v58  ;;  %v1471_v52 = vshll.u32 %v1234_v6, 16  ;;  %v780_v8 = vsel %vm7213_vm11, %v772_v43, %v779_v60  ;;  %v1013_v11 = vsel %vm7131_vm3, %v781_v54, %v1012_v61  ;;  %v517_v42 = vmax.f32 %v485_v59, 0.0  ;;  %v6971_v9 = vld [vmem:[#allocation2 + $0x60] sm:$0xff]  }
  0xae   : > { %v1454_v14 = vrot.slane %v1452_v23, 4  ;;  %v1457_v17 = vrot.slane %v1455_v7, 5  ;;  %v1463_v19 = vrot.slane %v1461_v45, 5  ;;  %v1467_v22 = vrot.slane %v1465_v40, 4  ;;  %1011 = vst [vmem:[#allocation2 + $0x70] sm:$0xf] %v780_v8  ;;  %4849 = vmatmul.mubr.bf16.gmra.mrb[32].mxu1 %v5878_v10 }
  0xaf   : > { %1014 = vst [vmem:[#allocation2 + $0x74] sm:$0x1] %v1013_v11  ;;  %v1473_v32 = vrot.slane %v1471_v52, 5  ;;  %v518_v33 = vmax.f32 %v486_v16, 0.0  ;;  %v6144_v36 = vpack.c.bf16 %v517_v42, %v517_v42  ;;  %4856 = vmatprep.mubr.bf16.mxu1 %v6978_v63  ;;  %v1859_v20 = vrot.slane %v1739_v34, 5 }
  0xb0   : > { %v1458_v30 = vor.u32 %v1457_v17, %v1454_v14  ;;  %v1468_v29 = vor.u32 %v1467_v22, %v1463_v19  ;;  %v1862_v39 = vrot.slane %v1740_v3, 5  ;;  %v281_v44 = vsel %vm7131_vm3, 0, %v280_v4  ;;  %v1015_v25 = vld [vmem:[#allocation2 + $0x78] sm:$0xf]  ;;  %v7031_v21 = vld [vmem:[%s8909_s1] ss:$0 sm:$0xff] }
  0xb1   : > { %v6145_v27 = vpack.c.bf16 %v518_v33, %v518_v33  ;;  %v783_v35 = vshrl.u32 %v6144_v36, 16  ;;  %v786_v15 = vshll.u32 %v6144_v36, 16  ;;  %v1860_v38 = vsel %vm7454_vm14, %v5863_v41, %v1859_v20  ;;  %282 = vst [vmem:[#allocation2 + $0x84] sm:$0x1] %v281_v44  ;;  %v7032_v46 = vld [vmem:[%s8910_s2] ss:$0 sm:$0xff] }
  0xb2   : > { %v1459_v49 = vrot.slane %v1458_v30, 4  ;;  %v1469_v51 = vrot.slane %v1468_v29, 4  ;;  %v1861_v26 = vrot.slane %v1859_v20, 4  ;;  %v337_v55 = vsel %vm7142_vm4, 0, %v336_v12  ;;  %v6982_v3 = vld [vmem:[#allocation2 + $0x54] sm:$0xff]  }
  0xb3   : > { %v785_v56 = vrot.slane %v783_v35, 7  ;;  %v791_v53 = vshrl.u32 %v6145_v27, 16  ;;  %338 = vst [vmem:[#allocation2 + $0x8c] sm:$0x1] %v337_v55  ;;  %v449_v43 = vmul.f32 %v7031_v21, %v6232_v48  ;;  %v450_v57 = vmul.f32 %v7031_v21, %v6233_v5  ;;  %v1741_v4 = vld [vmem:[#allocation2 + $0x48] sm:$0xe] }
  0xb4   : > { %v1235_v50 = vld [vmem:[#allocation2 + $0x6c] sm:$0xf]  ;;  %v1464_v59 = vsel %vm7199_vm9, %v1459_v49, %v1463_v19  ;;  %v1474_v60 = vsel %vm7199_vm9, %v1469_v51, %v1473_v32  ;;  %v1863_v24 = vsel %vm7454_vm14, %v1861_v26, %v1862_v39  ;;  %v794_v45 = vshll.u32 %v6145_v27, 16  ;;  %v1019_v42 = vld [vmem:[#allocation2 + $0x80] sm:$0x1] }
  0xb5   : > { %v1476_v54 = vshrl.u32 %v1235_v50, 16  ;;  %v1479_v61 = vshll.u32 %v1235_v50, 16  ;;  %v5850_v1 = vcombine.low %v1464_v59, %v1474_v60  ;;  %v1236_v63 = vld [vmem:[#allocation2 + $0x70] sm:$0xf]  ;;  %v788_v41 = vor.u32 %v786_v15, %v785_v56  ;;  %v1742_v5 = vld [vmem:[#allocation2 + $0x4c] sm:$0xf] }
  0xb6   : > { %v1237_v34 = vld [vmem:[#allocation2 + $0x74] sm:$0x1]  ;;  %v487_v48 = vadd.f32 %v7032_v46, %v449_v43  ;;  %v1485_v10 = vshll.u32 %v1236_v63, 16  ;;  %v1489_v16 = vshrl.u32 %v1236_v63, 16  ;;  %v789_v23 = vrot.slane %v785_v56, 4  ;;  %v6976_v51 = vld [vmem:[#allocation2 + $0x6c] sm:$0xff]  }
  0xb7   : > { %v1478_v47 = vrot.slane %v1476_v54, 4  ;;  %v1481_v58 = vrot.slane %v1479_v61, 5  ;;  %4719 = vmatprep.mubr.bf16.mxu0 %v5850_v1  ;;  %v1495_v6 = vshll.u32 %v1237_v34, 16  ;;  %v793_v7 = vrot.slane %v791_v53, 7  ;;  %v1743_v20 = vld [vmem:[#allocation2 + $0x50] sm:$0x1] }
  0xb8   : > { %4720 = vmatmul.mubr.bf16.gmra.mrb[32].mxu0 %v6971_v9  ;;  %v1487_v52 = vrot.slane %v1485_v10, 5  ;;  %v1491_v8 = vrot.slane %v1489_v16, 4  ;;  %v1016_v11 = vsel %vm7207_vm10, %v788_v41, %v1015_v25  ;;  %v5879_v19 = vcombine.low %v1860_v38, %v1863_v24  ;;  %v2670_v38 = vld [vmem:[#allocation2 + $0xc] sm:$0xe]  ;;  %v2671_v49 = vld [vmem:[#allocation2 + $0x10] sm:$0xf] }
  0xb9   : > { %v1482_v40 = vor.u32 %v1481_v58, %v1478_v47  ;;  %v1497_v12 = vrot.slane %v1495_v6, 5  ;;  %v796_v14 = vor.u32 %v794_v45, %v793_v7  ;;  %v798_v17 = vrot.slane %v793_v7, 4  ;;  %1017 = vst [vmem:[#allocation2 + $0x78] sm:$0xf] %v1016_v11  ;;  %v2672_v50 = vld [vmem:[#allocation2 + $0x14] sm:$0x1] }
  0xba   : > { %v1492_v32 = vor.u32 %v1491_v8, %v1487_v52  ;;  %v488_v33 = vadd.f32 %v7032_v46, %v450_v57  ;;  %v519_v36 = vmax.f32 %v487_v48, 0.0  ;;  %4857 = vmatmul.mubr.bf16.gmra.mrb[36].mxu1 %v5879_v19  ;;  %v5864_v29 = vrot.slane %v1741_v4, 9  ;;  %v6995_v56 = vld [vmem:[%s8911_s3 + $0x1e8] sm:$0xff]   ;;  %v6988_v60 = vld [vmem:[#allocation2 + $0x60] sm:$0xff]   ;;  %v1744_v6 = vld [vmem:[#allocation2 + $0x54] sm:$0xe] }
  0xbb   : > { %v1483_v22 = vrot.slane %v1482_v40, 4  ;;  %v797_v37 = vsel %vm7213_vm11, %v789_v23, %v796_v14  ;;  %v1020_v30 = vsel %vm7131_vm3, %v798_v17, %v1019_v42  ;;  %v1866_v39 = vrot.slane %v1742_v5, 5  ;;  %4864 = vmatprep.mubr.bf16.mxu1 %v6982_v3  ;;  %6710 = vmatprep.subr.bf16.mxu1 %v6995_v56  ;;  %v1022_v41 = vld [vmem:[#allocation2 + $0x84] sm:$0xf]  ;;  %v1026_v4 = vld [vmem:[#allocation2 + $0x8c] sm:$0x1] }
  0xbc   : > { %v1493_v27 = vrot.slane %v1492_v32, 4  ;;  %1018 = vst [vmem:[#allocation2 + $0x7c] sm:$0xf] %v797_v37  ;;  %1021 = vst [vmem:[#allocation2 + $0x80] sm:$0x1] %v1020_v30  ;;  %v520_v35 = vmax.f32 %v488_v33, 0.0  ;;  %v6146_v15 = vpack.c.bf16 %v519_v36, %v519_v36 }
  0xbd   : > { %v1488_v44 = vsel %vm7199_vm9, %v1483_v22, %v1487_v52  ;;  %v1867_v9 = vsel %vm7454_vm14, %v5864_v29, %v1866_v39  ;;  %v1868_v26 = vrot.slane %v1866_v39, 4  ;;  %v1869_v55 = vrot.slane %v1743_v20, 5  ;;  %v6997_v23 = vld [vmem:[%s8911_s3 + $0x1a8] sm:$0xff]   ;;  %v1745_v8 = vld [vmem:[#allocation2 + $0x58] sm:$0xf] }
  0xbe   : > { %v1498_v53 = vsel %vm7199_vm9, %v1493_v27, %v1497_v12  ;;  %v6147_v25 = vpack.c.bf16 %v520_v35, %v520_v35  ;;  %v800_v21 = vshrl.u32 %v6146_v15, 16  ;;  %v803_v43 = vshll.u32 %v6146_v15, 16  ;;  %v1746_v11 = vld [vmem:[#allocation2 + $0x5c] sm:$0x1]  ;;  %6711 = vmatpush3.bf16.msra.mxu1 %v6997_v23  ;;  %v2158_v36 = vld [vmem:[#allocation2 + $0xc] sm:$0xf] }
  0xbf   : > { %v5851_v57 = vcombine.low %v1488_v44, %v1498_v53  ;;  %v1870_v59 = vsel %vm7454_vm14, %v1868_v26, %v1869_v55  ;;  %v5922_v54 = vrot.slane %v2670_v38, 9  ;;  %v2768_v61 = vrot.slane %v2671_v49, 5  ;;  %v2159_v39 = vld [vmem:[#allocation2 + $0x10] sm:$0xf]  ;;  %v2160_v38 = vld [vmem:[#allocation2 + $0x14] sm:$0x1] }
  0xc0   : > { %v1238_v1 = vld [vmem:[#allocation2 + $0x78] sm:$0xf]  ;;  %v802_v63 = vrot.slane %v800_v21, 7  ;;  %v808_v34 = vshrl.u32 %v6147_v25, 16  ;;  %v5880_v24 = vcombine.low %v1867_v9, %v1870_v59  ;;  %v811_v47 = vshll.u32 %v6147_v25, 16 }
  0xc1   : > { %4727 = vmatprep.mubr.bf16.mxu0 %v5851_v57  ;;  %v1500_v46 = vshrl.u32 %v1238_v1, 16  ;;  %v1503_v48 = vshll.u32 %v1238_v1, 16  ;;  %v2771_v58 = vrot.slane %v2672_v50, 5  ;;  %v2770_v5 = vrot.slane %v2768_v61, 4  ;;  %v2673_v55 = vld [vmem:[#allocation2 + $0x18] sm:$0xe] }
  0xc2   : > { %4728 = vmatmul.mubr.bf16.gmra.mrb[36].mxu0 %v6976_v51  ;;  %v805_v10 = vor.u32 %v803_v43, %v802_v63  ;;  %v806_v16 = vrot.slane %v802_v63, 4  ;;  %v810_v3 = vrot.slane %v808_v34, 7  ;;  %4865 = vmatmul.mubr.bf16.gmra.mrb[40].mxu1 %v5880_v24  ;;  %v7772_v33 = vsel %vm7454_vm14, %v5922_v54, %v2768_v61  ;;  %v2674_v21 = vld [vmem:[#allocation2 + $0x1c] sm:$0xf]  ;;  %v7000_v43 = vld [vmem:[%s8911_s3 + $0x1f0] sm:$0xff]  }
  0xc3   : > { %v1239_v7 = vld [vmem:[#allocation2 + $0x7c] sm:$0xf]  ;;  %v1240_v45 = vld [vmem:[#allocation2 + $0x80] sm:$0x1]  ;;  %v1502_v40 = vrot.slane %v1500_v46, 4  ;;  %v1505_v52 = vrot.slane %v1503_v48, 5  ;;  %4872 = vmatprep.mubr.bf16.mxu1 %v6988_v60  ;;  %v7778_v29 = vsel %vm7454_vm14, %v2770_v5, %v2771_v58  ;;  %6712 = vmatprep.subr.bf16.mxu1 %v7000_v43 }
  0xc4   : > { %v1509_v42 = vshll.u32 %v1239_v7, 16  ;;  %v1513_v12 = vshrl.u32 %v1239_v7, 16  ;;  %v1519_v14 = vshll.u32 %v1240_v45, 16  ;;  %v813_v17 = vor.u32 %v811_v47, %v810_v3  ;;  %v6980_v24 = vld [vmem:[#allocation2 + $0x78] sm:$0xff]   ;;  %v6989_v48 = vld [vmem:[#allocation2 + $0x6c] sm:$0xff]  }
  0xc5   : > { %v1506_v19 = vor.u32 %v1505_v52, %v1502_v40  ;;  %v815_v22 = vrot.slane %v810_v3, 4  ;;  %v1023_v32 = vsel %vm7207_vm10, %v805_v10, %v1022_v41  ;;  %v5865_v15 = vrot.slane %v1744_v6, 9  ;;  %v2675_v6 = vld [vmem:[#allocation2 + $0x20] sm:$0x1]  ;;  %v1747_v52 = vld [vmem:[#allocation2 + $0x60] sm:$0xe] }
  0xc6   : > { %v1511_v20 = vrot.slane %v1509_v42, 5  ;;  %v1515_v37 = vrot.slane %v1513_v12, 4  ;;  %v814_v30 = vsel %vm7213_vm11, %v806_v16, %v813_v17  ;;  %1024 = vst [vmem:[#allocation2 + $0x84] sm:$0xf] %v1023_v32  ;;  %v1521_v27 = vrot.slane %v1519_v14, 5 }
  0xc7   : > { %v1507_v44 = vrot.slane %v1506_v19, 4  ;;  %1025 = vst [vmem:[#allocation2 + $0x88] sm:$0xf] %v814_v30  ;;  %v1027_v35 = vsel %vm7131_vm3, %v815_v22, %v1026_v4  ;;  %v1873_v51 = vrot.slane %v1745_v8, 5  ;;  %v1876_v9 = vrot.slane %v1746_v11, 5 }
  0xc8   : > { %v1516_v49 = vor.u32 %v1515_v37, %v1511_v20  ;;  %1028 = vst [vmem:[#allocation2 + $0x8c] sm:$0x1] %v1027_v35  ;;  %v2207_v26 = vshrl.u32 %v2158_v36, 16  ;;  %v2210_v56 = vshll.u32 %v2158_v36, 16  ;;  %v2216_v53 = vshll.u32 %v2159_v39, 16 }
  0xc9   : > { %v1512_v50 = vsel %vm7199_vm9, %v1507_v44, %v1511_v20  ;;  %v2220_v25 = vshrl.u32 %v2159_v39, 16  ;;  %v1874_v59 = vsel %vm7454_vm14, %v5865_v15, %v1873_v51  ;;  %v1875_v60 = vrot.slane %v1873_v51, 4  ;;  %v1748_v8 = vld [vmem:[#allocation2 + $0x64] sm:$0xf]  ;;  %v1749_v19 = vld [vmem:[#allocation2 + $0x68] sm:$0x1] }
  0xca   : > { %v1517_v57 = vrot.slane %v1516_v49, 4  ;;  %v2209_v54 = vrot.slane %v2207_v26, 4  ;;  %v2212_v61 = vrot.slane %v2210_v56, 5  ;;  %v2218_v1 = vrot.slane %v2216_v53, 5  ;;  %v7002_v51 = vld [vmem:[%s8911_s3 + $0x1b0] sm:$0xff]  }
  0xcb   : > { %v2222_v63 = vrot.slane %v2220_v25, 4  ;;  %v2226_v34 = vshll.u32 %v2160_v38, 16  ;;  %v1877_v46 = vsel %vm7454_vm14, %v1875_v60, %v1876_v9  ;;  %v5923_v47 = vrot.slane %v2673_v55, 9  ;;  %v2162_v56 = vld [vmem:[#allocation2 + $0x1c] sm:$0xf]  ;;  %6713 = vmatpush3.bf16.msra.mxu1 %v7002_v51 }
  0xcc   : > { %v1522_v41 = vsel %vm7199_vm9, %v1517_v57, %v1521_v27  ;;  %v2775_v58 = vrot.slane %v2674_v21, 5  ;;  %v5881_v3 = vcombine.low %v1874_v59, %v1877_v46  ;;  %v2213_v4 = vor.u32 %v2212_v61, %v2209_v54  ;;  %v2161_v27 = vld [vmem:[#allocation2 + $0x18] sm:$0xf]  ;;  %v2163_v57 = vld [vmem:[#allocation2 + $0x20] sm:$0x1] }
  0xcd   : > { %v5852_v10 = vcombine.low %v1512_v50, %v1522_v41  ;;  %v1241_v16 = vld [vmem:[#allocation2 + $0x84] sm:$0xf]  ;;  %v2223_v5 = vor.u32 %v2222_v63, %v2218_v1  ;;  %v5938_v40 = vcombine.low %v7772_v33, %v7778_v29  ;;  %v2228_v44 = vrot.slane %v2226_v34, 5  ;;  %v6993_v63 = vld [vmem:[#allocation2 + $0x78] sm:$0xff]   ;;  %v2677_v34 = vld [vmem:[#allocation2 + $0x28] sm:$0xf] }
  0xce   : > { %v1242_v23 = vld [vmem:[#allocation2 + $0x88] sm:$0xf]  ;;  %v1524_v7 = vshrl.u32 %v1241_v16, 16  ;;  %v1527_v45 = vshll.u32 %v1241_v16, 16  ;;  %4873 = vmatmul.mubr.bf16.gmra.mrb[44].mxu1 %v5881_v3  ;;  %v2214_v14 = vrot.slane %v2213_v4, 4  ;;  %v7797_v17 = vsel %vm7454_vm14, %v5923_v47, %v2775_v58  ;;  %v7007_v33 = vld [vmem:[%s8911_s3 + $0x1b8] sm:$0xff]  }
  0xcf   : > { %4735 = vmatprep.mubr.bf16.mxu0 %v5852_v10  ;;  %v1243_v11 = vld [vmem:[#allocation2 + $0x8c] sm:$0x1]  ;;  %v1533_v42 = vshll.u32 %v1242_v23, 16  ;;  %v1537_v12 = vshrl.u32 %v1242_v23, 16  ;;  %v2224_v20 = vrot.slane %v2223_v5, 4  ;;  %4880 = vmatprep.mubr.bf16.mxu1 %v6989_v48  ;;  %v2777_v38 = vrot.slane %v2775_v58, 4 }
  0xd0   : > { %4736 = vmatmul.mubr.bf16.gmra.mrb[40].mxu0 %v6980_v24  ;;  %v1526_v22 = vrot.slane %v1524_v7, 4  ;;  %v1529_v32 = vrot.slane %v1527_v45, 5  ;;  %v1543_v36 = vshll.u32 %v1243_v11, 16  ;;  %v2219_v39 = vsel %vm7199_vm9, %v2214_v14, %v2218_v1  ;;  %v2676_v59 = vld [vmem:[#allocation2 + $0x24] sm:$0xe] }
  0xd1   : > { %v1535_v37 = vrot.slane %v1533_v42, 5  ;;  %v1539_v30 = vrot.slane %v1537_v12, 4  ;;  %v2778_v49 = vrot.slane %v2675_v6, 5  ;;  %v2229_v26 = vsel %vm7199_vm9, %v2224_v20, %v2228_v44  ;;  %v2678_v41 = vld [vmem:[#allocation2 + $0x2c] sm:$0x1]  ;;  %v6984_v48 = vld [vmem:[#allocation2 + $0x84] sm:$0xff]  }
  0xd2   : > { %v1530_v35 = vor.u32 %v1529_v32, %v1526_v22  ;;  %v1545_v15 = vrot.slane %v1543_v36, 5  ;;  %v5866_v55 = vrot.slane %v1747_v52, 9  ;;  %v1880_v50 = vrot.slane %v1748_v8, 5  ;;  %v1750_v24 = vld [vmem:[#allocation2 + $0x6c] sm:$0xe] }
  0xd3   : > { %v1540_v9 = vor.u32 %v1539_v30, %v1535_v37  ;;  %v7806_v25 = vcombine.low %v2219_v39, %v2229_v26  ;;  %v7810_v21 = vsel %vm7454_vm14, %v2777_v38, %v2778_v49  ;;  %v1883_v43 = vrot.slane %v1749_v19, 5  ;;  %v1751_v16 = vld [vmem:[#allocation2 + $0x70] sm:$0xf]  ;;  %v1752_v3 = vld [vmem:[#allocation2 + $0x74] sm:$0x1] }
  0xd4   : > { %v1531_v53 = vrot.slane %v1530_v35, 4  ;;  %v5939_v54 = vcombine.low %v7797_v17, %v7810_v21  ;;  %v1881_v61 = vsel %vm7454_vm14, %v5866_v55, %v1880_v50  ;;  %v1882_v1 = vrot.slane %v1880_v50, 4  ;;  %v2164_v4 = vld [vmem:[#allocation2 + $0x24] sm:$0xf]  ;;  %v2165_v44 = vld [vmem:[#allocation2 + $0x28] sm:$0xf] }
  0xd5   : > { %v1541_v60 = vrot.slane %v1540_v9, 4  ;;  %v2231_v47 = vshrl.u32 %v2161_v27, 16  ;;  %v2234_v58 = vshll.u32 %v2161_v27, 16  ;;  %v2240_v10 = vshll.u32 %v2162_v56, 16  ;;  %v7005_v35 = vld [vmem:[%s8911_s3 + $0x1f8] sm:$0xff]  }
  0xd6   : > { %v1536_v46 = vsel %vm7199_vm9, %v1531_v53, %v1535_v37  ;;  %v1884_v6 = vsel %vm7454_vm14, %v1882_v1, %v1883_v43  ;;  %v2244_v23 = vshrl.u32 %v2162_v56, 16  ;;  %v2250_v7 = vshll.u32 %v2163_v57, 16  ;;  %v2166_v51 = vld [vmem:[#allocation2 + $0x2c] sm:$0x1]  ;;  %v2679_v26 = vld [vmem:[#allocation2 + $0x30] sm:$0xe]  ;;  %6714 = vmatprep.subr.bf16.mxu1 %v7005_v35 }
  0xd7   : > { %v1546_v5 = vsel %vm7199_vm9, %v1541_v60, %v1545_v15  ;;  %v5882_v52 = vcombine.low %v1881_v61, %v1884_v6  ;;  %v2233_v8 = vrot.slane %v2231_v47, 4  ;;  %v2236_v11 = vrot.slane %v2234_v58, 5  ;;  %v2680_v43 = vld [vmem:[#allocation2 + $0x34] sm:$0xf]  ;;  %v2681_v60 = vld [vmem:[#allocation2 + $0x38] sm:$0x1]  ;;  %6715 = vmatpush3.bf16.msra.mxu1 %v7007_v33 }
  0xd8   : > { %v5853_v45 = vcombine.low %v1536_v46, %v1546_v5  ;;  %v2242_v42 = vrot.slane %v2240_v10, 5  ;;  %v2246_v12 = vrot.slane %v2244_v23, 4  ;;  %v2252_v14 = vrot.slane %v2250_v7, 5  ;;  %v1753_v61 = vld [vmem:[#allocation2 + $0x78] sm:$0xe] }
  0xd9   : > { %v5924_v19 = vrot.slane %v2676_v59, 9  ;;  %4881 = vmatmul.mubr.bf16.gmra.mrb[48].mxu1 %v5882_v52  ;;  %v2237_v22 = vor.u32 %v2236_v11, %v2233_v8  ;;  %v2782_v32 = vrot.slane %v2677_v34, 5  ;;  %v2785_v36 = vrot.slane %v2678_v41, 5  ;;  %v1754_v46 = vld [vmem:[#allocation2 + $0x7c] sm:$0xf] }
  0xda   : > { %4743 = vmatprep.mubr.bf16.mxu0 %v5853_v45  ;;  %v5867_v20 = vrot.slane %v1750_v24, 9  ;;  %v2247_v37 = vor.u32 %v2246_v12, %v2242_v42  ;;  %4888 = vmatprep.mubr.bf16.mxu1 %v6993_v63  ;;  %v1887_v30 = vrot.slane %v1751_v16, 5  ;;  %v1890_v39 = vrot.slane %v1752_v3, 5  ;;  %v6994_v24 = vld [vmem:[#allocation2 + $0x84] sm:$0xff]   ;;  %v2167_v7 = vld [vmem:[#allocation2 + $0x30] sm:$0xf] }
  0xdb   : > { %4744 = vmatmul.mubr.bf16.gmra.mrb[44].mxu0 %v6984_v48  ;;  %v2255_v27 = vshrl.u32 %v2164_v4, 16  ;;  %v2238_v15 = vrot.slane %v2237_v22, 4  ;;  %v7830_v38 = vsel %vm7454_vm14, %v5924_v19, %v2782_v32  ;;  %v2784_v49 = vrot.slane %v2782_v32, 4  ;;  %v1755_v48 = vld [vmem:[#allocation2 + $0x80] sm:$0x1]  ;;  %v6996_v3 = vld [vmem:[%s8911_s3 + $0x208] sm:$0xff]  }
  0xdc   : > { %4977 = vmatprep.mubr.bf16.mxu0 %v5938_v40  ;;  %v2258_v9 = vshll.u32 %v2164_v4, 16  ;;  %v2248_v55 = vrot.slane %v2247_v37, 4  ;;  %v1888_v50 = vsel %vm7454_vm14, %v5867_v20, %v1887_v30  ;;  %v1889_v56 = vrot.slane %v1887_v30, 4  ;;  %v2169_v32 = vld [vmem:[#allocation2 + $0x38] sm:$0x1] }
  0xdd   : > { %v2257_v53 = vrot.slane %v2255_v27, 4  ;;  %v2243_v29 = vsel %vm7199_vm9, %v2238_v15, %v2242_v42  ;;  %v7841_v40 = vsel %vm7454_vm14, %v2784_v49, %v2785_v36  ;;  %v2264_v59 = vshll.u32 %v2165_v44, 16  ;;  %v2168_v42 = vld [vmem:[#allocation2 + $0x34] sm:$0xf]  ;;  %v2682_v30 = vld [vmem:[#allocation2 + $0x3c] sm:$0xe] }
  0xde   : > { %v2260_v57 = vrot.slane %v2258_v9, 5  ;;  %v2253_v1 = vsel %vm7199_vm9, %v2248_v55, %v2252_v14  ;;  %v5940_v63 = vcombine.low %v7830_v38, %v7841_v40  ;;  %v1891_v34 = vsel %vm7454_vm14, %v1889_v56, %v1890_v39  ;;  %v2683_v39 = vld [vmem:[#allocation2 + $0x40] sm:$0xf]  ;;  %v2684_v9 = vld [vmem:[#allocation2 + $0x44] sm:$0x1] }
  0xdf   : > { %v2268_v41 = vshrl.u32 %v2165_v44, 16  ;;  %v7849_v47 = vcombine.low %v2243_v29, %v2253_v1  ;;  %v5883_v58 = vcombine.low %v1888_v50, %v1891_v34  ;;  %v2266_v16 = vrot.slane %v2264_v59, 5  ;;  %v1758_v33 = vld [vmem:[#allocation2 + $0x8c] sm:$0x1]  ;;  %v2187_v28 = vld [vmem:[#allocation2 + $0x80] sm:$0x1] }
  0xe0   : > { %v2261_v10 = vor.u32 %v2260_v57, %v2257_v53  ;;  %v2274_v5 = vshll.u32 %v2166_v51, 16  ;;  %v5925_v6 = vrot.slane %v2679_v26, 9  ;;  %v2789_v23 = vrot.slane %v2680_v43, 5  ;;  %v1756_v26 = vld [vmem:[#allocation2 + $0x84] sm:$0xe] }
  0xe1   : > { %v2270_v4 = vrot.slane %v2268_v41, 4  ;;  %4889 = vmatmul.mubr.bf16.gmra.mrb[52].mxu1 %v5883_v58  ;;  %v2792_v52 = vrot.slane %v2681_v60, 5  ;;  %v5868_v8 = vrot.slane %v1753_v61, 9  ;;  %v1894_v11 = vrot.slane %v1754_v46, 5  ;;  %v1757_v43 = vld [vmem:[#allocation2 + $0x88] sm:$0xf] }
  0xe2   : > { %v2262_v45 = vrot.slane %v2261_v10, 4  ;;  %v2276_v14 = vrot.slane %v2274_v5, 5  ;;  %4896 = vmatprep.mubr.bf16.mxu1 %v6994_v24  ;;  %v7857_v19 = vsel %vm7454_vm14, %v5925_v6, %v2789_v23  ;;  %v2791_v22 = vrot.slane %v2789_v23, 4  ;;  %v2170_v61 = vld [vmem:[#allocation2 + $0x3c] sm:$0xf] }
  0xe3   : > { %4978 = vmatmul.mubr.bf16.vlgmr.msra.gmra.mrb[48].mxu0 %v7806_v25  ;;  %v2271_v12 = vor.u32 %v2270_v4, %v2266_v16  ;;  %v1895_v25 = vsel %vm7454_vm14, %v5868_v8, %v1894_v11  ;;  %v1896_v20 = vrot.slane %v1894_v11, 4  ;;  %v1897_v37 = vrot.slane %v1755_v48, 5  ;;  %v2171_v46 = vld [vmem:[#allocation2 + $0x40] sm:$0xf]  ;;  %v7006_v48 = vld [vmem:[%s8911_s3 + $0x218] sm:$0xff]  }
  0xe4   : > { %4985 = vmatprep.mubr.bf16.mxu0 %v5939_v54  ;;  %6837 = vmatpush3.bf16.msra.mxu0 %v7711_v0  ;;  %v2267_v36 = vsel %vm7199_vm9, %v2262_v45, %v2266_v16  ;;  %v7869_v27 = vsel %vm7454_vm14, %v2791_v22, %v2792_v52  ;;  %v2279_v17 = vshrl.u32 %v2167_v7, 16  ;;  %v2282_v21 = vshll.u32 %v2167_v7, 16  ;;  %v6998_v54 = vld [vmem:[#allocation2 + $0x90] sm:$0xff]   ;;  %v2172_v7 = vld [vmem:[#allocation2 + $0x44] sm:$0x1] }
  0xe5   : > { %v2272_v44 = vrot.slane %v2271_v12, 4  ;;  %6838 = vmatprep.subr.bf16.mxu0 %v6996_v3  ;;  %v7001_v0 = vld [vmem:[%s8911_s3 + $0x210] sm:$0xff]   ;;  %v5941_v35 = vcombine.low %v7857_v19, %v7869_v27  ;;  %v1898_v15 = vsel %vm7454_vm14, %v1896_v20, %v1897_v37  ;;  %v2288_v49 = vshll.u32 %v2168_v42, 16  ;;  %v2685_v45 = vld [vmem:[#allocation2 + $0x48] sm:$0xe]  ;;  %v7009_v12 = vld [vmem:[%s8911_s3 + $0x220] sm:$0xff]  }
  0xe6   : > { %v2292_v51 = vshrl.u32 %v2168_v42, 16  ;;  %v5884_v50 = vcombine.low %v1895_v25, %v1898_v15  ;;  %v2281_v56 = vrot.slane %v2279_v17, 4  ;;  %v2284_v53 = vrot.slane %v2282_v21, 5  ;;  %v2686_v52 = vld [vmem:[#allocation2 + $0x4c] sm:$0xf] }
  0xe7   : > { %v2277_v55 = vsel %vm7199_vm9, %v2272_v44, %v2276_v14  ;;  %v2290_v57 = vrot.slane %v2288_v49, 5  ;;  %v2298_v60 = vshll.u32 %v2169_v32, 16  ;;  %v5926_v34 = vrot.slane %v2682_v30, 9  ;;  %v1759_v37 = vld [vmem:[#allocation2 + $0x90] sm:$0xe] }
  0xe8   : > { %v7880_v29 = vcombine.low %v2267_v36, %v2277_v55  ;;  %v2294_v59 = vrot.slane %v2292_v51, 4  ;;  %6839 = vmatpush3.bf16.msra.mxu0 %v6996_v3  ;;  %v2285_v1 = vor.u32 %v2284_v53, %v2281_v56  ;;  %v2796_v41 = vrot.slane %v2683_v39, 5  ;;  %v1760_v30 = vld [vmem:[#allocation2 + $0x94] sm:$0xf]  ;;  %v1762_v19 = vld [vmem:[#allocation2 + $0x9c] sm:$0xe] }
  0xe9   : > { %v2799_v24 = vrot.slane %v2684_v9, 5  ;;  %6840 = vmatprep.subr.bf16.mxu0 %v7001_v0  ;;  %4897 = vmatmul.mubr.bf16.gmra.mrb[56].mxu1 %v5884_v50  ;;  %v2300_v10 = vrot.slane %v2298_v60, 5  ;;  %v5869_v16 = vrot.slane %v1756_v26, 9  ;;  %v1901_v4 = vrot.slane %v1757_v43, 5  ;;  %v2173_v26 = vld [vmem:[#allocation2 + $0x48] sm:$0xf] }
  0xea   : > { %v2295_v58 = vor.u32 %v2294_v59, %v2290_v57  ;;  %v2286_v5 = vrot.slane %v2285_v1, 4  ;;  %4904 = vmatprep.mubr.bf16.mxu1 %v6998_v54  ;;  %v7888_v3 = vsel %vm7454_vm14, %v5926_v34, %v2796_v41  ;;  %v2798_v6 = vrot.slane %v2796_v41, 4  ;;  %v6999_v54 = vld [vmem:[#allocation2 + $0x9c] sm:$0xff]   ;;  %v2174_v43 = vld [vmem:[#allocation2 + $0x4c] sm:$0xf] }
  0xeb   : > { %4986 = vmatmul.mubr.bf16.gmra.mrb[52].mxu0 %v7849_v47  ;;  %v1904_v23 = vrot.slane %v1758_v33, 5  ;;  %v1902_v11 = vsel %vm7454_vm14, %v5869_v16, %v1901_v4  ;;  %v1903_v47 = vrot.slane %v1901_v4, 4  ;;  %v2303_v42 = vshrl.u32 %v2170_v61, 16  ;;  %v7012_v33 = vld [vmem:[%s8911_s3 + $0x228] sm:$0xff]   ;;  %v2175_v1 = vld [vmem:[#allocation2 + $0x50] sm:$0x1] }
  0xec   : > { %4993 = vmatprep.mubr.bf16.mxu0 %v5940_v63  ;;  %v2296_v8 = vrot.slane %v2295_v58, 4  ;;  %6841 = vmatpush3.bf16.msra.mxu0 %v7001_v0  ;;  %v2291_v14 = vsel %vm7199_vm9, %v2286_v5, %v2290_v57  ;;  %v7902_v22 = vsel %vm7454_vm14, %v2798_v6, %v2799_v24  ;;  %v2306_v38 = vshll.u32 %v2170_v61, 16  ;;  %v2687_v63 = vld [vmem:[#allocation2 + $0x50] sm:$0x1]  ;;  %v1761_v0 = vld [vmem:[#allocation2 + $0x98] sm:$0x1] }
  0xed   : > { %v2312_v40 = vshll.u32 %v2171_v46, 16  ;;  %6842 = vmatprep.subr.bf16.mxu0 %v7006_v48  ;;  %v5942_v36 = vcombine.low %v7888_v3, %v7902_v22  ;;  %v1905_v25 = vsel %vm7454_vm14, %v1903_v47, %v1904_v23  ;;  %v2305_v20 = vrot.slane %v2303_v42, 4  ;;  %v2688_v34 = vld [vmem:[#allocation2 + $0x54] sm:$0xe]  ;;  %v2689_v58 = vld [vmem:[#allocation2 + $0x58] sm:$0xf] }
  0xee   : > { %v2301_v32 = vsel %vm7199_vm9, %v2296_v8, %v2300_v10  ;;  %v5885_v44 = vcombine.low %v1902_v11, %v1905_v25  ;;  %v2308_v17 = vrot.slane %v2306_v38, 5  ;;  %v2316_v15 = vshrl.u32 %v2171_v46, 16  ;;  %v2690_v10 = vld [vmem:[#allocation2 + $0x5c] sm:$0x1]  ;;  %v1763_v27 = vld [vmem:[#allocation2 + $0xa0] sm:$0xf] }
  0xef   : > { %v7910_v39 = vcombine.low %v2291_v14, %v2301_v32  ;;  %v2314_v21 = vrot.slane %v2312_v40, 5  ;;  %v2322_v49 = vshll.u32 %v2172_v7, 16  ;;  %v5927_v51 = vrot.slane %v2685_v45, 9  ;;  %v7003_v42 = vld [vmem:[#allocation2 + $0xa8] sm:$0xff]   ;;  %v2176_v14 = vld [vmem:[#allocation2 + $0x54] sm:$0xf] }
  0xf0   : > { %v2803_v9 = vrot.slane %v2686_v52, 5  ;;  %6843 = vmatpush3.bf16.msra.mxu0 %v7006_v48  ;;  %v2309_v55 = vor.u32 %v2308_v17, %v2305_v20  ;;  %v2806_v50 = vrot.slane %v2687_v63, 5  ;;  %v5870_v56 = vrot.slane %v1759_v37, 9  ;;  %v3642_v13 = vld [vmem:[#allocation2 + $0x84] sm:$0xe] }
  0xf1   : > { %v1908_v53 = vrot.slane %v1760_v30, 5  ;;  %6844 = vmatprep.subr.bf16.mxu0 %v7009_v12  ;;  %4905 = vmatmul.mubr.bf16.gmra.mrb[60].mxu1 %v5885_v44  ;;  %v2318_v57 = vrot.slane %v2316_v15, 4  ;;  %v2324_v59 = vrot.slane %v2322_v49, 5  ;;  %v1911_v48 = vrot.slane %v1761_v0, 5  ;;  %v2177_v0 = vld [vmem:[#allocation2 + $0x58] sm:$0xf] }
  0xf2   : > { %v7917_v60 = vsel %vm7454_vm14, %v5927_v51, %v2803_v9  ;;  %v2805_v61 = vrot.slane %v2803_v9, 4  ;;  %v2310_v41 = vrot.slane %v2309_v55, 4  ;;  %4912 = vmatprep.mubr.bf16.mxu1 %v6999_v54  ;;  %v2327_v5 = vshrl.u32 %v2173_v26, 16  ;;  %v7018_v15 = vld [vmem:[%s8911_s3 + $0x238] sm:$0xff]  }
  0xf3   : > { %4994 = vmatmul.mubr.bf16.gmra.mrb[56].mxu0 %v7880_v29  ;;  %v1909_v24 = vsel %vm7454_vm14, %v5870_v56, %v1908_v53  ;;  %v1910_v46 = vrot.slane %v1908_v53, 4  ;;  %v2319_v16 = vor.u32 %v2318_v57, %v2314_v21  ;;  %v2330_v29 = vshll.u32 %v2173_v26, 16  ;;  %v2178_v55 = vld [vmem:[#allocation2 + $0x5c] sm:$0x1] }
  0xf4   : > { %5001 = vmatprep.mubr.bf16.mxu0 %v5941_v35  ;;  %v7927_v4 = vsel %vm7454_vm14, %v2805_v61, %v2806_v50  ;;  %6845 = vmatpush3.bf16.msra.mxu0 %v7009_v12  ;;  %v2315_v6 = vsel %vm7199_vm9, %v2310_v41, %v2314_v21  ;;  %v2336_v45 = vshll.u32 %v2174_v43, 16  ;;  %v7015_v35 = vld [vmem:[%s8911_s3 + $0x230] sm:$0xff]   ;;  %v2329_v11 = vrot.slane %v2327_v5, 4  ;;  %v1764_v12 = vld [vmem:[#allocation2 + $0xa4] sm:$0x1] }
  0xf5   : > { %v5943_v23 = vcombine.low %v7917_v60, %v7927_v4  ;;  %v1912_v7 = vsel %vm7454_vm14, %v1910_v46, %v1911_v48  ;;  %6846 = vmatprep.subr.bf16.mxu0 %v7012_v33  ;;  %v2320_v52 = vrot.slane %v2319_v16, 4  ;;  %v2332_v47 = vrot.slane %v2330_v29, 5  ;;  %v1765_v41 = vld [vmem:[#allocation2 + $0xa8] sm:$0xe]  ;;  %v7004_v46 = vld [vmem:[#allocation2 + $0xb4] sm:$0xff]  }
  0xf6   : > { %v5886_v8 = vcombine.low %v1909_v24, %v1912_v7  ;;  %v2338_v38 = vrot.slane %v2336_v45, 5  ;;  %v2340_v40 = vshrl.u32 %v2174_v43, 16  ;;  %v2346_v63 = vshll.u32 %v2175_v1, 16  ;;  %v2692_v1 = vld [vmem:[#allocation2 + $0x64] sm:$0xf] }
  0xf7   : > { %v5928_v32 = vrot.slane %v2688_v34, 9  ;;  %v2325_v25 = vsel %vm7199_vm9, %v2320_v52, %v2324_v59  ;;  %v2333_v20 = vor.u32 %v2332_v47, %v2329_v11  ;;  %v2810_v37 = vrot.slane %v2689_v58, 5  ;;  %v2693_v34 = vld [vmem:[#allocation2 + $0x68] sm:$0x1]  ;;  %v1766_v48 = vld [vmem:[#allocation2 + $0xac] sm:$0xf] }
  0xf8   : > { %v2813_v30 = vrot.slane %v2690_v10, 5  ;;  %6847 = vmatpush3.bf16.msra.mxu0 %v7012_v33  ;;  %v7940_v44 = vcombine.low %v2315_v6, %v2325_v25  ;;  %v2342_v17 = vrot.slane %v2340_v40, 4  ;;  %v2348_v21 = vrot.slane %v2346_v63, 5  ;;  %v2691_v33 = vld [vmem:[#allocation2 + $0x60] sm:$0xe] }
  0xf9   : > { %v5871_v54 = vrot.slane %v1762_v19, 9  ;;  %6848 = vmatprep.subr.bf16.mxu0 %v7015_v35  ;;  %4913 = vmatmul.mubr.bf16.gmra.mrb[64].mxu1 %v5886_v8  ;;  %v2334_v49 = vrot.slane %v2333_v20, 4  ;;  %v7947_v51 = vsel %vm7454_vm14, %v5928_v32, %v2810_v37  ;;  %v2812_v9 = vrot.slane %v2810_v37, 4  ;;  %v1767_v58 = vld [vmem:[#allocation2 + $0xb0] sm:$0x1] }
  0xfa   : > { %v1915_v26 = vrot.slane %v1763_v27, 5  ;;  %v2343_v50 = vor.u32 %v2342_v17, %v2338_v38  ;;  %4920 = vmatprep.mubr.bf16.mxu1 %v7003_v42  ;;  %v1918_v56 = vrot.slane %v1764_v12, 5  ;;  %v2351_v53 = vshrl.u32 %v2176_v14, 16  ;;  %v2179_v6 = vld [vmem:[#allocation2 + $0x60] sm:$0xf] }
  0xfb   : > { %5002 = vmatmul.mubr.bf16.gmra.mrb[60].mxu0 %v7910_v39  ;;  %v2354_v43 = vshll.u32 %v2176_v14, 16  ;;  %v2339_v57 = vsel %vm7199_vm9, %v2334_v49, %v2338_v38  ;;  %v7957_v59 = vsel %vm7454_vm14, %v2812_v9, %v2813_v30  ;;  %v2360_v16 = vshll.u32 %v2177_v0, 16  ;;  %v2180_v37 = vld [vmem:[#allocation2 + $0x64] sm:$0xf] }
  0xfc   : > { %5009 = vmatprep.mubr.bf16.mxu0 %v5942_v36  ;;  %v1916_v39 = vsel %vm7454_vm14, %v5871_v54, %v1915_v26  ;;  %v1917_v61 = vrot.slane %v1915_v26, 4  ;;  %6849 = vmatpush3.bf16.msra.mxu0 %v7015_v35  ;;  %v2344_v24 = vrot.slane %v2343_v50, 4  ;;  %v5944_v3 = vcombine.low %v7947_v51, %v7957_v59 }
  0xfd   : > { %v2353_v22 = vrot.slane %v2351_v53, 4  ;;  %v2356_v36 = vrot.slane %v2354_v43, 5  ;;  %6850 = vmatprep.subr.bf16.mxu0 %v7018_v15  ;;  %v2364_v5 = vshrl.u32 %v2177_v0, 16  ;;  %v2370_v29 = vshll.u32 %v2178_v55, 16 }
  0xfe   : > { %v1919_v10 = vsel %vm7454_vm14, %v1917_v61, %v1918_v56  ;;  %v2349_v45 = vsel %vm7199_vm9, %v2344_v24, %v2348_v21  ;;  %v5929_v35 = vrot.slane %v2691_v33, 9  ;;  %v2362_v11 = vrot.slane %v2360_v16, 5  ;;  %v295_v33 = vld [vmem:[#allocation2 + $0xc0] sm:$0x1]  ;;  %v2694_v61 = vld [vmem:[#allocation2 + $0x6c] sm:$0xe] }
  0xff   : > { %v5887_v19 = vcombine.low %v1916_v39, %v1919_v10  ;;  %v2357_v27 = vor.u32 %v2356_v36, %v2353_v22  ;;  %v7971_v8 = vcombine.low %v2339_v57, %v2349_v45  ;;  %v2366_v47 = vrot.slane %v2364_v5, 4  ;;  %v6348_v57 = vld [vmem:[%s7127_s22 + $0x78] sm:$0xff]   ;;  %v2696_v36 = vld [vmem:[#allocation2 + $0x74] sm:$0x1] }
 0x100   : > { %v2372_v42 = vrot.slane %v2370_v29, 5  ;;  %6851 = vmatpush3.bf16.msra.mxu0 %v7018_v15  ;;  %v2817_v38 = vrot.slane %v2692_v1, 5  ;;  %v2820_v40 = vrot.slane %v2693_v34, 5  ;;  %v5872_v63 = vrot.slane %v1765_v41, 9  ;;  %v2181_v15 = vld [vmem:[#allocation2 + $0x68] sm:$0x1] }
 0x101   : > { %v7965_v7 = vpop.f32.mrb[0].mxu0  ;;  %v2358_v14 = vrot.slane %v2357_v27, 4  ;;  %4921 = vmatmul.mubr.bf16.gmra.mrb[68].mxu1 %v5887_v19  ;;  %v2367_v32 = vor.u32 %v2366_v47, %v2362_v11  ;;  %v1922_v25 = vrot.slane %v1766_v48, 5  ;;  %v1925_v20 = vrot.slane %v1767_v58, 5  ;;  %v2695_v1 = vld [vmem:[#allocation2 + $0x70] sm:$0xf] }
 0x102   : > { %v7969_v52 = vpop.f32.mrb[1].mxu0  ;;  %v2375_v30 = vshrl.u32 %v2179_v6, 16  ;;  %4928 = vmatprep.mubr.bf16.mxu1 %v7004_v46  ;;  %v7982_v54 = vsel %vm7454_vm14, %v5929_v35, %v2817_v38  ;;  %v2819_v0 = vrot.slane %v2817_v38, 4  ;;  %v2378_v49 = vshll.u32 %v2179_v6, 16  ;;  %v1768_v46 = vld [vmem:[#allocation2 + $0xb4] sm:$0xe] }
 0x103   : > { %v7973_v12 = vpop.f32.mrb[2].mxu0  ;;  %5010 = vmatmul.mubr.bf16.gmra.mrb[64].mxu0 %v7940_v44  ;;  %v2363_v21 = vsel %vm7199_vm9, %v2358_v14, %v2362_v11  ;;  %v2368_v9 = vrot.slane %v2367_v32, 4  ;;  %v1923_v44 = vsel %vm7454_vm14, %v5872_v63, %v1922_v25  ;;  %v1924_v26 = vrot.slane %v1922_v25, 4  ;;  %v1769_v5 = vld [vmem:[#allocation2 + $0xb8] sm:$0xf] }
 0x104   : > { %v7975_v17 = vpop.f32.mrb[3].mxu0  ;;  %5017 = vmatprep.mubr.bf16.mxu0 %v5943_v23  ;;  %v2377_v55 = vrot.slane %v2375_v30, 4  ;;  %v7991_v50 = vsel %vm7454_vm14, %v2819_v0, %v2820_v40  ;;  %v2380_v56 = vrot.slane %v2378_v49, 5  ;;  %v2384_v53 = vshll.u32 %v2180_v37, 16  ;;  %v1770_v27 = vld [vmem:[#allocation2 + $0xbc] sm:$0x1] }
 0x105   : > { %v2388_v43 = vshrl.u32 %v2180_v37, 16  ;;  %v2373_v39 = vsel %vm7199_vm9, %v2368_v9, %v2372_v42  ;;  %v5945_v60 = vcombine.low %v7982_v54, %v7991_v50  ;;  %v1926_v4 = vsel %vm7454_vm14, %v1924_v26, %v1925_v20  ;;  %v7033_v11 = vld [vmem:[%s8909_s1] ss:$0 sm:$0xff]  ;;  %v2182_v38 = vld [vmem:[#allocation2 + $0x6c] sm:$0xf] }
 0x106   : > { %v2394_v23 = vshll.u32 %v2181_v15, 16  ;;  %v8000_v34 = vcombine.low %v2363_v21, %v2373_v39  ;;  %v5888_v41 = vcombine.low %v1923_v44, %v1926_v4  ;;  %v2381_v24 = vor.u32 %v2380_v56, %v2377_v55  ;;  %v7034_v37 = vld [vmem:[%s8910_s2] ss:$0 sm:$0xff]  ;;  %v2183_v49 = vld [vmem:[#allocation2 + $0x70] sm:$0xf] }
 0x107   : > { %v2386_v22 = vrot.slane %v2384_v53, 5  ;;  %v2390_v48 = vrot.slane %v2388_v43, 4  ;;  %v296_v10 = vsel %vm7131_vm3, 0, %v295_v33  ;;  %v6252_v16 = vunpack.c.l.bf16 %v6348_v57  ;;  %v2184_v9 = vld [vmem:[#allocation2 + $0x74] sm:$0x1] }
 0x108   : > { %v2396_v58 = vrot.slane %v2394_v23, 5  ;;  %v2382_v29 = vrot.slane %v2381_v24, 4  ;;  %297 = vst [vmem:[#allocation2 + $0xc0] sm:$0x1] %v296_v10  ;;  %v6253_v6 = vunpack.c.h.bf16 %v6348_v57  ;;  %v5930_v45 = vrot.slane %v2694_v61, 9 }
 0x109   : > { %v2824_v19 = vrot.slane %v2695_v1, 5  ;;  %4929 = vmatmul.mubr.bf16.gmra.mrb[72].mxu1 %v5888_v41  ;;  %v2391_v35 = vor.u32 %v2390_v48, %v2386_v22  ;;  %v459_v47 = vmul.f32 %v7033_v11, %v6252_v16  ;;  %v2827_v42 = vrot.slane %v2696_v36, 5  ;;  %v2697_v56 = vld [vmem:[#allocation2 + $0x78] sm:$0xe]  ;;  %v2699_v16 = vld [vmem:[#allocation2 + $0x80] sm:$0x1] }
 0x10a   : > { %v5873_v14 = vrot.slane %v1768_v46, 9  ;;  %v2387_v40 = vsel %vm7199_vm9, %v2382_v29, %v2386_v22  ;;  %v460_v63 = vmul.f32 %v7033_v11, %v6253_v6  ;;  %v1932_v21 = vrot.slane %v1770_v27, 5  ;;  %v2698_v22 = vld [vmem:[#allocation2 + $0x7c] sm:$0xf]  ;;  %v3105_v50 = vld [vmem:[#allocation2 + $0x20] sm:$0x1] }
 0x10b   : > { %5018 = vmatmul.mubr.bf16.gmra.mrb[68].mxu0 %v7971_v8  ;;  %v8012_v32 = vsel %vm7454_vm14, %v5930_v45, %v2824_v19  ;;  %v2826_v25 = vrot.slane %v2824_v19, 4  ;;  %v2392_v20 = vrot.slane %v2391_v35, 4  ;;  %v497_v30 = vadd.f32 %v7034_v37, %v459_v47 }
 0x10c   : > { %5025 = vmatprep.mubr.bf16.mxu0 %v5944_v3  ;;  %v1929_v8 = vrot.slane %v1769_v5, 5  ;;  %v498_v0 = vadd.f32 %v7034_v37, %v460_v63  ;;  %v2399_v44 = vshrl.u32 %v2182_v38, 16  ;;  %v2402_v26 = vshll.u32 %v2182_v38, 16  ;;  %v3103_v5 = vld [vmem:[#allocation2 + $0x18] sm:$0xf] }
 0x10d   : > { %v8022_v15 = vsel %vm7454_vm14, %v2826_v25, %v2827_v42  ;;  %v2397_v51 = vsel %vm7199_vm9, %v2392_v20, %v2396_v58  ;;  %v529_v59 = vmax.f32 %v497_v30, 0.0  ;;  %v2408_v23 = vshll.u32 %v2183_v49, 16  ;;  %v3104_v42 = vld [vmem:[#allocation2 + $0x1c] sm:$0xf] }
 0x10e   : > { %v5946_v3 = vcombine.low %v8012_v32, %v8022_v15  ;;  %v8030_v55 = vsel %vm7454_vm14, %v5873_v14, %v1929_v8  ;;  %v8032_v53 = vcombine.low %v2387_v40, %v2397_v51  ;;  %v530_v43 = vmax.f32 %v498_v0, 0.0 }
 0x10f   : > { %v1931_v33 = vrot.slane %v1929_v8, 4  ;;  %v2401_v57 = vrot.slane %v2399_v44, 4  ;;  %v6156_v39 = vpack.c.bf16 %v529_v59, %v529_v59  ;;  %v2404_v4 = vrot.slane %v2402_v26, 5  ;;  %v1057_v38 = vld [vmem:[#allocation2 + $0xc0] sm:$0xf] }
 0x110   : > { %v2412_v61 = vshrl.u32 %v2183_v49, 16  ;;  %v6157_v1 = vpack.c.bf16 %v530_v43, %v530_v43  ;;  %v2418_v24 = vshll.u32 %v2184_v9, 16  ;;  %v5931_v36 = vrot.slane %v2697_v56, 9 }
 0x111   : > { %v8036_v41 = vsel %vm7454_vm14, %v1931_v33, %v1932_v21  ;;  %v885_v46 = vshrl.u32 %v6156_v39, 16  ;;  %v888_v48 = vshll.u32 %v6156_v39, 16  ;;  %v2405_v10 = vor.u32 %v2404_v4, %v2401_v57 }
 0x112   : > { %v5889_v58 = vcombine.low %v8030_v55, %v8036_v41  ;;  %v893_v29 = vshrl.u32 %v6157_v1, 16  ;;  %v896_v6 = vshll.u32 %v6157_v1, 16  ;;  %v2410_v45 = vrot.slane %v2408_v23, 5  ;;  %v2186_v23 = vld [vmem:[#allocation2 + $0x7c] sm:$0xf] }
 0x113   : > { %5026 = vmatmul.mubr.bf16.gmra.mrb[72].mxu0 %v8000_v34  ;;  %v2414_v19 = vrot.slane %v2412_v61, 4  ;;  %v887_v27 = vrot.slane %v885_v46, 7  ;;  %v2406_v35 = vrot.slane %v2405_v10, 4  ;;  %v2420_v11 = vrot.slane %v2418_v24, 5  ;;  %v8072_v61 = vpop.f32.mrb[4].mxu0 }
 0x114   : > { %5033 = vmatprep.mubr.bf16.mxu0 %v5945_v60  ;;  %v2831_v47 = vrot.slane %v2698_v22, 5  ;;  %v8044_v14 = vrot.slane %v893_v29, 7  ;;  %v2834_v63 = vrot.slane %v2699_v16, 5  ;;  %v3152_v25 = vshrl.u32 %v3103_v5, 16  ;;  %v8046_v34 = vpop.f32.mrb[0].mxu1 }
 0x115   : > { %v2415_v40 = vor.u32 %v2414_v19, %v2410_v45  ;;  %v890_v20 = vor.u32 %v888_v48, %v887_v27  ;;  %v891_v37 = vrot.slane %v887_v27, 4  ;;  %v2411_v30 = vsel %vm7199_vm9, %v2406_v35, %v2410_v45  ;;  %v2185_v60 = vld [vmem:[#allocation2 + $0x78] sm:$0xf]  ;;  %v8054_v8 = vpop.f32.mrb[1].mxu1  ;;  %v2701_v46 = vld [vmem:[#allocation2 + $0x88] sm:$0xf] }
 0x116   : > { %v8052_v54 = vsel %vm7454_vm14, %v5931_v36, %v2831_v47  ;;  %v898_v21 = vor.u32 %v896_v6, %v8044_v14  ;;  %v2833_v9 = vrot.slane %v2831_v47, 4  ;;  %v8058_v44 = vpop.f32.mrb[2].mxu1  ;;  %v3154_v51 = vrot.slane %v3152_v25, 4  ;;  %v2700_v36 = vld [vmem:[#allocation2 + $0x84] sm:$0xe] }
 0x117   : > { %v2416_v49 = vrot.slane %v2415_v40, 4  ;;  %v1058_v26 = vsel %vm7207_vm10, %v890_v20, %v1057_v38  ;;  %v3155_v59 = vshll.u32 %v3103_v5, 16  ;;  %v3161_v56 = vshll.u32 %v3104_v42, 16  ;;  %v8062_v43 = vpop.f32.mrb[3].mxu1  ;;  %v2702_v29 = vld [vmem:[#allocation2 + $0x8c] sm:$0x1] }
 0x118   : > { %v899_v33 = vsel %vm7213_vm11, %v891_v37, %v898_v21  ;;  %1059 = vst [vmem:[#allocation2 + $0xc0] sm:$0xf] %v1058_v26  ;;  %v8070_v39 = vsel %vm7454_vm14, %v2833_v9, %v2834_v63  ;;  %v3165_v4 = vshrl.u32 %v3104_v42, 16  ;;  %v3171_v10 = vshll.u32 %v3105_v50, 16  ;;  %v3106_v35 = vld [vmem:[#allocation2 + $0x24] sm:$0xf] }
 0x119   : > { %v2421_v57 = vsel %vm7199_vm9, %v2416_v49, %v2420_v11  ;;  %1060 = vst [vmem:[#allocation2 + $0xc4] sm:$0xf] %v899_v33  ;;  %v5947_v24 = vcombine.low %v8052_v54, %v8070_v39  ;;  %v3157_v31 = vrot.slane %v3155_v59, 5  ;;  %v3163_v22 = vrot.slane %v3161_v56, 5  ;;  %v8080_v11 = vpop.f32.mrb[5].mxu0 }
 0x11a   : > { %v5914_v1 = vcombine.low %v2411_v30, %v2421_v57  ;;  %v3167_v48 = vrot.slane %v3165_v4, 4  ;;  %v2423_v16 = vshrl.u32 %v2185_v60, 16  ;;  %v2426_v5 = vshll.u32 %v2185_v60, 16  ;;  %v8082_v40 = vpop.f32.mrb[6].mxu0  ;;  %v3107_v30 = vld [vmem:[#allocation2 + $0x28] sm:$0xf] }
 0x11b   : > { %5034 = vmatmul.mubr.bf16.gmra.mrb[76].mxu0 %v8032_v53  ;;  %v3158_v6 = vor.u32 %v3157_v31, %v3154_v51  ;;  %v2432_v45 = vshll.u32 %v2186_v23, 16  ;;  %v2436_v19 = vshrl.u32 %v2186_v23, 16  ;;  %v2442_v27 = vshll.u32 %v2187_v28, 16  ;;  %v3108_v50 = vld [vmem:[#allocation2 + $0x2c] sm:$0x1]  ;;  %v8084_v60 = vpop.f32.mrb[7].mxu0 }
 0x11c   : > { %5041 = vmatprep.mubr.bf16.mxu0 %v5946_v3  ;;  %v3168_v47 = vor.u32 %v3167_v48, %v3163_v22  ;;  %v3173_v42 = vrot.slane %v3171_v10, 5  ;;  %v2425_v38 = vrot.slane %v2423_v16, 4  ;;  %v2428_v53 = vrot.slane %v2426_v5, 5  ;;  %v2188_v51 = vld [vmem:[#allocation2 + $0x84] sm:$0xf] }
 0x11d   : > { %v3159_v63 = vrot.slane %v3158_v6, 4  ;;  %v2434_v25 = vrot.slane %v2432_v45, 5  ;;  %v2438_v20 = vrot.slane %v2436_v19, 4  ;;  %v2444_v37 = vrot.slane %v2442_v27, 5  ;;  %v2703_v45 = vld [vmem:[#allocation2 + $0x90] sm:$0xe] }
 0x11e   : > { %v3169_v32 = vrot.slane %v3168_v47, 4  ;;  %v2429_v15 = vor.u32 %v2428_v53, %v2425_v38  ;;  %v5932_v3 = vrot.slane %v2700_v36, 9  ;;  %v2838_v54 = vrot.slane %v2701_v46, 5  ;;  %v2189_v36 = vld [vmem:[#allocation2 + $0x88] sm:$0xf] }
 0x11f   : > { %v3164_v21 = vsel %vm7199_vm9, %v3159_v63, %v3163_v22  ;;  %v2439_v49 = vor.u32 %v2438_v20, %v2434_v25  ;;  %v2841_v9 = vrot.slane %v2702_v29, 5  ;;  %v3176_v26 = vshrl.u32 %v3106_v35, 16  ;;  %v2705_v41 = vld [vmem:[#allocation2 + $0x98] sm:$0x1] }
 0x120   : > { %v7008_v59 = vld [vmem:[#allocation2 + $0xc0] sm:$0xff]   ;;  %v3174_v56 = vsel %vm7199_vm9, %v3169_v32, %v3173_v42  ;;  %v2430_v33 = vrot.slane %v2429_v15, 4  ;;  %v2839_v57 = vsel %vm7454_vm14, %v5932_v3, %v2838_v54  ;;  %v2840_v39 = vrot.slane %v2838_v54, 4  ;;  %v2704_v42 = vld [vmem:[#allocation2 + $0x94] sm:$0xf] }
 0x121   : > { %v5970_v4 = vcombine.low %v3164_v21, %v3174_v56  ;;  %v2440_v23 = vrot.slane %v2439_v49, 4  ;;  %v3178_v28 = vrot.slane %v3176_v26, 4  ;;  %v3179_v31 = vshll.u32 %v3106_v35, 16  ;;  %4936 = vmatprep.mubr.bf16.mxu1 %v7008_v59  ;;  %v3110_v56 = vld [vmem:[#allocation2 + $0x34] sm:$0xf] }
 0x122   : > { %v2435_v22 = vsel %vm7199_vm9, %v2430_v33, %v2434_v25  ;;  %v2842_v46 = vsel %vm7454_vm14, %v2840_v39, %v2841_v9  ;;  %v3185_v48 = vshll.u32 %v3107_v30, 16  ;;  %v3189_v10 = vshrl.u32 %v3107_v30, 16  ;;  %4937 = vmatmul.mubr.bf16.gmra.mrb[76].mxu1 %v5889_v58  ;;  %v7010_v30 = vld [vmem:[#allocation2 + $0x18] sm:$0xff]  }
 0x123   : > { %5042 = vmatmul.mubr.bf16.gmra.mrb[80].mxu0 %v5914_v1  ;;  %v2445_v16 = vsel %vm7199_vm9, %v2440_v23, %v2444_v37  ;;  %v5948_v5 = vcombine.low %v2839_v57, %v2842_v46  ;;  %v3181_v29 = vrot.slane %v3179_v31, 5  ;;  %v3195_v6 = vshll.u32 %v3108_v50, 16  ;;  %v2190_v1 = vld [vmem:[#allocation2 + $0x8c] sm:$0x1]  ;;  %5138 = vmatprep.mubr.bf16.mxu1 %v5970_v4  ;;  %v3109_v37 = vld [vmem:[#allocation2 + $0x30] sm:$0xf] }
 0x124   : > { %5049 = vmatprep.mubr.bf16.mxu0 %v5947_v24  ;;  %v5915_v19 = vcombine.low %v2435_v22, %v2445_v16  ;;  %v3187_v27 = vrot.slane %v3185_v48, 5  ;;  %v3191_v35 = vrot.slane %v3189_v10, 4  ;;  %v2447_v47 = vshrl.u32 %v2188_v51, 16  ;;  %v3111_v33 = vld [vmem:[#allocation2 + $0x38] sm:$0x1] }
 0x125   : > { %v3182_v38 = vor.u32 %v3181_v29, %v3178_v28  ;;  %v3197_v53 = vrot.slane %v3195_v6, 5  ;;  %v2450_v63 = vshll.u32 %v2188_v51, 16  ;;  %v2456_v55 = vshll.u32 %v2189_v36, 16  ;;  %v2191_v10 = vld [vmem:[#allocation2 + $0x90] sm:$0xf] }
 0x126   : > { %v3192_v58 = vor.u32 %v3191_v35, %v3187_v27  ;;  %v2449_v24 = vrot.slane %v2447_v47, 4  ;;  %v2460_v25 = vshrl.u32 %v2189_v36, 16  ;;  %v2466_v20 = vshll.u32 %v2190_v1, 16  ;;  %v7011_v35 = vld [vmem:[#allocation2 + $0x24] sm:$0xff]  }
 0x127   : > { %v3183_v32 = vrot.slane %v3182_v38, 4  ;;  %v2452_v15 = vrot.slane %v2450_v63, 5  ;;  %v2458_v3 = vrot.slane %v2456_v55, 5  ;;  %v5933_v54 = vrot.slane %v2703_v45, 9  ;;  %v2706_v63 = vld [vmem:[#allocation2 + $0x9c] sm:$0xe] }
 0x128   : > { %v3193_v50 = vrot.slane %v3192_v58, 4  ;;  %v2462_v21 = vrot.slane %v2460_v25, 4  ;;  %v2468_v49 = vrot.slane %v2466_v20, 5  ;;  %v2845_v9 = vrot.slane %v2704_v42, 5  ;;  %v8107_v31 = vpop.f32.mrb[8].mxu0 }
 0x129   : > { %v3188_v26 = vsel %vm7199_vm9, %v3183_v32, %v3187_v27  ;;  %v2453_v51 = vor.u32 %v2452_v15, %v2449_v24  ;;  %v2848_v59 = vrot.slane %v2705_v41, 5  ;;  %v3200_v57 = vshrl.u32 %v3109_v37, 16  ;;  %v8109_v16 = vpop.f32.mrb[9].mxu0  ;;  %v2707_v25 = vld [vmem:[#allocation2 + $0xa0] sm:$0xf] }
 0x12a   : > { %v3198_v39 = vsel %vm7199_vm9, %v3193_v50, %v3197_v53  ;;  %v2463_v4 = vor.u32 %v2462_v21, %v2458_v3  ;;  %v2846_v23 = vsel %vm7454_vm14, %v5933_v54, %v2845_v9  ;;  %v2847_v28 = vrot.slane %v2845_v9, 4  ;;  %5139 = vmatmul.mubr.bf16.vlgmr.msra.gmra.mrb[80].mxu1 %v7010_v30  ;;  %v8113_v27 = vpop.f32.mrb[10].mxu0  ;;  %v2193_v53 = vld [vmem:[#allocation2 + $0x98] sm:$0x1] }
 0x12b   : > { %5050 = vmatmul.mubr.bf16.gmra.mrb[84].mxu0 %v5915_v19  ;;  %v5971_v36 = vcombine.low %v3188_v26, %v3198_v39  ;;  %v2454_v22 = vrot.slane %v2453_v51, 4  ;;  %v3202_v46 = vrot.slane %v3200_v57, 4  ;;  %v3203_v48 = vshll.u32 %v3109_v37, 16  ;;  %v2192_v19 = vld [vmem:[#allocation2 + $0x94] sm:$0xf] }
 0x12c   : > { %5057 = vmatprep.mubr.bf16.mxu0 %v5948_v5  ;;  %v2464_v29 = vrot.slane %v2463_v4, 4  ;;  %v2849_v6 = vsel %vm7454_vm14, %v2847_v28, %v2848_v59  ;;  %v3209_v1 = vshll.u32 %v3110_v56, 16  ;;  %v3213_v45 = vshrl.u32 %v3110_v56, 16 }
 0x12d   : > { %5146 = vmatprep.mubr.bf16.mxu1 %v5971_v36  ;;  %v2459_v5 = vsel %vm7199_vm9, %v2454_v22, %v2458_v3  ;;  %v5949_v47 = vcombine.low %v2846_v23, %v2849_v6  ;;  %v3205_v42 = vrot.slane %v3203_v48, 5  ;;  %v3219_v38 = vshll.u32 %v3111_v33, 16  ;;  %v2708_v3 = vld [vmem:[#allocation2 + $0xa4] sm:$0x1]  ;;  %v3112_v23 = vld [vmem:[#allocation2 + $0x3c] sm:$0xf] }
 0x12e   : > { %v2469_v55 = vsel %vm7199_vm9, %v2464_v29, %v2468_v49  ;;  %v3211_v41 = vrot.slane %v3209_v1, 5  ;;  %v3215_v58 = vrot.slane %v3213_v45, 4  ;;  %v2471_v24 = vshrl.u32 %v2191_v10, 16  ;;  %v3113_v48 = vld [vmem:[#allocation2 + $0x40] sm:$0xf] }
 0x12f   : > { %v8119_v20 = vpop.f32.mrb[4].mxu1  ;;  %v5916_v37 = vcombine.low %v2459_v5, %v2469_v55  ;;  %v3206_v30 = vor.u32 %v3205_v42, %v3202_v46  ;;  %v3221_v32 = vrot.slane %v3219_v38, 5  ;;  %v2474_v15 = vshll.u32 %v2191_v10, 16 }
 0x130   : > { %v3216_v54 = vor.u32 %v3215_v58, %v3211_v41  ;;  %v2473_v50 = vrot.slane %v2471_v24, 4  ;;  %v2480_v21 = vshll.u32 %v2192_v19, 16  ;;  %v2484_v9 = vshrl.u32 %v2192_v19, 16  ;;  %v8121_v26 = vpop.f32.mrb[5].mxu1  ;;  %v2194_v24 = vld [vmem:[#allocation2 + $0x9c] sm:$0xf] }
 0x131   : > { %v3207_v51 = vrot.slane %v3206_v30, 4  ;;  %v2476_v59 = vrot.slane %v2474_v15, 5  ;;  %v2490_v49 = vshll.u32 %v2193_v53, 16  ;;  %v5934_v56 = vrot.slane %v2706_v63, 9  ;;  %v8129_v45 = vpop.f32.mrb[6].mxu1 }
 0x132   : > { %v3217_v33 = vrot.slane %v3216_v54, 4  ;;  %v2482_v57 = vrot.slane %v2480_v21, 5  ;;  %v2486_v39 = vrot.slane %v2484_v9, 4  ;;  %v2852_v4 = vrot.slane %v2707_v25, 5  ;;  %5147 = vmatmul.mubr.bf16.gmra.mrb[84].mxu1 %v7011_v35  ;;  %v7013_v35 = vld [vmem:[#allocation2 + $0x30] sm:$0xff]   ;;  %v8131_v53 = vpop.f32.mrb[7].mxu1 }
 0x133   : > { %5058 = vmatmul.mubr.bf16.gmra.mrb[88].mxu0 %v5916_v37  ;;  %v3212_v28 = vsel %vm7199_vm9, %v3207_v51, %v3211_v41  ;;  %v2477_v36 = vor.u32 %v2476_v59, %v2473_v50  ;;  %v2492_v22 = vrot.slane %v2490_v49, 5  ;;  %v2855_v46 = vrot.slane %v2708_v3, 5  ;;  %v8135_v25 = vpop.f32.mrb[11].mxu0  ;;  %v2195_v3 = vld [vmem:[#allocation2 + $0xa0] sm:$0xf] }
 0x134   : > { %5065 = vmatprep.mubr.bf16.mxu0 %v5949_v47  ;;  %v3222_v10 = vsel %vm7199_vm9, %v3217_v33, %v3221_v32  ;;  %v2487_v29 = vor.u32 %v2486_v39, %v2482_v57  ;;  %v2853_v6 = vsel %vm7454_vm14, %v5934_v56, %v2852_v4  ;;  %v2854_v1 = vrot.slane %v2852_v4, 4  ;;  %v3114_v47 = vld [vmem:[#allocation2 + $0x44] sm:$0x1]  ;;  %v2709_v59 = vld [vmem:[#allocation2 + $0xa8] sm:$0xe] }
 0x135   : > { %v5972_v19 = vcombine.low %v3212_v28, %v3222_v10  ;;  %v2478_v5 = vrot.slane %v2477_v36, 4  ;;  %v3224_v42 = vshrl.u32 %v3112_v23, 16  ;;  %v3227_v38 = vshll.u32 %v3112_v23, 16  ;;  %v2196_v54 = vld [vmem:[#allocation2 + $0xa4] sm:$0x1] }
 0x136   : > { %v2488_v63 = vrot.slane %v2487_v29, 4  ;;  %v2856_v55 = vsel %vm7454_vm14, %v2854_v1, %v2855_v46  ;;  %v3233_v41 = vshll.u32 %v3113_v48, 16  ;;  %v3237_v58 = vshrl.u32 %v3113_v48, 16  ;;  %v2710_v4 = vld [vmem:[#allocation2 + $0xac] sm:$0xf] }
 0x137   : > { %5154 = vmatprep.mubr.bf16.mxu1 %v5972_v19  ;;  %v2483_v37 = vsel %vm7199_vm9, %v2478_v5, %v2482_v57  ;;  %v5950_v30 = vcombine.low %v2853_v6, %v2856_v55  ;;  %v3226_v32 = vrot.slane %v3224_v42, 4  ;;  %v3229_v15 = vrot.slane %v3227_v38, 5  ;;  %v2711_v23 = vld [vmem:[#allocation2 + $0xb0] sm:$0x1]  ;;  %v3115_v48 = vld [vmem:[#allocation2 + $0x48] sm:$0xf] }
 0x138   : > { %v2493_v50 = vsel %vm7199_vm9, %v2488_v63, %v2492_v22  ;;  %v3235_v21 = vrot.slane %v3233_v41, 5  ;;  %v3239_v9 = vrot.slane %v3237_v58, 4  ;;  %v3243_v51 = vshll.u32 %v3114_v47, 16  ;;  %v3116_v58 = vld [vmem:[#allocation2 + $0x4c] sm:$0xf] }
 0x139   : > { %v5917_v49 = vcombine.low %v2483_v37, %v2493_v50  ;;  %v3230_v56 = vor.u32 %v3229_v15, %v3226_v32  ;;  %v2495_v33 = vshrl.u32 %v2194_v24, 16  ;;  %v2498_v39 = vshll.u32 %v2194_v24, 16  ;;  %v7014_v37 = vld [vmem:[#allocation2 + $0x3c] sm:$0xff]   ;;  %v3117_v15 = vld [vmem:[#allocation2 + $0x50] sm:$0x1] }
 0x13a   : > { %v3240_v28 = vor.u32 %v3239_v9, %v3235_v21  ;;  %v3245_v57 = vrot.slane %v3243_v51, 5  ;;  %v2504_v36 = vshll.u32 %v2195_v3, 16  ;;  %v2508_v46 = vshrl.u32 %v2195_v3, 16  ;;  %5155 = vmatmul.mubr.bf16.gmra.mrb[88].mxu1 %v7013_v35  ;;  %v2197_v51 = vld [vmem:[#allocation2 + $0xa8] sm:$0xf] }
 0x13b   : > { %v8141_v10 = vpop.f32.mrb[12].mxu0  ;;  %5066 = vmatmul.mubr.bf16.gmra.mrb[92].mxu0 %v5917_v49  ;;  %v3231_v22 = vrot.slane %v3230_v56, 4  ;;  %v2497_v29 = vrot.slane %v2495_v33, 4  ;;  %v2500_v6 = vrot.slane %v2498_v39, 5  ;;  %v2514_v1 = vshll.u32 %v2196_v54, 16 }
 0x13c   : > { %5073 = vmatprep.mubr.bf16.mxu0 %v5950_v30  ;;  %v3241_v19 = vrot.slane %v3240_v28, 4  ;;  %v2506_v5 = vrot.slane %v2504_v36, 5  ;;  %v2510_v47 = vrot.slane %v2508_v46, 4  ;;  %v5935_v42 = vrot.slane %v2709_v59, 9  ;;  %v2199_v39 = vld [vmem:[#allocation2 + $0xb0] sm:$0x1] }
 0x13d   : > { %v3236_v38 = vsel %vm7199_vm9, %v3231_v22, %v3235_v21  ;;  %v2501_v63 = vor.u32 %v2500_v6, %v2497_v29  ;;  %v2516_v55 = vrot.slane %v2514_v1, 5  ;;  %v2859_v41 = vrot.slane %v2710_v4, 5  ;;  %v2198_v21 = vld [vmem:[#allocation2 + $0xac] sm:$0xf]  ;;  %v2712_v36 = vld [vmem:[#allocation2 + $0xb4] sm:$0xe] }
 0x13e   : > { %v3246_v24 = vsel %vm7199_vm9, %v3241_v19, %v3245_v57  ;;  %v2511_v35 = vor.u32 %v2510_v47, %v2506_v5  ;;  %v2862_v32 = vrot.slane %v2711_v23, 5  ;;  %v3248_v3 = vshrl.u32 %v3115_v48, 16  ;;  %v2713_v1 = vld [vmem:[#allocation2 + $0xb8] sm:$0xf] }
 0x13f   : > { %v5973_v30 = vcombine.low %v3236_v38, %v3246_v24  ;;  %v2502_v54 = vrot.slane %v2501_v63, 4  ;;  %v2860_v50 = vsel %vm7454_vm14, %v5935_v42, %v2859_v41  ;;  %v2861_v9 = vrot.slane %v2859_v41, 4  ;;  %v2714_v24 = vld [vmem:[#allocation2 + $0xbc] sm:$0x1] }
 0x140   : > { %v2512_v59 = vrot.slane %v2511_v35, 4  ;;  %v3250_v49 = vrot.slane %v3248_v3, 4  ;;  %v3251_v56 = vshll.u32 %v3115_v48, 16  ;;  %v3257_v33 = vshll.u32 %v3116_v58, 16 }
 0x141   : > { %5162 = vmatprep.mubr.bf16.mxu1 %v5973_v30  ;;  %v2507_v4 = vsel %vm7199_vm9, %v2502_v54, %v2506_v5  ;;  %v2863_v23 = vsel %vm7454_vm14, %v2861_v9, %v2862_v32  ;;  %v3261_v28 = vshrl.u32 %v3116_v58, 16  ;;  %v3267_v57 = vshll.u32 %v3117_v15, 16  ;;  %v3118_v30 = vld [vmem:[#allocation2 + $0x54] sm:$0xf] }
 0x142   : > { %v2517_v46 = vsel %vm7199_vm9, %v2512_v59, %v2516_v55  ;;  %v5951_v22 = vcombine.low %v2860_v50, %v2863_v23  ;;  %v3253_v29 = vrot.slane %v3251_v56, 5  ;;  %v3259_v6 = vrot.slane %v3257_v33, 5  ;;  %5163 = vmatmul.mubr.bf16.gmra.mrb[92].mxu1 %v7014_v37  ;;  %v7016_v56 = vld [vmem:[#allocation2 + $0x48] sm:$0xff]  }
 0x143   : > { %v5918_v48 = vcombine.low %v2507_v4, %v2517_v46  ;;  %v3263_v19 = vrot.slane %v3261_v28, 4  ;;  %v3269_v47 = vrot.slane %v3267_v57, 5  ;;  %v2519_v42 = vshrl.u32 %v2197_v51, 16  ;;  %v8155_v38 = vpop.f32.mrb[8].mxu1  ;;  %v3120_v57 = vld [vmem:[#allocation2 + $0x5c] sm:$0x1] }
 0x144   : > { %v3254_v5 = vor.u32 %v3253_v29, %v3250_v49  ;;  %v2522_v63 = vshll.u32 %v2197_v51, 16  ;;  %v2528_v41 = vshll.u32 %v2198_v21, 16  ;;  %v2532_v58 = vshrl.u32 %v2198_v21, 16  ;;  %v8157_v35 = vpop.f32.mrb[9].mxu1 }
 0x145   : > { %5074 = vmatmul.mubr.bf16.gmra.mrb[96].mxu0 %v5918_v48  ;;  %v3264_v55 = vor.u32 %v3263_v19, %v3259_v6  ;;  %v2521_v32 = vrot.slane %v2519_v42, 4  ;;  %v2538_v15 = vshll.u32 %v2199_v39, 16  ;;  %v5936_v3 = vrot.slane %v2712_v36, 9  ;;  %v8159_v54 = vpop.f32.mrb[10].mxu1  ;;  %v3119_v39 = vld [vmem:[#allocation2 + $0x58] sm:$0xf] }
 0x146   : > { %5081 = vmatprep.mubr.bf16.mxu0 %v5951_v22  ;;  %v3255_v37 = vrot.slane %v3254_v5, 4  ;;  %v2524_v50 = vrot.slane %v2522_v63, 5  ;;  %v2530_v9 = vrot.slane %v2528_v41, 5  ;;  %v2534_v59 = vrot.slane %v2532_v58, 4  ;;  %v8163_v46 = vpop.f32.mrb[11].mxu1  ;;  %v8169_v41 = vpop.f32.mrb[13].mxu0 }
 0x147   : > { %v3265_v49 = vrot.slane %v3264_v55, 4  ;;  %v2540_v51 = vrot.slane %v2538_v15, 5  ;;  %v2866_v21 = vrot.slane %v2713_v1, 5  ;;  %v2869_v33 = vrot.slane %v2714_v24, 5  ;;  %v2201_v15 = vld [vmem:[#allocation2 + $0xb8] sm:$0xf] }
 0x148   : > { %v3260_v4 = vsel %vm7199_vm9, %v3255_v37, %v3259_v6  ;;  %v2525_v23 = vor.u32 %v2524_v50, %v2521_v32  ;;  %v2535_v28 = vor.u32 %v2534_v59, %v2530_v9  ;;  %v3272_v36 = vshrl.u32 %v3118_v30, 16  ;;  %v2200_v6 = vld [vmem:[#allocation2 + $0xb4] sm:$0xf]  ;;  %v2202_v59 = vld [vmem:[#allocation2 + $0xbc] sm:$0x1] }
 0x149   : > { %v3270_v22 = vsel %vm7199_vm9, %v3265_v49, %v3269_v47  ;;  %v2867_v29 = vsel %vm7454_vm14, %v5936_v3, %v2866_v21  ;;  %v2868_v48 = vrot.slane %v2866_v21, 4  ;;  %v3275_v19 = vshll.u32 %v3118_v30, 16  ;;  %v8173_v47 = vpop.f32.mrb[14].mxu0 }
 0x14a   : > { %v5974_v1 = vcombine.low %v3260_v4, %v3270_v22  ;;  %v2526_v42 = vrot.slane %v2525_v23, 4  ;;  %v2536_v5 = vrot.slane %v2535_v28, 4  ;;  %v3274_v63 = vrot.slane %v3272_v36, 4  ;;  %v8179_v49 = vpop.f32.mrb[15].mxu0  ;;  %v351_v28 = vld [vmem:[#allocation2 + $0xc8] sm:$0x1] }
 0x14b   : > { %v2870_v58 = vsel %vm7454_vm14, %v2868_v48, %v2869_v33  ;;  %v3277_v24 = vrot.slane %v3275_v19, 5  ;;  %v3281_v55 = vshll.u32 %v3119_v39, 16  ;;  %v3285_v32 = vshrl.u32 %v3119_v39, 16  ;;  %v2715_v39 = vld [vmem:[#allocation2 + $0xc0] sm:$0xe] }
 0x14c   : > { %5170 = vmatprep.mubr.bf16.mxu1 %v5974_v1  ;;  %v2531_v3 = vsel %vm7199_vm9, %v2526_v42, %v2530_v9  ;;  %v2541_v30 = vsel %vm7199_vm9, %v2536_v5, %v2540_v51  ;;  %v5952_v37 = vcombine.low %v2867_v29, %v2870_v58  ;;  %v3291_v50 = vshll.u32 %v3120_v57, 16  ;;  %v2716_v9 = vld [vmem:[#allocation2 + $0xc4] sm:$0xf]  ;;  %v3121_v42 = vld [vmem:[#allocation2 + $0x60] sm:$0xf]  ;;  %v8181_v5 = vpop.f32.mrb[16].mxu0 }
 0x14d   : > { %v5919_v21 = vcombine.low %v2531_v3, %v2541_v30  ;;  %5171 = vmatmul.mubr.bf16.gmra.mrb[96].mxu1 %v7016_v56  ;;  %v3278_v33 = vor.u32 %v3277_v24, %v3274_v63  ;;  %v3283_v4 = vrot.slane %v3281_v55, 5  ;;  %v3287_v23 = vrot.slane %v3285_v32, 4  ;;  %v3122_v55 = vld [vmem:[#allocation2 + $0x64] sm:$0xf] }
 0x14e   : > { %v3293_v36 = vrot.slane %v3291_v50, 5  ;;  %v2543_v22 = vshrl.u32 %v2200_v6, 16  ;;  %v2546_v48 = vshll.u32 %v2200_v6, 16  ;;  %v2552_v19 = vshll.u32 %v2201_v15, 16  ;;  %v7017_v50 = vld [vmem:[#allocation2 + $0x54] sm:$0xff]  }
 0x14f   : > { %5082 = vmatmul.mubr.bf16.gmra.mrb[100].mxu0 %v5919_v21  ;;  %v3279_v1 = vrot.slane %v3278_v33, 4  ;;  %v3288_v51 = vor.u32 %v3287_v23, %v3283_v4  ;;  %v2556_v29 = vshrl.u32 %v2201_v15, 16  ;;  %v2562_v57 = vshll.u32 %v2202_v59, 16  ;;  %v8187_v15 = vpop.f32.mrb[17].mxu0 }
 0x150   : > { %5089 = vmatprep.mubr.bf16.mxu0 %v5952_v37  ;;  %v2545_v56 = vrot.slane %v2543_v22, 4  ;;  %v2548_v63 = vrot.slane %v2546_v48, 5  ;;  %v2554_v58 = vrot.slane %v2552_v19, 5  ;;  %v352_v24 = vsel %vm7142_vm4, 0, %v351_v28  ;;  %v8189_v23 = vpop.f32.mrb[18].mxu0 }
 0x151   : > { %v3284_v6 = vsel %vm7199_vm9, %v3279_v1, %v3283_v4  ;;  %v3289_v32 = vrot.slane %v3288_v51, 4  ;;  %v2558_v3 = vrot.slane %v2556_v29, 4  ;;  %v2564_v30 = vrot.slane %v2562_v57, 5  ;;  %353 = vst [vmem:[#allocation2 + $0xc8] sm:$0x1] %v352_v24  ;;  %8930 = vst [vmem:[#allocation6_spill] sm:$0xff] %v8189_v23 }
 0x152   : > { %v2549_v59 = vor.u32 %v2548_v63, %v2545_v56  ;;  %v5937_v21 = vrot.slane %v2715_v39, 9  ;;  %v2873_v37 = vrot.slane %v2716_v9, 5  ;;  %v3296_v33 = vshrl.u32 %v3121_v42, 16  ;;  %v3123_v48 = vld [vmem:[#allocation2 + $0x68] sm:$0x1] }
 0x153   : > { %v3294_v28 = vsel %vm7199_vm9, %v3289_v32, %v3293_v36  ;;  %v2559_v22 = vor.u32 %v2558_v3, %v2554_v58  ;;  %v3299_v19 = vshll.u32 %v3121_v42, 16  ;;  %v3305_v4 = vshll.u32 %v3122_v55, 16  ;;  %v2203_v1 = vld [vmem:[#allocation2 + $0xc0] sm:$0xf]  ;;  %v2204_v39 = vld [vmem:[#allocation2 + $0xc4] sm:$0xf] }
 0x154   : > { %v5975_v51 = vcombine.low %v3284_v6, %v3294_v28  ;;  %v2550_v29 = vrot.slane %v2549_v59, 4  ;;  %v8195_v57 = vsel %vm7454_vm14, %v5937_v21, %v2873_v37  ;;  %v8197_v56 = vrot.slane %v2873_v37, 4  ;;  %v8201_v6 = vpop.f32.mrb[19].mxu0  ;;  %v3125_v23 = vld [vmem:[#allocation2 + $0x70] sm:$0xf] }
 0x155   : > { %v2560_v9 = vrot.slane %v2559_v22, 4  ;;  %v3298_v63 = vrot.slane %v3296_v33, 4  ;;  %v3301_v24 = vrot.slane %v3299_v19, 5  ;;  %v3307_v0 = vrot.slane %v3305_v4, 5  ;;  %v3124_v22 = vld [vmem:[#allocation2 + $0x6c] sm:$0xf] }
 0x156   : > { %5178 = vmatprep.mubr.bf16.mxu1 %v5975_v51  ;;  %v2555_v36 = vsel %vm7199_vm9, %v2550_v29, %v2554_v58  ;;  %v3309_v42 = vshrl.u32 %v3122_v55, 16  ;;  %v3315_v32 = vshll.u32 %v3123_v48, 16  ;;  %v2567_v3 = vshrl.u32 %v2203_v1, 16 }
 0x157   : > { %v2565_v59 = vsel %vm7199_vm9, %v2560_v9, %v2564_v30  ;;  %5179 = vmatmul.mubr.bf16.gmra.mrb[100].mxu1 %v7017_v50  ;;  %v3302_v21 = vor.u32 %v3301_v24, %v3298_v63  ;;  %v2570_v37 = vshll.u32 %v2203_v1, 16  ;;  %v2576_v28 = vshll.u32 %v2204_v39, 16  ;;  %v3126_v1 = vld [vmem:[#allocation2 + $0x74] sm:$0x1] }
 0x158   : > { %v5920_v33 = vcombine.low %v2555_v36, %v2565_v59  ;;  %v1061_v19 = vld [vmem:[#allocation2 + $0xc8] sm:$0x1]  ;;  %v3311_v4 = vrot.slane %v3309_v42, 4  ;;  %v3317_v51 = vrot.slane %v3315_v32, 5  ;;  %v2569_v18 = vrot.slane %v2567_v3, 4 }
 0x159   : > { %v8205_v58 = vpop.f32.mrb[12].mxu1  ;;  %v8931_v55 = vrot.slane %v8044_v14, 4  ;;  %v3303_v29 = vrot.slane %v3302_v21, 4  ;;  %v2572_v30 = vrot.slane %v2570_v37, 5  ;;  %v8211_v50 = vrot.slane %v2576_v28, 5  ;;  %v7019_v21 = vld [vmem:[#allocation2 + $0x60] sm:$0xff]  }
 0x15a   : > { %v8213_v9 = vpop.f32.mrb[13].mxu1  ;;  %5090 = vmatmul.mubr.bf16.gmra.mrb[104].mxu0 %v5920_v33  ;;  %v3312_v63 = vor.u32 %v3311_v4, %v3307_v0  ;;  %v2580_v24 = vshrl.u32 %v2204_v39, 16  ;;  %v8217_v36 = vadd.f32 %v7969_v52, %v7965_v7  ;;  %v8221_v14 = vadd.f32 %v7975_v17, %v7973_v12  ;;  %v3616_v4 = vld [vmem:[#allocation2 + $0x1c] sm:$0xf] }
 0x15b   : > { %v1062_v48 = vsel %vm7131_vm3, %v8931_v55, %v1061_v19  ;;  %v8223_v42 = vpop.f32.mrb[14].mxu1  ;;  %v3308_v32 = vsel %vm7199_vm9, %v3303_v29, %v3307_v0  ;;  %v2573_v3 = vor.u32 %v2572_v30, %v2569_v18  ;;  %v8229_v59 = vadd.f32 %v8054_v8, %v8046_v34  ;;  %v3615_v19 = vld [vmem:[#allocation2 + $0x18] sm:$0xe]  ;;  %v3617_v55 = vld [vmem:[#allocation2 + $0x20] sm:$0x1] }
 0x15c   : > { %1063 = vst [vmem:[#allocation2 + $0xc8] sm:$0x1] %v1062_v48  ;;  %v8233_v39 = vadd.f32 %v8062_v43, %v8058_v44  ;;  %v3313_v7 = vrot.slane %v3312_v63, 4  ;;  %v2582_v52 = vrot.slane %v2580_v24, 4  ;;  %v3320_v37 = vshrl.u32 %v3124_v22, 16  ;;  %v8235_v17 = vpop.f32.mrb[15].mxu1 }
 0x15d   : > { %8932 = vst [vmem:[#allocation7_spill] sm:$0xff] %v8229_v59  ;;  %v3323_v12 = vshll.u32 %v3124_v22, 16  ;;  %v8237_v28 = vrot.slane %v2573_v3, 4  ;;  %v3329_v33 = vshll.u32 %v3125_v23, 16  ;;  %v3333_v0 = vshrl.u32 %v3125_v23, 16 }
 0x15e   : > { %8933 = vst [vmem:[#allocation8_spill] sm:$0xff] %v8233_v39  ;;  %v3339_v18 = vshll.u32 %v3126_v1, 16  ;;  %v3318_v34 = vsel %vm7199_vm9, %v3313_v7, %v3317_v51  ;;  %v2583_v8 = vor.u32 %v2582_v52, %v8211_v50  ;;  %v3322_v44 = vrot.slane %v3320_v37, 4  ;;  %v3618_v23 = vld [vmem:[#allocation2 + $0x24] sm:$0xe] }
 0x15f   : > { %v3325_v43 = vrot.slane %v3323_v12, 5  ;;  %v5976_v48 = vcombine.low %v3308_v32, %v3318_v34  ;;  %v2579_v22 = vsel %vm7199_vm9, %v8237_v28, %v8211_v50  ;;  %v3331_v29 = vrot.slane %v3329_v33, 5  ;;  %v3619_v1 = vld [vmem:[#allocation2 + $0x28] sm:$0xf]  ;;  %v3620_v7 = vld [vmem:[#allocation2 + $0x2c] sm:$0x1] }
 0x160   : > { %v3335_v30 = vrot.slane %v3333_v0, 4  ;;  %v2584_v63 = vrot.slane %v2583_v8, 4  ;;  %v3341_v3 = vrot.slane %v3339_v18, 5  ;;  %v5986_v51 = vrot.slane %v3615_v19, 9 }
 0x161   : > { %v3326_v24 = vor.u32 %v3325_v43, %v3322_v44  ;;  %v8246_v52 = vpop.f32.mrb[16].mxu1  ;;  %5186 = vmatprep.mubr.bf16.mxu1 %v5976_v48  ;;  %v3713_v34 = vrot.slane %v3616_v4, 5  ;;  %v3716_v39 = vrot.slane %v3617_v55, 5  ;;  %v8250_v50 = vadd.f32 %v8080_v11, %v8072_v61  ;;  %v7020_v11 = vld [vmem:[#allocation2 + $0x6c] sm:$0xff]  }
 0x162   : > { %v3336_v32 = vor.u32 %v3335_v30, %v3331_v29  ;;  %5187 = vmatmul.mubr.bf16.gmra.mrb[104].mxu1 %v7019_v21  ;;  %v5987_v8 = vrot.slane %v3618_v23, 9  ;;  %v3720_v43 = vrot.slane %v3619_v1, 5  ;;  %v8254_v48 = vpop.f32.mrb[17].mxu1  ;;  %v3723_v21 = vrot.slane %v3620_v7, 5  ;;  %v3127_v30 = vld [vmem:[#allocation2 + $0x78] sm:$0xf] }
 0x163   : > { %v2717_v37 = vld [vmem:[#allocation2 + $0xc8] sm:$0x1]  ;;  %v3327_v0 = vrot.slane %v3326_v24, 4  ;;  %v3714_v19 = vsel %vm7454_vm14, %v5986_v51, %v3713_v34  ;;  %v3715_v44 = vrot.slane %v3713_v34, 4 }
 0x164   : > { %v2205_v12 = vld [vmem:[#allocation2 + $0xc8] sm:$0x1]  ;;  %v2876_v28 = vrot.slane %v2717_v37, 5  ;;  %v3337_v18 = vrot.slane %v3336_v32, 4  ;;  %v8268_v51 = vsel %vm7454_vm14, %v5987_v8, %v3720_v43  ;;  %v3129_v37 = vld [vmem:[#allocation2 + $0x80] sm:$0x1]  ;;  %v8284_v8 = vadd.f32 %v8121_v26, %v8119_v20 }
 0x165   : > { %v2586_v33 = vshll.u32 %v2205_v12, 16  ;;  %v3332_v61 = vsel %vm7199_vm9, %v3327_v0, %v3331_v29  ;;  %v3717_v1 = vsel %vm7454_vm14, %v3715_v44, %v3716_v39  ;;  %v8270_v12 = vpop.f32.mrb[18].mxu1  ;;  %v8272_v29 = vpop.f32.mrb[20].mxu0  ;;  %v3722_v34 = vrot.slane %v3720_v43, 4  ;;  %v3625_v44 = vld [vmem:[#allocation2 + $0x40] sm:$0xf] }
 0x166   : > { %v2877_v4 = vsel %vm7454_vm14, %v8197_v56, %v2876_v28  ;;  %v3342_v24 = vsel %vm7199_vm9, %v3337_v18, %v3341_v3  ;;  %v3128_v56 = vld [vmem:[#allocation2 + $0x7c] sm:$0xf]  ;;  %v6002_v32 = vcombine.low %v3714_v19, %v3717_v1  ;;  %v3621_v3 = vld [vmem:[#allocation2 + $0x30] sm:$0xe]  ;;  %v3622_v28 = vld [vmem:[#allocation2 + $0x34] sm:$0xf]  ;;  %v8280_v0 = vadd.f32 %v8084_v60, %v8082_v40 }
 0x167   : > { %v2588_v55 = vrot.slane %v2586_v33, 5  ;;  %v5953_v23 = vcombine.low %v8195_v57, %v2877_v4  ;;  %v5977_v57 = vcombine.low %v3332_v61, %v3342_v24  ;;  %v8276_v33 = vpop.f32.mrb[19].mxu1  ;;  %8934 = vst [vmem:[#allocation9_spill] sm:$0xff] %v8284_v8  ;;  %v3623_v18 = vld [vmem:[#allocation2 + $0x38] sm:$0x1]  ;;  %v3724_v43 = vsel %vm7454_vm14, %v3722_v34, %v3723_v21  ;;  %v8292_v40 = vpop.f32.mrb[21].mxu0 }
 0x168   : > { %v3624_v19 = vld [vmem:[#allocation2 + $0x3c] sm:$0xe]  ;;  %v3347_v4 = vshll.u32 %v3127_v30, 16  ;;  %v6003_v60 = vcombine.low %v8268_v51, %v3724_v43  ;;  %v3357_v20 = vshrl.u32 %v3128_v56, 16  ;;  %v3363_v26 = vshll.u32 %v3129_v37, 16 }
 0x169   : > { %v2589_v7 = vsel %vm7199_vm9, %v2584_v63, %v2588_v55  ;;  %5097 = vmatprep.mubr.bf16.mxu0 %v5953_v23  ;;  %v8288_v63 = vadd.f32 %v8131_v53, %v8129_v45  ;;  %5194 = vmatprep.mubr.bf16.mxu1 %v5977_v57  ;;  %v3353_v55 = vshll.u32 %v3128_v56, 16  ;;  %v5988_v61 = vrot.slane %v3621_v3, 9  ;;  %v8295_v45 = vpop.f32.mrb[22].mxu0  ;;  %v3626_v21 = vld [vmem:[#allocation2 + $0x44] sm:$0x1] }
 0x16a   : > { %v5921_v39 = vcombine.low %v2579_v22, %v2589_v7  ;;  %v3344_v22 = vshrl.u32 %v3127_v30, 16  ;;  %5195 = vmatmul.mubr.bf16.gmra.mrb[108].mxu1 %v7020_v11  ;;  %v3349_v23 = vrot.slane %v3347_v4, 5  ;;  %v3727_v1 = vrot.slane %v3622_v28, 5  ;;  %v8299_v3 = vpop.f32.mrb[23].mxu0  ;;  %v3131_v43 = vld [vmem:[#allocation2 + $0x88] sm:$0xf] }
 0x16b   : > { %8935 = vst [vmem:[#allocation10_spill] sm:$0xff] %v8288_v63  ;;  %v3355_v24 = vrot.slane %v3353_v55, 5  ;;  %v3359_v7 = vrot.slane %v3357_v20, 4  ;;  %v3365_v30 = vrot.slane %v3363_v26, 5  ;;  %v3730_v57 = vrot.slane %v3623_v18, 5 }
 0x16c   : > { %5098 = vmatmul.mubr.bf16.gmra.mrb[108].mxu0 %v5921_v39  ;;  %v3346_v53 = vrot.slane %v3344_v22, 4  ;;  %v5989_v34 = vrot.slane %v3624_v19, 9  ;;  %v3728_v51 = vsel %vm7454_vm14, %v5988_v61, %v3727_v1  ;;  %v3729_v56 = vrot.slane %v3727_v1, 4  ;;  %v8301_v39 = vpop.f32.mrb[20].mxu1  ;;  %v3130_v19 = vld [vmem:[#allocation2 + $0x84] sm:$0xf] }
 0x16d   : > { %6852 = vmatprep.mubr.bf16.mxu0 %v6002_v32  ;;  %v3734_v37 = vrot.slane %v3625_v44, 5  ;;  %v3360_v11 = vor.u32 %v3359_v7, %v3355_v24  ;;  %v3737_v32 = vrot.slane %v3626_v21, 5  ;;  %v8305_v28 = vadd.f32 %v8109_v16, %v8107_v31  ;;  %v8311_v22 = vpop.f32.mrb[21].mxu1  ;;  %v3132_v26 = vld [vmem:[#allocation2 + $0x8c] sm:$0x1] }
 0x16e   : > { %v3350_v63 = vor.u32 %v3349_v23, %v3346_v53  ;;  %v8309_v18 = vadd.f32 %v8135_v25, %v8113_v27  ;;  %v3731_v44 = vsel %vm7454_vm14, %v3729_v56, %v3730_v57  ;;  %v8319_v31 = vpop.f32.mrb[22].mxu1  ;;  %v7021_v27 = vld [vmem:[#allocation2 + $0x78] sm:$0xff]   ;;  %v8323_v25 = vadd.f32 %v8157_v35, %v8155_v38  ;;  %v3627_v53 = vld [vmem:[#allocation2 + $0x48] sm:$0xe]  ;;  %v3628_v23 = vld [vmem:[#allocation2 + $0x4c] sm:$0xf] }
 0x16f   : > { %v8317_v55 = vsel %vm7454_vm14, %v5989_v34, %v3734_v37  ;;  %v3736_v20 = vrot.slane %v3734_v37, 4  ;;  %v3361_v16 = vrot.slane %v3360_v11, 4  ;;  %v6004_v61 = vcombine.low %v3728_v51, %v3731_v44  ;;  %v8329_v1 = vpop.f32.mrb[23].mxu1  ;;  %v3629_v51 = vld [vmem:[#allocation2 + $0x50] sm:$0x1] }
 0x170   : > { %v3351_v4 = vrot.slane %v3350_v63, 4  ;;  %8936 = vst [vmem:[#allocation11_spill] sm:$0xff] %v8323_v25  ;;  %v8327_v63 = vadd.f32 %v8163_v46, %v8159_v54  ;;  %v3368_v57 = vshrl.u32 %v3130_v19, 16  ;;  %v3371_v34 = vshll.u32 %v3130_v19, 16  ;;  %v3630_v56 = vld [vmem:[#allocation2 + $0x54] sm:$0xe] }
 0x171   : > { %v3738_v7 = vsel %vm7454_vm14, %v3736_v20, %v3737_v32  ;;  %v3366_v38 = vsel %vm7199_vm9, %v3361_v16, %v3365_v30  ;;  %v3377_v54 = vshll.u32 %v3131_v43, 16  ;;  %v3381_v46 = vshrl.u32 %v3131_v43, 16  ;;  %v3632_v25 = vld [vmem:[#allocation2 + $0x5c] sm:$0x1]  ;;  %v3638_v8 = vld [vmem:[#allocation2 + $0x74] sm:$0x1] }
 0x172   : > { %8937 = vst [vmem:[#allocation12_spill] sm:$0xff] %v8327_v63  ;;  %v3356_v21 = vsel %vm7199_vm9, %v3351_v4, %v3355_v24  ;;  %v6005_v35 = vcombine.low %v8317_v55, %v3738_v7  ;;  %v3370_v11 = vrot.slane %v3368_v57, 4  ;;  %v3373_v44 = vrot.slane %v3371_v34, 5  ;;  %v3631_v4 = vld [vmem:[#allocation2 + $0x58] sm:$0xf] }
 0x173   : > { %v5978_v37 = vcombine.low %v3356_v21, %v3366_v38  ;;  %v3387_v24 = vshll.u32 %v3132_v26, 16  ;;  %v8338_v63 = vpop.f32.mrb[24].mxu0  ;;  %v3379_v32 = vrot.slane %v3377_v54, 5  ;;  %v3383_v19 = vrot.slane %v3381_v46, 4  ;;  %v8342_v21 = vpop.f32.mrb[24].mxu1 }
 0x174   : > { %6853 = vmatmul.mubr.bf16.vlgmr.msra.gmra.mrb[112].mxu0 %v6003_v60  ;;  %v5990_v20 = vrot.slane %v3627_v53, 9  ;;  %v3741_v60 = vrot.slane %v3628_v23, 5  ;;  %v3374_v30 = vor.u32 %v3373_v44, %v3370_v11  ;;  %v3744_v55 = vrot.slane %v3629_v51, 5  ;;  %v8340_v43 = vpop.f32.mrb[25].mxu0  ;;  %v3133_v38 = vld [vmem:[#allocation2 + $0x90] sm:$0xf] }
 0x175   : > { %6856 = vmatprep.mubr.bf16.mxu0 %v6004_v61  ;;  %5202 = vmatprep.mubr.bf16.mxu1 %v5978_v37  ;;  %v3389_v16 = vrot.slane %v3387_v24, 5  ;;  %v5991_v7 = vrot.slane %v3630_v56, 9  ;;  %v3384_v61 = vor.u32 %v3383_v19, %v3379_v32  ;;  %v3748_v34 = vrot.slane %v3631_v4, 5  ;;  %v8346_v53 = vpop.f32.mrb[26].mxu0  ;;  %v8348_v23 = vpop.f32.mrb[25].mxu1  ;;  %v7022_v4 = vld [vmem:[#allocation2 + $0x84] sm:$0xff]  }
 0x176   : > { %5203 = vmatmul.mubr.bf16.gmra.mrb[112].mxu1 %v7021_v27  ;;  %v3742_v26 = vsel %vm7454_vm14, %v5990_v20, %v3741_v60  ;;  %v3743_v57 = vrot.slane %v3741_v60, 4  ;;  %v3375_v54 = vrot.slane %v3374_v30, 4  ;;  %v3751_v46 = vrot.slane %v3632_v25, 5  ;;  %v3134_v56 = vld [vmem:[#allocation2 + $0x94] sm:$0xf]  ;;  %v8358_v37 = vpop.f32.mrb[27].mxu0 }
 0x177   : > { %v8352_v51 = vadd.f32 %v8169_v41, %v8141_v10  ;;  %v8356_v27 = vadd.f32 %v8179_v49, %v8173_v47  ;;  %v8360_v11 = vpop.f32.mrb[26].mxu1  ;;  %v3385_v44 = vrot.slane %v3384_v61, 4  ;;  %v8366_v25 = vsel %vm7454_vm14, %v5991_v7, %v3748_v34  ;;  %v3135_v41 = vld [vmem:[#allocation2 + $0x98] sm:$0x1]  ;;  %v3633_v30 = vld [vmem:[#allocation2 + $0x60] sm:$0xe] }
 0x178   : > { %v3745_v24 = vsel %vm7454_vm14, %v3743_v57, %v3744_v55  ;;  %v3750_v10 = vrot.slane %v3748_v34, 4  ;;  %v8368_v19 = vpop.f32.mrb[27].mxu1  ;;  %v3380_v47 = vsel %vm7199_vm9, %v3375_v54, %v3379_v32  ;;  %v8374_v20 = vadd.f32 %v8213_v9, %v8205_v58  ;;  %v3634_v55 = vld [vmem:[#allocation2 + $0x64] sm:$0xf]  ;;  %v3635_v7 = vld [vmem:[#allocation2 + $0x68] sm:$0x1] }
 0x179   : > { %v6006_v49 = vcombine.low %v3742_v26, %v3745_v24  ;;  %v8378_v60 = vadd.f32 %v8235_v17, %v8223_v42  ;;  %v3390_v61 = vsel %vm7199_vm9, %v3385_v44, %v3389_v16  ;;  %v3392_v32 = vshrl.u32 %v3133_v38, 16  ;;  %v3636_v42 = vld [vmem:[#allocation2 + $0x6c] sm:$0xe]  ;;  %v3637_v17 = vld [vmem:[#allocation2 + $0x70] sm:$0xf] }
 0x17a   : > { %8938 = vst [vmem:[#allocation13_spill] sm:$0xff] %v8374_v20  ;;  %v3752_v57 = vsel %vm7454_vm14, %v3750_v10, %v3751_v46  ;;  %v3395_v26 = vshll.u32 %v3133_v38, 16  ;;  %v5979_v34 = vcombine.low %v3380_v47, %v3390_v61  ;;  %v3401_v9 = vshll.u32 %v3134_v56, 16  ;;  %v8387_v38 = vpop.f32.mrb[28].mxu1 }
 0x17b   : > { %8939 = vst [vmem:[#allocation14_spill] sm:$0xff] %v8378_v60  ;;  %v6007_v58 = vcombine.low %v8366_v25, %v3752_v57  ;;  %v3405_v54 = vshrl.u32 %v3134_v56, 16  ;;  %v3394_v24 = vrot.slane %v3392_v32, 4  ;;  %v3411_v20 = vshll.u32 %v3135_v41, 16  ;;  %v8391_v57 = vpop.f32.mrb[29].mxu1 }
 0x17c   : > { %6857 = vmatmul.mubr.bf16.gmra.mrb[116].mxu0 %v6005_v35  ;;  %v3397_v60 = vrot.slane %v3395_v26, 5  ;;  %v5992_v35 = vrot.slane %v3633_v30, 9  ;;  %5210 = vmatprep.mubr.bf16.mxu1 %v5979_v34  ;;  %v3403_v16 = vrot.slane %v3401_v9, 5  ;;  %v3755_v59 = vrot.slane %v3634_v55, 5  ;;  %v8397_v34 = vpop.f32.mrb[30].mxu1 }
 0x17d   : > { %6860 = vmatprep.mubr.bf16.mxu0 %v6006_v49  ;;  %v3407_v44 = vrot.slane %v3405_v54, 4  ;;  %v3758_v46 = vrot.slane %v3635_v7, 5  ;;  %v3413_v47 = vrot.slane %v3411_v20, 5  ;;  %v5993_v56 = vrot.slane %v3636_v42, 9  ;;  %v3136_v7 = vld [vmem:[#allocation2 + $0x9c] sm:$0xf] }
 0x17e   : > { %v8385_v10 = vpop.f32.mrb[28].mxu0  ;;  %5211 = vmatmul.mubr.bf16.gmra.mrb[116].mxu1 %v7022_v4  ;;  %v3398_v25 = vor.u32 %v3397_v60, %v3394_v24  ;;  %v3762_v49 = vrot.slane %v3637_v17, 5  ;;  %v3756_v30 = vsel %vm7454_vm14, %v5992_v35, %v3755_v59  ;;  %v3757_v32 = vrot.slane %v3755_v59, 4  ;;  %v3137_v54 = vld [vmem:[#allocation2 + $0xa0] sm:$0xf]  ;;  %v8407_v17 = vpop.f32.mrb[31].mxu1 }
 0x17f   : > { %v8389_v61 = vpop.f32.mrb[29].mxu0  ;;  %v3408_v41 = vor.u32 %v3407_v44, %v3403_v16  ;;  %v3765_v55 = vrot.slane %v3638_v8, 5  ;;  %v8403_v9 = vadd.f32 %v8187_v15, %v8181_v5  ;;  %v7023_v24 = vld [vmem:[#allocation2 + $0x90] sm:$0xff]   ;;  %v8941_v35 = vld [vmem:[#allocation6_spill] sm:$0xff] }
 0x180   : > { %v8395_v26 = vpop.f32.mrb[30].mxu0  ;;  %v3399_v4 = vrot.slane %v3398_v25, 4  ;;  %v3763_v20 = vsel %vm7454_vm14, %v5993_v56, %v3762_v49  ;;  %v3764_v60 = vrot.slane %v3762_v49, 4  ;;  %v3759_v8 = vsel %vm7454_vm14, %v3757_v32, %v3758_v46  ;;  %v3138_v56 = vld [vmem:[#allocation2 + $0xa4] sm:$0x1] }
 0x181   : > { %8940 = vst [vmem:[#allocation15_spill] sm:$0xff] %v8403_v9  ;;  %v8405_v42 = vpop.f32.mrb[31].mxu0  ;;  %v3409_v59 = vrot.slane %v3408_v41, 4  ;;  %v8413_v44 = vadd.f32 %v8201_v6, %v8941_v35  ;;  %v6494_v25 = vadd.f32 %v8254_v48, %v8246_v52  ;;  %v8417_v5 = vpop.f32.mrb[32].mxu1  ;;  %v6008_v49 = vcombine.low %v3756_v30, %v3759_v8  ;;  %v3639_v32 = vld [vmem:[#allocation2 + $0x78] sm:$0xe] }
 0x182   : > { %v3404_v15 = vsel %vm7199_vm9, %v3399_v4, %v3403_v16  ;;  %v3766_v41 = vsel %vm7454_vm14, %v3764_v60, %v3765_v55  ;;  %v6497_v46 = vadd.f32 %v8276_v33, %v8270_v12  ;;  %v3640_v6 = vld [vmem:[#allocation2 + $0x7c] sm:$0xf]  ;;  %v8430_v16 = vpop.f32.mrb[33].mxu1  ;;  %v3419_v12 = vshll.u32 %v3136_v7, 16  ;;  %v3643_v4 = vld [vmem:[#allocation2 + $0x88] sm:$0xf] }
 0x183   : > { %8942 = vst [vmem:[#allocation6_spill] sm:$0xff] %v8413_v44  ;;  %v3414_v35 = vsel %vm7199_vm9, %v3409_v59, %v3413_v47  ;;  %v6009_v52 = vcombine.low %v3763_v20, %v3766_v41  ;;  %v8428_v48 = vadd.f32 %v6494_v25, %v8217_v36  ;;  %v3641_v44 = vld [vmem:[#allocation2 + $0x80] sm:$0x1]  ;;  %v3425_v33 = vshll.u32 %v3137_v54, 16  ;;  %v3644_v60 = vld [vmem:[#allocation2 + $0x8c] sm:$0x1] }
 0x184   : > { %6861 = vmatmul.mubr.bf16.gmra.mrb[120].mxu0 %v6007_v58  ;;  %v3416_v58 = vshrl.u32 %v3136_v7, 16  ;;  %v5980_v30 = vcombine.low %v3404_v15, %v3414_v35  ;;  %v8433_v55 = vadd.f32 %v6497_v46, %v8221_v14  ;;  %v3429_v47 = vshrl.u32 %v3137_v54, 16  ;;  %v8435_v36 = vpop.f32.mrb[34].mxu1 }
 0x185   : > { %8943 = vst [vmem:[#allocation16_spill] sm:$0xff] %v8428_v48  ;;  %6864 = vmatprep.mubr.bf16.mxu0 %v6008_v49  ;;  %v3435_v20 = vshll.u32 %v3138_v56, 16  ;;  %v5994_v59 = vrot.slane %v3639_v32, 9  ;;  %v3421_v25 = vrot.slane %v3419_v12, 5  ;;  %v3427_v41 = vrot.slane %v3425_v33, 5  ;;  %v8437_v15 = vpop.f32.mrb[35].mxu1 }
 0x186   : > { %v3418_v8 = vrot.slane %v3416_v58, 4  ;;  %5218 = vmatprep.mubr.bf16.mxu1 %v5980_v30  ;;  %v3769_v48 = vrot.slane %v3640_v6, 5  ;;  %v3772_v9 = vrot.slane %v3641_v44, 5  ;;  %v3431_v14 = vrot.slane %v3429_v47, 4  ;;  %v3140_v6 = vld [vmem:[#allocation2 + $0xac] sm:$0xf] }
 0x187   : > { %5219 = vmatmul.mubr.bf16.gmra.mrb[120].mxu1 %v7023_v24  ;;  %v3437_v49 = vrot.slane %v3435_v20, 5  ;;  %v5995_v7 = vrot.slane %v3642_v13, 9  ;;  %v3776_v46 = vrot.slane %v3643_v4, 5  ;;  %v3779_v32 = vrot.slane %v3644_v60, 5  ;;  %v3139_v24 = vld [vmem:[#allocation2 + $0xa8] sm:$0xf] }
 0x188   : > { %v3422_v35 = vor.u32 %v3421_v25, %v3418_v8  ;;  %v3770_v54 = vsel %vm7454_vm14, %v5994_v59, %v3769_v48  ;;  %v3771_v56 = vrot.slane %v3769_v48, 4  ;;  %v3432_v58 = vor.u32 %v3431_v14, %v3427_v41  ;;  %v3141_v60 = vld [vmem:[#allocation2 + $0xb0] sm:$0x1]  ;;  %v3645_v8 = vld [vmem:[#allocation2 + $0x90] sm:$0xe] }
 0x189   : > { %v3777_v30 = vsel %vm7454_vm14, %v5995_v7, %v3776_v46  ;;  %v3778_v12 = vrot.slane %v3776_v46, 4  ;;  %v8445_v44 = vadd.f32 %v8292_v40, %v8272_v29  ;;  %v8451_v48 = vadd.f32 %v8299_v3, %v8295_v45  ;;  %v3647_v59 = vld [vmem:[#allocation2 + $0x98] sm:$0x1]  ;;  %v3648_v25 = vld [vmem:[#allocation2 + $0x9c] sm:$0xe] }
 0x18a   : > { %v3423_v13 = vrot.slane %v3422_v35, 4  ;;  %v3773_v33 = vsel %vm7454_vm14, %v3771_v56, %v3772_v9  ;;  %v6500_v4 = vadd.f32 %v8311_v22, %v8301_v39  ;;  %v3433_v47 = vrot.slane %v3432_v58, 4  ;;  %v3649_v14 = vld [vmem:[#allocation2 + $0xa0] sm:$0xf] }
 0x18b   : > { %v6010_v20 = vcombine.low %v3770_v54, %v3773_v33  ;;  %v3780_v29 = vsel %vm7454_vm14, %v3778_v12, %v3779_v32  ;;  %v6503_v40 = vadd.f32 %v8329_v1, %v8319_v31  ;;  %v8459_v9 = vpop.f32.mrb[32].mxu0  ;;  %v3440_v22 = vshrl.u32 %v3139_v24, 16  ;;  %v7024_v31 = vld [vmem:[#allocation2 + $0x9c] sm:$0xff]  }
 0x18c   : > { %6865 = vmatmul.mubr.bf16.gmra.mrb[124].mxu0 %v6009_v52  ;;  %v3646_v52 = vld [vmem:[#allocation2 + $0x94] sm:$0xf]  ;;  %v3428_v45 = vsel %vm7199_vm9, %v3423_v13, %v3427_v41  ;;  %v6011_v3 = vcombine.low %v3777_v30, %v3780_v29  ;;  %v8464_v39 = vadd.f32 %v6500_v4, %v8250_v50  ;;  %v8466_v7 = vpop.f32.mrb[33].mxu0  ;;  %v3438_v46 = vsel %vm7199_vm9, %v3433_v47, %v3437_v49  ;;  %v3650_v41 = vld [vmem:[#allocation2 + $0xa4] sm:$0x1] }
 0x18d   : > { %6868 = vmatprep.mubr.bf16.mxu0 %v6010_v20  ;;  %v8471_v1 = vadd.f32 %v6503_v40, %v8280_v0  ;;  %v3443_v35 = vshll.u32 %v3139_v24, 16  ;;  %v3449_v54 = vshll.u32 %v3140_v6, 16  ;;  %v8473_v56 = vpop.f32.mrb[34].mxu0  ;;  %v5981_v50 = vcombine.low %v3428_v45, %v3438_v46  ;;  %v8477_v13 = vpop.f32.mrb[36].mxu1 }
 0x18e   : > { %v3442_v32 = vrot.slane %v3440_v22, 4  ;;  %v3453_v58 = vshrl.u32 %v3140_v6, 16  ;;  %v3459_v30 = vshll.u32 %v3141_v60, 16  ;;  %v8475_v12 = vpop.f32.mrb[35].mxu0  ;;  %v5996_v4 = vrot.slane %v3645_v8, 9  ;;  %v8479_v20 = vpop.f32.mrb[37].mxu1 }
 0x18f   : > { %8944 = vst [vmem:[#allocation17_spill] sm:$0xff] %v8471_v1  ;;  %v3445_v33 = vrot.slane %v3443_v35, 5  ;;  %v3451_v49 = vrot.slane %v3449_v54, 5  ;;  %v3783_v47 = vrot.slane %v3646_v52, 5  ;;  %5226 = vmatprep.mubr.bf16.mxu1 %v5981_v50  ;;  %v3786_v29 = vrot.slane %v3647_v59, 5  ;;  %v8481_v1 = vpop.f32.mrb[38].mxu1 }
 0x190   : > { %v3455_v0 = vrot.slane %v3453_v58, 4  ;;  %v3461_v24 = vrot.slane %v3459_v30, 5  ;;  %v5997_v40 = vrot.slane %v3648_v25, 9  ;;  %5227 = vmatmul.mubr.bf16.gmra.mrb[124].mxu1 %v7024_v31  ;;  %v3790_v22 = vrot.slane %v3649_v14, 5  ;;  %v8485_v46 = vpop.f32.mrb[39].mxu1 }
 0x191   : > { %v3446_v6 = vor.u32 %v3445_v33, %v3442_v32  ;;  %v3784_v60 = vsel %vm7454_vm14, %v5996_v4, %v3783_v47  ;;  %v3785_v45 = vrot.slane %v3783_v47, 4  ;;  %v3793_v52 = vrot.slane %v3650_v41, 5  ;;  %v3142_v25 = vld [vmem:[#allocation2 + $0xb4] sm:$0xf]  ;;  %v3143_v31 = vld [vmem:[#allocation2 + $0xb8] sm:$0xf] }
 0x192   : > { %v3456_v8 = vor.u32 %v3455_v0, %v3451_v49  ;;  %v8489_v35 = vadd.f32 %v8340_v43, %v8338_v63  ;;  %v8493_v59 = vadd.f32 %v8358_v37, %v8346_v53  ;;  %v3791_v14 = vsel %vm7454_vm14, %v5997_v40, %v3790_v22  ;;  %v3144_v32 = vld [vmem:[#allocation2 + $0xbc] sm:$0x1]  ;;  %v3651_v41 = vld [vmem:[#allocation2 + $0xa8] sm:$0xe]  ;;  %v3652_v53 = vld [vmem:[#allocation2 + $0xac] sm:$0xf] }
 0x193   : > { %v3447_v54 = vrot.slane %v3446_v6, 4  ;;  %v3787_v50 = vsel %vm7454_vm14, %v3785_v45, %v3786_v29  ;;  %v6506_v63 = vadd.f32 %v8348_v23, %v8342_v21  ;;  %v6509_v43 = vadd.f32 %v8368_v19, %v8360_v11  ;;  %v3653_v37 = vld [vmem:[#allocation2 + $0xb0] sm:$0x1]  ;;  %v7025_v4 = vld [vmem:[#allocation2 + $0xa8] sm:$0xff]   ;;  %v3654_v40 = vld [vmem:[#allocation2 + $0xb4] sm:$0xe] }
 0x194   : > { %6869 = vmatmul.mubr.bf16.gmra.mrb[128].mxu0 %v6011_v3  ;;  %v3792_v3 = vrot.slane %v3790_v22, 4  ;;  %v3457_v58 = vrot.slane %v3456_v8, 4  ;;  %v6012_v30 = vcombine.low %v3784_v60, %v3787_v50  ;;  %v3464_v0 = vshrl.u32 %v3142_v25, 16  ;;  %v3656_v60 = vld [vmem:[#allocation2 + $0xbc] sm:$0x1] }
 0x195   : > { %v3452_v33 = vsel %vm7199_vm9, %v3447_v54, %v3451_v49  ;;  %v3467_v29 = vshll.u32 %v3142_v25, 16  ;;  %v8507_v6 = vpop.f32.mrb[36].mxu0  ;;  %v8512_v11 = vadd.f32 %v6506_v63, %v8305_v28  ;;  %v8515_v19 = vadd.f32 %v6509_v43, %v8309_v18  ;;  %v3655_v49 = vld [vmem:[#allocation2 + $0xb8] sm:$0xf]  ;;  %v8519_v22 = vpop.f32.mrb[40].mxu1 }
 0x196   : > { %v3794_v47 = vsel %vm7454_vm14, %v3792_v3, %v3793_v52  ;;  %v3462_v21 = vsel %vm7199_vm9, %v3457_v58, %v3461_v24  ;;  %6872 = vmatprep.mubr.bf16.mxu0 %v6012_v30  ;;  %v8517_v45 = vpop.f32.mrb[37].mxu0  ;;  %v3466_v52 = vrot.slane %v3464_v0, 4  ;;  %v3473_v54 = vshll.u32 %v3143_v31, 16  ;;  %v8523_v24 = vpop.f32.mrb[41].mxu1 }
 0x197   : > { %v6013_v23 = vcombine.low %v3791_v14, %v3794_v47  ;;  %8945 = vst [vmem:[#allocation18_spill] sm:$0xff] %v8515_v19  ;;  %v5982_v8 = vcombine.low %v3452_v33, %v3462_v21  ;;  %v3469_v25 = vrot.slane %v3467_v29, 5  ;;  %v8521_v50 = vpop.f32.mrb[38].mxu0  ;;  %v3477_v14 = vshrl.u32 %v3143_v31, 16  ;;  %v8527_v30 = vpop.f32.mrb[42].mxu1 }
 0x198   : > { %v3483_v28 = vshll.u32 %v3144_v32, 16  ;;  %v5998_v3 = vrot.slane %v3651_v41, 9  ;;  %v3797_v58 = vrot.slane %v3652_v53, 5  ;;  %v8525_v18 = vpop.f32.mrb[39].mxu0  ;;  %v3475_v43 = vrot.slane %v3473_v54, 5  ;;  %v8529_v0 = vpop.f32.mrb[43].mxu1 }
 0x199   : > { %5234 = vmatprep.mubr.bf16.mxu1 %v5982_v8  ;;  %v3470_v63 = vor.u32 %v3469_v25, %v3466_v52  ;;  %v3800_v47 = vrot.slane %v3653_v37, 5  ;;  %v5999_v33 = vrot.slane %v3654_v40, 9  ;;  %v3479_v29 = vrot.slane %v3477_v14, 4  ;;  %v3145_v52 = vld [vmem:[#allocation2 + $0xc0] sm:$0xf] }
 0x19a   : > { %5235 = vmatmul.mubr.bf16.gmra.mrb[128].mxu1 %v7025_v4  ;;  %v3485_v21 = vrot.slane %v3483_v28, 5  ;;  %v3798_v31 = vsel %vm7454_vm14, %v5998_v3, %v3797_v58  ;;  %v3799_v32 = vrot.slane %v3797_v58, 4  ;;  %v3804_v53 = vrot.slane %v3655_v49, 5  ;;  %v3146_v25 = vld [vmem:[#allocation2 + $0xc4] sm:$0xf] }
 0x19b   : > { %v3471_v41 = vrot.slane %v3470_v63, 4  ;;  %v3807_v19 = vrot.slane %v3656_v60, 5  ;;  %v8535_v8 = vadd.f32 %v8389_v61, %v8385_v10  ;;  %v3480_v37 = vor.u32 %v3479_v29, %v3475_v43  ;;  %v3147_v54 = vld [vmem:[#allocation2 + $0xc8] sm:$0x1]  ;;  %v3657_v3 = vld [vmem:[#allocation2 + $0xc0] sm:$0xe] }
 0x19c   : > { %6873 = vmatmul.mubr.bf16.gmra.mrb[132].mxu0 %v6013_v23  ;;  %v3801_v40 = vsel %vm7454_vm14, %v3799_v32, %v3800_v47  ;;  %v8541_v4 = vadd.f32 %v8405_v42, %v8395_v26  ;;  %v6512_v23 = vadd.f32 %v8391_v57, %v8387_v38  ;;  %v3805_v10 = vsel %vm7454_vm14, %v5999_v33, %v3804_v53  ;;  %v3658_v38 = vld [vmem:[#allocation2 + $0xc4] sm:$0xf]  ;;  %v3659_v47 = vld [vmem:[#allocation2 + $0xc8] sm:$0x1]  ;;  %v7026_v29 = vld [vmem:[#allocation2 + $0xb4] sm:$0xff]  }
 0x19d   : > { %v3476_v49 = vsel %vm7199_vm9, %v3471_v41, %v3475_v43  ;;  %v6014_v60 = vcombine.low %v3798_v31, %v3801_v40  ;;  %v3806_v61 = vrot.slane %v3804_v53, 4  ;;  %v3481_v14 = vrot.slane %v3480_v37, 4  ;;  %v3660_v32 = vld [vmem:[#allocation2 + $0xcc] sm:$0xe] }
 0x19e   : > { %v8550_v28 = vadd.f32 %v6512_v23, %v8352_v51  ;;  %v6515_v26 = vadd.f32 %v8407_v17, %v8397_v34  ;;  %v3488_v42 = vshrl.u32 %v3145_v52, 16  ;;  %v3491_v58 = vshll.u32 %v3145_v52, 16  ;;  %v354_v17 = vld [vmem:[#allocation2 + $0xd4] sm:$0x1] }
 0x19f   : > { %6876 = vmatprep.mubr.bf16.mxu0 %v6014_v60  ;;  %v3808_v57 = vsel %vm7454_vm14, %v3806_v61, %v3807_v19  ;;  %v3497_v63 = vshll.u32 %v3146_v25, 16  ;;  %v3501_v43 = vshrl.u32 %v3146_v25, 16  ;;  %v3486_v33 = vsel %vm7199_vm9, %v3481_v14, %v3485_v21  ;;  %v3661_v19 = vld [vmem:[#allocation2 + $0xd0] sm:$0xf]  ;;  %v298_v25 = vld [vmem:[#allocation2 + $0xcc] sm:$0x1] }
 0x1a0   : > { %v6015_v51 = vcombine.low %v3805_v10, %v3808_v57  ;;  %v8559_v31 = vadd.f32 %v6515_v26, %v8356_v27  ;;  %v3490_v34 = vrot.slane %v3488_v42, 4  ;;  %v5983_v41 = vcombine.low %v3476_v49, %v3486_v33  ;;  %v3149_v26 = vld [vmem:[#allocation2 + $0xd0] sm:$0xf] }
 0x1a1   : > { %v3493_v53 = vrot.slane %v3491_v58, 5  ;;  %v3499_v37 = vrot.slane %v3497_v63, 5  ;;  %v3503_v40 = vrot.slane %v3501_v43, 4  ;;  %v3507_v52 = vshll.u32 %v3147_v54, 16  ;;  %v6534_v60 = vpop.f32.mrb[44].mxu1 }
 0x1a2   : > { %v8563_v23 = vadd.f32 %v8466_v7, %v8459_v9  ;;  %v8567_v21 = vadd.f32 %v8475_v12, %v8473_v56  ;;  %v6000_v27 = vrot.slane %v3657_v3, 9  ;;  %5242 = vmatprep.mubr.bf16.mxu1 %v5983_v41  ;;  %v3811_v61 = vrot.slane %v3658_v38, 5  ;;  %v6535_v57 = vpop.f32.mrb[45].mxu1 }
 0x1a3   : > { %v3494_v10 = vor.u32 %v3493_v53, %v3490_v34  ;;  %v3504_v49 = vor.u32 %v3503_v40, %v3499_v37  ;;  %v3814_v14 = vrot.slane %v3659_v47, 5  ;;  %v6440_v42 = vpop.f32.mrb[40].mxu0  ;;  %5243 = vmatmul.mubr.bf16.gmra.mrb[132].mxu1 %v7026_v29  ;;  %v3509_v54 = vrot.slane %v3507_v52, 5  ;;  %v6537_v58 = vpop.f32.mrb[46].mxu1  ;;  %v8947_v29 = vld [vmem:[#allocation15_spill] sm:$0xff] }
 0x1a4   : > { %6877 = vmatmul.mubr.bf16.gmra.mrb[136].mxu0 %v6015_v51  ;;  %v6518_v9 = vadd.f32 %v8430_v16, %v8417_v5  ;;  %v355_v56 = vsel %vm7142_vm4, 0, %v354_v17  ;;  %v6001_v12 = vrot.slane %v3660_v32, 9  ;;  %v6441_v3 = vpop.f32.mrb[41].mxu0  ;;  %v3812_v38 = vsel %vm7454_vm14, %v6000_v27, %v3811_v61  ;;  %v6538_v51 = vpop.f32.mrb[47].mxu1 }
 0x1a5   : > { %v3495_v63 = vrot.slane %v3494_v10, 4  ;;  %v3505_v43 = vrot.slane %v3504_v49, 4  ;;  %v3813_v47 = vrot.slane %v3811_v61, 4  ;;  %356 = vst [vmem:[#allocation2 + $0xd4] sm:$0x1] %v355_v56  ;;  %v6443_v33 = vpop.f32.mrb[42].mxu0  ;;  %v6521_v5 = vadd.f32 %v8437_v15, %v8435_v36 }
 0x1a6   : > { %v8576_v34 = vadd.f32 %v6518_v9, %v8947_v29  ;;  %v3818_v41 = vrot.slane %v3661_v19, 5  ;;  %v299_v17 = vsel %vm7131_vm3, 0, %v298_v25  ;;  %v6444_v32 = vpop.f32.mrb[43].mxu0  ;;  %v3521_v27 = vshll.u32 %v3149_v26, 16  ;;  %v7027_v19 = vld [vmem:[#allocation2 + $0xc0] sm:$0xff]   ;;  %v8949_v15 = vld [vmem:[#allocation6_spill] sm:$0xff] }
 0x1a7   : > { %v3500_v53 = vsel %vm7199_vm9, %v3495_v63, %v3499_v37  ;;  %v3510_v40 = vsel %vm7199_vm9, %v3505_v43, %v3509_v54  ;;  %v3815_v52 = vsel %vm7454_vm14, %v3813_v47, %v3814_v14  ;;  %300 = vst [vmem:[#allocation2 + $0xcc] sm:$0x1] %v299_v17  ;;  %v8591_v25 = vadd.f32 %v6521_v5, %v8949_v15 }
 0x1a8   : > { %v5984_v10 = vcombine.low %v3500_v53, %v3510_v40  ;;  %v6016_v49 = vcombine.low %v3812_v38, %v3815_v52  ;;  %v3819_v36 = vsel %vm7454_vm14, %v6001_v12, %v3818_v41  ;;  %v8593_v61 = vrot.slane %v3521_v27, 5 }
 0x1a9   : > { %v3525_v37 = vshrl.u32 %v3149_v26, 16  ;;  %v8597_v54 = vadd.f32 %v8517_v45, %v8507_v6  ;;  %v3820_v14 = vrot.slane %v3818_v41, 4  ;;  %v8601_v9 = vadd.f32 %v8525_v18, %v8521_v50 }
 0x1aa   : > { %5250 = vmatprep.mubr.bf16.mxu1 %v5984_v10  ;;  %6880 = vmatprep.mubr.bf16.mxu0 %v6016_v49  ;;  %v6524_v7 = vadd.f32 %v8479_v20, %v8477_v13  ;;  %v6527_v56 = vadd.f32 %v8485_v46, %v8481_v1  ;;  %v8607_v63 = vadd.f32 %v6441_v3, %v6440_v42 }
 0x1ab   : > { %v3527_v12 = vrot.slane %v3525_v37, 4  ;;  %v8609_v26 = vadd.f32 %v6444_v32, %v6443_v33  ;;  %v6530_v6 = vadd.f32 %v8523_v24, %v8519_v22  ;;  %5251 = vmatmul.mubr.bf16.gmra.mrb[136].mxu1 %v7027_v19  ;;  %v6533_v1 = vadd.f32 %v8529_v0, %v8527_v30 }
 0x1ac   : > { %v3662_v45 = vld [vmem:[#allocation2 + $0xd4] sm:$0x1]  ;;  %v8614_v50 = vadd.f32 %v6524_v7, %v8445_v44  ;;  %v8617_v18 = vadd.f32 %v6527_v56, %v8451_v48  ;;  %v6536_v13 = vadd.f32 %v6535_v57, %v6534_v60  ;;  %v6540_v22 = vpop.f32.mrb[48].mxu1  ;;  %v6539_v47 = vadd.f32 %v6538_v51, %v6537_v58 }
 0x1ad   : > { %v3150_v43 = vld [vmem:[#allocation2 + $0xd4] sm:$0x1]  ;;  %v3821_v20 = vrot.slane %v3662_v45, 5  ;;  %v3528_v46 = vor.u32 %v3527_v12, %v8593_v61  ;;  %v8623_v3 = vadd.f32 %v6530_v6, %v8489_v35  ;;  %v8626_v38 = vadd.f32 %v6533_v1, %v8493_v59  ;;  %v6541_v33 = vpop.f32.mrb[49].mxu1 }
 0x1ae   : > { %v3531_v42 = vshll.u32 %v3150_v43, 16  ;;  %v3148_v24 = vld [vmem:[#allocation2 + $0xcc] sm:$0xf]  ;;  %v6446_v44 = vpop.f32.mrb[44].mxu0  ;;  %v8629_v48 = vadd.f32 %v6536_v13, %v8535_v8  ;;  %v8636_v59 = vadd.f32 %v6539_v47, %v8541_v4  ;;  %v6543_v16 = vpop.f32.mrb[50].mxu1  ;;  %v6542_v51 = vadd.f32 %v6541_v33, %v6540_v22 }
 0x1af   : > { %v3822_v30 = vsel %vm7454_vm14, %v3820_v14, %v3821_v20  ;;  %v3512_v0 = vshrl.u32 %v3148_v24, 16  ;;  %v3515_v60 = vshll.u32 %v3148_v24, 16  ;;  %v6447_v57 = vpop.f32.mrb[45].mxu0  ;;  %v3529_v35 = vrot.slane %v3528_v46, 4  ;;  %v6544_v62 = vpop.f32.mrb[51].mxu1  ;;  %v7028_v14 = vld [vmem:[#allocation2 + $0xcc] sm:$0xff]  }
 0x1b0   : > { %v6017_v29 = vcombine.low %v3819_v36, %v3822_v30  ;;  %v8633_v41 = vadd.f32 %v6447_v57, %v6446_v44  ;;  %v6449_v5 = vpop.f32.mrb[46].mxu0  ;;  %v3533_v32 = vrot.slane %v3531_v42, 5  ;;  %v6545_v40 = vadd.f32 %v6544_v62, %v6543_v16  ;;  %v8950_v20 = vld [vmem:[#allocation16_spill] sm:$0xff]  ;;  %v8951_v16 = vld [vmem:[#allocation17_spill] sm:$0xff] }
 0x1b1   : > { %v3514_v17 = vrot.slane %v3512_v0, 4  ;;  %v3517_v8 = vrot.slane %v3515_v60, 5  ;;  %v6450_v58 = vpop.f32.mrb[47].mxu0  ;;  %v8639_v27 = vadd.f32 %v6542_v51, %v8563_v23 }
 0x1b2   : > { %6881 = vmatmul.mubr.bf16.gmra.mrb[140].mxu0 %v6017_v29  ;;  %v6451_v53 = vadd.f32 %v6450_v58, %v6449_v5  ;;  %v8642_v10 = vadd.f32 %v6545_v40, %v8567_v21  ;;  %v3534_v4 = vsel %vm7199_vm9, %v3529_v35, %v3533_v32 }
 0x1b3   : > { %v3518_v52 = vor.u32 %v3517_v8, %v3514_v17 }
 0x1b4   : > { %v6546_v49 = vpop.f32.mrb[52].mxu1 }
 0x1b5   : > { %v3519_v19 = vrot.slane %v3518_v52, 4  ;;  %v6547_v15 = vpop.f32.mrb[53].mxu1 }
 0x1b6   : > { %v6604_v36 = vpop.f32.mrb[48].mxu0  ;;  %v6548_v56 = vadd.f32 %v6547_v15, %v6546_v49  ;;  %v6549_v12 = vpop.f32.mrb[54].mxu1 }
 0x1b7   : > { %v3524_v37 = vsel %vm7199_vm9, %v3519_v19, %v8593_v61  ;;  %v6605_v7 = vpop.f32.mrb[49].mxu0  ;;  %v6550_v21 = vpop.f32.mrb[55].mxu1 }
 0x1b8   : > { %v5985_v23 = vcombine.low %v3524_v37, %v3534_v4  ;;  %v6606_v6 = vadd.f32 %v6605_v7, %v6604_v36  ;;  %v6607_v45 = vpop.f32.mrb[50].mxu0  ;;  %v8650_v1 = vadd.f32 %v6548_v56, %v8597_v54  ;;  %v6551_v13 = vadd.f32 %v6550_v21, %v6549_v12  ;;  %v8952_v37 = vld [vmem:[#allocation18_spill] sm:$0xff] }
 0x1b9   : > { %v6608_v43 = vpop.f32.mrb[51].mxu0 }
 0x1ba   : > { %5258 = vmatprep.mubr.bf16.mxu1 %v5985_v23  ;;  %v8653_v46 = vadd.f32 %v6606_v6, %v8950_v20  ;;  %v6609_v42 = vadd.f32 %v6608_v43, %v6607_v45  ;;  %v8656_v2 = vadd.f32 %v6551_v13, %v8601_v9  ;;  %v8953_v20 = vld [vmem:[#allocation7_spill] sm:$0xff] }
 0x1bb   : > { %5259 = vmatmul.mubr.bf16.gmra.mrb[140].mxu1 %v7028_v14 }
 0x1bc   : > { %v8659_v61 = vadd.f32 %v6609_v42, %v8433_v55  ;;  %v6552_v22 = vpop.f32.mrb[56].mxu1 }
 0x1bd   : > { %v6553_v44 = vpop.f32.mrb[57].mxu1 }
 0x1be   : > { %v6610_v24 = vpop.f32.mrb[52].mxu0  ;;  %v6554_v30 = vadd.f32 %v6553_v44, %v6552_v22  ;;  %v6555_v54 = vpop.f32.mrb[58].mxu1 }
 0x1bf   : > { %v6611_v47 = vpop.f32.mrb[53].mxu0  ;;  %v6556_v57 = vpop.f32.mrb[59].mxu1 }
 0x1c0   : > { %v6612_v0 = vadd.f32 %v6611_v47, %v6610_v24  ;;  %v6613_v60 = vpop.f32.mrb[54].mxu0  ;;  %v8662_v29 = vadd.f32 %v6554_v30, %v8607_v63  ;;  %v6557_v35 = vadd.f32 %v6556_v57, %v6555_v54  ;;  %v8954_v24 = vld [vmem:[#allocation8_spill] sm:$0xff] }
 0x1c1   : > { %v6614_v33 = vpop.f32.mrb[55].mxu0 }
 0x1c2   : > { %v8665_v9 = vadd.f32 %v6612_v0, %v8464_v39  ;;  %v6615_v5 = vadd.f32 %v6614_v33, %v6613_v60  ;;  %v8668_v55 = vadd.f32 %v6557_v35, %v8609_v26 }
 0x1c4   : > { %v8671_v17 = vadd.f32 %v6615_v5, %v8951_v16  ;;  %v6558_v8 = vpop.f32.mrb[60].mxu1 }
 0x1c5   : > { %v6559_v58 = vpop.f32.mrb[61].mxu1 }
 0x1c6   : > { %v6616_v32 = vpop.f32.mrb[56].mxu0  ;;  %v6560_v62 = vadd.f32 %v6559_v58, %v6558_v8  ;;  %v6561_v40 = vpop.f32.mrb[62].mxu1 }
 0x1c7   : > { %v6617_v51 = vpop.f32.mrb[57].mxu0  ;;  %v6562_v19 = vpop.f32.mrb[63].mxu1 }
 0x1c8   : > { %v6618_v52 = vadd.f32 %v6617_v51, %v6616_v32  ;;  %v6619_v63 = vpop.f32.mrb[58].mxu0  ;;  %v8674_v39 = vadd.f32 %v6560_v62, %v8633_v41  ;;  %v6563_v49 = vadd.f32 %v6562_v19, %v6561_v40  ;;  %v8955_v32 = vld [vmem:[#allocation9_spill] sm:$0xff] }
 0x1c9   : > { %v6620_v4 = vpop.f32.mrb[59].mxu0 }
 0x1ca   : > { %v8677_v26 = vadd.f32 %v6618_v52, %v8512_v11  ;;  %v6621_v36 = vadd.f32 %v6620_v4, %v6619_v63  ;;  %v8679_v15 = vadd.f32 %v6563_v49, %v6451_v53 }
 0x1cc   : > { %v8682_v14 = vadd.f32 %v6621_v36, %v8952_v37  ;;  %v6564_v7 = vpop.f32.mrb[64].mxu1 }
 0x1cd   : > { %v6565_v12 = vpop.f32.mrb[65].mxu1 }
 0x1ce   : > { %v6622_v56 = vpop.f32.mrb[60].mxu0  ;;  %v6566_v6 = vadd.f32 %v6565_v12, %v6564_v7  ;;  %v6567_v45 = vpop.f32.mrb[66].mxu1 }
 0x1cf   : > { %v6623_v23 = vpop.f32.mrb[61].mxu0  ;;  %v6568_v41 = vpop.f32.mrb[67].mxu1 }
 0x1d0   : > { %v6624_v21 = vadd.f32 %v6623_v23, %v6622_v56  ;;  %v6625_v43 = vpop.f32.mrb[62].mxu0  ;;  %v8685_v42 = vadd.f32 %v6566_v6, %v8953_v20  ;;  %v6569_v11 = vadd.f32 %v6568_v41, %v6567_v45  ;;  %v8957_v6 = vld [vmem:[#allocation11_spill] sm:$0xff] }
 0x1d1   : > { %v6626_v13 = vpop.f32.mrb[63].mxu0 }
 0x1d2   : > { %v8688_v53 = vadd.f32 %v6624_v21, %v8550_v28  ;;  %v6627_v22 = vadd.f32 %v6626_v13, %v6625_v43  ;;  %v8691_v44 = vadd.f32 %v6569_v11, %v8954_v24 }
 0x1d4   : > { %v8694_v47 = vadd.f32 %v6627_v22, %v8559_v31  ;;  %v6570_v30 = vpop.f32.mrb[68].mxu1  ;;  %v8956_v31 = vld [vmem:[#allocation10_spill] sm:$0xff] }
 0x1d5   : > { %v6571_v0 = vpop.f32.mrb[69].mxu1 }
 0x1d6   : > { %v6628_v54 = vpop.f32.mrb[64].mxu0  ;;  %v6572_v57 = vadd.f32 %v6571_v0, %v6570_v30  ;;  %v6573_v33 = vpop.f32.mrb[70].mxu1 }
 0x1d7   : > { %v6629_v60 = vpop.f32.mrb[65].mxu0  ;;  %v6574_v16 = vpop.f32.mrb[71].mxu1 }
 0x1d8   : > { %v6630_v35 = vadd.f32 %v6629_v60, %v6628_v54  ;;  %v6631_v5 = vpop.f32.mrb[66].mxu0  ;;  %v8697_v28 = vadd.f32 %v6572_v57, %v8955_v32  ;;  %v6575_v58 = vadd.f32 %v6574_v16, %v6573_v33 }
 0x1d9   : > { %v6632_v8 = vpop.f32.mrb[67].mxu0 }
 0x1da   : > { %v8700_v51 = vadd.f32 %v6630_v35, %v8576_v34  ;;  %v6633_v62 = vadd.f32 %v6632_v8, %v6631_v5  ;;  %v8703_v40 = vadd.f32 %v6575_v58, %v8956_v31 }
 0x1dc   : > { %v8706_v52 = vadd.f32 %v6633_v62, %v8591_v25  ;;  %v6576_v63 = vpop.f32.mrb[72].mxu1  ;;  %v8958_v25 = vld [vmem:[#allocation12_spill] sm:$0xff] }
 0x1dd   : > { %v6577_v4 = vpop.f32.mrb[73].mxu1 }
 0x1de   : > { %v6634_v19 = vpop.f32.mrb[68].mxu0  ;;  %v6578_v36 = vadd.f32 %v6577_v4, %v6576_v63  ;;  %v6579_v37 = vpop.f32.mrb[74].mxu1 }
 0x1df   : > { %v6635_v49 = vpop.f32.mrb[69].mxu0  ;;  %v6580_v12 = vpop.f32.mrb[75].mxu1 }
 0x1e0   : > { %v6636_v7 = vadd.f32 %v6635_v49, %v6634_v19  ;;  %v6637_v56 = vpop.f32.mrb[70].mxu0  ;;  %v8709_v34 = vadd.f32 %v6578_v36, %v8957_v6  ;;  %v6581_v45 = vadd.f32 %v6580_v12, %v6579_v37  ;;  %v8960_v12 = vld [vmem:[#allocation14_spill] sm:$0xff] }
 0x1e1   : > { %v6638_v23 = vpop.f32.mrb[71].mxu0 }
 0x1e2   : > { %v8712_v21 = vadd.f32 %v6636_v7, %v8614_v50  ;;  %v6639_v43 = vadd.f32 %v6638_v23, %v6637_v56  ;;  %v8715_v41 = vadd.f32 %v6581_v45, %v8958_v25 }
 0x1e4   : > { %v8718_v13 = vadd.f32 %v6639_v43, %v8617_v18 }
 0x1e6   : > { %v6640_v20 = vpop.f32.mrb[72].mxu0 }
 0x1e7   : > { %v6641_v11 = vpop.f32.mrb[73].mxu0 }
 0x1e8   : > { %v6642_v22 = vadd.f32 %v6641_v11, %v6640_v20  ;;  %v6643_v24 = vpop.f32.mrb[74].mxu0 }
 0x1e9   : > { %v6644_v30 = vpop.f32.mrb[75].mxu0 }
 0x1ea   : > { %v8721_v54 = vadd.f32 %v6642_v22, %v8623_v3  ;;  %v6645_v0 = vadd.f32 %v6644_v30, %v6643_v24 }
 0x1ec   : > { %v8724_v60 = vadd.f32 %v6645_v0, %v8626_v38 }
 0x1ee   : > { %v6646_v50 = vpop.f32.mrb[76].mxu0 }
 0x1ef   : > { %v6647_v57 = vpop.f32.mrb[77].mxu0 }
 0x1f0   : > { %v6648_v33 = vadd.f32 %v6647_v57, %v6646_v50  ;;  %v6649_v35 = vpop.f32.mrb[78].mxu0 }
 0x1f1   : > { %v6650_v5 = vpop.f32.mrb[79].mxu0 }
 0x1f2   : > { %v8727_v18 = vadd.f32 %v6648_v33, %v8629_v48  ;;  %v6651_v16 = vadd.f32 %v6650_v5, %v6649_v35  ;;  %v8959_v48 = vld [vmem:[#allocation13_spill] sm:$0xff] }
 0x1f4   : > { %v8730_v8 = vadd.f32 %v6651_v16, %v8636_v59 }
 0x1f5   : > { %v6582_v58 = vpop.f32.mrb[76].mxu1 }
 0x1f6   : > { %v6652_v32 = vpop.f32.mrb[80].mxu0  ;;  %v6583_v62 = vpop.f32.mrb[77].mxu1 }
 0x1f7   : > { %v6653_v3 = vpop.f32.mrb[81].mxu0  ;;  %v6584_v38 = vadd.f32 %v6583_v62, %v6582_v58  ;;  %v6585_v19 = vpop.f32.mrb[78].mxu1 }
 0x1f8   : > { %v6654_v31 = vadd.f32 %v6653_v3, %v6652_v32  ;;  %v6655_v63 = vpop.f32.mrb[82].mxu0  ;;  %v6586_v36 = vpop.f32.mrb[79].mxu1 }
 0x1f9   : > { %v6656_v4 = vpop.f32.mrb[83].mxu0  ;;  %v8736_v7 = vadd.f32 %v6584_v38, %v8959_v48  ;;  %v6587_v56 = vadd.f32 %v6586_v36, %v6585_v19 }
 0x1fa   : > { %v8733_v49 = vadd.f32 %v6654_v31, %v8639_v27  ;;  %v6657_v37 = vadd.f32 %v6656_v4, %v6655_v63 }
 0x1fb   : > { %v8742_v23 = vadd.f32 %v6587_v56, %v8960_v12 }
 0x1fc   : > { %v8739_v59 = vadd.f32 %v6657_v37, %v8642_v10 }
 0x1fd   : > { %v6716_v45 = vpop.f32.mrb[80].mxu1 }
 0x1fe   : > { %v6658_v6 = vpop.f32.mrb[84].mxu0  ;;  %v6717_v20 = vpop.f32.mrb[81].mxu1 }
 0x1ff   : > { %v6659_v43 = vpop.f32.mrb[85].mxu0  ;;  %v6718_v27 = vadd.f32 %v6717_v20, %v6716_v45  ;;  %v6719_v22 = vpop.f32.mrb[82].mxu1 }
 0x200   : > { %v6660_v25 = vadd.f32 %v6659_v43, %v6658_v6  ;;  %v6661_v11 = vpop.f32.mrb[86].mxu0  ;;  %v6720_v50 = vpop.f32.mrb[83].mxu1 }
 0x201   : > { %v6662_v24 = vpop.f32.mrb[87].mxu0  ;;  %v6721_v57 = vadd.f32 %v6720_v50, %v6719_v22  ;;  %v8748_v10 = vadd.f32 %v6718_v27, %v8653_v46 }
 0x202   : > { %v8745_v30 = vadd.f32 %v6660_v25, %v8650_v1  ;;  %v6663_v0 = vadd.f32 %v6662_v24, %v6661_v11 }
 0x203   : > { %v8754_v35 = vadd.f32 %v6721_v57, %v8659_v61 }
 0x204   : > { %v8751_v33 = vadd.f32 %v6663_v0, %v8656_v2 }
 0x205   : > { %v6722_v16 = vpop.f32.mrb[84].mxu1 }
 0x206   : > { %v6664_v5 = vpop.f32.mrb[88].mxu0  ;;  %v6723_v3 = vpop.f32.mrb[85].mxu1 }
 0x207   : > { %v6665_v32 = vpop.f32.mrb[89].mxu0  ;;  %v6724_v1 = vadd.f32 %v6723_v3, %v6722_v16  ;;  %v6725_v31 = vpop.f32.mrb[86].mxu1 }
 0x208   : > { %v6666_v58 = vadd.f32 %v6665_v32, %v6664_v5  ;;  %v6667_v62 = vpop.f32.mrb[90].mxu0  ;;  %v6726_v19 = vpop.f32.mrb[87].mxu1 }
 0x209   : > { %v6668_v63 = vpop.f32.mrb[91].mxu0  ;;  %v6727_v4 = vadd.f32 %v6726_v19, %v6725_v31  ;;  %v8760_v2 = vadd.f32 %v6724_v1, %v8665_v9 }
 0x20a   : > { %v8757_v38 = vadd.f32 %v6666_v58, %v8662_v29  ;;  %v6669_v46 = vadd.f32 %v6668_v63, %v6667_v62 }
 0x20b   : > { %v8766_v36 = vadd.f32 %v6727_v4, %v8671_v17 }
 0x20c   : > { %v8763_v61 = vadd.f32 %v6669_v46, %v8668_v55 }
 0x20d   : > { %v6728_v48 = vpop.f32.mrb[88].mxu1 }
 0x20e   : > { %v6670_v37 = vpop.f32.mrb[92].mxu0  ;;  %v6729_v12 = vpop.f32.mrb[89].mxu1 }
 0x20f   : > { %v6671_v56 = vpop.f32.mrb[93].mxu0  ;;  %v6730_v45 = vadd.f32 %v6729_v12, %v6728_v48  ;;  %v6731_v43 = vpop.f32.mrb[90].mxu1 }
 0x210   : > { %v6672_v6 = vadd.f32 %v6671_v56, %v6670_v37  ;;  %v6673_v29 = vpop.f32.mrb[94].mxu0  ;;  %v6732_v20 = vpop.f32.mrb[91].mxu1 }
 0x211   : > { %v6674_v25 = vpop.f32.mrb[95].mxu0  ;;  %v6733_v27 = vadd.f32 %v6732_v20, %v6731_v43  ;;  %v8772_v55 = vadd.f32 %v6730_v45, %v8677_v26 }
 0x212   : > { %v8769_v11 = vadd.f32 %v6672_v6, %v8674_v39  ;;  %v6675_v9 = vadd.f32 %v6674_v25, %v6673_v29 }
 0x213   : > { %v8778_v22 = vadd.f32 %v6733_v27, %v8682_v14 }
 0x214   : > { %v8775_v17 = vadd.f32 %v6675_v9, %v8679_v15 }
 0x215   : > { %v6734_v24 = vpop.f32.mrb[92].mxu1 }
 0x216   : > { %v6735_v0 = vpop.f32.mrb[93].mxu1 }
 0x217   : > { %v6736_v57 = vadd.f32 %v6735_v0, %v6734_v24  ;;  %v6737_v5 = vpop.f32.mrb[94].mxu1 }
 0x218   : > { %v6676_v50 = vpop.f32.mrb[96].mxu0  ;;  %v6738_v32 = vpop.f32.mrb[95].mxu1 }
 0x219   : > { %v6677_v16 = vpop.f32.mrb[97].mxu0  ;;  %v6739_v3 = vadd.f32 %v6738_v32, %v6737_v5  ;;  %v8781_v62 = vadd.f32 %v6736_v57, %v8688_v53 }
 0x21a   : > { %v6678_v39 = vadd.f32 %v6677_v16, %v6676_v50  ;;  %v6679_v58 = vpop.f32.mrb[98].mxu0 }
 0x21b   : > { %v6680_v26 = vpop.f32.mrb[99].mxu0  ;;  %v8787_v14 = vadd.f32 %v6739_v3, %v8694_v47 }
 0x21c   : > { %v8784_v15 = vadd.f32 %v6678_v39, %v8685_v42  ;;  %v6681_v1 = vadd.f32 %v6680_v26, %v6679_v58 }
 0x21e   : > { %v8790_v31 = vadd.f32 %v6681_v1, %v8691_v44 }
 0x220   : > { %v6740_v63 = vpop.f32.mrb[96].mxu1 }
 0x221   : > { %v6741_v46 = vpop.f32.mrb[97].mxu1 }
 0x222   : > { %v6682_v19 = vpop.f32.mrb[100].mxu0  ;;  %v6742_v4 = vadd.f32 %v6741_v46, %v6740_v63  ;;  %v6743_v37 = vpop.f32.mrb[98].mxu1 }
 0x223   : > { %v6683_v48 = vpop.f32.mrb[101].mxu0  ;;  %v6744_v56 = vpop.f32.mrb[99].mxu1 }
 0x224   : > { %v6684_v53 = vadd.f32 %v6683_v48, %v6682_v19  ;;  %v6685_v12 = vpop.f32.mrb[102].mxu0  ;;  %v6745_v6 = vadd.f32 %v6744_v56, %v6743_v37  ;;  %v8793_v42 = vadd.f32 %v6742_v4, %v8700_v51 }
 0x225   : > { %v6686_v45 = vpop.f32.mrb[103].mxu0 }
 0x226   : > { %v8796_v47 = vadd.f32 %v6684_v53, %v8697_v28  ;;  %v6687_v29 = vadd.f32 %v6686_v45, %v6685_v12  ;;  %v8799_v44 = vadd.f32 %v6745_v6, %v8706_v52 }
 0x228   : > { %v8802_v43 = vadd.f32 %v6687_v29, %v8703_v40 }
 0x22a   : > { %v6746_v25 = vpop.f32.mrb[100].mxu1 }
 0x22b   : > { %v6747_v20 = vpop.f32.mrb[101].mxu1 }
 0x22c   : > { %v6748_v9 = vadd.f32 %v6747_v20, %v6746_v25  ;;  %v6749_v27 = vpop.f32.mrb[102].mxu1 }
 0x22d   : > { %v6688_v24 = vpop.f32.mrb[104].mxu0  ;;  %v6750_v0 = vpop.f32.mrb[103].mxu1 }
 0x22e   : > { %v6689_v50 = vpop.f32.mrb[105].mxu0  ;;  %v6751_v51 = vadd.f32 %v6750_v0, %v6749_v27  ;;  %v8805_v57 = vadd.f32 %v6748_v9, %v8712_v21 }
 0x22f   : > { %v6690_v28 = vadd.f32 %v6689_v50, %v6688_v24  ;;  %v6691_v5 = vpop.f32.mrb[106].mxu0 }
 0x230   : > { %v6692_v16 = vpop.f32.mrb[107].mxu0  ;;  %v8808_v52 = vadd.f32 %v6751_v51, %v8718_v13 }
 0x231   : > { %v8811_v40 = vadd.f32 %v6690_v28, %v8709_v34  ;;  %v6693_v32 = vadd.f32 %v6692_v16, %v6691_v5 }
 0x233   : > { %v8814_v39 = vadd.f32 %v6693_v32, %v8715_v41 }
 0x235   : > { %v6752_v58 = vpop.f32.mrb[104].mxu1 }
 0x236   : > { %v6753_v3 = vpop.f32.mrb[105].mxu1 }
 0x237   : > { %v6754_v26 = vadd.f32 %v6753_v3, %v6752_v58  ;;  %v6755_v1 = vpop.f32.mrb[106].mxu1 }
 0x238   : > { %v6756_v63 = vpop.f32.mrb[107].mxu1 }
 0x239   : > { %v6757_v21 = vadd.f32 %v6756_v63, %v6755_v1  ;;  %v8817_v46 = vadd.f32 %v6754_v26, %v8721_v54 }
 0x23b   : > { %v8820_v19 = vadd.f32 %v6757_v21, %v8724_v60 }
 0x23d   : > { %v6758_v34 = vpop.f32.mrb[108].mxu1 }
 0x23e   : > { %v6759_v56 = vpop.f32.mrb[109].mxu1 }
 0x23f   : > { %v6694_v13 = vpop.f32.mrb[108].mxu0  ;;  %v6760_v53 = vadd.f32 %v6759_v56, %v6758_v34  ;;  %v6761_v12 = vpop.f32.mrb[110].mxu1 }
 0x240   : > { %v6695_v4 = vpop.f32.mrb[109].mxu0  ;;  %v6762_v29 = vpop.f32.mrb[111].mxu1 }
 0x241   : > { %v6696_v37 = vadd.f32 %v6695_v4, %v6694_v13  ;;  %v6697_v48 = vpop.f32.mrb[110].mxu0  ;;  %v6763_v54 = vadd.f32 %v6762_v29, %v6761_v12  ;;  %v8826_v25 = vadd.f32 %v6760_v53, %v8727_v18 }
 0x242   : > { %v6698_v41 = vpop.f32.mrb[111].mxu0 }
 0x243   : > { %v8823_v6 = vadd.f32 %v6696_v37, %v8736_v7  ;;  %v6699_v45 = vadd.f32 %v6698_v41, %v6697_v48  ;;  %v8832_v20 = vadd.f32 %v6763_v54, %v8730_v8 }
 0x245   : > { %v8829_v60 = vadd.f32 %v6699_v45, %v8742_v23 }
 0x247   : > { %v6854_v9 = vpop.f32.mrb[112].mxu0 }
 0x248   : > { %v5310_v27 = vadd.f32 %v6854_v9, %v8760_v2  ;;  %v5301_v24 = vpop.f32.mrb[113].mxu0 }
 0x249   : > { %v5302_v0 = vadd.f32 %v5301_v24, %v8748_v10  ;;  %v6855_v7 = vpop.f32.mrb[114].mxu0  ;;  %v6764_v8 = vpop.f32.mrb[112].mxu1 }
 0x24a   : > { %v5313_v50 = vadd.f32 %v6855_v7, %v8766_v36  ;;  %v5304_v51 = vpop.f32.mrb[115].mxu0  ;;  %v6765_v28 = vpop.f32.mrb[113].mxu1  ;;  %v5468_v58 = vmul.f32 %v5310_v27, %v5310_v27 }
 0x24b   : > { %v5305_v18 = vadd.f32 %v5304_v51, %v8754_v35  ;;  %v5466_v23 = vmul.f32 %v5302_v0, %v5302_v0  ;;  %v6766_v32 = vadd.f32 %v6765_v28, %v6764_v8  ;;  %v6767_v36 = vpop.f32.mrb[114].mxu1 }
 0x24c   : > { %v6262_v2 = vpack.c.bf16 %v5313_v50, %v5310_v27  ;;  %v6768_v3 = vpop.f32.mrb[115].mxu1  ;;  %v5469_v35 = vmul.f32 %v5313_v50, %v5313_v50 }
 0x24d   : > { %v5428_v5 = vadd.f32 %v5305_v18, %v5302_v0  ;;  %v5467_v10 = vmul.f32 %v5305_v18, %v5305_v18  ;;  %v6257_v16 = vpack.c.bf16 %v5305_v18, %v5302_v0  ;;  %v6769_v21 = vadd.f32 %v6768_v3, %v6767_v36 }
 0x24e   : > { %6349 = vst [vmem:[%s8842_s11 + $0x8] sm:$0xff] %v6262_v2   ;;  %v8848_v13 = vadd.f32 %v6766_v32, %v8733_v49 }
 0x24f   : > { %v5429_v26 = vadd.f32 %v5428_v5, %v5310_v27  ;;  %v5498_v1 = vadd.f32 %v5467_v10, %v5466_v23  ;;  %6258 = vst [vmem:[%s8842_s11] sm:$0xff] %v6257_v16   ;;  %v6858_v63 = vpop.f32.mrb[116].mxu0  ;;  %v8853_v53 = vadd.f32 %v6769_v21, %v8739_v59 }
 0x250   : > { %v5326_v4 = vadd.f32 %v6858_v63, %v8781_v62  ;;  %v5317_v34 = vpop.f32.mrb[117].mxu0 }
 0x251   : > { %v5499_v37 = vadd.f32 %v5498_v1, %v5468_v58  ;;  %v5318_v48 = vadd.f32 %v5317_v34, %v8772_v55  ;;  %v5430_v56 = vadd.f32 %v5429_v26, %v5313_v50  ;;  %v6859_v41 = vpop.f32.mrb[118].mxu0  ;;  %v6770_v62 = vpop.f32.mrb[116].mxu1 }
 0x252   : > { %v5329_v12 = vadd.f32 %v6859_v41, %v8787_v14  ;;  %v5320_v45 = vpop.f32.mrb[119].mxu0  ;;  %v6771_v24 = vpop.f32.mrb[117].mxu1  ;;  %v5472_v8 = vmul.f32 %v5326_v4, %v5326_v4 }
 0x253   : > { %v5431_v29 = vadd.f32 %v5430_v56, %v5318_v48  ;;  %v5470_v54 = vmul.f32 %v5318_v48, %v5318_v48  ;;  %v5500_v49 = vadd.f32 %v5499_v37, %v5469_v35  ;;  %v5321_v9 = vadd.f32 %v5320_v45, %v8778_v22  ;;  %v6773_v51 = vpop.f32.mrb[118].mxu1 }
 0x254   : > { %v6272_v27 = vpack.c.bf16 %v5329_v12, %v5326_v4  ;;  %v6772_v59 = vadd.f32 %v6771_v24, %v6770_v62  ;;  %v6774_v18 = vpop.f32.mrb[119].mxu1  ;;  %v5473_v5 = vmul.f32 %v5329_v12, %v5329_v12 }
 0x255   : > { %v5501_v0 = vadd.f32 %v5500_v49, %v5470_v54  ;;  %v5432_v55 = vadd.f32 %v5431_v29, %v5321_v9  ;;  %v5471_v7 = vmul.f32 %v5321_v9, %v5321_v9  ;;  %v6267_v50 = vpack.c.bf16 %v5321_v9, %v5318_v48 }
 0x256   : > { %6351 = vst [vmem:[%s8842_s11 + $0x18] sm:$0xff] %v6272_v27   ;;  %v6775_v28 = vadd.f32 %v6774_v18, %v6773_v51  ;;  %v5213_v16 = vadd.f32 %v6772_v59, %v8745_v30 }
 0x257   : > { %v5433_v14 = vadd.f32 %v5432_v55, %v5326_v4  ;;  %v5502_v23 = vadd.f32 %v5501_v0, %v5471_v7  ;;  %6350 = vst [vmem:[%s8842_s11 + $0x10] sm:$0xff] %v6267_v50   ;;  %v6862_v2 = vpop.f32.mrb[120].mxu0 }
 0x258   : > { %v5342_v22 = vadd.f32 %v6862_v2, %v8805_v57  ;;  %v5333_v10 = vpop.f32.mrb[121].mxu0  ;;  %v5216_v26 = vadd.f32 %v6775_v28, %v8751_v33 }
 0x259   : > { %v5503_v32 = vadd.f32 %v5502_v23, %v5472_v8  ;;  %v5334_v36 = vadd.f32 %v5333_v10, %v8793_v42  ;;  %v5434_v58 = vadd.f32 %v5433_v14, %v5329_v12  ;;  %v6863_v3 = vpop.f32.mrb[122].mxu0 }
 0x25a   : > { %v5345_v1 = vadd.f32 %v6863_v3, %v8808_v52  ;;  %v5336_v63 = vpop.f32.mrb[123].mxu0  ;;  %v6776_v37 = vpop.f32.mrb[120].mxu1  ;;  %v5476_v33 = vmul.f32 %v5342_v22, %v5342_v22 }
 0x25b   : > { %v5435_v21 = vadd.f32 %v5434_v58, %v5334_v36  ;;  %v5474_v35 = vmul.f32 %v5334_v36, %v5334_v36  ;;  %v5504_v4 = vadd.f32 %v5503_v32, %v5473_v5  ;;  %v5337_v57 = vadd.f32 %v5336_v63, %v8799_v44  ;;  %v6777_v41 = vpop.f32.mrb[121].mxu1 }
 0x25c   : > { %v6282_v34 = vpack.c.bf16 %v5345_v1, %v5342_v22  ;;  %v6778_v12 = vadd.f32 %v6777_v41, %v6776_v37  ;;  %v6779_v45 = vpop.f32.mrb[122].mxu1  ;;  %v5477_v24 = vmul.f32 %v5345_v1, %v5345_v1 }
 0x25d   : > { %v5505_v30 = vadd.f32 %v5504_v4, %v5474_v35  ;;  %v5436_v48 = vadd.f32 %v5435_v21, %v5337_v57  ;;  %v5475_v56 = vmul.f32 %v5337_v57, %v5337_v57  ;;  %v6277_v42 = vpack.c.bf16 %v5337_v57, %v5334_v36  ;;  %v6780_v49 = vpop.f32.mrb[123].mxu1 }
 0x25e   : > { %6353 = vst [vmem:[%s8842_s11 + $0x28] sm:$0xff] %v6282_v34   ;;  %v6781_v44 = vadd.f32 %v6780_v49, %v6779_v45  ;;  %v8869_v27 = vadd.f32 %v6778_v12, %v8757_v38 }
 0x25f   : > { %v5437_v29 = vadd.f32 %v5436_v48, %v5342_v22  ;;  %v5506_v52 = vadd.f32 %v5505_v30, %v5475_v56  ;;  %6352 = vst [vmem:[%s8842_s11 + $0x20] sm:$0xff] %v6277_v42   ;;  %v6866_v54 = vpop.f32.mrb[124].mxu0 }
 0x260   : > { %v5358_v9 = vadd.f32 %v6866_v54, %v8826_v25  ;;  %v5349_v62 = vpop.f32.mrb[125].mxu0  ;;  %v8874_v18 = vadd.f32 %v6781_v44, %v8763_v61 }
 0x261   : > { %v5507_v0 = vadd.f32 %v5506_v52, %v5476_v33  ;;  %v5350_v55 = vadd.f32 %v5349_v62, %v8817_v46  ;;  %v5438_v7 = vadd.f32 %v5437_v29, %v5345_v1  ;;  %v6867_v50 = vpop.f32.mrb[126].mxu0 }
 0x262   : > { %v5361_v51 = vadd.f32 %v6867_v50, %v8832_v20  ;;  %v5352_v59 = vpop.f32.mrb[127].mxu0  ;;  %v5480_v10 = vmul.f32 %v5358_v9, %v5358_v9 }
 0x263   : > { %v5439_v25 = vadd.f32 %v5438_v7, %v5350_v55  ;;  %v5478_v8 = vmul.f32 %v5350_v55, %v5350_v55  ;;  %v5508_v14 = vadd.f32 %v5507_v0, %v5477_v24  ;;  %v5353_v38 = vadd.f32 %v5352_v59, %v8820_v19  ;;  %v6782_v46 = vpop.f32.mrb[124].mxu1 }
 0x264   : > { %v6292_v23 = vpack.c.bf16 %v5361_v51, %v5358_v9  ;;  %v6783_v58 = vpop.f32.mrb[125].mxu1  ;;  %v5481_v21 = vmul.f32 %v5361_v51, %v5361_v51 }
 0x265   : > { %v5509_v2 = vadd.f32 %v5508_v14, %v5478_v8  ;;  %v5440_v28 = vadd.f32 %v5439_v25, %v5353_v38  ;;  %v5479_v5 = vmul.f32 %v5353_v38, %v5353_v38  ;;  %v6287_v22 = vpack.c.bf16 %v5353_v38, %v5350_v55  ;;  %v6785_v63 = vpop.f32.mrb[126].mxu1 }
 0x266   : > { %6355 = vst [vmem:[%s8842_s11 + $0x38] sm:$0xff] %v6292_v23   ;;  %v6784_v3 = vadd.f32 %v6783_v58, %v6782_v46  ;;  %v6786_v34 = vpop.f32.mrb[127].mxu1 }
 0x267   : > { %v5441_v32 = vadd.f32 %v5440_v28, %v5358_v9  ;;  %v5510_v20 = vadd.f32 %v5509_v2, %v5479_v5  ;;  %6354 = vst [vmem:[%s8842_s11 + $0x30] sm:$0xff] %v6287_v22   ;;  %v6870_v36 = vpop.f32.mrb[128].mxu0  ;;  %v6787_v30 = vadd.f32 %v6786_v34, %v6785_v63 }
 0x268   : > { %v5374_v61 = vadd.f32 %v6870_v36, %v5213_v16  ;;  %v5365_v1 = vpop.f32.mrb[129].mxu0  ;;  %v5229_v56 = vadd.f32 %v6784_v3, %v8769_v11 }
 0x269   : > { %v5511_v35 = vadd.f32 %v5510_v20, %v5480_v10  ;;  %v5366_v19 = vadd.f32 %v5365_v1, %v8848_v13  ;;  %v5442_v4 = vadd.f32 %v5441_v32, %v5361_v51  ;;  %v6871_v57 = vpop.f32.mrb[130].mxu0  ;;  %v5232_v33 = vadd.f32 %v6787_v30, %v8775_v17 }
 0x26a   : > { %v5377_v37 = vadd.f32 %v6871_v57, %v5216_v26  ;;  %v5368_v48 = vpop.f32.mrb[131].mxu0  ;;  %v5484_v49 = vmul.f32 %v5374_v61, %v5374_v61 }
 0x26b   : > { %v5443_v42 = vadd.f32 %v5442_v4, %v5366_v19  ;;  %v5482_v41 = vmul.f32 %v5366_v19, %v5366_v19  ;;  %v5512_v16 = vadd.f32 %v5511_v35, %v5481_v21  ;;  %v5369_v12 = vadd.f32 %v5368_v48, %v8853_v53 }
 0x26c   : > { %v6302_v45 = vpack.c.bf16 %v5377_v37, %v5374_v61  ;;  %v5485_v11 = vmul.f32 %v5377_v37, %v5377_v37 }
 0x26d   : > { %v5513_v29 = vadd.f32 %v5512_v16, %v5482_v41  ;;  %v5444_v13 = vadd.f32 %v5443_v42, %v5369_v12  ;;  %v5483_v52 = vmul.f32 %v5369_v12, %v5369_v12  ;;  %v6297_v54 = vpack.c.bf16 %v5369_v12, %v5366_v19  ;;  %v6788_v62 = vpop.f32.mrb[128].mxu1 }
 0x26e   : > { %6357 = vst [vmem:[%s8842_s11 + $0x48] sm:$0xff] %v6302_v45   ;;  %v6789_v0 = vpop.f32.mrb[129].mxu1 }
 0x26f   : > { %v5445_v26 = vadd.f32 %v5444_v13, %v5374_v61  ;;  %v5514_v9 = vadd.f32 %v5513_v29, %v5483_v52  ;;  %6356 = vst [vmem:[%s8842_s11 + $0x40] sm:$0xff] %v6297_v54   ;;  %v6874_v44 = vpop.f32.mrb[132].mxu0  ;;  %v6790_v53 = vadd.f32 %v6789_v0, %v6788_v62  ;;  %v6791_v51 = vpop.f32.mrb[130].mxu1 }
 0x270   : > { %v5390_v24 = vadd.f32 %v6874_v44, %v5229_v56  ;;  %v5381_v55 = vpop.f32.mrb[133].mxu0  ;;  %v6792_v8 = vpop.f32.mrb[131].mxu1 }
 0x271   : > { %v5515_v7 = vadd.f32 %v5514_v9, %v5484_v49  ;;  %v5382_v50 = vadd.f32 %v5381_v55, %v8869_v27  ;;  %v5446_v17 = vadd.f32 %v5445_v26, %v5377_v37  ;;  %v6875_v59 = vpop.f32.mrb[134].mxu0  ;;  %v6793_v28 = vadd.f32 %v6792_v8, %v6791_v51 }
 0x272   : > { %v5393_v25 = vadd.f32 %v6875_v59, %v5232_v33  ;;  %v5384_v14 = vpop.f32.mrb[135].mxu0  ;;  %v5237_v46 = vadd.f32 %v6790_v53, %v8784_v15  ;;  %v5488_v61 = vmul.f32 %v5390_v24, %v5390_v24 }
 0x273   : > { %v5447_v38 = vadd.f32 %v5446_v17, %v5382_v50  ;;  %v5486_v23 = vmul.f32 %v5382_v50, %v5382_v50  ;;  %v5516_v2 = vadd.f32 %v5515_v7, %v5485_v11  ;;  %v5385_v22 = vadd.f32 %v5384_v14, %v8874_v18 }
 0x274   : > { %v6312_v5 = vpack.c.bf16 %v5393_v25, %v5390_v24  ;;  %v5240_v27 = vadd.f32 %v6793_v28, %v8790_v31  ;;  %v5489_v4 = vmul.f32 %v5393_v25, %v5393_v25 }
 0x275   : > { %v5517_v10 = vadd.f32 %v5516_v2, %v5486_v23  ;;  %v5448_v32 = vadd.f32 %v5447_v38, %v5385_v22  ;;  %v5487_v20 = vmul.f32 %v5385_v22, %v5385_v22  ;;  %v6307_v36 = vpack.c.bf16 %v5385_v22, %v5382_v50 }
 0x276   : > { %6359 = vst [vmem:[%s8842_s11 + $0x58] sm:$0xff] %v6312_v5   ;;  %v6794_v21 = vpop.f32.mrb[132].mxu1 }
 0x277   : > { %v6878_v58 = vpop.f32.mrb[136].mxu0  ;;  %v5449_v3 = vadd.f32 %v5448_v32, %v5390_v24  ;;  %v5518_v1 = vadd.f32 %v5517_v10, %v5487_v20  ;;  %6358 = vst [vmem:[%s8842_s11 + $0x50] sm:$0xff] %v6307_v36   ;;  %v6795_v57 = vpop.f32.mrb[133].mxu1 }
 0x278   : > { %v5397_v63 = vpop.f32.mrb[137].mxu0  ;;  %v6796_v31 = vadd.f32 %v6795_v57, %v6794_v21  ;;  %v6797_v30 = vpop.f32.mrb[134].mxu1 }
 0x279   : > { %v5398_v35 = vadd.f32 %v5397_v63, %v5237_v46  ;;  %v6879_v19 = vpop.f32.mrb[138].mxu0  ;;  %v5519_v18 = vadd.f32 %v5518_v1, %v5488_v61  ;;  %v5450_v15 = vadd.f32 %v5449_v3, %v5393_v25  ;;  %v6798_v41 = vpop.f32.mrb[135].mxu1 }
 0x27a   : > { %v5400_v34 = vpop.f32.mrb[139].mxu0  ;;  %v5245_v16 = vadd.f32 %v6796_v31, %v8796_v47  ;;  %v6799_v12 = vadd.f32 %v6798_v41, %v6797_v30 }
 0x27b   : > { %v5490_v37 = vmul.f32 %v5398_v35, %v5398_v35  ;;  %v5401_v48 = vadd.f32 %v5400_v34, %v5240_v27  ;;  %v5451_v56 = vadd.f32 %v5450_v15, %v5398_v35  ;;  %v5520_v42 = vadd.f32 %v5519_v18, %v5489_v4 }
 0x27c   : > { %v5406_v52 = vadd.f32 %v6878_v58, %v5245_v16  ;;  %v5248_v54 = vadd.f32 %v6799_v12, %v8802_v43 }
 0x27d   : > { %v5491_v45 = vmul.f32 %v5401_v48, %v5401_v48  ;;  %v6317_v33 = vpack.c.bf16 %v5401_v48, %v5398_v35  ;;  %v5521_v29 = vadd.f32 %v5520_v42, %v5490_v37  ;;  %v5452_v13 = vadd.f32 %v5451_v56, %v5401_v48 }
 0x27e   : > { %v5492_v26 = vmul.f32 %v5406_v52, %v5406_v52  ;;  %v5409_v9 = vadd.f32 %v6879_v19, %v5248_v54  ;;  %v6800_v44 = vpop.f32.mrb[136].mxu1 }
 0x27f   : > { %6360 = vst [vmem:[%s8842_s11 + $0x60] sm:$0xff] %v6317_v33   ;;  %v5522_v49 = vadd.f32 %v5521_v29, %v5491_v45  ;;  %v5453_v62 = vadd.f32 %v5452_v13, %v5406_v52  ;;  %v6801_v11 = vpop.f32.mrb[137].mxu1 }
 0x280   : > { %v5493_v24 = vmul.f32 %v5409_v9, %v5409_v9  ;;  %v6322_v0 = vpack.c.bf16 %v5409_v9, %v5406_v52  ;;  %v6802_v47 = vadd.f32 %v6801_v11, %v6800_v44  ;;  %v6803_v7 = vpop.f32.mrb[138].mxu1 }
 0x281   : > { %v5523_v55 = vadd.f32 %v5522_v49, %v5492_v26  ;;  %v6804_v53 = vpop.f32.mrb[139].mxu1  ;;  %v5454_v50 = vadd.f32 %v5453_v62, %v5409_v9 }
 0x282   : > { %6361 = vst [vmem:[%s8842_s11 + $0x68] sm:$0xff] %v6322_v0   ;;  %v6805_v17 = vadd.f32 %v6804_v53, %v6803_v7  ;;  %v5253_v51 = vadd.f32 %v6802_v47, %v8811_v40 }
 0x283   : > { %v5524_v43 = vadd.f32 %v5523_v55, %v5493_v24 }
 0x284   : > { %v5256_v25 = vadd.f32 %v6805_v17, %v8814_v39 }
 0x285   : > { %v6882_v59 = vpop.f32.mrb[140].mxu0 }
 0x286   : > { %v5413_v8 = vpop.f32.mrb[141].mxu0 }
 0x287   : > { %v5414_v14 = vadd.f32 %v5413_v8, %v5253_v51  ;;  %v6883_v38 = vpop.f32.mrb[142].mxu0 }
 0x288   : > { %v5416_v23 = vpop.f32.mrb[143].mxu0 }
 0x289   : > { %v5455_v2 = vadd.f32 %v5454_v50, %v5414_v14  ;;  %v5494_v28 = vmul.f32 %v5414_v14, %v5414_v14  ;;  %v5417_v5 = vadd.f32 %v5416_v23, %v5256_v25 }
 0x28b   : > { %v5525_v22 = vadd.f32 %v5524_v43, %v5494_v28  ;;  %v5456_v46 = vadd.f32 %v5455_v2, %v5417_v5  ;;  %v5495_v10 = vmul.f32 %v5417_v5, %v5417_v5  ;;  %v6327_v27 = vpack.c.bf16 %v5417_v5, %v5414_v14 }
 0x28d   : > { %v5526_v32 = vadd.f32 %v5525_v22, %v5495_v10  ;;  %6362 = vst [vmem:[%s8842_s11 + $0x70] sm:$0xff] %v6327_v27  }
 0x28e   : > { %v6806_v20 = vpop.f32.mrb[140].mxu1 }
 0x28f   : > { %v6807_v40 = vpop.f32.mrb[141].mxu1 }
 0x290   : > { %v6808_v36 = vadd.f32 %v6807_v40, %v6806_v20  ;;  %v6809_v58 = vpop.f32.mrb[142].mxu1 }
 0x291   : > { %v6810_v61 = vpop.f32.mrb[143].mxu1 }
 0x292   : > { %v5261_v39 = vadd.f32 %v6808_v36, %v8823_v6  ;;  %v6811_v3 = vadd.f32 %v6810_v61, %v6809_v58 }
 0x294   : > { %v5422_v1 = vadd.f32 %v6882_v59, %v5261_v39  ;;  %v5264_v63 = vadd.f32 %v6811_v3, %v8829_v60 }
 0x296   : > { %v5457_v21 = vadd.f32 %v5456_v46, %v5422_v1  ;;  %v5496_v35 = vmul.f32 %v5422_v1, %v5422_v1  ;;  %v5425_v19 = vadd.f32 %v6883_v38, %v5264_v63 }
 0x298   : > { %v5527_v4 = vadd.f32 %v5526_v32, %v5496_v35  ;;  %v5458_v18 = vadd.f32 %v5457_v21, %v5425_v19  ;;  %v5497_v57 = vmul.f32 %v5425_v19, %v5425_v19  ;;  %v6332_v15 = vpack.c.bf16 %v5425_v19, %v5422_v1 }
 0x29a   : > { %v5459_v34 = vrot.slane %v5458_v18, 4  ;;  %v5528_v31 = vadd.f32 %v5527_v4, %v5497_v57  ;;  %6363 = vst [vmem:[%s8842_s11 + $0x78] sm:$0xff] %v6332_v15  }
 0x29c   : > { %v5460_v37 = vadd.f32 %v5459_v34, %v5458_v18  ;;  %v5529_v30 = vrot.slane %v5528_v31, 4 }
 0x29e   : > { %v5461_v48 = vrot.slane %v5460_v37, 2  ;;  %v5530_v56 = vadd.f32 %v5529_v30, %v5528_v31 }
 0x2a0   : > { %v5462_v6 = vadd.f32 %v5461_v48, %v5460_v37  ;;  %v5531_v42 = vrot.slane %v5530_v56, 2 }
 0x2a2   : > { %v5463_v41 = vrot.slane %v5462_v6, 1  ;;  %v5532_v16 = vadd.f32 %v5531_v42, %v5530_v56 }
 0x2a4   : > { %v5464_v60 = vadd.f32 %v5463_v41, %v5462_v6  ;;  %v5533_v12 = vrot.slane %v5532_v16, 1 }
 0x2a6   : > { %5465 = vst [vmem:[%s235_s15] sm:$0x1] %v5464_v60  ;;  %v5534_v45 = vadd.f32 %v5533_v12, %v5532_v16 }
 0x2a8   : > { %5535 = vst [vmem:[%s235_s15 + $0x1] sm:$0x1] %v5534_v45 }
 0x2a9 PF: > { %s16_s18 = sadd.s32 1, %s7041_s18  }
 0x2aa   : > { %p13_p4 = scmp.ge.s32.totalorder %s16_s18, 4  }
 0x2ac   :  { %15 = sbr.rel (!%p13_p4) target bundleno = 1 (0x1), region = 81 }

</bundles_post_ra>
